<compile_context>
chip_gen: v7x
topology: tpu7x:2x2x1
jax: 0.10.0
libtpu: 0.0.40
codegen_flags: <defaults>
</compile_context>

<pallas_src>
import functools

import numpy as np
import jax
import jax.numpy as jnp
from jax.experimental import pallas as pl
from jax.experimental.pallas import tpu as pltpu

C0, C1, C2, C3 = 64, 32, 16, 1      # channel widths of the three layers
K1, K2 = 7, 3                       # kernel sizes
NP = 8                              # sublane padding of the batch ("slot") dim


# ---------------------------------------------------------------------------
# Fused Pallas kernel: all three transposed convs + activations, VMEM resident.
#
# Activation layout inside the kernel:
#   rows = (a, b, slot) over a zero-extended (base+1) x (base+1) "base grid"
#   cols = channels; for the stride-2 layers the 2x2 / 4x4 sub-pixel phases are
#          folded into the channel dimension (space-to-depth).
# Each stride-2 transposed conv then reduces to a 2x2 gather-convolution over
# the base grid, i.e. 4 shifted-row matmuls accumulated in f32.
# ---------------------------------------------------------------------------
def _generator_kernel(x1_ref, w1d_ref, g2_ref, g3_ref, b1_ref, b2_ref, b3_ref,
                      o_ref, h1_s, s1, s2, *, n, base, ext):
    rows = ext * ext * NP                 # rows per tap matmul (incl. junk rows)
    taps = ((0, 0), (0, 1), (1, 0), (1, 1))

    # zero-init: extension rows / unused slots must stay zero
    s1[...] = jnp.zeros_like(s1)
    s2[...] = jnp.zeros_like(s2)

    # ---- layer 1: dense (n, h*w*C0) @ (h*w*C0, base*base*C1) + bias + ReLU ----
    h1 = jnp.dot(x1_ref[...], w1d_ref[...], preferred_element_type=jnp.float32)
    h1_s[...] = jnp.maximum(h1 + b1_ref[...], 0.0)
    # scatter (n, base*base*C1) into the extended base-grid row layout
    for a in range(base):
        for b in range(base):
            col = (a * base + b) * C1
            row = (a * ext + b) * NP
            s1[row:row + n, :] = h1_s[:, col:col + C1]

    # ---- layer 2: stride-2 deconv == 2x2 gather conv over the base grid ----
    acc2 = None
    for t, (dy, dx) in enumerate(taps):
        off = (dy * ext + dx) * NP
        lhs = s1[off:off + rows, :].astype(jnp.bfloat16)
        d = jnp.dot(lhs, g2_ref[t], preferred_element_type=jnp.float32)
        acc2 = d if acc2 is None else acc2 + d
    acc2 = jnp.maximum(acc2 + b2_ref[...], 0.0)
    for a in range(base):                 # store only valid rows (keep ext rows 0)
        r = a * ext * NP
        s2[r:r + base * NP, :] = acc2[r:r + base * NP, :]

    # ---- layer 3: second stride-2 deconv, consumed/produced in s2d form ----
    acc3 = None
    for t, (dy, dx) in enumerate(taps):
        off = (dy * ext + dx) * NP
        lhs = s2[off:off + rows, :].astype(jnp.bfloat16)
        d = jnp.dot(lhs, g3_ref[t], preferred_element_type=jnp.float32)
        acc3 = d if acc3 is None else acc3 + d
    y = jnp.tanh(acc3 + b3_ref[...])
    for a in range(base):
        o_ref[a * base * NP:(a + 1) * base * NP, :] = \
            y[a * ext * NP:a * ext * NP + base * NP, :]


# ---------------------------------------------------------------------------
# Weight repacking (pure functions of the parameters, done in the XLA wrapper)
# ---------------------------------------------------------------------------
def _repack_weights(params, h0, w0):
    base = h0 + K1 - 1
    w1, b1 = params["w1"], params["b1"]
    w2, b2 = params["w2"], params["b2"]
    w3, b3 = params["w3"], params["b3"]

    # layer 1 as a dense matrix: rows (iy, ix, ci) -> cols (a, b, co)
    sel_h = np.zeros((base, h0, K1), np.float32)
    for i in range(h0):
        for k in range(K1):
            sel_h[i + k, i, k] = 1.0
    sel_w = np.zeros((base, w0, K1), np.float32)
    for j in range(w0):
        for k in range(K1):
            sel_w[j + k, j, k] = 1.0
    w1d = jnp.einsum('aik,bjl,cdkl->ijcabd',
                     jnp.asarray(sel_h), jnp.asarray(sel_w), w1)
    w1d = w1d.reshape(h0 * w0 * C0, base * base * C1).astype(jnp.bfloat16)
    b1t = jnp.tile(b1, base * base).reshape(1, base * base * C1)

    # gather tables of a stride-2 / k=3 / pad=1 / outpad=1 transposed conv:
    # output sub-row of parity p at base-offset dy uses kernel row ky
    tab2 = np.zeros((2, 2, K2), np.float32)            # [p, dy, ky]
    tab2[0, 0, 1] = 1.0
    tab2[1, 0, 2] = 1.0
    tab2[1, 1, 0] = 1.0
    # two stacked stride-2 deconvs -> 4x upsample: output sub-row r in [0,4)
    # reads layer-2 phase p at base-offset dy through kernel row ky
    tab4 = np.zeros((4, 2, 2, K2), np.float32)         # [r, dy, p, ky]
    tab4[0, 0, 0, 1] = 1.0
    tab4[1, 0, 0, 2] = 1.0
    tab4[1, 0, 1, 0] = 1.0
    tab4[2, 0, 1, 1] = 1.0
    tab4[3, 0, 1, 2] = 1.0
    tab4[3, 1, 0, 0] = 1.0
    tab2 = jnp.asarray(tab2)
    tab4 = jnp.asarray(tab4)

    # layer 2 tap matrices: rows ci, cols (py, px, co)
    g2 = jnp.einsum('pdk,qel,zokl->dezpqo', tab2, tab2, w2)
    g2 = g2.reshape(4, C1, 4 * C2).astype(jnp.bfloat16)
    b2t = jnp.tile(b2, 4).reshape(1, 4 * C2)

    # layer 3 tap matrices: rows (py, px, ci), cols (ry, rx)
    g3 = jnp.einsum('rdpk,seql,zkl->depqzrs', tab4, tab4, w3[:, 0])
    g3 = g3.reshape(4, 4 * C2, 16 * C3).astype(jnp.bfloat16)
    b3t = jnp.tile(b3, 16).reshape(1, 16 * C3)

    return w1d, b1t, g2, b2t, g3, b3t


# ---------------------------------------------------------------------------
# Generator forward (NCHW in / NCHW out, like PyTorch)
# ---------------------------------------------------------------------------
def generator_forward(x_nchw, params):
    n, c0, h0, w0 = x_nchw.shape
    assert c0 == C0 and h0 == w0 and n <= NP
    base = h0 + K1 - 1                       # layer-1 output spatial size
    ext = base + 1                           # zero-extended base grid
    rows_alloc = ext * ext * NP + (ext + 1) * NP

    w1d, b1t, g2, b2t, g3, b3t = _repack_weights(params, h0, w0)
    x_l1 = jnp.transpose(x_nchw, (0, 2, 3, 1)).reshape(n, h0 * w0 * C0)
    x_l1 = x_l1.astype(jnp.bfloat16)

    out_rows = base * base * NP
    kernel = functools.partial(_generator_kernel, n=n, base=base, ext=ext)

    out = pl.pallas_call(
        kernel,
        out_shape=jax.ShapeDtypeStruct((out_rows, 16 * C3), jnp.float32),
        grid_spec=pltpu.PrefetchScalarGridSpec(
            num_scalar_prefetch=0,
            grid=(1,),
            in_specs=[
                pl.BlockSpec(x_l1.shape, lambda i: (0, 0)),
                pl.BlockSpec(w1d.shape, lambda i: (0, 0)),
                pl.BlockSpec(g2.shape, lambda i: (0, 0, 0)),
                pl.BlockSpec(g3.shape, lambda i: (0, 0, 0)),
                pl.BlockSpec(b1t.shape, lambda i: (0, 0)),
                pl.BlockSpec(b2t.shape, lambda i: (0, 0)),
                pl.BlockSpec(b3t.shape, lambda i: (0, 0)),
            ],
            out_specs=pl.BlockSpec((out_rows, 16 * C3), lambda i: (0, 0)),
            scratch_shapes=[
                pltpu.VMEM((n, base * base * C1), jnp.float32),   # layer-1 act
                pltpu.VMEM((rows_alloc, C1), jnp.float32),        # x1 (ext grid)
                pltpu.VMEM((rows_alloc, 4 * C2), jnp.float32),    # x2 in s2d form
            ],
        ),
        compiler_params=pltpu.CompilerParams(
            dimension_semantics=("arbitrary",),
        ),
    )(x_l1, w1d, g2, g3, b1t, b2t, b3t)

    # rows are (a, b, slot); cols are the 4x4 sub-pixel grid (ry, rx)
    y = out.reshape(base, base, NP, 4, 4)[:, :, :n]
    y = jnp.transpose(y, (2, 0, 3, 1, 4)).reshape(n, 1, 4 * base, 4 * base)
    return y


# ---------------------------------------------------------------------------
# Pure-JAX reference (lax conv with lhs dilation) for a sanity check
# ---------------------------------------------------------------------------
def _conv_transpose2d_ref(x_nhwc, w_ct, b, *, stride, padding, output_padding):
    k = w_ct.shape[2]
    pad_lo = k - 1 - padding
    pad_hi = k - 1 - padding + output_padding
    w_hwio = jnp.transpose(jnp.flip(w_ct, (2, 3)), (2, 3, 0, 1))  # (k,k,Cin,Cout)
    out = jax.lax.conv_general_dilated(
        x_nhwc, w_hwio, window_strides=(1, 1),
        padding=[(pad_lo, pad_hi), (pad_lo, pad_hi)],
        lhs_dilation=(stride, stride),
        dimension_numbers=("NHWC", "HWIO", "NHWC"),
        precision=jax.lax.Precision.HIGHEST)
    return out + b


def _generator_ref(x_nchw, params):
    x = jnp.transpose(x_nchw, (0, 2, 3, 1))
    x = jnp.maximum(_conv_transpose2d_ref(x, params["w1"], params["b1"],
                                          stride=1, padding=0, output_padding=0), 0.0)
    x = jnp.maximum(_conv_transpose2d_ref(x, params["w2"], params["b2"],
                                          stride=2, padding=1, output_padding=1), 0.0)
    x = jnp.tanh(_conv_transpose2d_ref(x, params["w3"], params["b3"],
                                       stride=2, padding=1, output_padding=1))
    return jnp.transpose(x, (0, 3, 1, 2))


# ---------------------------------------------------------------------------
# Deterministic parameter init (PyTorch-like uniform(-1/sqrt(fan), 1/sqrt(fan)))
# ---------------------------------------------------------------------------
def init_params(key):
    def ct_layer(k, c_in, c_out, ks):
        kw, kb = jax.random.split(k)
        bound = 1.0 / (c_in * ks * ks) ** 0.5
        w = jax.random.uniform(kw, (c_in, c_out, ks, ks), jnp.float32, -bound, bound)
        b = jax.random.uniform(kb, (c_out,), jnp.float32, -bound, bound)
        return w, b

    k1, k2, k3 = jax.random.split(key, 3)
    w1, b1 = ct_layer(k1, 64, 32, 7)
    w2, b2 = ct_layer(k2, 32, 16, 3)
    w3, b3 = ct_layer(k3, 16, 1, 3)
    return {"w1": w1, "b1": b1, "w2": w2, "b2": b2, "w3": w3, "b3": b3}


if __name__ == "__main__":
    key = jax.random.PRNGKey(0)
    k_params, k_x = jax.random.split(key)
    params = init_params(k_params)

    # small latent feature map: (batch=2, channels=64, spatial=2x2)
    x = jax.random.normal(k_x, (2, 64, 2, 2), jnp.float32)

    out = jax.block_until_ready(jax.jit(generator_forward)(x, params))
    assert out.shape == (2, 1, 32, 32), out.shape

    ref = jax.block_until_ready(jax.jit(_generator_ref)(x, params))
    max_err = float(jnp.max(jnp.abs(out - ref)))
    # bf16 operands with f32 accumulation -> expected error O(1e-3)
    assert max_err < 2e-2, f"max abs error {max_err}"

    print("KERNEL_OK")
</pallas_src>

<mosaic_0001>
module attributes {stable_mosaic.version = 11 : i64} {
  func.func @_generator_kernel(%arg0: i32, %arg1: memref<2x256xbf16, #tpu.memory_space<vmem>>, %arg2: memref<256x2048xbf16, #tpu.memory_space<vmem>>, %arg3: memref<4x32x64xbf16, #tpu.memory_space<vmem>>, %arg4: memref<4x64x16xbf16, #tpu.memory_space<vmem>>, %arg5: memref<1x2048xf32, #tpu.memory_space<vmem>>, %arg6: memref<1x64xf32, #tpu.memory_space<vmem>>, %arg7: memref<1x16xf32, #tpu.memory_space<vmem>>, %arg8: memref<512x16xf32, #tpu.memory_space<vmem>>, %arg9: memref<2x2048xf32, #tpu.memory_space<vmem>>, %arg10: memref<728x32xf32, #tpu.memory_space<vmem>>, %arg11: memref<728x64xf32, #tpu.memory_space<vmem>>) attributes {dimension_semantics = [#tpu.dimension_semantics<arbitrary>], iteration_bounds = array<i64: 1>, scalar_prefetch = 0 : i64, scratch_operands = 3 : i64, tpu.core_type = #tpu.core_type<tc>, window_params = [{pipeline_mode = #tpu.pipeline_mode<synchronous>, transform_indices = @transform_0, window_bounds = array<i64: 2, 256>}, {pipeline_mode = #tpu.pipeline_mode<synchronous>, transform_indices = @transform_1, window_bounds = array<i64: 256, 2048>}, {pipeline_mode = #tpu.pipeline_mode<synchronous>, transform_indices = @transform_2, window_bounds = array<i64: 4, 32, 64>}, {pipeline_mode = #tpu.pipeline_mode<synchronous>, transform_indices = @transform_3, window_bounds = array<i64: 4, 64, 16>}, {pipeline_mode = #tpu.pipeline_mode<synchronous>, transform_indices = @transform_4, window_bounds = array<i64: 1, 2048>}, {pipeline_mode = #tpu.pipeline_mode<synchronous>, transform_indices = @transform_5, window_bounds = array<i64: 1, 64>}, {pipeline_mode = #tpu.pipeline_mode<synchronous>, transform_indices = @transform_6, window_bounds = array<i64: 1, 16>}, {pipeline_mode = #tpu.pipeline_mode<synchronous>, transform_indices = @transform_7, window_bounds = array<i64: 512, 16>}]} {
    %cst = arith.constant 0.000000e+00 : f32
    %0 = vector.broadcast %cst : f32 to vector<728x32xf32>
    %c0 = arith.constant 0 : index
    %c0_0 = arith.constant 0 : index
    %1 = vector.load %arg10[%c0, %c0_0] : memref<728x32xf32, #tpu.memory_space<vmem>>, vector<728x32xf32>
    tpu.vector_store %arg10[%c0, %c0_0], %0 {strides = array<i32>} : memref<728x32xf32, #tpu.memory_space<vmem>>, vector<728x32xf32>,
    %cst_1 = arith.constant 0.000000e+00 : f32
    %2 = vector.broadcast %cst_1 : f32 to vector<728x64xf32>
    %c0_2 = arith.constant 0 : index
    %c0_3 = arith.constant 0 : index
    %3 = vector.load %arg11[%c0_2, %c0_3] : memref<728x64xf32, #tpu.memory_space<vmem>>, vector<728x64xf32>
    tpu.vector_store %arg11[%c0_2, %c0_3], %2 {strides = array<i32>} : memref<728x64xf32, #tpu.memory_space<vmem>>, vector<728x64xf32>,
    %c0_4 = arith.constant 0 : index
    %c0_5 = arith.constant 0 : index
    %4 = vector.load %arg1[%c0_4, %c0_5] : memref<2x256xbf16, #tpu.memory_space<vmem>>, vector<2x256xbf16>
    %c0_6 = arith.constant 0 : index
    %c0_7 = arith.constant 0 : index
    %5 = vector.load %arg2[%c0_6, %c0_7] : memref<256x2048xbf16, #tpu.memory_space<vmem>>, vector<256x2048xbf16>
    %cst_8 = arith.constant dense<0.000000e+00> : vector<2x2048xf32>
    %6 = tpu.matmul %4, %5, %cst_8 {dimension_numbers = #tpu.dot_dimension_numbers<[1], [0], [0], [1], [0, 0, 1, 1], [], []>} : vector<2x256xbf16>, vector<256x2048xbf16>, vector<2x2048xf32> -> vector<2x2048xf32>
    %c0_9 = arith.constant 0 : index
    %c0_10 = arith.constant 0 : index
    %7 = vector.load %arg5[%c0_9, %c0_10] : memref<1x2048xf32, #tpu.memory_space<vmem>>, vector<1x2048xf32>
    %8 = vector.broadcast %7 : vector<1x2048xf32> to vector<2x2048xf32>
    %9 = arith.addf %6, %8 : vector<2x2048xf32>
    %cst_11 = arith.constant 0.000000e+00 : f32
    %10 = vector.broadcast %cst_11 : f32 to vector<2x2048xf32>
    %11 = arith.maximumf %9, %10 : vector<2x2048xf32>
    %c0_12 = arith.constant 0 : index
    %c0_13 = arith.constant 0 : index
    %12 = vector.load %arg9[%c0_12, %c0_13] : memref<2x2048xf32, #tpu.memory_space<vmem>>, vector<2x2048xf32>
    tpu.vector_store %arg9[%c0_12, %c0_13], %11 {strides = array<i32>} : memref<2x2048xf32, #tpu.memory_space<vmem>>, vector<2x2048xf32>,
    %c0_14 = arith.constant 0 : index
    %c0_15 = arith.constant 0 : index
    %13 = vector.load %arg9[%c0_14, %c0_15] : memref<2x2048xf32, #tpu.memory_space<vmem>>, vector<2x32xf32>
    %c0_16 = arith.constant 0 : index
    %c0_17 = arith.constant 0 : index
    %14 = vector.load %arg10[%c0_16, %c0_17] : memref<728x32xf32, #tpu.memory_space<vmem>>, vector<2x32xf32>
    tpu.vector_store %arg10[%c0_16, %c0_17], %13 {strides = array<i32>} : memref<728x32xf32, #tpu.memory_space<vmem>>, vector<2x32xf32>,
    %c0_18 = arith.constant 0 : index
    %c32 = arith.constant 32 : index
    %15 = vector.load %arg9[%c0_18, %c32] : memref<2x2048xf32, #tpu.memory_space<vmem>>, vector<2x32xf32>
    %c8 = arith.constant 8 : index
    %c0_19 = arith.constant 0 : index
    %16 = vector.load %arg10[%c8, %c0_19] : memref<728x32xf32, #tpu.memory_space<vmem>>, vector<2x32xf32>
    tpu.vector_store %arg10[%c8, %c0_19], %15 {strides = array<i32>} : memref<728x32xf32, #tpu.memory_space<vmem>>, vector<2x32xf32>,
    %c0_20 = arith.constant 0 : index
    %c64 = arith.constant 64 : index
    %17 = vector.load %arg9[%c0_20, %c64] : memref<2x2048xf32, #tpu.memory_space<vmem>>, vector<2x32xf32>
    %c16 = arith.constant 16 : index
    %c0_21 = arith.constant 0 : index
    %18 = vector.load %arg10[%c16, %c0_21] : memref<728x32xf32, #tpu.memory_space<vmem>>, vector<2x32xf32>
    tpu.vector_store %arg10[%c16, %c0_21], %17 {strides = array<i32>} : memref<728x32xf32, #tpu.memory_space<vmem>>, vector<2x32xf32>,
    %c0_22 = arith.constant 0 : index
    %c96 = arith.constant 96 : index
    %19 = vector.load %arg9[%c0_22, %c96] : memref<2x2048xf32, #tpu.memory_space<vmem>>, vector<2x32xf32>
    %c24 = arith.constant 24 : index
    %c0_23 = arith.constant 0 : index
    %20 = vector.load %arg10[%c24, %c0_23] : memref<728x32xf32, #tpu.memory_space<vmem>>, vector<2x32xf32>
    tpu.vector_store %arg10[%c24, %c0_23], %19 {strides = array<i32>} : memref<728x32xf32, #tpu.memory_space<vmem>>, vector<2x32xf32>,
    %c0_24 = arith.constant 0 : index
    %c128 = arith.constant 128 : index
    %21 = vector.load %arg9[%c0_24, %c128] : memref<2x2048xf32, #tpu.memory_space<vmem>>, vector<2x32xf32>
    %c32_25 = arith.constant 32 : index
    %c0_26 = arith.constant 0 : index
    %22 = vector.load %arg10[%c32_25, %c0_26] : memref<728x32xf32, #tpu.memory_space<vmem>>, vector<2x32xf32>
    tpu.vector_store %arg10[%c32_25, %c0_26], %21 {strides = array<i32>} : memref<728x32xf32, #tpu.memory_space<vmem>>, vector<2x32xf32>,
    %c0_27 = arith.constant 0 : index
    %c160 = arith.constant 160 : index
    %23 = vector.load %arg9[%c0_27, %c160] : memref<2x2048xf32, #tpu.memory_space<vmem>>, vector<2x32xf32>
    %c40 = arith.constant 40 : index
    %c0_28 = arith.constant 0 : index
    %24 = vector.load %arg10[%c40, %c0_28] : memref<728x32xf32, #tpu.memory_space<vmem>>, vector<2x32xf32>
    tpu.vector_store %arg10[%c40, %c0_28], %23 {strides = array<i32>} : memref<728x32xf32, #tpu.memory_space<vmem>>, vector<2x32xf32>,
    %c0_29 = arith.constant 0 : index
    %c192 = arith.constant 192 : index
    %25 = vector.load %arg9[%c0_29, %c192] : memref<2x2048xf32, #tpu.memory_space<vmem>>, vector<2x32xf32>
    %c48 = arith.constant 48 : index
    %c0_30 = arith.constant 0 : index
    %26 = vector.load %arg10[%c48, %c0_30] : memref<728x32xf32, #tpu.memory_space<vmem>>, vector<2x32xf32>
    tpu.vector_store %arg10[%c48, %c0_30], %25 {strides = array<i32>} : memref<728x32xf32, #tpu.memory_space<vmem>>, vector<2x32xf32>,
    %c0_31 = arith.constant 0 : index
    %c224 = arith.constant 224 : index
    %27 = vector.load %arg9[%c0_31, %c224] : memref<2x2048xf32, #tpu.memory_space<vmem>>, vector<2x32xf32>
    %c56 = arith.constant 56 : index
    %c0_32 = arith.constant 0 : index
    %28 = vector.load %arg10[%c56, %c0_32] : memref<728x32xf32, #tpu.memory_space<vmem>>, vector<2x32xf32>
    tpu.vector_store %arg10[%c56, %c0_32], %27 {strides = array<i32>} : memref<728x32xf32, #tpu.memory_space<vmem>>, vector<2x32xf32>,
    %c0_33 = arith.constant 0 : index
    %c256 = arith.constant 256 : index
    %29 = vector.load %arg9[%c0_33, %c256] : memref<2x2048xf32, #tpu.memory_space<vmem>>, vector<2x32xf32>
    %c72 = arith.constant 72 : index
    %c0_34 = arith.constant 0 : index
    %30 = vector.load %arg10[%c72, %c0_34] : memref<728x32xf32, #tpu.memory_space<vmem>>, vector<2x32xf32>
    tpu.vector_store %arg10[%c72, %c0_34], %29 {strides = array<i32>} : memref<728x32xf32, #tpu.memory_space<vmem>>, vector<2x32xf32>,
    %c0_35 = arith.constant 0 : index
    %c288 = arith.constant 288 : index
    %31 = vector.load %arg9[%c0_35, %c288] : memref<2x2048xf32, #tpu.memory_space<vmem>>, vector<2x32xf32>
    %c80 = arith.constant 80 : index
    %c0_36 = arith.constant 0 : index
    %32 = vector.load %arg10[%c80, %c0_36] : memref<728x32xf32, #tpu.memory_space<vmem>>, vector<2x32xf32>
    tpu.vector_store %arg10[%c80, %c0_36], %31 {strides = array<i32>} : memref<728x32xf32, #tpu.memory_space<vmem>>, vector<2x32xf32>,
    %c0_37 = arith.constant 0 : index
    %c320 = arith.constant 320 : index
    %33 = vector.load %arg9[%c0_37, %c320] : memref<2x2048xf32, #tpu.memory_space<vmem>>, vector<2x32xf32>
    %c88 = arith.constant 88 : index
    %c0_38 = arith.constant 0 : index
    %34 = vector.load %arg10[%c88, %c0_38] : memref<728x32xf32, #tpu.memory_space<vmem>>, vector<2x32xf32>
    tpu.vector_store %arg10[%c88, %c0_38], %33 {strides = array<i32>} : memref<728x32xf32, #tpu.memory_space<vmem>>, vector<2x32xf32>,
    %c0_39 = arith.constant 0 : index
    %c352 = arith.constant 352 : index
    %35 = vector.load %arg9[%c0_39, %c352] : memref<2x2048xf32, #tpu.memory_space<vmem>>, vector<2x32xf32>
    %c96_40 = arith.constant 96 : index
    %c0_41 = arith.constant 0 : index
    %36 = vector.load %arg10[%c96_40, %c0_41] : memref<728x32xf32, #tpu.memory_space<vmem>>, vector<2x32xf32>
    tpu.vector_store %arg10[%c96_40, %c0_41], %35 {strides = array<i32>} : memref<728x32xf32, #tpu.memory_space<vmem>>, vector<2x32xf32>,
    %c0_42 = arith.constant 0 : index
    %c384 = arith.constant 384 : index
    %37 = vector.load %arg9[%c0_42, %c384] : memref<2x2048xf32, #tpu.memory_space<vmem>>, vector<2x32xf32>
    %c104 = arith.constant 104 : index
    %c0_43 = arith.constant 0 : index
    %38 = vector.load %arg10[%c104, %c0_43] : memref<728x32xf32, #tpu.memory_space<vmem>>, vector<2x32xf32>
    tpu.vector_store %arg10[%c104, %c0_43], %37 {strides = array<i32>} : memref<728x32xf32, #tpu.memory_space<vmem>>, vector<2x32xf32>,
    %c0_44 = arith.constant 0 : index
    %c416 = arith.constant 416 : index
    %39 = vector.load %arg9[%c0_44, %c416] : memref<2x2048xf32, #tpu.memory_space<vmem>>, vector<2x32xf32>
    %c112 = arith.constant 112 : index
    %c0_45 = arith.constant 0 : index
    %40 = vector.load %arg10[%c112, %c0_45] : memref<728x32xf32, #tpu.memory_space<vmem>>, vector<2x32xf32>
    tpu.vector_store %arg10[%c112, %c0_45], %39 {strides = array<i32>} : memref<728x32xf32, #tpu.memory_space<vmem>>, vector<2x32xf32>,
    %c0_46 = arith.constant 0 : index
    %c448 = arith.constant 448 : index
    %41 = vector.load %arg9[%c0_46, %c448] : memref<2x2048xf32, #tpu.memory_space<vmem>>, vector<2x32xf32>
    %c120 = arith.constant 120 : index
    %c0_47 = arith.constant 0 : index
    %42 = vector.load %arg10[%c120, %c0_47] : memref<728x32xf32, #tpu.memory_space<vmem>>, vector<2x32xf32>
    tpu.vector_store %arg10[%c120, %c0_47], %41 {strides = array<i32>} : memref<728x32xf32, #tpu.memory_space<vmem>>, vector<2x32xf32>,
    %c0_48 = arith.constant 0 : index
    %c480 = arith.constant 480 : index
    %43 = vector.load %arg9[%c0_48, %c480] : memref<2x2048xf32, #tpu.memory_space<vmem>>, vector<2x32xf32>
    %c128_49 = arith.constant 128 : index
    %c0_50 = arith.constant 0 : index
    %44 = vector.load %arg10[%c128_49, %c0_50] : memref<728x32xf32, #tpu.memory_space<vmem>>, vector<2x32xf32>
    tpu.vector_store %arg10[%c128_49, %c0_50], %43 {strides = array<i32>} : memref<728x32xf32, #tpu.memory_space<vmem>>, vector<2x32xf32>,
    %c0_51 = arith.constant 0 : index
    %c512 = arith.constant 512 : index
    %45 = vector.load %arg9[%c0_51, %c512] : memref<2x2048xf32, #tpu.memory_space<vmem>>, vector<2x32xf32>
    %c144 = arith.constant 144 : index
    %c0_52 = arith.constant 0 : index
    %46 = vector.load %arg10[%c144, %c0_52] : memref<728x32xf32, #tpu.memory_space<vmem>>, vector<2x32xf32>
    tpu.vector_store %arg10[%c144, %c0_52], %45 {strides = array<i32>} : memref<728x32xf32, #tpu.memory_space<vmem>>, vector<2x32xf32>,
    %c0_53 = arith.constant 0 : index
    %c544 = arith.constant 544 : index
    %47 = vector.load %arg9[%c0_53, %c544] : memref<2x2048xf32, #tpu.memory_space<vmem>>, vector<2x32xf32>
    %c152 = arith.constant 152 : index
    %c0_54 = arith.constant 0 : index
    %48 = vector.load %arg10[%c152, %c0_54] : memref<728x32xf32, #tpu.memory_space<vmem>>, vector<2x32xf32>
    tpu.vector_store %arg10[%c152, %c0_54], %47 {strides = array<i32>} : memref<728x32xf32, #tpu.memory_space<vmem>>, vector<2x32xf32>,
    %c0_55 = arith.constant 0 : index
    %c576 = arith.constant 576 : index
    %49 = vector.load %arg9[%c0_55, %c576] : memref<2x2048xf32, #tpu.memory_space<vmem>>, vector<2x32xf32>
    %c160_56 = arith.constant 160 : index
    %c0_57 = arith.constant 0 : index
    %50 = vector.load %arg10[%c160_56, %c0_57] : memref<728x32xf32, #tpu.memory_space<vmem>>, vector<2x32xf32>
    tpu.vector_store %arg10[%c160_56, %c0_57], %49 {strides = array<i32>} : memref<728x32xf32, #tpu.memory_space<vmem>>, vector<2x32xf32>,
    %c0_58 = arith.constant 0 : index
    %c608 = arith.constant 608 : index
    %51 = vector.load %arg9[%c0_58, %c608] : memref<2x2048xf32, #tpu.memory_space<vmem>>, vector<2x32xf32>
    %c168 = arith.constant 168 : index
    %c0_59 = arith.constant 0 : index
    %52 = vector.load %arg10[%c168, %c0_59] : memref<728x32xf32, #tpu.memory_space<vmem>>, vector<2x32xf32>
    tpu.vector_store %arg10[%c168, %c0_59], %51 {strides = array<i32>} : memref<728x32xf32, #tpu.memory_space<vmem>>, vector<2x32xf32>,
    %c0_60 = arith.constant 0 : index
    %c640 = arith.constant 640 : index
    %53 = vector.load %arg9[%c0_60, %c640] : memref<2x2048xf32, #tpu.memory_space<vmem>>, vector<2x32xf32>
    %c176 = arith.constant 176 : index
    %c0_61 = arith.constant 0 : index
    %54 = vector.load %arg10[%c176, %c0_61] : memref<728x32xf32, #tpu.memory_space<vmem>>, vector<2x32xf32>
    tpu.vector_store %arg10[%c176, %c0_61], %53 {strides = array<i32>} : memref<728x32xf32, #tpu.memory_space<vmem>>, vector<2x32xf32>,
    %c0_62 = arith.constant 0 : index
    %c672 = arith.constant 672 : index
    %55 = vector.load %arg9[%c0_62, %c672] : memref<2x2048xf32, #tpu.memory_space<vmem>>, vector<2x32xf32>
    %c184 = arith.constant 184 : index
    %c0_63 = arith.constant 0 : index
    %56 = vector.load %arg10[%c184, %c0_63] : memref<728x32xf32, #tpu.memory_space<vmem>>, vector<2x32xf32>
    tpu.vector_store %arg10[%c184, %c0_63], %55 {strides = array<i32>} : memref<728x32xf32, #tpu.memory_space<vmem>>, vector<2x32xf32>,
    %c0_64 = arith.constant 0 : index
    %c704 = arith.constant 704 : index
    %57 = vector.load %arg9[%c0_64, %c704] : memref<2x2048xf32, #tpu.memory_space<vmem>>, vector<2x32xf32>
    %c192_65 = arith.constant 192 : index
    %c0_66 = arith.constant 0 : index
    %58 = vector.load %arg10[%c192_65, %c0_66] : memref<728x32xf32, #tpu.memory_space<vmem>>, vector<2x32xf32>
    tpu.vector_store %arg10[%c192_65, %c0_66], %57 {strides = array<i32>} : memref<728x32xf32, #tpu.memory_space<vmem>>, vector<2x32xf32>,
    %c0_67 = arith.constant 0 : index
    %c736 = arith.constant 736 : index
    %59 = vector.load %arg9[%c0_67, %c736] : memref<2x2048xf32, #tpu.memory_space<vmem>>, vector<2x32xf32>
    %c200 = arith.constant 200 : index
    %c0_68 = arith.constant 0 : index
    %60 = vector.load %arg10[%c200, %c0_68] : memref<728x32xf32, #tpu.memory_space<vmem>>, vector<2x32xf32>
    tpu.vector_store %arg10[%c200, %c0_68], %59 {strides = array<i32>} : memref<728x32xf32, #tpu.memory_space<vmem>>, vector<2x32xf32>,
    %c0_69 = arith.constant 0 : index
    %c768 = arith.constant 768 : index
    %61 = vector.load %arg9[%c0_69, %c768] : memref<2x2048xf32, #tpu.memory_space<vmem>>, vector<2x32xf32>
    %c216 = arith.constant 216 : index
    %c0_70 = arith.constant 0 : index
    %62 = vector.load %arg10[%c216, %c0_70] : memref<728x32xf32, #tpu.memory_space<vmem>>, vector<2x32xf32>
    tpu.vector_store %arg10[%c216, %c0_70], %61 {strides = array<i32>} : memref<728x32xf32, #tpu.memory_space<vmem>>, vector<2x32xf32>,
    %c0_71 = arith.constant 0 : index
    %c800 = arith.constant 800 : index
    %63 = vector.load %arg9[%c0_71, %c800] : memref<2x2048xf32, #tpu.memory_space<vmem>>, vector<2x32xf32>
    %c224_72 = arith.constant 224 : index
    %c0_73 = arith.constant 0 : index
    %64 = vector.load %arg10[%c224_72, %c0_73] : memref<728x32xf32, #tpu.memory_space<vmem>>, vector<2x32xf32>
    tpu.vector_store %arg10[%c224_72, %c0_73], %63 {strides = array<i32>} : memref<728x32xf32, #tpu.memory_space<vmem>>, vector<2x32xf32>,
    %c0_74 = arith.constant 0 : index
    %c832 = arith.constant 832 : index
    %65 = vector.load %arg9[%c0_74, %c832] : memref<2x2048xf32, #tpu.memory_space<vmem>>, vector<2x32xf32>
    %c232 = arith.constant 232 : index
    %c0_75 = arith.constant 0 : index
    %66 = vector.load %arg10[%c232, %c0_75] : memref<728x32xf32, #tpu.memory_space<vmem>>, vector<2x32xf32>
    tpu.vector_store %arg10[%c232, %c0_75], %65 {strides = array<i32>} : memref<728x32xf32, #tpu.memory_space<vmem>>, vector<2x32xf32>,
    %c0_76 = arith.constant 0 : index
    %c864 = arith.constant 864 : index
    %67 = vector.load %arg9[%c0_76, %c864] : memref<2x2048xf32, #tpu.memory_space<vmem>>, vector<2x32xf32>
    %c240 = arith.constant 240 : index
    %c0_77 = arith.constant 0 : index
    %68 = vector.load %arg10[%c240, %c0_77] : memref<728x32xf32, #tpu.memory_space<vmem>>, vector<2x32xf32>
    tpu.vector_store %arg10[%c240, %c0_77], %67 {strides = array<i32>} : memref<728x32xf32, #tpu.memory_space<vmem>>, vector<2x32xf32>,
    %c0_78 = arith.constant 0 : index
    %c896 = arith.constant 896 : index
    %69 = vector.load %arg9[%c0_78, %c896] : memref<2x2048xf32, #tpu.memory_space<vmem>>, vector<2x32xf32>
    %c248 = arith.constant 248 : index
    %c0_79 = arith.constant 0 : index
    %70 = vector.load %arg10[%c248, %c0_79] : memref<728x32xf32, #tpu.memory_space<vmem>>, vector<2x32xf32>
    tpu.vector_store %arg10[%c248, %c0_79], %69 {strides = array<i32>} : memref<728x32xf32, #tpu.memory_space<vmem>>, vector<2x32xf32>,
    %c0_80 = arith.constant 0 : index
    %c928 = arith.constant 928 : index
    %71 = vector.load %arg9[%c0_80, %c928] : memref<2x2048xf32, #tpu.memory_space<vmem>>, vector<2x32xf32>
    %c256_81 = arith.constant 256 : index
    %c0_82 = arith.constant 0 : index
    %72 = vector.load %arg10[%c256_81, %c0_82] : memref<728x32xf32, #tpu.memory_space<vmem>>, vector<2x32xf32>
    tpu.vector_store %arg10[%c256_81, %c0_82], %71 {strides = array<i32>} : memref<728x32xf32, #tpu.memory_space<vmem>>, vector<2x32xf32>,
    %c0_83 = arith.constant 0 : index
    %c960 = arith.constant 960 : index
    %73 = vector.load %arg9[%c0_83, %c960] : memref<2x2048xf32, #tpu.memory_space<vmem>>, vector<2x32xf32>
    %c264 = arith.constant 264 : index
    %c0_84 = arith.constant 0 : index
    %74 = vector.load %arg10[%c264, %c0_84] : memref<728x32xf32, #tpu.memory_space<vmem>>, vector<2x32xf32>
    tpu.vector_store %arg10[%c264, %c0_84], %73 {strides = array<i32>} : memref<728x32xf32, #tpu.memory_space<vmem>>, vector<2x32xf32>,
    %c0_85 = arith.constant 0 : index
    %c992 = arith.constant 992 : index
    %75 = vector.load %arg9[%c0_85, %c992] : memref<2x2048xf32, #tpu.memory_space<vmem>>, vector<2x32xf32>
    %c272 = arith.constant 272 : index
    %c0_86 = arith.constant 0 : index
    %76 = vector.load %arg10[%c272, %c0_86] : memref<728x32xf32, #tpu.memory_space<vmem>>, vector<2x32xf32>
    tpu.vector_store %arg10[%c272, %c0_86], %75 {strides = array<i32>} : memref<728x32xf32, #tpu.memory_space<vmem>>, vector<2x32xf32>,
    %c0_87 = arith.constant 0 : index
    %c1024 = arith.constant 1024 : index
    %77 = vector.load %arg9[%c0_87, %c1024] : memref<2x2048xf32, #tpu.memory_space<vmem>>, vector<2x32xf32>
    %c288_88 = arith.constant 288 : index
    %c0_89 = arith.constant 0 : index
    %78 = vector.load %arg10[%c288_88, %c0_89] : memref<728x32xf32, #tpu.memory_space<vmem>>, vector<2x32xf32>
    tpu.vector_store %arg10[%c288_88, %c0_89], %77 {strides = array<i32>} : memref<728x32xf32, #tpu.memory_space<vmem>>, vector<2x32xf32>,
    %c0_90 = arith.constant 0 : index
    %c1056 = arith.constant 1056 : index
    %79 = vector.load %arg9[%c0_90, %c1056] : memref<2x2048xf32, #tpu.memory_space<vmem>>, vector<2x32xf32>
    %c296 = arith.constant 296 : index
    %c0_91 = arith.constant 0 : index
    %80 = vector.load %arg10[%c296, %c0_91] : memref<728x32xf32, #tpu.memory_space<vmem>>, vector<2x32xf32>
    tpu.vector_store %arg10[%c296, %c0_91], %79 {strides = array<i32>} : memref<728x32xf32, #tpu.memory_space<vmem>>, vector<2x32xf32>,
    %c0_92 = arith.constant 0 : index
    %c1088 = arith.constant 1088 : index
    %81 = vector.load %arg9[%c0_92, %c1088] : memref<2x2048xf32, #tpu.memory_space<vmem>>, vector<2x32xf32>
    %c304 = arith.constant 304 : index
    %c0_93 = arith.constant 0 : index
    %82 = vector.load %arg10[%c304, %c0_93] : memref<728x32xf32, #tpu.memory_space<vmem>>, vector<2x32xf32>
    tpu.vector_store %arg10[%c304, %c0_93], %81 {strides = array<i32>} : memref<728x32xf32, #tpu.memory_space<vmem>>, vector<2x32xf32>,
    %c0_94 = arith.constant 0 : index
    %c1120 = arith.constant 1120 : index
    %83 = vector.load %arg9[%c0_94, %c1120] : memref<2x2048xf32, #tpu.memory_space<vmem>>, vector<2x32xf32>
    %c312 = arith.constant 312 : index
    %c0_95 = arith.constant 0 : index
    %84 = vector.load %arg10[%c312, %c0_95] : memref<728x32xf32, #tpu.memory_space<vmem>>, vector<2x32xf32>
    tpu.vector_store %arg10[%c312, %c0_95], %83 {strides = array<i32>} : memref<728x32xf32, #tpu.memory_space<vmem>>, vector<2x32xf32>,
    %c0_96 = arith.constant 0 : index
    %c1152 = arith.constant 1152 : index
    %85 = vector.load %arg9[%c0_96, %c1152] : memref<2x2048xf32, #tpu.memory_space<vmem>>, vector<2x32xf32>
    %c320_97 = arith.constant 320 : index
    %c0_98 = arith.constant 0 : index
    %86 = vector.load %arg10[%c320_97, %c0_98] : memref<728x32xf32, #tpu.memory_space<vmem>>, vector<2x32xf32>
    tpu.vector_store %arg10[%c320_97, %c0_98], %85 {strides = array<i32>} : memref<728x32xf32, #tpu.memory_space<vmem>>, vector<2x32xf32>,
    %c0_99 = arith.constant 0 : index
    %c1184 = arith.constant 1184 : index
    %87 = vector.load %arg9[%c0_99, %c1184] : memref<2x2048xf32, #tpu.memory_space<vmem>>, vector<2x32xf32>
    %c328 = arith.constant 328 : index
    %c0_100 = arith.constant 0 : index
    %88 = vector.load %arg10[%c328, %c0_100] : memref<728x32xf32, #tpu.memory_space<vmem>>, vector<2x32xf32>
    tpu.vector_store %arg10[%c328, %c0_100], %87 {strides = array<i32>} : memref<728x32xf32, #tpu.memory_space<vmem>>, vector<2x32xf32>,
    %c0_101 = arith.constant 0 : index
    %c1216 = arith.constant 1216 : index
    %89 = vector.load %arg9[%c0_101, %c1216] : memref<2x2048xf32, #tpu.memory_space<vmem>>, vector<2x32xf32>
    %c336 = arith.constant 336 : index
    %c0_102 = arith.constant 0 : index
    %90 = vector.load %arg10[%c336, %c0_102] : memref<728x32xf32, #tpu.memory_space<vmem>>, vector<2x32xf32>
    tpu.vector_store %arg10[%c336, %c0_102], %89 {strides = array<i32>} : memref<728x32xf32, #tpu.memory_space<vmem>>, vector<2x32xf32>,
    %c0_103 = arith.constant 0 : index
    %c1248 = arith.constant 1248 : index
    %91 = vector.load %arg9[%c0_103, %c1248] : memref<2x2048xf32, #tpu.memory_space<vmem>>, vector<2x32xf32>
    %c344 = arith.constant 344 : index
    %c0_104 = arith.constant 0 : index
    %92 = vector.load %arg10[%c344, %c0_104] : memref<728x32xf32, #tpu.memory_space<vmem>>, vector<2x32xf32>
    tpu.vector_store %arg10[%c344, %c0_104], %91 {strides = array<i32>} : memref<728x32xf32, #tpu.memory_space<vmem>>, vector<2x32xf32>,
    %c0_105 = arith.constant 0 : index
    %c1280 = arith.constant 1280 : index
    %93 = vector.load %arg9[%c0_105, %c1280] : memref<2x2048xf32, #tpu.memory_space<vmem>>, vector<2x32xf32>
    %c360 = arith.constant 360 : index
    %c0_106 = arith.constant 0 : index
    %94 = vector.load %arg10[%c360, %c0_106] : memref<728x32xf32, #tpu.memory_space<vmem>>, vector<2x32xf32>
    tpu.vector_store %arg10[%c360, %c0_106], %93 {strides = array<i32>} : memref<728x32xf32, #tpu.memory_space<vmem>>, vector<2x32xf32>,
    %c0_107 = arith.constant 0 : index
    %c1312 = arith.constant 1312 : index
    %95 = vector.load %arg9[%c0_107, %c1312] : memref<2x2048xf32, #tpu.memory_space<vmem>>, vector<2x32xf32>
    %c368 = arith.constant 368 : index
    %c0_108 = arith.constant 0 : index
    %96 = vector.load %arg10[%c368, %c0_108] : memref<728x32xf32, #tpu.memory_space<vmem>>, vector<2x32xf32>
    tpu.vector_store %arg10[%c368, %c0_108], %95 {strides = array<i32>} : memref<728x32xf32, #tpu.memory_space<vmem>>, vector<2x32xf32>,
    %c0_109 = arith.constant 0 : index
    %c1344 = arith.constant 1344 : index
    %97 = vector.load %arg9[%c0_109, %c1344] : memref<2x2048xf32, #tpu.memory_space<vmem>>, vector<2x32xf32>
    %c376 = arith.constant 376 : index
    %c0_110 = arith.constant 0 : index
    %98 = vector.load %arg10[%c376, %c0_110] : memref<728x32xf32, #tpu.memory_space<vmem>>, vector<2x32xf32>
    tpu.vector_store %arg10[%c376, %c0_110], %97 {strides = array<i32>} : memref<728x32xf32, #tpu.memory_space<vmem>>, vector<2x32xf32>,
    %c0_111 = arith.constant 0 : index
    %c1376 = arith.constant 1376 : index
    %99 = vector.load %arg9[%c0_111, %c1376] : memref<2x2048xf32, #tpu.memory_space<vmem>>, vector<2x32xf32>
    %c384_112 = arith.constant 384 : index
    %c0_113 = arith.constant 0 : index
    %100 = vector.load %arg10[%c384_112, %c0_113] : memref<728x32xf32, #tpu.memory_space<vmem>>, vector<2x32xf32>
    tpu.vector_store %arg10[%c384_112, %c0_113], %99 {strides = array<i32>} : memref<728x32xf32, #tpu.memory_space<vmem>>, vector<2x32xf32>,
    %c0_114 = arith.constant 0 : index
    %c1408 = arith.constant 1408 : index
    %101 = vector.load %arg9[%c0_114, %c1408] : memref<2x2048xf32, #tpu.memory_space<vmem>>, vector<2x32xf32>
    %c392 = arith.constant 392 : index
    %c0_115 = arith.constant 0 : index
    %102 = vector.load %arg10[%c392, %c0_115] : memref<728x32xf32, #tpu.memory_space<vmem>>, vector<2x32xf32>
    tpu.vector_store %arg10[%c392, %c0_115], %101 {strides = array<i32>} : memref<728x32xf32, #tpu.memory_space<vmem>>, vector<2x32xf32>,
    %c0_116 = arith.constant 0 : index
    %c1440 = arith.constant 1440 : index
    %103 = vector.load %arg9[%c0_116, %c1440] : memref<2x2048xf32, #tpu.memory_space<vmem>>, vector<2x32xf32>
    %c400 = arith.constant 400 : index
    %c0_117 = arith.constant 0 : index
    %104 = vector.load %arg10[%c400, %c0_117] : memref<728x32xf32, #tpu.memory_space<vmem>>, vector<2x32xf32>
    tpu.vector_store %arg10[%c400, %c0_117], %103 {strides = array<i32>} : memref<728x32xf32, #tpu.memory_space<vmem>>, vector<2x32xf32>,
    %c0_118 = arith.constant 0 : index
    %c1472 = arith.constant 1472 : index
    %105 = vector.load %arg9[%c0_118, %c1472] : memref<2x2048xf32, #tpu.memory_space<vmem>>, vector<2x32xf32>
    %c408 = arith.constant 408 : index
    %c0_119 = arith.constant 0 : index
    %106 = vector.load %arg10[%c408, %c0_119] : memref<728x32xf32, #tpu.memory_space<vmem>>, vector<2x32xf32>
    tpu.vector_store %arg10[%c408, %c0_119], %105 {strides = array<i32>} : memref<728x32xf32, #tpu.memory_space<vmem>>, vector<2x32xf32>,
    %c0_120 = arith.constant 0 : index
    %c1504 = arith.constant 1504 : index
    %107 = vector.load %arg9[%c0_120, %c1504] : memref<2x2048xf32, #tpu.memory_space<vmem>>, vector<2x32xf32>
    %c416_121 = arith.constant 416 : index
    %c0_122 = arith.constant 0 : index
    %108 = vector.load %arg10[%c416_121, %c0_122] : memref<728x32xf32, #tpu.memory_space<vmem>>, vector<2x32xf32>
    tpu.vector_store %arg10[%c416_121, %c0_122], %107 {strides = array<i32>} : memref<728x32xf32, #tpu.memory_space<vmem>>, vector<2x32xf32>,
    %c0_123 = arith.constant 0 : index
    %c1536 = arith.constant 1536 : index
    %109 = vector.load %arg9[%c0_123, %c1536] : memref<2x2048xf32, #tpu.memory_space<vmem>>, vector<2x32xf32>
    %c432 = arith.constant 432 : index
    %c0_124 = arith.constant 0 : index
    %110 = vector.load %arg10[%c432, %c0_124] : memref<728x32xf32, #tpu.memory_space<vmem>>, vector<2x32xf32>
    tpu.vector_store %arg10[%c432, %c0_124], %109 {strides = array<i32>} : memref<728x32xf32, #tpu.memory_space<vmem>>, vector<2x32xf32>,
    %c0_125 = arith.constant 0 : index
    %c1568 = arith.constant 1568 : index
    %111 = vector.load %arg9[%c0_125, %c1568] : memref<2x2048xf32, #tpu.memory_space<vmem>>, vector<2x32xf32>
    %c440 = arith.constant 440 : index
    %c0_126 = arith.constant 0 : index
    %112 = vector.load %arg10[%c440, %c0_126] : memref<728x32xf32, #tpu.memory_space<vmem>>, vector<2x32xf32>
    tpu.vector_store %arg10[%c440, %c0_126], %111 {strides = array<i32>} : memref<728x32xf32, #tpu.memory_space<vmem>>, vector<2x32xf32>,
    %c0_127 = arith.constant 0 : index
    %c1600 = arith.constant 1600 : index
    %113 = vector.load %arg9[%c0_127, %c1600] : memref<2x2048xf32, #tpu.memory_space<vmem>>, vector<2x32xf32>
    %c448_128 = arith.constant 448 : index
    %c0_129 = arith.constant 0 : index
    %114 = vector.load %arg10[%c448_128, %c0_129] : memref<728x32xf32, #tpu.memory_space<vmem>>, vector<2x32xf32>
    tpu.vector_store %arg10[%c448_128, %c0_129], %113 {strides = array<i32>} : memref<728x32xf32, #tpu.memory_space<vmem>>, vector<2x32xf32>,
    %c0_130 = arith.constant 0 : index
    %c1632 = arith.constant 1632 : index
    %115 = vector.load %arg9[%c0_130, %c1632] : memref<2x2048xf32, #tpu.memory_space<vmem>>, vector<2x32xf32>
    %c456 = arith.constant 456 : index
    %c0_131 = arith.constant 0 : index
    %116 = vector.load %arg10[%c456, %c0_131] : memref<728x32xf32, #tpu.memory_space<vmem>>, vector<2x32xf32>
    tpu.vector_store %arg10[%c456, %c0_131], %115 {strides = array<i32>} : memref<728x32xf32, #tpu.memory_space<vmem>>, vector<2x32xf32>,
    %c0_132 = arith.constant 0 : index
    %c1664 = arith.constant 1664 : index
    %117 = vector.load %arg9[%c0_132, %c1664] : memref<2x2048xf32, #tpu.memory_space<vmem>>, vector<2x32xf32>
    %c464 = arith.constant 464 : index
    %c0_133 = arith.constant 0 : index
    %118 = vector.load %arg10[%c464, %c0_133] : memref<728x32xf32, #tpu.memory_space<vmem>>, vector<2x32xf32>
    tpu.vector_store %arg10[%c464, %c0_133], %117 {strides = array<i32>} : memref<728x32xf32, #tpu.memory_space<vmem>>, vector<2x32xf32>,
    %c0_134 = arith.constant 0 : index
    %c1696 = arith.constant 1696 : index
    %119 = vector.load %arg9[%c0_134, %c1696] : memref<2x2048xf32, #tpu.memory_space<vmem>>, vector<2x32xf32>
    %c472 = arith.constant 472 : index
    %c0_135 = arith.constant 0 : index
    %120 = vector.load %arg10[%c472, %c0_135] : memref<728x32xf32, #tpu.memory_space<vmem>>, vector<2x32xf32>
    tpu.vector_store %arg10[%c472, %c0_135], %119 {strides = array<i32>} : memref<728x32xf32, #tpu.memory_space<vmem>>, vector<2x32xf32>,
    %c0_136 = arith.constant 0 : index
    %c1728 = arith.constant 1728 : index
    %121 = vector.load %arg9[%c0_136, %c1728] : memref<2x2048xf32, #tpu.memory_space<vmem>>, vector<2x32xf32>
    %c480_137 = arith.constant 480 : index
    %c0_138 = arith.constant 0 : index
    %122 = vector.load %arg10[%c480_137, %c0_138] : memref<728x32xf32, #tpu.memory_space<vmem>>, vector<2x32xf32>
    tpu.vector_store %arg10[%c480_137, %c0_138], %121 {strides = array<i32>} : memref<728x32xf32, #tpu.memory_space<vmem>>, vector<2x32xf32>,
    %c0_139 = arith.constant 0 : index
    %c1760 = arith.constant 1760 : index
    %123 = vector.load %arg9[%c0_139, %c1760] : memref<2x2048xf32, #tpu.memory_space<vmem>>, vector<2x32xf32>
    %c488 = arith.constant 488 : index
    %c0_140 = arith.constant 0 : index
    %124 = vector.load %arg10[%c488, %c0_140] : memref<728x32xf32, #tpu.memory_space<vmem>>, vector<2x32xf32>
    tpu.vector_store %arg10[%c488, %c0_140], %123 {strides = array<i32>} : memref<728x32xf32, #tpu.memory_space<vmem>>, vector<2x32xf32>,
    %c0_141 = arith.constant 0 : index
    %c1792 = arith.constant 1792 : index
    %125 = vector.load %arg9[%c0_141, %c1792] : memref<2x2048xf32, #tpu.memory_space<vmem>>, vector<2x32xf32>
    %c504 = arith.constant 504 : index
    %c0_142 = arith.constant 0 : index
    %126 = vector.load %arg10[%c504, %c0_142] : memref<728x32xf32, #tpu.memory_space<vmem>>, vector<2x32xf32>
    tpu.vector_store %arg10[%c504, %c0_142], %125 {strides = array<i32>} : memref<728x32xf32, #tpu.memory_space<vmem>>, vector<2x32xf32>,
    %c0_143 = arith.constant 0 : index
    %c1824 = arith.constant 1824 : index
    %127 = vector.load %arg9[%c0_143, %c1824] : memref<2x2048xf32, #tpu.memory_space<vmem>>, vector<2x32xf32>
    %c512_144 = arith.constant 512 : index
    %c0_145 = arith.constant 0 : index
    %128 = vector.load %arg10[%c512_144, %c0_145] : memref<728x32xf32, #tpu.memory_space<vmem>>, vector<2x32xf32>
    tpu.vector_store %arg10[%c512_144, %c0_145], %127 {strides = array<i32>} : memref<728x32xf32, #tpu.memory_space<vmem>>, vector<2x32xf32>,
    %c0_146 = arith.constant 0 : index
    %c1856 = arith.constant 1856 : index
    %129 = vector.load %arg9[%c0_146, %c1856] : memref<2x2048xf32, #tpu.memory_space<vmem>>, vector<2x32xf32>
    %c520 = arith.constant 520 : index
    %c0_147 = arith.constant 0 : index
    %130 = vector.load %arg10[%c520, %c0_147] : memref<728x32xf32, #tpu.memory_space<vmem>>, vector<2x32xf32>
    tpu.vector_store %arg10[%c520, %c0_147], %129 {strides = array<i32>} : memref<728x32xf32, #tpu.memory_space<vmem>>, vector<2x32xf32>,
    %c0_148 = arith.constant 0 : index
    %c1888 = arith.constant 1888 : index
    %131 = vector.load %arg9[%c0_148, %c1888] : memref<2x2048xf32, #tpu.memory_space<vmem>>, vector<2x32xf32>
    %c528 = arith.constant 528 : index
    %c0_149 = arith.constant 0 : index
    %132 = vector.load %arg10[%c528, %c0_149] : memref<728x32xf32, #tpu.memory_space<vmem>>, vector<2x32xf32>
    tpu.vector_store %arg10[%c528, %c0_149], %131 {strides = array<i32>} : memref<728x32xf32, #tpu.memory_space<vmem>>, vector<2x32xf32>,
    %c0_150 = arith.constant 0 : index
    %c1920 = arith.constant 1920 : index
    %133 = vector.load %arg9[%c0_150, %c1920] : memref<2x2048xf32, #tpu.memory_space<vmem>>, vector<2x32xf32>
    %c536 = arith.constant 536 : index
    %c0_151 = arith.constant 0 : index
    %134 = vector.load %arg10[%c536, %c0_151] : memref<728x32xf32, #tpu.memory_space<vmem>>, vector<2x32xf32>
    tpu.vector_store %arg10[%c536, %c0_151], %133 {strides = array<i32>} : memref<728x32xf32, #tpu.memory_space<vmem>>, vector<2x32xf32>,
    %c0_152 = arith.constant 0 : index
    %c1952 = arith.constant 1952 : index
    %135 = vector.load %arg9[%c0_152, %c1952] : memref<2x2048xf32, #tpu.memory_space<vmem>>, vector<2x32xf32>
    %c544_153 = arith.constant 544 : index
    %c0_154 = arith.constant 0 : index
    %136 = vector.load %arg10[%c544_153, %c0_154] : memref<728x32xf32, #tpu.memory_space<vmem>>, vector<2x32xf32>
    tpu.vector_store %arg10[%c544_153, %c0_154], %135 {strides = array<i32>} : memref<728x32xf32, #tpu.memory_space<vmem>>, vector<2x32xf32>,
    %c0_155 = arith.constant 0 : index
    %c1984 = arith.constant 1984 : index
    %137 = vector.load %arg9[%c0_155, %c1984] : memref<2x2048xf32, #tpu.memory_space<vmem>>, vector<2x32xf32>
    %c552 = arith.constant 552 : index
    %c0_156 = arith.constant 0 : index
    %138 = vector.load %arg10[%c552, %c0_156] : memref<728x32xf32, #tpu.memory_space<vmem>>, vector<2x32xf32>
    tpu.vector_store %arg10[%c552, %c0_156], %137 {strides = array<i32>} : memref<728x32xf32, #tpu.memory_space<vmem>>, vector<2x32xf32>,
    %c0_157 = arith.constant 0 : index
    %c2016 = arith.constant 2016 : index
    %139 = vector.load %arg9[%c0_157, %c2016] : memref<2x2048xf32, #tpu.memory_space<vmem>>, vector<2x32xf32>
    %c560 = arith.constant 560 : index
    %c0_158 = arith.constant 0 : index
    %140 = vector.load %arg10[%c560, %c0_158] : memref<728x32xf32, #tpu.memory_space<vmem>>, vector<2x32xf32>
    tpu.vector_store %arg10[%c560, %c0_158], %139 {strides = array<i32>} : memref<728x32xf32, #tpu.memory_space<vmem>>, vector<2x32xf32>,
    %c0_159 = arith.constant 0 : index
    %c0_160 = arith.constant 0 : index
    %141 = vector.load %arg10[%c0_159, %c0_160] : memref<728x32xf32, #tpu.memory_space<vmem>>, vector<648x32xf32>
    %142 = arith.truncf %141 : vector<648x32xf32> to vector<648x32xbf16>
    %c0_161 = arith.constant 0 : index
    %c0_162 = arith.constant 0 : index
    %c0_163 = arith.constant 0 : index
    %143 = vector.load %arg3[%c0_161, %c0_162, %c0_163] : memref<4x32x64xbf16, #tpu.memory_space<vmem>>, vector<1x32x64xbf16>
    %144 = vector.shape_cast %143 : vector<1x32x64xbf16> to vector<32x64xbf16>
    %cst_164 = arith.constant dense<0.000000e+00> : vector<648x64xf32>
    %145 = tpu.matmul %142, %144, %cst_164 {dimension_numbers = #tpu.dot_dimension_numbers<[1], [0], [0], [1], [0, 0, 1, 1], [], []>} : vector<648x32xbf16>, vector<32x64xbf16>, vector<648x64xf32> -> vector<648x64xf32>
    %c8_165 = arith.constant 8 : index
    %c0_166 = arith.constant 0 : index
    %146 = vector.load %arg10[%c8_165, %c0_166] : memref<728x32xf32, #tpu.memory_space<vmem>>, vector<648x32xf32>
    %147 = arith.truncf %146 : vector<648x32xf32> to vector<648x32xbf16>
    %c1 = arith.constant 1 : index
    %c0_167 = arith.constant 0 : index
    %c0_168 = arith.constant 0 : index
    %148 = vector.load %arg3[%c1, %c0_167, %c0_168] : memref<4x32x64xbf16, #tpu.memory_space<vmem>>, vector<1x32x64xbf16>
    %149 = vector.shape_cast %148 : vector<1x32x64xbf16> to vector<32x64xbf16>
    %cst_169 = arith.constant dense<0.000000e+00> : vector<648x64xf32>
    %150 = tpu.matmul %147, %149, %cst_169 {dimension_numbers = #tpu.dot_dimension_numbers<[1], [0], [0], [1], [0, 0, 1, 1], [], []>} : vector<648x32xbf16>, vector<32x64xbf16>, vector<648x64xf32> -> vector<648x64xf32>
    %151 = arith.addf %145, %150 : vector<648x64xf32>
    %c72_170 = arith.constant 72 : index
    %c0_171 = arith.constant 0 : index
    %152 = vector.load %arg10[%c72_170, %c0_171] : memref<728x32xf32, #tpu.memory_space<vmem>>, vector<648x32xf32>
    %153 = arith.truncf %152 : vector<648x32xf32> to vector<648x32xbf16>
    %c2 = arith.constant 2 : index
    %c0_172 = arith.constant 0 : index
    %c0_173 = arith.constant 0 : index
    %154 = vector.load %arg3[%c2, %c0_172, %c0_173] : memref<4x32x64xbf16, #tpu.memory_space<vmem>>, vector<1x32x64xbf16>
    %155 = vector.shape_cast %154 : vector<1x32x64xbf16> to vector<32x64xbf16>
    %cst_174 = arith.constant dense<0.000000e+00> : vector<648x64xf32>
    %156 = tpu.matmul %153, %155, %cst_174 {dimension_numbers = #tpu.dot_dimension_numbers<[1], [0], [0], [1], [0, 0, 1, 1], [], []>} : vector<648x32xbf16>, vector<32x64xbf16>, vector<648x64xf32> -> vector<648x64xf32>
    %157 = arith.addf %151, %156 : vector<648x64xf32>
    %c80_175 = arith.constant 80 : index
    %c0_176 = arith.constant 0 : index
    %158 = vector.load %arg10[%c80_175, %c0_176] : memref<728x32xf32, #tpu.memory_space<vmem>>, vector<648x32xf32>
    %159 = arith.truncf %158 : vector<648x32xf32> to vector<648x32xbf16>
    %c3 = arith.constant 3 : index
    %c0_177 = arith.constant 0 : index
    %c0_178 = arith.constant 0 : index
    %160 = vector.load %arg3[%c3, %c0_177, %c0_178] : memref<4x32x64xbf16, #tpu.memory_space<vmem>>, vector<1x32x64xbf16>
    %161 = vector.shape_cast %160 : vector<1x32x64xbf16> to vector<32x64xbf16>
    %cst_179 = arith.constant dense<0.000000e+00> : vector<648x64xf32>
    %162 = tpu.matmul %159, %161, %cst_179 {dimension_numbers = #tpu.dot_dimension_numbers<[1], [0], [0], [1], [0, 0, 1, 1], [], []>} : vector<648x32xbf16>, vector<32x64xbf16>, vector<648x64xf32> -> vector<648x64xf32>
    %163 = arith.addf %157, %162 : vector<648x64xf32>
    %c0_180 = arith.constant 0 : index
    %c0_181 = arith.constant 0 : index
    %164 = vector.load %arg6[%c0_180, %c0_181] : memref<1x64xf32, #tpu.memory_space<vmem>>, vector<1x64xf32>
    %165 = vector.broadcast %164 : vector<1x64xf32> to vector<648x64xf32>
    %166 = arith.addf %163, %165 : vector<648x64xf32>
    %cst_182 = arith.constant 0.000000e+00 : f32
    %167 = vector.broadcast %cst_182 : f32 to vector<648x64xf32>
    %168 = arith.maximumf %166, %167 : vector<648x64xf32>
    %169 = vector.extract_strided_slice %168 {offsets = [0, 0], sizes = [64, 64], strides = [1, 1]} : vector<648x64xf32> to vector<64x64xf32>
    %c0_183 = arith.constant 0 : index
    %c0_184 = arith.constant 0 : index
    %170 = vector.load %arg11[%c0_183, %c0_184] : memref<728x64xf32, #tpu.memory_space<vmem>>, vector<64x64xf32>
    tpu.vector_store %arg11[%c0_183, %c0_184], %169 {strides = array<i32>} : memref<728x64xf32, #tpu.memory_space<vmem>>, vector<64x64xf32>,
    %171 = vector.extract_strided_slice %168 {offsets = [72, 0], sizes = [64, 64], strides = [1, 1]} : vector<648x64xf32> to vector<64x64xf32>
    %c72_185 = arith.constant 72 : index
    %c0_186 = arith.constant 0 : index
    %172 = vector.load %arg11[%c72_185, %c0_186] : memref<728x64xf32, #tpu.memory_space<vmem>>, vector<64x64xf32>
    tpu.vector_store %arg11[%c72_185, %c0_186], %171 {strides = array<i32>} : memref<728x64xf32, #tpu.memory_space<vmem>>, vector<64x64xf32>,
    %173 = vector.extract_strided_slice %168 {offsets = [144, 0], sizes = [64, 64], strides = [1, 1]} : vector<648x64xf32> to vector<64x64xf32>
    %c144_187 = arith.constant 144 : index
    %c0_188 = arith.constant 0 : index
    %174 = vector.load %arg11[%c144_187, %c0_188] : memref<728x64xf32, #tpu.memory_space<vmem>>, vector<64x64xf32>
    tpu.vector_store %arg11[%c144_187, %c0_188], %173 {strides = array<i32>} : memref<728x64xf32, #tpu.memory_space<vmem>>, vector<64x64xf32>,
    %175 = vector.extract_strided_slice %168 {offsets = [216, 0], sizes = [64, 64], strides = [1, 1]} : vector<648x64xf32> to vector<64x64xf32>
    %c216_189 = arith.constant 216 : index
    %c0_190 = arith.constant 0 : index
    %176 = vector.load %arg11[%c216_189, %c0_190] : memref<728x64xf32, #tpu.memory_space<vmem>>, vector<64x64xf32>
    tpu.vector_store %arg11[%c216_189, %c0_190], %175 {strides = array<i32>} : memref<728x64xf32, #tpu.memory_space<vmem>>, vector<64x64xf32>,
    %177 = vector.extract_strided_slice %168 {offsets = [288, 0], sizes = [64, 64], strides = [1, 1]} : vector<648x64xf32> to vector<64x64xf32>
    %c288_191 = arith.constant 288 : index
    %c0_192 = arith.constant 0 : index
    %178 = vector.load %arg11[%c288_191, %c0_192] : memref<728x64xf32, #tpu.memory_space<vmem>>, vector<64x64xf32>
    tpu.vector_store %arg11[%c288_191, %c0_192], %177 {strides = array<i32>} : memref<728x64xf32, #tpu.memory_space<vmem>>, vector<64x64xf32>,
    %179 = vector.extract_strided_slice %168 {offsets = [360, 0], sizes = [64, 64], strides = [1, 1]} : vector<648x64xf32> to vector<64x64xf32>
    %c360_193 = arith.constant 360 : index
    %c0_194 = arith.constant 0 : index
    %180 = vector.load %arg11[%c360_193, %c0_194] : memref<728x64xf32, #tpu.memory_space<vmem>>, vector<64x64xf32>
    tpu.vector_store %arg11[%c360_193, %c0_194], %179 {strides = array<i32>} : memref<728x64xf32, #tpu.memory_space<vmem>>, vector<64x64xf32>,
    %181 = vector.extract_strided_slice %168 {offsets = [432, 0], sizes = [64, 64], strides = [1, 1]} : vector<648x64xf32> to vector<64x64xf32>
    %c432_195 = arith.constant 432 : index
    %c0_196 = arith.constant 0 : index
    %182 = vector.load %arg11[%c432_195, %c0_196] : memref<728x64xf32, #tpu.memory_space<vmem>>, vector<64x64xf32>
    tpu.vector_store %arg11[%c432_195, %c0_196], %181 {strides = array<i32>} : memref<728x64xf32, #tpu.memory_space<vmem>>, vector<64x64xf32>,
    %183 = vector.extract_strided_slice %168 {offsets = [504, 0], sizes = [64, 64], strides = [1, 1]} : vector<648x64xf32> to vector<64x64xf32>
    %c504_197 = arith.constant 504 : index
    %c0_198 = arith.constant 0 : index
    %184 = vector.load %arg11[%c504_197, %c0_198] : memref<728x64xf32, #tpu.memory_space<vmem>>, vector<64x64xf32>
    tpu.vector_store %arg11[%c504_197, %c0_198], %183 {strides = array<i32>} : memref<728x64xf32, #tpu.memory_space<vmem>>, vector<64x64xf32>,
    %c0_199 = arith.constant 0 : index
    %c0_200 = arith.constant 0 : index
    %185 = vector.load %arg11[%c0_199, %c0_200] : memref<728x64xf32, #tpu.memory_space<vmem>>, vector<648x64xf32>
    %186 = arith.truncf %185 : vector<648x64xf32> to vector<648x64xbf16>
    %c0_201 = arith.constant 0 : index
    %c0_202 = arith.constant 0 : index
    %c0_203 = arith.constant 0 : index
    %187 = vector.load %arg4[%c0_201, %c0_202, %c0_203] : memref<4x64x16xbf16, #tpu.memory_space<vmem>>, vector<1x64x16xbf16>
    %188 = vector.shape_cast %187 : vector<1x64x16xbf16> to vector<64x16xbf16>
    %cst_204 = arith.constant dense<0.000000e+00> : vector<648x16xf32>
    %189 = tpu.matmul %186, %188, %cst_204 {dimension_numbers = #tpu.dot_dimension_numbers<[1], [0], [0], [1], [0, 0, 1, 1], [], []>} : vector<648x64xbf16>, vector<64x16xbf16>, vector<648x16xf32> -> vector<648x16xf32>
    %c8_205 = arith.constant 8 : index
    %c0_206 = arith.constant 0 : index
    %190 = vector.load %arg11[%c8_205, %c0_206] : memref<728x64xf32, #tpu.memory_space<vmem>>, vector<648x64xf32>
    %191 = arith.truncf %190 : vector<648x64xf32> to vector<648x64xbf16>
    %c1_207 = arith.constant 1 : index
    %c0_208 = arith.constant 0 : index
    %c0_209 = arith.constant 0 : index
    %192 = vector.load %arg4[%c1_207, %c0_208, %c0_209] : memref<4x64x16xbf16, #tpu.memory_space<vmem>>, vector<1x64x16xbf16>
    %193 = vector.shape_cast %192 : vector<1x64x16xbf16> to vector<64x16xbf16>
    %cst_210 = arith.constant dense<0.000000e+00> : vector<648x16xf32>
    %194 = tpu.matmul %191, %193, %cst_210 {dimension_numbers = #tpu.dot_dimension_numbers<[1], [0], [0], [1], [0, 0, 1, 1], [], []>} : vector<648x64xbf16>, vector<64x16xbf16>, vector<648x16xf32> -> vector<648x16xf32>
    %195 = arith.addf %189, %194 : vector<648x16xf32>
    %c72_211 = arith.constant 72 : index
    %c0_212 = arith.constant 0 : index
    %196 = vector.load %arg11[%c72_211, %c0_212] : memref<728x64xf32, #tpu.memory_space<vmem>>, vector<648x64xf32>
    %197 = arith.truncf %196 : vector<648x64xf32> to vector<648x64xbf16>
    %c2_213 = arith.constant 2 : index
    %c0_214 = arith.constant 0 : index
    %c0_215 = arith.constant 0 : index
    %198 = vector.load %arg4[%c2_213, %c0_214, %c0_215] : memref<4x64x16xbf16, #tpu.memory_space<vmem>>, vector<1x64x16xbf16>
    %199 = vector.shape_cast %198 : vector<1x64x16xbf16> to vector<64x16xbf16>
    %cst_216 = arith.constant dense<0.000000e+00> : vector<648x16xf32>
    %200 = tpu.matmul %197, %199, %cst_216 {dimension_numbers = #tpu.dot_dimension_numbers<[1], [0], [0], [1], [0, 0, 1, 1], [], []>} : vector<648x64xbf16>, vector<64x16xbf16>, vector<648x16xf32> -> vector<648x16xf32>
    %201 = arith.addf %195, %200 : vector<648x16xf32>
    %c80_217 = arith.constant 80 : index
    %c0_218 = arith.constant 0 : index
    %202 = vector.load %arg11[%c80_217, %c0_218] : memref<728x64xf32, #tpu.memory_space<vmem>>, vector<648x64xf32>
    %203 = arith.truncf %202 : vector<648x64xf32> to vector<648x64xbf16>
    %c3_219 = arith.constant 3 : index
    %c0_220 = arith.constant 0 : index
    %c0_221 = arith.constant 0 : index
    %204 = vector.load %arg4[%c3_219, %c0_220, %c0_221] : memref<4x64x16xbf16, #tpu.memory_space<vmem>>, vector<1x64x16xbf16>
    %205 = vector.shape_cast %204 : vector<1x64x16xbf16> to vector<64x16xbf16>
    %cst_222 = arith.constant dense<0.000000e+00> : vector<648x16xf32>
    %206 = tpu.matmul %203, %205, %cst_222 {dimension_numbers = #tpu.dot_dimension_numbers<[1], [0], [0], [1], [0, 0, 1, 1], [], []>} : vector<648x64xbf16>, vector<64x16xbf16>, vector<648x16xf32> -> vector<648x16xf32>
    %207 = arith.addf %201, %206 : vector<648x16xf32>
    %c0_223 = arith.constant 0 : index
    %c0_224 = arith.constant 0 : index
    %208 = vector.load %arg7[%c0_223, %c0_224] : memref<1x16xf32, #tpu.memory_space<vmem>>, vector<1x16xf32>
    %209 = vector.broadcast %208 : vector<1x16xf32> to vector<648x16xf32>
    %210 = arith.addf %207, %209 : vector<648x16xf32>
    %211 = math.tanh %210 : vector<648x16xf32>
    %212 = vector.extract_strided_slice %211 {offsets = [0, 0], sizes = [64, 16], strides = [1, 1]} : vector<648x16xf32> to vector<64x16xf32>
    %c0_225 = arith.constant 0 : index
    %c0_226 = arith.constant 0 : index
    %213 = vector.load %arg8[%c0_225, %c0_226] : memref<512x16xf32, #tpu.memory_space<vmem>>, vector<64x16xf32>
    tpu.vector_store %arg8[%c0_225, %c0_226], %212 {strides = array<i32>} : memref<512x16xf32, #tpu.memory_space<vmem>>, vector<64x16xf32>,
    %214 = vector.extract_strided_slice %211 {offsets = [72, 0], sizes = [64, 16], strides = [1, 1]} : vector<648x16xf32> to vector<64x16xf32>
    %c64_227 = arith.constant 64 : index
    %c0_228 = arith.constant 0 : index
    %215 = vector.load %arg8[%c64_227, %c0_228] : memref<512x16xf32, #tpu.memory_space<vmem>>, vector<64x16xf32>
    tpu.vector_store %arg8[%c64_227, %c0_228], %214 {strides = array<i32>} : memref<512x16xf32, #tpu.memory_space<vmem>>, vector<64x16xf32>,
    %216 = vector.extract_strided_slice %211 {offsets = [144, 0], sizes = [64, 16], strides = [1, 1]} : vector<648x16xf32> to vector<64x16xf32>
    %c128_229 = arith.constant 128 : index
    %c0_230 = arith.constant 0 : index
    %217 = vector.load %arg8[%c128_229, %c0_230] : memref<512x16xf32, #tpu.memory_space<vmem>>, vector<64x16xf32>
    tpu.vector_store %arg8[%c128_229, %c0_230], %216 {strides = array<i32>} : memref<512x16xf32, #tpu.memory_space<vmem>>, vector<64x16xf32>,
    %218 = vector.extract_strided_slice %211 {offsets = [216, 0], sizes = [64, 16], strides = [1, 1]} : vector<648x16xf32> to vector<64x16xf32>
    %c192_231 = arith.constant 192 : index
    %c0_232 = arith.constant 0 : index
    %219 = vector.load %arg8[%c192_231, %c0_232] : memref<512x16xf32, #tpu.memory_space<vmem>>, vector<64x16xf32>
    tpu.vector_store %arg8[%c192_231, %c0_232], %218 {strides = array<i32>} : memref<512x16xf32, #tpu.memory_space<vmem>>, vector<64x16xf32>,
    %220 = vector.extract_strided_slice %211 {offsets = [288, 0], sizes = [64, 16], strides = [1, 1]} : vector<648x16xf32> to vector<64x16xf32>
    %c256_233 = arith.constant 256 : index
    %c0_234 = arith.constant 0 : index
    %221 = vector.load %arg8[%c256_233, %c0_234] : memref<512x16xf32, #tpu.memory_space<vmem>>, vector<64x16xf32>
    tpu.vector_store %arg8[%c256_233, %c0_234], %220 {strides = array<i32>} : memref<512x16xf32, #tpu.memory_space<vmem>>, vector<64x16xf32>,
    %222 = vector.extract_strided_slice %211 {offsets = [360, 0], sizes = [64, 16], strides = [1, 1]} : vector<648x16xf32> to vector<64x16xf32>
    %c320_235 = arith.constant 320 : index
    %c0_236 = arith.constant 0 : index
    %223 = vector.load %arg8[%c320_235, %c0_236] : memref<512x16xf32, #tpu.memory_space<vmem>>, vector<64x16xf32>
    tpu.vector_store %arg8[%c320_235, %c0_236], %222 {strides = array<i32>} : memref<512x16xf32, #tpu.memory_space<vmem>>, vector<64x16xf32>,
    %224 = vector.extract_strided_slice %211 {offsets = [432, 0], sizes = [64, 16], strides = [1, 1]} : vector<648x16xf32> to vector<64x16xf32>
    %c384_237 = arith.constant 384 : index
    %c0_238 = arith.constant 0 : index
    %225 = vector.load %arg8[%c384_237, %c0_238] : memref<512x16xf32, #tpu.memory_space<vmem>>, vector<64x16xf32>
    tpu.vector_store %arg8[%c384_237, %c0_238], %224 {strides = array<i32>} : memref<512x16xf32, #tpu.memory_space<vmem>>, vector<64x16xf32>,
    %226 = vector.extract_strided_slice %211 {offsets = [504, 0], sizes = [64, 16], strides = [1, 1]} : vector<648x16xf32> to vector<64x16xf32>
    %c448_239 = arith.constant 448 : index
    %c0_240 = arith.constant 0 : index
    %227 = vector.load %arg8[%c448_239, %c0_240] : memref<512x16xf32, #tpu.memory_space<vmem>>, vector<64x16xf32>
    tpu.vector_store %arg8[%c448_239, %c0_240], %226 {strides = array<i32>} : memref<512x16xf32, #tpu.memory_space<vmem>>, vector<64x16xf32>,
    return
  }
  func.func @transform_0(%arg0: i32) -> (i32, i32) {
    %c0_i32 = arith.constant 0 : i32
    %c0_i32_0 = arith.constant 0 : i32
    %c0_i32_1 = arith.constant 0 : i32
    return %c0_i32, %c0_i32_0 : i32, i32
  }
  func.func @transform_1(%arg0: i32) -> (i32, i32) {
    %c0_i32 = arith.constant 0 : i32
    %c0_i32_0 = arith.constant 0 : i32
    %c0_i32_1 = arith.constant 0 : i32
    return %c0_i32, %c0_i32_0 : i32, i32
  }
  func.func @transform_2(%arg0: i32) -> (i32, i32, i32) {
    %c0_i32 = arith.constant 0 : i32
    %c0_i32_0 = arith.constant 0 : i32
    %c0_i32_1 = arith.constant 0 : i32
    %c0_i32_2 = arith.constant 0 : i32
    return %c0_i32, %c0_i32_0, %c0_i32_1 : i32, i32, i32
  }
  func.func @transform_3(%arg0: i32) -> (i32, i32, i32) {
    %c0_i32 = arith.constant 0 : i32
    %c0_i32_0 = arith.constant 0 : i32
    %c0_i32_1 = arith.constant 0 : i32
    %c0_i32_2 = arith.constant 0 : i32
    return %c0_i32, %c0_i32_0, %c0_i32_1 : i32, i32, i32
  }
  func.func @transform_4(%arg0: i32) -> (i32, i32) {
    %c0_i32 = arith.constant 0 : i32
    %c0_i32_0 = arith.constant 0 : i32
    %c0_i32_1 = arith.constant 0 : i32
    return %c0_i32, %c0_i32_0 : i32, i32
  }
  func.func @transform_5(%arg0: i32) -> (i32, i32) {
    %c0_i32 = arith.constant 0 : i32
    %c0_i32_0 = arith.constant 0 : i32
    %c0_i32_1 = arith.constant 0 : i32
    return %c0_i32, %c0_i32_0 : i32, i32
  }
  func.func @transform_6(%arg0: i32) -> (i32, i32) {
    %c0_i32 = arith.constant 0 : i32
    %c0_i32_0 = arith.constant 0 : i32
    %c0_i32_1 = arith.constant 0 : i32
    return %c0_i32, %c0_i32_0 : i32, i32
  }
  func.func @transform_7(%arg0: i32) -> (i32, i32) {
    %c0_i32 = arith.constant 0 : i32
    %c0_i32_0 = arith.constant 0 : i32
    %c0_i32_1 = arith.constant 0 : i32
    return %c0_i32, %c0_i32_0 : i32, i32
  }
}

</mosaic_0001>

<bundles_post_ra>
// kernel: tile.18
= control target key start
LH: loop header
LB: loop body
LE: loop exit
PB: predicated region body
PF: predicated region fallthrough
CT: control target
= control target key end

     0   :  { %s64_s0 = inlined_call_operand.vmem [shape: f32[32], index: 0, kind: input, shape index: {}]   ;;  %s65_s1 = inlined_call_operand.vmem [shape: f32[64,32], index: 1, kind: output, shape index: {}]  }
   0x1   :  { %v4_v0 = vld [vmem:[%s64_s0] ss:$0 sm:$0xff] }
   0x2   :  { %5 = vst [vmem:[%s65_s1] sm:$0xff] %v4_v0  ;;  %20 = vst [vmem:[%s65_s1 + $0x8] sm:$0xff] %v4_v0 }
   0x3   :  { %21 = vst [vmem:[%s65_s1 + $0x10] sm:$0xff] %v4_v0  ;;  %22 = vst [vmem:[%s65_s1 + $0x18] sm:$0xff] %v4_v0 }
   0x4   :  { %23 = vst [vmem:[%s65_s1 + $0x20] sm:$0xff] %v4_v0  ;;  %24 = vst [vmem:[%s65_s1 + $0x28] sm:$0xff] %v4_v0 }
   0x5   :  { %25 = vst [vmem:[%s65_s1 + $0x30] sm:$0xff] %v4_v0  ;;  %26 = vst [vmem:[%s65_s1 + $0x38] sm:$0xff] %v4_v0 }

// kernel: tile.19
= control target key start
LH: loop header
LB: loop body
LE: loop exit
PB: predicated region body
PF: predicated region fallthrough
CT: control target
= control target key end

     0   :  { %s195_s10 = smov 64   ;;  %s196_s11 = smov 96   ;;  %vm3_vm0 = vcmask 261120   ;;  %vm17_vm1 = vcmask 1048320   ;;  %vm33_vm2 = vcmask 785920   ;;  %vm49_vm3 = vcmask 523520   ;;  %s280_s0 = inlined_call_operand.vmem [shape: f32[64,32], index: 0, kind: input, shape index: {}]   ;;  %s281_s1 = inlined_call_operand.vmem [shape: f32[1,2048], index: 1, kind: output, shape index: {}]  }
   0x1   :  { %v173_v0 = vld [vmem:[%s280_s0 + $0x2] ss:$4 sm:$0xff]   ;;  %v171_v1 = vld [vmem:[%s280_s0 + $0x3] ss:$4 sm:$0xff]   ;;  %v2_v4 = vld [vmem:[%s280_s0] ss:$4 sm:$0xff]  }
   0x2   :  { %31 = vrot.lane.b32.xlu1 %v173_v0, %s195_s10  ;;  %15 = vrot.lane.b32.xlu0 %v171_v1, %s196_s11  ;;  %v174_v2 = vld [vmem:[%s280_s0 + $0x22] ss:$4 sm:$0xff]   ;;  %v172_v3 = vld [vmem:[%s280_s0 + $0x23] ss:$4 sm:$0xff]  }
   0x3   :  { %v170_v5 = vld [vmem:[%s280_s0 + $0x20] ss:$4 sm:$0xff]   ;;  %4 = vst.msk [vmem:[#allocation0] ss:$8 sm:$0xf] %vm3_vm0, %v2_v4  }
   0x4   :  { %5 = vst.msk [vmem:[#allocation0] ss:$8 sm:$0xf0] %vm3_vm0, %v2_v4   ;;  %10 = vst.msk [vmem:[#allocation0 + $0x40] ss:$8 sm:$0xf] %vm3_vm0, %v170_v5  }
   0x5   :  { %12 = vst.msk [vmem:[#allocation0 + $0x40] ss:$8 sm:$0xf0] %vm3_vm0, %v170_v5   ;;  %v176_v6 = vld [vmem:[%s280_s0 + $0x21] ss:$4 sm:$0xff]  }
   0x6   :  { %38 = vrot.lane.b32.xlu1 %v174_v2, %s195_s10  ;;  %22 = vrot.lane.b32.xlu0 %v172_v3, %s196_s11  ;;  %v175_v7 = vld [vmem:[%s280_s0 + $0x1] ss:$4 sm:$0xff]   ;;  %s197_s0 = smov 32  }
   0xa   :  { %54 = vrot.lane.b32.xlu1 %v176_v6, %s197_s0  ;;  %47 = vrot.lane.b32.xlu0 %v175_v7, %s197_s0 }
  0x74   :  { %v32_v8 = vpop.permute.xlu1 %31   ;;  %v16_v9 = vpop.permute.xlu0 %15  }
  0x75   :  { %18 = vst.msk [vmem:[#allocation0] ss:$8 sm:$0xf] %vm17_vm1, %v16_v9   ;;  %19 = vst.msk [vmem:[#allocation0] ss:$8 sm:$0xf0] %vm17_vm1, %v16_v9  }
  0x76   :  { %34 = vst.msk [vmem:[#allocation0] ss:$8 sm:$0xf] %vm33_vm2, %v32_v8   ;;  %35 = vst.msk [vmem:[#allocation0] ss:$8 sm:$0xf0] %vm33_vm2, %v32_v8  }
  0x78   :  { %v39_v10 = vpop.permute.xlu1 %38   ;;  %v23_v11 = vpop.permute.xlu0 %22  }
  0x79   :  { %26 = vst.msk [vmem:[#allocation0 + $0x40] ss:$8 sm:$0xf] %vm17_vm1, %v23_v11   ;;  %28 = vst.msk [vmem:[#allocation0 + $0x40] ss:$8 sm:$0xf0] %vm17_vm1, %v23_v11  }
  0x7a   :  { %42 = vst.msk [vmem:[#allocation0 + $0x40] ss:$8 sm:$0xf] %vm33_vm2, %v39_v10   ;;  %44 = vst.msk [vmem:[#allocation0 + $0x40] ss:$8 sm:$0xf0] %vm33_vm2, %v39_v10  }
  0x7c   :  { %v55_v12 = vpop.permute.xlu1 %54   ;;  %v48_v13 = vpop.permute.xlu0 %47  }
  0x7d   :  { %58 = vst.msk [vmem:[#allocation0 + $0x40] ss:$8 sm:$0xf] %vm49_vm3, %v55_v12   ;;  %60 = vst.msk [vmem:[#allocation0 + $0x40] ss:$8 sm:$0xf0] %vm49_vm3, %v55_v12  }
  0x7e   :  { %50 = vst.msk [vmem:[#allocation0] ss:$8 sm:$0xf] %vm49_vm3, %v48_v13   ;;  %51 = vst.msk [vmem:[#allocation0] ss:$8 sm:$0xf0] %vm49_vm3, %v48_v13  }
  0x84   :  { %v109_v14 = vld [vmem:[#allocation0 + $0x40] sm:$0x1]  ;;  %v115_v15 = vld [vmem:[#allocation0 + $0x48] sm:$0x1]  ;;  %v121_v16 = vld [vmem:[#allocation0 + $0x50] sm:$0x1] }
  0x85   :  { %184 = vst [vmem:[%s281_s1 + $0x8] sm:$0x1] %v109_v14  ;;  %185 = vst [vmem:[%s281_s1 + $0x9] sm:$0x1] %v115_v15  ;;  %v127_v17 = vld [vmem:[#allocation0 + $0x58] sm:$0x1] }
  0x86   :  { %186 = vst [vmem:[%s281_s1 + $0xa] sm:$0x1] %v121_v16  ;;  %v133_v18 = vld [vmem:[#allocation0 + $0x60] sm:$0x1]  ;;  %v139_v19 = vld [vmem:[#allocation0 + $0x68] sm:$0x1] }
  0x87   :  { %187 = vst [vmem:[%s281_s1 + $0xb] sm:$0x1] %v127_v17  ;;  %188 = vst [vmem:[%s281_s1 + $0xc] sm:$0x1] %v133_v18  ;;  %v145_v20 = vld [vmem:[#allocation0 + $0x70] sm:$0x1] }
  0x88   :  { %189 = vst [vmem:[%s281_s1 + $0xd] sm:$0x1] %v139_v19  ;;  %v151_v21 = vld [vmem:[#allocation0 + $0x78] sm:$0x1]  ;;  %v64_v22 = vld [vmem:[#allocation0] sm:$0x1] }
  0x89   :  { %190 = vst [vmem:[%s281_s1 + $0xe] sm:$0x1] %v145_v20  ;;  %191 = vst [vmem:[%s281_s1 + $0xf] sm:$0x1] %v151_v21  ;;  %v68_v23 = vld [vmem:[#allocation0 + $0x8] sm:$0x1] }
  0x8a   :  { %66 = vst [vmem:[%s281_s1] sm:$0x1] %v64_v22  ;;  %v73_v24 = vld [vmem:[#allocation0 + $0x10] sm:$0x1]  ;;  %v79_v25 = vld [vmem:[#allocation0 + $0x18] sm:$0x1] }
  0x8b   :  { %177 = vst [vmem:[%s281_s1 + $0x1] sm:$0x1] %v68_v23  ;;  %178 = vst [vmem:[%s281_s1 + $0x2] sm:$0x1] %v73_v24  ;;  %v85_v26 = vld [vmem:[#allocation0 + $0x20] sm:$0x1] }
  0x8c   :  { %179 = vst [vmem:[%s281_s1 + $0x3] sm:$0x1] %v79_v25  ;;  %v91_v27 = vld [vmem:[#allocation0 + $0x28] sm:$0x1]  ;;  %v97_v28 = vld [vmem:[#allocation0 + $0x30] sm:$0x1] }
  0x8d   :  { %180 = vst [vmem:[%s281_s1 + $0x4] sm:$0x1] %v85_v26  ;;  %181 = vst [vmem:[%s281_s1 + $0x5] sm:$0x1] %v91_v27  ;;  %v103_v29 = vld [vmem:[#allocation0 + $0x38] sm:$0x1] }
  0x8e   :  { %182 = vst [vmem:[%s281_s1 + $0x6] sm:$0x1] %v97_v28  ;;  %183 = vst [vmem:[%s281_s1 + $0x7] sm:$0x1] %v103_v29 }

// kernel: tile.23
= control target key start
LH: loop header
LB: loop body
LE: loop exit
PB: predicated region body
PF: predicated region fallthrough
CT: control target
= control target key end

     0   :  { %s22_s0 = inlined_call_operand.vmem [shape: f32[16], index: 0, kind: input, shape index: {}]   ;;  %s23_s1 = inlined_call_operand.vmem [shape: f32[4,16], index: 1, kind: output, shape index: {}]  }
   0x1   :  { %v4_v0 = vld [vmem:[%s22_s0] ss:$0 sm:$0xff] }
   0x2   :  { %5 = vst [vmem:[%s23_s1] sm:$0xf] %v4_v0 }

// kernel: tile.24
= control target key start
LH: loop header
LB: loop body
LE: loop exit
PB: predicated region body
PF: predicated region fallthrough
CT: control target
= control target key end

     0   :  { %vm7_vm0 = vcmask 130048   ;;  %s37_s8 = smov 16   ;;  %s38_s9 = smov 32   ;;  %vm13_vm1 = vcmask 523648   ;;  %vm19_vm2 = vcmask 392448   ;;  %vm25_vm3 = vcmask 261248   ;;  %s55_s0 = inlined_call_operand.vmem [shape: f32[4,16], index: 0, kind: input, shape index: {}]   ;;  %s56_s1 = inlined_call_operand.vmem [shape: f32[1,64], index: 1, kind: output, shape index: {}]  }
   0x1   :  { %v4_v0 = vld [vmem:[%s55_s0] sm:$0xf]  ;;  %s36_s0 = smov 48  }
   0x2   :  { %5 = vst [vmem:[#allocation1] sm:$0xf] %v4_v0 }
   0x9   :  { %v10_v1 = vld [vmem:[#allocation1 + $0x3] sm:$0x1]   ;;  %v22_v2 = vld [vmem:[#allocation1 + $0x1] sm:$0x1]   ;;  %v6_v3 = vld [vmem:[#allocation1] sm:$0x1]  }
   0xa   :  { %11 = vrot.lane.b32.xlu0 %v10_v1, %s36_s0  ;;  %23 = vrot.lane.b32.xlu1 %v22_v2, %s37_s8  ;;  %v16_v4 = vld [vmem:[#allocation1 + $0x2] sm:$0x1]   ;;  %8 = vst.msk [vmem:[#allocation0] sm:$0x1] %vm7_vm0, %v6_v3  }
   0xe   :  { %17 = vrot.lane.b32.xlu0 %v16_v4, %s38_s9 }
  0x7c   :  { %v12_v5 = vpop.permute.xlu0 %11   ;;  %v24_v6 = vpop.permute.xlu1 %23  }
  0x7d   :  { %14 = vst.msk [vmem:[#allocation0] sm:$0x1] %vm13_vm1, %v12_v5  }
  0x80   :  { %v18_v7 = vpop.permute.xlu0 %17  }
  0x81   :  { %20 = vst.msk [vmem:[#allocation0] sm:$0x1] %vm19_vm2, %v18_v7  }
  0x82   :  { %26 = vst.msk [vmem:[#allocation0] sm:$0x1] %vm25_vm3, %v24_v6  }
  0x89   :  { %v30_v8 = vld [vmem:[#allocation0] sm:$0x1] }
  0x8a   :  { %32 = vst [vmem:[%s56_s1] sm:$0x1] %v30_v8 }

// kernel: generator_forward.1
= control target key start
LH: loop header
LB: loop body
LE: loop exit
PB: predicated region body
PF: predicated region fallthrough
CT: control target
= control target key end

     0   :  { %v472_v35 = vlaneseq  ;;  %v10919_v36 = vmov 1966171168   ;;  %vm27_vm0 = vcmask 261120   ;;  %vm2294_vm1 = vcmask 254976   ;;  %s10923_s20 = smov 96   ;;  %s10925_s23 = smov 64   ;;  %s14433_s1 = inlined_call_operand.vmem [shape: bf16[256,2048], index: 1, kind: input, shape index: {}]   ;;  %s14434_s0 = inlined_call_operand.vmem [shape: bf16[2,256], index: 0, kind: input, shape index: {}]   ;;  %s14435_s4 = inlined_call_operand.vmem [shape: f32[1,2048], index: 4, kind: input, shape index: {}]   ;;  %s14436_s2 = inlined_call_operand.vmem [shape: bf16[4,32,64], index: 2, kind: input, shape index: {}]   ;;  %s14437_s3 = inlined_call_operand.vmem [shape: bf16[4,64,16], index: 3, kind: input, shape index: {}]   ;;  %s14438_s5 = inlined_call_operand.vmem [shape: f32[1,64], index: 5, kind: input, shape index: {}]   ;;  %s14439_s6 = inlined_call_operand.vmem [shape: f32[1,16], index: 6, kind: input, shape index: {}]   ;;  %s14440_s7 = inlined_call_operand.vmem [shape: f32[512,16], index: 7, kind: output, shape index: {}]  }
   0x1   :  { %v212_v0 = vld [vmem:[%s14433_s1] sm:$0xff]  ;;  %v213_v2 = vld [vmem:[%s14433_s1 + $0x8] sm:$0xff]  ;;  %v562_v37 = vunpack.c.l.s4 %v10919_v36  ;;  %vm10924_vm2 = vmmov 0   ;;  %vm119_vm3 = vcmask 523264   ;;  %vm8282_vm4 = vcmask 130048  }
   0x2   :  { %v220_v1 = vld [vmem:[%s14433_s1 + $0x40] sm:$0xff]  ;;  %v221_v4 = vld [vmem:[%s14433_s1 + $0x48] sm:$0xff]  ;;  %v11038_v46 = vshrl.u32 %v472_v35, 7 }
   0x3   :  { %v8353_v3 = vcombine.high %v212_v0, %v220_v1  ;;  %v8352_v5 = vcombine.low %v212_v0, %v220_v1  ;;  %v228_v6 = vld [vmem:[%s14433_s1 + $0x80] sm:$0xff]  ;;  %v8355_v8 = vcombine.high %v213_v2, %v221_v4  ;;  %v8354_v9 = vcombine.low %v213_v2, %v221_v4  ;;  %v229_v11 = vld [vmem:[%s14433_s1 + $0x88] sm:$0xff] }
   0x4   :  { %v236_v7 = vld [vmem:[%s14433_s1 + $0xc0] sm:$0xff]  ;;  %v237_v12 = vld [vmem:[%s14433_s1 + $0xc8] sm:$0xff]  ;;  %v563_v47 = vunpack.c.0.s8 %v562_v37 }
   0x5   :  { %v8369_v10 = vcombine.high %v228_v6, %v236_v7  ;;  %v244_v13 = vld [vmem:[%s14433_s1 + $0x100] sm:$0xff]  ;;  %1857 = vmatprep.subr.bf16.mxu0 %v8353_v3  ;;  %v8371_v14 = vcombine.high %v229_v11, %v237_v12  ;;  %v245_v16 = vld [vmem:[%s14433_s1 + $0x108] sm:$0xff]  ;;  %1898 = vmatprep.subr.bf16.mxu1 %v8355_v8  ;;  %v8368_v18 = vcombine.low %v228_v6, %v236_v7 }
   0x6   :  { %v252_v15 = vld [vmem:[%s14433_s1 + $0x140] sm:$0xff]  ;;  %v253_v17 = vld [vmem:[%s14433_s1 + $0x148] sm:$0xff]  ;;  %1858 = vmatpush1.bf16.msra.mxu0 %v8352_v5  ;;  %1899 = vmatpush1.bf16.msra.mxu1 %v8354_v9  ;;  %v8370_v19 = vcombine.low %v229_v11, %v237_v12  ;;  %v11053_v56 = vsub.s32 %v563_v47, %v11038_v46 }
   0x7   :  { %1859 = vmatprep.subr.bf16.mxu0 %v8369_v10  ;;  %v8385_v20 = vcombine.high %v244_v13, %v252_v15  ;;  %1900 = vmatprep.subr.bf16.mxu1 %v8371_v14  ;;  %v8387_v21 = vcombine.high %v245_v16, %v253_v17  ;;  %v260_v22 = vld [vmem:[%s14433_s1 + $0x180] sm:$0xff]  ;;  %v261_v24 = vld [vmem:[%s14433_s1 + $0x188] sm:$0xff]  ;;  %v8384_v26 = vcombine.low %v244_v13, %v252_v15 }
   0x8   :  { %v268_v23 = vld [vmem:[%s14433_s1 + $0x1c0] sm:$0xff]  ;;  %v269_v25 = vld [vmem:[%s14433_s1 + $0x1c8] sm:$0xff]  ;;  %v8386_v27 = vcombine.low %v245_v16, %v253_v17 }
   0x9   :  { %v8401_v28 = vcombine.high %v260_v22, %v268_v23  ;;  %v8403_v29 = vcombine.high %v261_v24, %v269_v25  ;;  %v276_v30 = vld [vmem:[%s14433_s1 + $0x200] sm:$0xff]  ;;  %v277_v32 = vld [vmem:[%s14433_s1 + $0x208] sm:$0xff]  ;;  %v8400_v34 = vcombine.low %v260_v22, %v268_v23  ;;  %v8402_v38 = vcombine.low %v261_v24, %v269_v25 }
   0xa   :  { %1860 = vmatpush1.bf16.msra.mxu0 %v8368_v18  ;;  %1901 = vmatpush1.bf16.msra.mxu1 %v8370_v19  ;;  %v284_v31 = vld [vmem:[%s14433_s1 + $0x240] sm:$0xff]  ;;  %v285_v33 = vld [vmem:[%s14433_s1 + $0x248] sm:$0xff] }
   0xb   :  { %1861 = vmatprep.subr.bf16.mxu0 %v8385_v20  ;;  %1902 = vmatprep.subr.bf16.mxu1 %v8387_v21  ;;  %v8417_v39 = vcombine.high %v276_v30, %v284_v31  ;;  %v8419_v40 = vcombine.high %v277_v32, %v285_v33  ;;  %v292_v41 = vld [vmem:[%s14433_s1 + $0x280] sm:$0xff]  ;;  %v293_v43 = vld [vmem:[%s14433_s1 + $0x288] sm:$0xff]  ;;  %v8416_v45 = vcombine.low %v276_v30, %v284_v31 }
   0xc   :  { %v300_v42 = vld [vmem:[%s14433_s1 + $0x2c0] sm:$0xff]  ;;  %v301_v44 = vld [vmem:[%s14433_s1 + $0x2c8] sm:$0xff]  ;;  %v8418_v48 = vcombine.low %v277_v32, %v285_v33 }
   0xd   :  { %v8433_v49 = vcombine.high %v292_v41, %v300_v42  ;;  %v8435_v50 = vcombine.high %v293_v43, %v301_v44  ;;  %v308_v51 = vld [vmem:[%s14433_s1 + $0x300] sm:$0xff]  ;;  %v309_v53 = vld [vmem:[%s14433_s1 + $0x308] sm:$0xff]  ;;  %v8432_v55 = vcombine.low %v292_v41, %v300_v42  ;;  %v8434_v57 = vcombine.low %v293_v43, %v301_v44 }
   0xe   :  { %1862 = vmatpush1.bf16.msra.mxu0 %v8384_v26  ;;  %1903 = vmatpush1.bf16.msra.mxu1 %v8386_v27  ;;  %v316_v52 = vld [vmem:[%s14433_s1 + $0x340] sm:$0xff]  ;;  %v317_v54 = vld [vmem:[%s14433_s1 + $0x348] sm:$0xff] }
   0xf   :  { %1863 = vmatprep.subr.bf16.mxu0 %v8401_v28  ;;  %1904 = vmatprep.subr.bf16.mxu1 %v8403_v29  ;;  %v8449_v58 = vcombine.high %v308_v51, %v316_v52  ;;  %v11058_v59 = vld.sshfl [vmem:[%s14434_s0] sm:$0x11 pattern:$0x75316420]  ;;  %v8451_v60 = vcombine.high %v309_v53, %v317_v54  ;;  %v325_v0 = vld [vmem:[%s14433_s1 + $0x388] sm:$0xff]  ;;  %v8448_v2 = vcombine.low %v308_v51, %v316_v52  ;;  %s10922_s0 = smov 32  }
  0x10   :  { %v324_v61 = vld [vmem:[%s14433_s1 + $0x380] sm:$0xff]  ;;  %v560_v63 = vcombine.high %v11058_v59, %v11058_v59  ;;  %v333_v1 = vld [vmem:[%s14433_s1 + $0x3c8] sm:$0xff]  ;;  %v8450_v4 = vcombine.low %v309_v53, %v317_v54 }
  0x11   :  { %v332_v62 = vld [vmem:[%s14433_s1 + $0x3c0] sm:$0xff]  ;;  %v8467_v6 = vcombine.high %v325_v0, %v333_v1  ;;  %v341_v9 = vld [vmem:[%s14433_s1 + $0x408] sm:$0xff]  ;;  %v8466_v12 = vcombine.low %v325_v0, %v333_v1 }
  0x12   :  { %1864 = vmatpush1.bf16.msra.mxu0 %v8400_v34  ;;  %1905 = vmatpush1.bf16.msra.mxu1 %v8402_v38  ;;  %v11075_v3 = vrot.slane %v560_v63, %v11053_v56  ;;  %v8465_v5 = vcombine.high %v324_v61, %v332_v62  ;;  %v340_v7 = vld [vmem:[%s14433_s1 + $0x400] sm:$0xff]  ;;  %v349_v10 = vld [vmem:[%s14433_s1 + $0x448] sm:$0xff]  ;;  %v8464_v11 = vcombine.low %v324_v61, %v332_v62 }
  0x13   :  { %1865 = vmatprep.subr.bf16.mxu0 %v8417_v39  ;;  %1906 = vmatprep.subr.bf16.mxu1 %v8419_v40  ;;  %v348_v8 = vld [vmem:[%s14433_s1 + $0x440] sm:$0xff]  ;;  %v8483_v14 = vcombine.high %v341_v9, %v349_v10  ;;  %v357_v17 = vld [vmem:[%s14433_s1 + $0x488] sm:$0xff]  ;;  %v8482_v20 = vcombine.low %v341_v9, %v349_v10 }
  0x14   :  { %1889 = vmatprep.mubr.bf16.mxu0 %v11075_v3  ;;  %1930 = vmatprep.mubr.bf16.mxu1 %v11075_v3  ;;  %v8481_v13 = vcombine.high %v340_v7, %v348_v8  ;;  %v356_v15 = vld [vmem:[%s14433_s1 + $0x480] sm:$0xff]  ;;  %v365_v18 = vld [vmem:[%s14433_s1 + $0x4c8] sm:$0xff]  ;;  %v8480_v19 = vcombine.low %v340_v7, %v348_v8 }
  0x15   :  { %v364_v16 = vld [vmem:[%s14433_s1 + $0x4c0] sm:$0xff]  ;;  %v8499_v22 = vcombine.high %v357_v17, %v365_v18  ;;  %v373_v25 = vld [vmem:[%s14433_s1 + $0x508] sm:$0xff]  ;;  %v8498_v28 = vcombine.low %v357_v17, %v365_v18 }
  0x16   :  { %1866 = vmatpush1.bf16.msra.mxu0 %v8416_v45  ;;  %1907 = vmatpush1.bf16.msra.mxu1 %v8418_v48  ;;  %v8497_v21 = vcombine.high %v356_v15, %v364_v16  ;;  %v372_v23 = vld [vmem:[%s14433_s1 + $0x500] sm:$0xff]  ;;  %v381_v26 = vld [vmem:[%s14433_s1 + $0x548] sm:$0xff]  ;;  %v8496_v27 = vcombine.low %v356_v15, %v364_v16 }
  0x17   :  { %1867 = vmatprep.subr.bf16.mxu0 %v8433_v49  ;;  %1908 = vmatprep.subr.bf16.mxu1 %v8435_v50  ;;  %v380_v24 = vld [vmem:[%s14433_s1 + $0x540] sm:$0xff]  ;;  %v8515_v30 = vcombine.high %v373_v25, %v381_v26  ;;  %v389_v33 = vld [vmem:[%s14433_s1 + $0x588] sm:$0xff]  ;;  %v8514_v36 = vcombine.low %v373_v25, %v381_v26 }
  0x18   :  { %v8513_v29 = vcombine.high %v372_v23, %v380_v24  ;;  %v388_v31 = vld [vmem:[%s14433_s1 + $0x580] sm:$0xff]  ;;  %v397_v34 = vld [vmem:[%s14433_s1 + $0x5c8] sm:$0xff]  ;;  %v8512_v35 = vcombine.low %v372_v23, %v380_v24  ;;  %v239_v23 = vld [vmem:[%s14433_s1 + $0xd8] sm:$0xff] }
  0x19   :  { %v396_v32 = vld [vmem:[%s14433_s1 + $0x5c0] sm:$0xff]  ;;  %v8531_v38 = vcombine.high %v389_v33, %v397_v34  ;;  %v405_v41 = vld [vmem:[%s14433_s1 + $0x608] sm:$0xff]  ;;  %v8530_v44 = vcombine.low %v389_v33, %v397_v34  ;;  %v262_v34 = vld [vmem:[%s14433_s1 + $0x190] sm:$0xff] }
  0x1a   :  { %1868 = vmatpush1.bf16.msra.mxu0 %v8432_v55  ;;  %1909 = vmatpush1.bf16.msra.mxu1 %v8434_v57  ;;  %v8529_v37 = vcombine.high %v388_v31, %v396_v32  ;;  %v404_v39 = vld [vmem:[%s14433_s1 + $0x600] sm:$0xff]  ;;  %v413_v42 = vld [vmem:[%s14433_s1 + $0x648] sm:$0xff]  ;;  %v8528_v43 = vcombine.low %v388_v31, %v396_v32 }
  0x1b   :  { %1869 = vmatprep.subr.bf16.mxu0 %v8449_v58  ;;  %1910 = vmatprep.subr.bf16.mxu1 %v8451_v60  ;;  %v412_v40 = vld [vmem:[%s14433_s1 + $0x640] sm:$0xff]  ;;  %v8547_v47 = vcombine.high %v405_v41, %v413_v42  ;;  %v421_v50 = vld [vmem:[%s14433_s1 + $0x688] sm:$0xff]  ;;  %v8546_v53 = vcombine.low %v405_v41, %v413_v42  ;;  %v278_v42 = vld [vmem:[%s14433_s1 + $0x210] sm:$0xff] }
  0x1c   :  { %v8545_v45 = vcombine.high %v404_v39, %v412_v40  ;;  %v420_v48 = vld [vmem:[%s14433_s1 + $0x680] sm:$0xff]  ;;  %v429_v51 = vld [vmem:[%s14433_s1 + $0x6c8] sm:$0xff]  ;;  %v8544_v52 = vcombine.low %v404_v39, %v412_v40 }
  0x1d   :  { %v428_v49 = vld [vmem:[%s14433_s1 + $0x6c0] sm:$0xff]  ;;  %v8563_v55 = vcombine.high %v421_v50, %v429_v51  ;;  %v437_v60 = vld [vmem:[%s14433_s1 + $0x708] sm:$0xff]  ;;  %v8562_v63 = vcombine.low %v421_v50, %v429_v51  ;;  %v294_v51 = vld [vmem:[%s14433_s1 + $0x290] sm:$0xff] }
  0x1e   :  { %1870 = vmatpush1.bf16.msra.mxu0 %v8448_v2  ;;  %1911 = vmatpush1.bf16.msra.mxu1 %v8450_v4  ;;  %v8561_v54 = vcombine.high %v420_v48, %v428_v49  ;;  %v436_v57 = vld [vmem:[%s14433_s1 + $0x700] sm:$0xff]  ;;  %v445_v61 = vld [vmem:[%s14433_s1 + $0x748] sm:$0xff]  ;;  %v8560_v62 = vcombine.low %v420_v48, %v428_v49 }
  0x1f   :  { %1871 = vmatprep.subr.bf16.mxu0 %v8465_v5  ;;  %1912 = vmatprep.subr.bf16.mxu1 %v8467_v6  ;;  %v444_v58 = vld [vmem:[%s14433_s1 + $0x740] sm:$0xff]  ;;  %v8579_v1 = vcombine.high %v437_v60, %v445_v61  ;;  %v453_v5 = vld [vmem:[%s14433_s1 + $0x788] sm:$0xff]  ;;  %v8578_v8 = vcombine.low %v437_v60, %v445_v61  ;;  %v310_v61 = vld [vmem:[%s14433_s1 + $0x310] sm:$0xff] }
  0x20   :  { %v8577_v0 = vcombine.high %v436_v57, %v444_v58  ;;  %v452_v2 = vld [vmem:[%s14433_s1 + $0x780] sm:$0xff]  ;;  %v461_v6 = vld [vmem:[%s14433_s1 + $0x7c8] sm:$0xff]  ;;  %v8576_v7 = vcombine.low %v436_v57, %v444_v58 }
  0x21   :  { %v460_v4 = vld [vmem:[%s14433_s1 + $0x7c0] sm:$0xff]  ;;  %v8595_v10 = vcombine.high %v453_v5, %v461_v6  ;;  %v8594_v16 = vcombine.low %v453_v5, %v461_v6  ;;  %v326_v6 = vld [vmem:[%s14433_s1 + $0x390] sm:$0xff] }
  0x22   :  { %1872 = vmatpush1.bf16.msra.mxu0 %v8464_v11  ;;  %1913 = vmatpush1.bf16.msra.mxu1 %v8466_v12  ;;  %v8593_v9 = vcombine.high %v452_v2, %v460_v4  ;;  %v214_v11 = vld [vmem:[%s14433_s1 + $0x10] sm:$0xff]  ;;  %v8592_v15 = vcombine.low %v452_v2, %v460_v4 }
  0x23   :  { %1873 = vmatprep.subr.bf16.mxu0 %v8481_v13  ;;  %1914 = vmatprep.subr.bf16.mxu1 %v8483_v14  ;;  %v222_v12 = vld [vmem:[%s14433_s1 + $0x50] sm:$0xff]  ;;  %v215_v13 = vld [vmem:[%s14433_s1 + $0x18] sm:$0xff] }
  0x24   :  { %v223_v14 = vld [vmem:[%s14433_s1 + $0x58] sm:$0xff]  ;;  %v8357_v17 = vcombine.high %v214_v11, %v222_v12  ;;  %v8356_v24 = vcombine.low %v214_v11, %v222_v12 }
  0x25   :  { %v8359_v18 = vcombine.high %v215_v13, %v223_v14  ;;  %v8358_v25 = vcombine.low %v215_v13, %v223_v14  ;;  %v342_v14 = vld [vmem:[%s14433_s1 + $0x410] sm:$0xff] }
  0x26   :  { %1874 = vmatpush1.bf16.msra.mxu0 %v8480_v19  ;;  %1915 = vmatpush1.bf16.msra.mxu1 %v8482_v20  ;;  %v230_v19 = vld [vmem:[%s14433_s1 + $0x90] sm:$0xff] }
  0x27   :  { %1875 = vmatprep.subr.bf16.mxu0 %v8497_v21  ;;  %1916 = vmatprep.subr.bf16.mxu1 %v8499_v22  ;;  %v238_v20 = vld [vmem:[%s14433_s1 + $0xd0] sm:$0xff]  ;;  %v11195_v21 = vrot.slane %v11058_v59, %v11053_v56  ;;  %v231_v22 = vld [vmem:[%s14433_s1 + $0x98] sm:$0xff] }
  0x28   :  { %v8373_v26 = vcombine.high %v230_v19, %v238_v20  ;;  %v246_v56 = vld [vmem:[%s14433_s1 + $0x110] sm:$0xff]  ;;  %v8374_v31 = vcombine.low %v231_v22, %v239_v23 }
  0x29   :  { %v254_v59 = vld [vmem:[%s14433_s1 + $0x150] sm:$0xff] }
  0x2a   :  { %1876 = vmatpush1.bf16.msra.mxu0 %v8496_v27  ;;  %1917 = vmatpush1.bf16.msra.mxu1 %v8498_v28  ;;  %v8375_v27 = vcombine.high %v231_v22, %v239_v23  ;;  %v247_v28 = vld [vmem:[%s14433_s1 + $0x118] sm:$0xff]  ;;  %v8389_v32 = vcombine.high %v246_v56, %v254_v59  ;;  %v358_v23 = vld [vmem:[%s14433_s1 + $0x490] sm:$0xff] }
  0x2b   :  { %1877 = vmatprep.subr.bf16.mxu0 %v8513_v29  ;;  %1918 = vmatprep.subr.bf16.mxu1 %v8515_v30  ;;  %v255_v29 = vld [vmem:[%s14433_s1 + $0x158] sm:$0xff]  ;;  %v8372_v30 = vcombine.low %v230_v19, %v238_v20 }
  0x2c   :  { %v8391_v33 = vcombine.high %v247_v28, %v255_v29  ;;  %v8390_v39 = vcombine.low %v247_v28, %v255_v29  ;;  %v374_v29 = vld [vmem:[%s14433_s1 + $0x510] sm:$0xff] }
  0x2e   :  { %1878 = vmatpush1.bf16.msra.mxu0 %v8512_v35  ;;  %1919 = vmatpush1.bf16.msra.mxu1 %v8514_v36  ;;  %v270_v35 = vld [vmem:[%s14433_s1 + $0x1d0] sm:$0xff]  ;;  %v263_v36 = vld [vmem:[%s14433_s1 + $0x198] sm:$0xff] }
  0x2f   :  { %1879 = vmatprep.subr.bf16.mxu0 %v8529_v37  ;;  %1920 = vmatprep.subr.bf16.mxu1 %v8531_v38  ;;  %v271_v37 = vld [vmem:[%s14433_s1 + $0x1d8] sm:$0xff]  ;;  %v8388_v38 = vcombine.low %v246_v56, %v254_v59  ;;  %v8405_v40 = vcombine.high %v262_v34, %v270_v35 }
  0x30   :  { %v8407_v41 = vcombine.high %v263_v36, %v271_v37  ;;  %v8406_v48 = vcombine.low %v263_v36, %v271_v37  ;;  %v390_v37 = vld [vmem:[%s14433_s1 + $0x590] sm:$0xff] }
  0x32   :  { %1880 = vmatpush1.bf16.msra.mxu0 %v8528_v43  ;;  %1921 = vmatpush1.bf16.msra.mxu1 %v8530_v44  ;;  %v286_v43 = vld [vmem:[%s14433_s1 + $0x250] sm:$0xff]  ;;  %v279_v44 = vld [vmem:[%s14433_s1 + $0x218] sm:$0xff] }
  0x33   :  { %1881 = vmatprep.subr.bf16.mxu0 %v8545_v45  ;;  %1922 = vmatprep.subr.bf16.mxu1 %v8547_v47  ;;  %v287_v45 = vld [vmem:[%s14433_s1 + $0x258] sm:$0xff]  ;;  %v8404_v47 = vcombine.low %v262_v34, %v270_v35  ;;  %v8421_v49 = vcombine.high %v278_v42, %v286_v43 }
  0x34   :  { %v8423_v50 = vcombine.high %v279_v44, %v287_v45  ;;  %v8422_v57 = vcombine.low %v279_v44, %v287_v45  ;;  %v406_v45 = vld [vmem:[%s14433_s1 + $0x610] sm:$0xff] }
  0x36   :  { %1882 = vmatpush1.bf16.msra.mxu0 %v8544_v52  ;;  %1923 = vmatpush1.bf16.msra.mxu1 %v8546_v53  ;;  %v302_v52 = vld [vmem:[%s14433_s1 + $0x2d0] sm:$0xff]  ;;  %v295_v53 = vld [vmem:[%s14433_s1 + $0x298] sm:$0xff] }
  0x37   :  { %1883 = vmatprep.subr.bf16.mxu0 %v8561_v54  ;;  %1924 = vmatprep.subr.bf16.mxu1 %v8563_v55  ;;  %v303_v54 = vld [vmem:[%s14433_s1 + $0x2d8] sm:$0xff]  ;;  %v8420_v55 = vcombine.low %v278_v42, %v286_v43  ;;  %v8437_v58 = vcombine.high %v294_v51, %v302_v52 }
  0x38   :  { %v8439_v60 = vcombine.high %v295_v53, %v303_v54  ;;  %v8438_v2 = vcombine.low %v295_v53, %v303_v54  ;;  %v422_v54 = vld [vmem:[%s14433_s1 + $0x690] sm:$0xff] }
  0x3a   :  { %1884 = vmatpush1.bf16.msra.mxu0 %v8560_v62  ;;  %1925 = vmatpush1.bf16.msra.mxu1 %v8562_v63  ;;  %v318_v62 = vld [vmem:[%s14433_s1 + $0x350] sm:$0xff]  ;;  %v311_v63 = vld [vmem:[%s14433_s1 + $0x318] sm:$0xff] }
  0x3b   :  { %1885 = vmatprep.subr.bf16.mxu0 %v8577_v0  ;;  %1926 = vmatprep.subr.bf16.mxu1 %v8579_v1  ;;  %v319_v0 = vld [vmem:[%s14433_s1 + $0x358] sm:$0xff]  ;;  %v8436_v1 = vcombine.low %v294_v51, %v302_v52  ;;  %v8453_v4 = vcombine.high %v310_v61, %v318_v62 }
  0x3c   :  { %v8455_v5 = vcombine.high %v311_v63, %v319_v0  ;;  %v8454_v11 = vcombine.low %v311_v63, %v319_v0  ;;  %v438_v0 = vld [vmem:[%s14433_s1 + $0x710] sm:$0xff] }
  0x3e   :  { %1886 = vmatpush1.bf16.msra.mxu0 %v8576_v7  ;;  %1927 = vmatpush1.bf16.msra.mxu1 %v8578_v8  ;;  %v334_v7 = vld [vmem:[%s14433_s1 + $0x3d0] sm:$0xff]  ;;  %v327_v8 = vld [vmem:[%s14433_s1 + $0x398] sm:$0xff] }
  0x3f   :  { %1887 = vmatprep.subr.bf16.mxu0 %v8593_v9  ;;  %1928 = vmatprep.subr.bf16.mxu1 %v8595_v10  ;;  %v335_v9 = vld [vmem:[%s14433_s1 + $0x3d8] sm:$0xff]  ;;  %v8452_v10 = vcombine.low %v310_v61, %v318_v62  ;;  %v8469_v12 = vcombine.high %v326_v6, %v334_v7 }
  0x40   :  { %v8471_v13 = vcombine.high %v327_v8, %v335_v9  ;;  %v8470_v19 = vcombine.low %v327_v8, %v335_v9  ;;  %v454_v9 = vld [vmem:[%s14433_s1 + $0x790] sm:$0xff] }
  0x42   :  { %1888 = vmatpush1.bf16.msra.mxu0 %v8592_v15  ;;  %1929 = vmatpush1.bf16.msra.mxu1 %v8594_v16  ;;  %v350_v15 = vld [vmem:[%s14433_s1 + $0x450] sm:$0xff]  ;;  %v343_v16 = vld [vmem:[%s14433_s1 + $0x418] sm:$0xff] }
  0x43   :  { %1939 = vmatprep.subr.bf16.mxu0 %v8357_v17  ;;  %1980 = vmatprep.subr.bf16.mxu1 %v8359_v18  ;;  %v351_v17 = vld [vmem:[%s14433_s1 + $0x458] sm:$0xff]  ;;  %v8468_v18 = vcombine.low %v326_v6, %v334_v7  ;;  %v8485_v20 = vcombine.high %v342_v14, %v350_v15 }
  0x44   :  { %v8487_v22 = vcombine.high %v343_v16, %v351_v17  ;;  %v8486_v56 = vcombine.low %v343_v16, %v351_v17  ;;  %v216_v17 = vld [vmem:[%s14433_s1 + $0x20] sm:$0xff] }
  0x45   :  { %1890 = vmatmul.mubr.bf16.vlgmr.msra.gmra.mrb[0].mxu0 %v11195_v21  ;;  %1931 = vmatmul.mubr.bf16.vlgmr.msra.gmra.mrb[0].mxu1 %v11195_v21 }
  0x46   :  { %1940 = vmatpush1.bf16.msra.mxu0 %v8356_v24  ;;  %1981 = vmatpush1.bf16.msra.mxu1 %v8358_v25  ;;  %v366_v24 = vld [vmem:[%s14433_s1 + $0x4d0] sm:$0xff]  ;;  %v359_v25 = vld [vmem:[%s14433_s1 + $0x498] sm:$0xff] }
  0x47   :  { %1941 = vmatprep.subr.bf16.mxu0 %v8373_v26  ;;  %1982 = vmatprep.subr.bf16.mxu1 %v8375_v27  ;;  %v367_v26 = vld [vmem:[%s14433_s1 + $0x4d8] sm:$0xff]  ;;  %v8484_v27 = vcombine.low %v342_v14, %v350_v15  ;;  %v8501_v59 = vcombine.high %v358_v23, %v366_v24 }
  0x48   :  { %1971 = vmatprep.mubr.bf16.mxu0 %v11075_v3  ;;  %2012 = vmatprep.mubr.bf16.mxu1 %v11075_v3  ;;  %v8503_v28 = vcombine.high %v359_v25, %v367_v26  ;;  %v8502_v34 = vcombine.low %v359_v25, %v367_v26  ;;  %v232_v26 = vld [vmem:[%s14433_s1 + $0xa0] sm:$0xff] }
  0x4a   :  { %1942 = vmatpush1.bf16.msra.mxu0 %v8372_v30  ;;  %1983 = vmatpush1.bf16.msra.mxu1 %v8374_v31  ;;  %v382_v30 = vld [vmem:[%s14433_s1 + $0x550] sm:$0xff]  ;;  %v375_v31 = vld [vmem:[%s14433_s1 + $0x518] sm:$0xff] }
  0x4b   :  { %1943 = vmatprep.subr.bf16.mxu0 %v8389_v32  ;;  %1984 = vmatprep.subr.bf16.mxu1 %v8391_v33  ;;  %v383_v32 = vld [vmem:[%s14433_s1 + $0x558] sm:$0xff]  ;;  %v8500_v33 = vcombine.low %v358_v23, %v366_v24  ;;  %v8517_v35 = vcombine.high %v374_v29, %v382_v30 }
  0x4c   :  { %v8519_v36 = vcombine.high %v375_v31, %v383_v32  ;;  %v8518_v42 = vcombine.low %v375_v31, %v383_v32  ;;  %v248_v32 = vld [vmem:[%s14433_s1 + $0x120] sm:$0xff] }
  0x4e   :  { %1944 = vmatpush1.bf16.msra.mxu0 %v8388_v38  ;;  %1985 = vmatpush1.bf16.msra.mxu1 %v8390_v39  ;;  %v398_v38 = vld [vmem:[%s14433_s1 + $0x5d0] sm:$0xff]  ;;  %v391_v39 = vld [vmem:[%s14433_s1 + $0x598] sm:$0xff] }
  0x4f   :  { %1945 = vmatprep.subr.bf16.mxu0 %v8405_v40  ;;  %1986 = vmatprep.subr.bf16.mxu1 %v8407_v41  ;;  %v399_v40 = vld [vmem:[%s14433_s1 + $0x5d8] sm:$0xff]  ;;  %v8516_v41 = vcombine.low %v374_v29, %v382_v30  ;;  %v8533_v43 = vcombine.high %v390_v37, %v398_v38 }
  0x50   :  { %v8535_v44 = vcombine.high %v391_v39, %v399_v40  ;;  %v8534_v51 = vcombine.low %v391_v39, %v399_v40  ;;  %v264_v40 = vld [vmem:[%s14433_s1 + $0x1a0] sm:$0xff] }
  0x52   :  { %1946 = vmatpush1.bf16.msra.mxu0 %v8404_v47  ;;  %1987 = vmatpush1.bf16.msra.mxu1 %v8406_v48  ;;  %v414_v47 = vld [vmem:[%s14433_s1 + $0x650] sm:$0xff]  ;;  %v407_v48 = vld [vmem:[%s14433_s1 + $0x618] sm:$0xff] }
  0x53   :  { %1947 = vmatprep.subr.bf16.mxu0 %v8421_v49  ;;  %1988 = vmatprep.subr.bf16.mxu1 %v8423_v50  ;;  %v415_v49 = vld [vmem:[%s14433_s1 + $0x658] sm:$0xff]  ;;  %v8532_v50 = vcombine.low %v390_v37, %v398_v38  ;;  %v8549_v52 = vcombine.high %v406_v45, %v414_v47 }
  0x54   :  { %v8551_v53 = vcombine.high %v407_v48, %v415_v49  ;;  %v8550_v61 = vcombine.low %v407_v48, %v415_v49  ;;  %v280_v49 = vld [vmem:[%s14433_s1 + $0x220] sm:$0xff] }
  0x56   :  { %1948 = vmatpush1.bf16.msra.mxu0 %v8420_v55  ;;  %1989 = vmatpush1.bf16.msra.mxu1 %v8422_v57  ;;  %v430_v55 = vld [vmem:[%s14433_s1 + $0x6d0] sm:$0xff]  ;;  %v423_v57 = vld [vmem:[%s14433_s1 + $0x698] sm:$0xff] }
  0x57   :  { %1949 = vmatprep.subr.bf16.mxu0 %v8437_v58  ;;  %1990 = vmatprep.subr.bf16.mxu1 %v8439_v60  ;;  %v431_v58 = vld [vmem:[%s14433_s1 + $0x6d8] sm:$0xff]  ;;  %v8548_v60 = vcombine.low %v406_v45, %v414_v47  ;;  %v8565_v62 = vcombine.high %v422_v54, %v430_v55 }
  0x58   :  { %v8567_v63 = vcombine.high %v423_v57, %v431_v58  ;;  %v8566_v6 = vcombine.low %v423_v57, %v431_v58  ;;  %v296_v58 = vld [vmem:[%s14433_s1 + $0x2a0] sm:$0xff] }
  0x5a   :  { %1950 = vmatpush1.bf16.msra.mxu0 %v8436_v1  ;;  %1991 = vmatpush1.bf16.msra.mxu1 %v8438_v2  ;;  %v446_v1 = vld [vmem:[%s14433_s1 + $0x750] sm:$0xff]  ;;  %v439_v2 = vld [vmem:[%s14433_s1 + $0x718] sm:$0xff] }
  0x5b   :  { %1951 = vmatprep.subr.bf16.mxu0 %v8453_v4  ;;  %1992 = vmatprep.subr.bf16.mxu1 %v8455_v5  ;;  %v447_v4 = vld [vmem:[%s14433_s1 + $0x758] sm:$0xff]  ;;  %v8564_v5 = vcombine.low %v422_v54, %v430_v55  ;;  %v8581_v7 = vcombine.high %v438_v0, %v446_v1 }
  0x5c   :  { %v8583_v8 = vcombine.high %v439_v2, %v447_v4  ;;  %v8582_v14 = vcombine.low %v439_v2, %v447_v4  ;;  %v312_v4 = vld [vmem:[%s14433_s1 + $0x320] sm:$0xff] }
  0x5e   :  { %1952 = vmatpush1.bf16.msra.mxu0 %v8452_v10  ;;  %1993 = vmatpush1.bf16.msra.mxu1 %v8454_v11  ;;  %v462_v10 = vld [vmem:[%s14433_s1 + $0x7d0] sm:$0xff]  ;;  %v455_v11 = vld [vmem:[%s14433_s1 + $0x798] sm:$0xff] }
  0x5f   :  { %1953 = vmatprep.subr.bf16.mxu0 %v8469_v12  ;;  %1994 = vmatprep.subr.bf16.mxu1 %v8471_v13  ;;  %v463_v12 = vld [vmem:[%s14433_s1 + $0x7d8] sm:$0xff]  ;;  %v8580_v13 = vcombine.low %v438_v0, %v446_v1  ;;  %v8597_v15 = vcombine.high %v454_v9, %v462_v10 }
  0x60   :  { %v8599_v16 = vcombine.high %v455_v11, %v463_v12  ;;  %v8598_v23 = vcombine.low %v455_v11, %v463_v12  ;;  %v11466_v12 = vld [vmem:[%s14433_s1 + $0x3a0] sm:$0xff] }
  0x62   :  { %1954 = vmatpush1.bf16.msra.mxu0 %v8468_v18  ;;  %1995 = vmatpush1.bf16.msra.mxu1 %v8470_v19  ;;  %v224_v18 = vld [vmem:[%s14433_s1 + $0x60] sm:$0xff]  ;;  %v217_v19 = vld [vmem:[%s14433_s1 + $0x28] sm:$0xff] }
  0x63   :  { %1955 = vmatprep.subr.bf16.mxu0 %v8485_v20  ;;  %1996 = vmatprep.subr.bf16.mxu1 %v8487_v22  ;;  %v225_v20 = vld [vmem:[%s14433_s1 + $0x68] sm:$0xff]  ;;  %v8596_v22 = vcombine.low %v454_v9, %v462_v10  ;;  %v8361_v24 = vcombine.high %v216_v17, %v224_v18 }
  0x64   :  { %v8363_v25 = vcombine.high %v217_v19, %v225_v20  ;;  %v8362_v29 = vcombine.low %v217_v19, %v225_v20  ;;  %v11490_v20 = vld [vmem:[%s14433_s1 + $0x420] sm:$0xff] }
  0x66   :  { %1956 = vmatpush1.bf16.msra.mxu0 %v8484_v27  ;;  %1997 = vmatpush1.bf16.msra.mxu1 %v8486_v56  ;;  %v240_v27 = vld [vmem:[%s14433_s1 + $0xe0] sm:$0xff]  ;;  %v233_v56 = vld [vmem:[%s14433_s1 + $0xa8] sm:$0xff] }
  0x67   :  { %1957 = vmatprep.subr.bf16.mxu0 %v8501_v59  ;;  %1998 = vmatprep.subr.bf16.mxu1 %v8503_v28  ;;  %v241_v59 = vld [vmem:[%s14433_s1 + $0xe8] sm:$0xff]  ;;  %v8360_v28 = vcombine.low %v216_v17, %v224_v18  ;;  %v8377_v30 = vcombine.high %v232_v26, %v240_v27 }
  0x68   :  { %v8379_v31 = vcombine.high %v233_v56, %v241_v59  ;;  %v8378_v37 = vcombine.low %v233_v56, %v241_v59  ;;  %v11518_v59 = vld [vmem:[%s14433_s1 + $0x4a0] sm:$0xff] }
  0x6a   :  { %1958 = vmatpush1.bf16.msra.mxu0 %v8500_v33  ;;  %1999 = vmatpush1.bf16.msra.mxu1 %v8502_v34  ;;  %v256_v33 = vld [vmem:[%s14433_s1 + $0x160] sm:$0xff]  ;;  %v249_v34 = vld [vmem:[%s14433_s1 + $0x128] sm:$0xff] }
  0x6b   :  { %1959 = vmatprep.subr.bf16.mxu0 %v8517_v35  ;;  %2000 = vmatprep.subr.bf16.mxu1 %v8519_v36  ;;  %v257_v35 = vld [vmem:[%s14433_s1 + $0x168] sm:$0xff]  ;;  %v8376_v36 = vcombine.low %v232_v26, %v240_v27  ;;  %v8393_v38 = vcombine.high %v248_v32, %v256_v33 }
  0x6c   :  { %v8395_v39 = vcombine.high %v249_v34, %v257_v35  ;;  %v8394_v45 = vcombine.low %v249_v34, %v257_v35 }
  0x6e   :  { %1960 = vmatpush1.bf16.msra.mxu0 %v8516_v41  ;;  %2001 = vmatpush1.bf16.msra.mxu1 %v8518_v42  ;;  %v272_v41 = vld [vmem:[%s14433_s1 + $0x1e0] sm:$0xff]  ;;  %v265_v42 = vld [vmem:[%s14433_s1 + $0x1a8] sm:$0xff] }
  0x6f   :  { %1961 = vmatprep.subr.bf16.mxu0 %v8533_v43  ;;  %2002 = vmatprep.subr.bf16.mxu1 %v8535_v44  ;;  %v273_v43 = vld [vmem:[%s14433_s1 + $0x1e8] sm:$0xff]  ;;  %v8392_v44 = vcombine.low %v248_v32, %v256_v33  ;;  %v8409_v47 = vcombine.high %v264_v40, %v272_v41 }
  0x70   :  { %v8411_v48 = vcombine.high %v265_v42, %v273_v43  ;;  %v8410_v54 = vcombine.low %v265_v42, %v273_v43 }
  0x72   :  { %1962 = vmatpush1.bf16.msra.mxu0 %v8532_v50  ;;  %2003 = vmatpush1.bf16.msra.mxu1 %v8534_v51  ;;  %v288_v50 = vld [vmem:[%s14433_s1 + $0x260] sm:$0xff]  ;;  %v281_v51 = vld [vmem:[%s14433_s1 + $0x228] sm:$0xff] }
  0x73   :  { %1963 = vmatprep.subr.bf16.mxu0 %v8549_v52  ;;  %2004 = vmatprep.subr.bf16.mxu1 %v8551_v53  ;;  %v289_v52 = vld [vmem:[%s14433_s1 + $0x268] sm:$0xff]  ;;  %v8408_v53 = vcombine.low %v264_v40, %v272_v41  ;;  %v8425_v55 = vcombine.high %v280_v49, %v288_v50 }
  0x74   :  { %v8427_v57 = vcombine.high %v281_v51, %v289_v52  ;;  %v8426_v0 = vcombine.low %v281_v51, %v289_v52 }
  0x76   :  { %1964 = vmatpush1.bf16.msra.mxu0 %v8548_v60  ;;  %2005 = vmatpush1.bf16.msra.mxu1 %v8550_v61  ;;  %v304_v60 = vld [vmem:[%s14433_s1 + $0x2e0] sm:$0xff]  ;;  %v297_v61 = vld [vmem:[%s14433_s1 + $0x2a8] sm:$0xff] }
  0x77   :  { %1965 = vmatprep.subr.bf16.mxu0 %v8565_v62  ;;  %2006 = vmatprep.subr.bf16.mxu1 %v8567_v63  ;;  %v305_v62 = vld [vmem:[%s14433_s1 + $0x2e8] sm:$0xff]  ;;  %v8424_v63 = vcombine.low %v280_v49, %v288_v50  ;;  %v8441_v1 = vcombine.high %v296_v58, %v304_v60 }
  0x78   :  { %v8443_v2 = vcombine.high %v297_v61, %v305_v62  ;;  %v8442_v9 = vcombine.low %v297_v61, %v305_v62 }
  0x7a   :  { %1966 = vmatpush1.bf16.msra.mxu0 %v8564_v5  ;;  %2007 = vmatpush1.bf16.msra.mxu1 %v8566_v6  ;;  %v320_v5 = vld [vmem:[%s14433_s1 + $0x360] sm:$0xff]  ;;  %v313_v6 = vld [vmem:[%s14433_s1 + $0x328] sm:$0xff] }
  0x7b   :  { %1967 = vmatprep.subr.bf16.mxu0 %v8581_v7  ;;  %2008 = vmatprep.subr.bf16.mxu1 %v8583_v8  ;;  %v321_v7 = vld [vmem:[%s14433_s1 + $0x368] sm:$0xff]  ;;  %v8440_v8 = vcombine.low %v296_v58, %v304_v60  ;;  %v8457_v10 = vcombine.high %v312_v4, %v320_v5 }
  0x7c   :  { %v8459_v11 = vcombine.high %v313_v6, %v321_v7  ;;  %v8458_v17 = vcombine.low %v313_v6, %v321_v7 }
  0x7e   :  { %1968 = vmatpush1.bf16.msra.mxu0 %v8580_v13  ;;  %2009 = vmatpush1.bf16.msra.mxu1 %v8582_v14  ;;  %v11471_v13 = vld [vmem:[%s14433_s1 + $0x3e0] sm:$0xff]  ;;  %v11476_v14 = vld [vmem:[%s14433_s1 + $0x3a8] sm:$0xff] }
  0x7f   :  { %1969 = vmatprep.subr.bf16.mxu0 %v8597_v15  ;;  %2010 = vmatprep.subr.bf16.mxu1 %v8599_v16  ;;  %v11481_v15 = vld [vmem:[%s14433_s1 + $0x3e8] sm:$0xff]  ;;  %v8456_v16 = vcombine.low %v312_v4, %v320_v5  ;;  %v8473_v18 = vcombine.high %v11466_v12, %v11471_v13 }
  0x80   :  { %v8475_v19 = vcombine.high %v11476_v14, %v11481_v15  ;;  %v8474_v26 = vcombine.low %v11476_v14, %v11481_v15 }
  0x82   :  { %1970 = vmatpush1.bf16.msra.mxu0 %v8596_v22  ;;  %2011 = vmatpush1.bf16.msra.mxu1 %v8598_v23  ;;  %v11495_v22 = vld [vmem:[%s14433_s1 + $0x460] sm:$0xff]  ;;  %v11500_v23 = vld [vmem:[%s14433_s1 + $0x428] sm:$0xff] }
  0x83   :  { %2021 = vmatprep.subr.bf16.mxu0 %v8361_v24  ;;  %2062 = vmatprep.subr.bf16.mxu1 %v8363_v25  ;;  %v11505_v24 = vld [vmem:[%s14433_s1 + $0x468] sm:$0xff]  ;;  %v8472_v25 = vcombine.low %v11466_v12, %v11471_v13  ;;  %v8489_v27 = vcombine.high %v11490_v20, %v11495_v22  ;;  %v8488_v32 = vcombine.low %v11490_v20, %v11495_v22 }
  0x84   :  { %v8491_v56 = vcombine.high %v11500_v23, %v11505_v24  ;;  %v8490_v33 = vcombine.low %v11500_v23, %v11505_v24 }
  0x85   :  { %1972 = vmatmul.mubr.bf16.vlgmr.msra.gmra.mrb[4].mxu0 %v11195_v21  ;;  %2013 = vmatmul.mubr.bf16.vlgmr.msra.gmra.mrb[4].mxu1 %v11195_v21 }
  0x86   :  { %2022 = vmatpush1.bf16.msra.mxu0 %v8360_v28  ;;  %2063 = vmatpush1.bf16.msra.mxu1 %v8362_v29  ;;  %v11523_v28 = vld [vmem:[%s14433_s1 + $0x4e0] sm:$0xff]  ;;  %v11528_v29 = vld [vmem:[%s14433_s1 + $0x4a8] sm:$0xff] }
  0x87   :  { %2023 = vmatprep.subr.bf16.mxu0 %v8377_v30  ;;  %2064 = vmatprep.subr.bf16.mxu1 %v8379_v31  ;;  %v11533_v30 = vld [vmem:[%s14433_s1 + $0x4e8] sm:$0xff]  ;;  %v14441_v31 = vmov 0.0   ;;  %v8505_v34 = vcombine.high %v11518_v59, %v11523_v28  ;;  %v8504_v40 = vcombine.low %v11518_v59, %v11523_v28 }
  0x88   :  { %2053 = vmatprep.mubr.bf16.mxu0 %v11075_v3  ;;  %2094 = vmatprep.mubr.bf16.mxu1 %v11075_v3  ;;  %28 = vst.msk [vmem:[#allocation3] sm:$0xff] %vm27_vm0, %v14441_v31  ;;  %29 = vst.msk [vmem:[#allocation3 + $0x8] sm:$0xff] %vm27_vm0, %v14441_v31  ;;  %v8507_v35 = vcombine.high %v11528_v29, %v11533_v30  ;;  %v8506_v41 = vcombine.low %v11528_v29, %v11533_v30 }
  0x89   :  { %30 = vst.msk [vmem:[#allocation3 + $0x10] sm:$0xff] %vm27_vm0, %v14441_v31  ;;  %31 = vst.msk [vmem:[#allocation3 + $0x18] sm:$0xff] %vm27_vm0, %v14441_v31 }
  0x8a   :  { %2024 = vmatpush1.bf16.msra.mxu0 %v8376_v36  ;;  %2065 = vmatpush1.bf16.msra.mxu1 %v8378_v37  ;;  %32 = vst.msk [vmem:[#allocation3 + $0x20] sm:$0xff] %vm27_vm0, %v14441_v31  ;;  %33 = vst.msk [vmem:[#allocation3 + $0x28] sm:$0xff] %vm27_vm0, %v14441_v31  ;;  %v376_v36 = vld [vmem:[%s14433_s1 + $0x520] sm:$0xff] }
  0x8b   :  { %2025 = vmatprep.subr.bf16.mxu0 %v8393_v38  ;;  %2066 = vmatprep.subr.bf16.mxu1 %v8395_v39  ;;  %34 = vst.msk [vmem:[#allocation3 + $0x30] sm:$0xff] %vm27_vm0, %v14441_v31  ;;  %35 = vst.msk [vmem:[#allocation3 + $0x38] sm:$0xff] %vm27_vm0, %v14441_v31  ;;  %v384_v37 = vld [vmem:[%s14433_s1 + $0x560] sm:$0xff]  ;;  %v377_v38 = vld [vmem:[%s14433_s1 + $0x528] sm:$0xff] }
  0x8c   :  { %36 = vst.msk [vmem:[#allocation3 + $0x40] sm:$0xff] %vm27_vm0, %v14441_v31  ;;  %37 = vst.msk [vmem:[#allocation3 + $0x48] sm:$0xff] %vm27_vm0, %v14441_v31  ;;  %v385_v39 = vld [vmem:[%s14433_s1 + $0x568] sm:$0xff]  ;;  %v8521_v42 = vcombine.high %v376_v36, %v384_v37  ;;  %v8520_v49 = vcombine.low %v376_v36, %v384_v37 }
  0x8d   :  { %38 = vst.msk [vmem:[#allocation3 + $0x50] sm:$0xff] %vm27_vm0, %v14441_v31  ;;  %39 = vst.msk [vmem:[#allocation3 + $0x58] sm:$0xff] %vm27_vm0, %v14441_v31  ;;  %v8523_v43 = vcombine.high %v377_v38, %v385_v39  ;;  %v8522_v50 = vcombine.low %v377_v38, %v385_v39 }
  0x8e   :  { %2026 = vmatpush1.bf16.msra.mxu0 %v8392_v44  ;;  %2067 = vmatpush1.bf16.msra.mxu1 %v8394_v45  ;;  %40 = vst.msk [vmem:[#allocation3 + $0x60] sm:$0xff] %vm27_vm0, %v14441_v31  ;;  %41 = vst.msk [vmem:[#allocation3 + $0x68] sm:$0xff] %vm27_vm0, %v14441_v31  ;;  %v392_v44 = vld [vmem:[%s14433_s1 + $0x5a0] sm:$0xff] }
  0x8f   :  { %2027 = vmatprep.subr.bf16.mxu0 %v8409_v47  ;;  %2068 = vmatprep.subr.bf16.mxu1 %v8411_v48  ;;  %42 = vst.msk [vmem:[#allocation3 + $0x70] sm:$0xff] %vm27_vm0, %v14441_v31  ;;  %43 = vst.msk [vmem:[#allocation3 + $0x78] sm:$0xff] %vm27_vm0, %v14441_v31  ;;  %v400_v45 = vld [vmem:[%s14433_s1 + $0x5e0] sm:$0xff]  ;;  %v393_v47 = vld [vmem:[%s14433_s1 + $0x5a8] sm:$0xff] }
  0x90   :  { %44 = vst.msk [vmem:[#allocation3 + $0x80] sm:$0xff] %vm27_vm0, %v14441_v31  ;;  %45 = vst.msk [vmem:[#allocation3 + $0x88] sm:$0xff] %vm27_vm0, %v14441_v31  ;;  %v401_v48 = vld [vmem:[%s14433_s1 + $0x5e8] sm:$0xff]  ;;  %v8537_v51 = vcombine.high %v392_v44, %v400_v45  ;;  %v8536_v58 = vcombine.low %v392_v44, %v400_v45 }
  0x91   :  { %46 = vst.msk [vmem:[#allocation3 + $0x90] sm:$0xff] %vm27_vm0, %v14441_v31  ;;  %47 = vst.msk [vmem:[#allocation3 + $0x98] sm:$0xff] %vm27_vm0, %v14441_v31  ;;  %v8539_v52 = vcombine.high %v393_v47, %v401_v48  ;;  %v8538_v60 = vcombine.low %v393_v47, %v401_v48 }
  0x92   :  { %2028 = vmatpush1.bf16.msra.mxu0 %v8408_v53  ;;  %2069 = vmatpush1.bf16.msra.mxu1 %v8410_v54  ;;  %48 = vst.msk [vmem:[#allocation3 + $0xa0] sm:$0xff] %vm27_vm0, %v14441_v31  ;;  %49 = vst.msk [vmem:[#allocation3 + $0xa8] sm:$0xff] %vm27_vm0, %v14441_v31  ;;  %v408_v53 = vld [vmem:[%s14433_s1 + $0x620] sm:$0xff] }
  0x93   :  { %2029 = vmatprep.subr.bf16.mxu0 %v8425_v55  ;;  %2070 = vmatprep.subr.bf16.mxu1 %v8427_v57  ;;  %50 = vst.msk [vmem:[#allocation3 + $0xb0] sm:$0xff] %vm27_vm0, %v14441_v31  ;;  %51 = vst.msk [vmem:[#allocation3 + $0xb8] sm:$0xff] %vm27_vm0, %v14441_v31  ;;  %v416_v54 = vld [vmem:[%s14433_s1 + $0x660] sm:$0xff]  ;;  %v409_v55 = vld [vmem:[%s14433_s1 + $0x628] sm:$0xff] }
  0x94   :  { %52 = vst.msk [vmem:[#allocation3 + $0xc0] sm:$0xff] %vm27_vm0, %v14441_v31  ;;  %53 = vst.msk [vmem:[#allocation3 + $0xc8] sm:$0xff] %vm27_vm0, %v14441_v31  ;;  %v417_v57 = vld [vmem:[%s14433_s1 + $0x668] sm:$0xff]  ;;  %v8553_v61 = vcombine.high %v408_v53, %v416_v54  ;;  %v8552_v4 = vcombine.low %v408_v53, %v416_v54 }
  0x95   :  { %54 = vst.msk [vmem:[#allocation3 + $0xd0] sm:$0xff] %vm27_vm0, %v14441_v31  ;;  %55 = vst.msk [vmem:[#allocation3 + $0xd8] sm:$0xff] %vm27_vm0, %v14441_v31  ;;  %v8555_v62 = vcombine.high %v409_v55, %v417_v57  ;;  %v8554_v5 = vcombine.low %v409_v55, %v417_v57 }
  0x96   :  { %2030 = vmatpush1.bf16.msra.mxu0 %v8424_v63  ;;  %2071 = vmatpush1.bf16.msra.mxu1 %v8426_v0  ;;  %56 = vst.msk [vmem:[#allocation3 + $0xe0] sm:$0xff] %vm27_vm0, %v14441_v31  ;;  %57 = vst.msk [vmem:[#allocation3 + $0xe8] sm:$0xff] %vm27_vm0, %v14441_v31  ;;  %v424_v63 = vld [vmem:[%s14433_s1 + $0x6a0] sm:$0xff] }
  0x97   :  { %2031 = vmatprep.subr.bf16.mxu0 %v8441_v1  ;;  %2072 = vmatprep.subr.bf16.mxu1 %v8443_v2  ;;  %58 = vst.msk [vmem:[#allocation3 + $0xf0] sm:$0xff] %vm27_vm0, %v14441_v31  ;;  %59 = vst.msk [vmem:[#allocation3 + $0xf8] sm:$0xff] %vm27_vm0, %v14441_v31  ;;  %v432_v0 = vld [vmem:[%s14433_s1 + $0x6e0] sm:$0xff]  ;;  %v425_v1 = vld [vmem:[%s14433_s1 + $0x6a8] sm:$0xff] }
  0x98   :  { %60 = vst.msk [vmem:[#allocation3 + $0x100] sm:$0xff] %vm27_vm0, %v14441_v31  ;;  %61 = vst.msk [vmem:[#allocation3 + $0x108] sm:$0xff] %vm27_vm0, %v14441_v31  ;;  %v433_v2 = vld [vmem:[%s14433_s1 + $0x6e8] sm:$0xff]  ;;  %v8569_v6 = vcombine.high %v424_v63, %v432_v0  ;;  %v8568_v12 = vcombine.low %v424_v63, %v432_v0 }
  0x99   :  { %62 = vst.msk [vmem:[#allocation3 + $0x110] sm:$0xff] %vm27_vm0, %v14441_v31  ;;  %63 = vst.msk [vmem:[#allocation3 + $0x118] sm:$0xff] %vm27_vm0, %v14441_v31  ;;  %v8571_v7 = vcombine.high %v425_v1, %v433_v2  ;;  %v8570_v13 = vcombine.low %v425_v1, %v433_v2  ;;  %v298_v2 = vld [vmem:[%s14433_s1 + $0x2b0] sm:$0xff] }
  0x9a   :  { %2032 = vmatpush1.bf16.msra.mxu0 %v8440_v8  ;;  %2073 = vmatpush1.bf16.msra.mxu1 %v8442_v9  ;;  %64 = vst.msk [vmem:[#allocation3 + $0x120] sm:$0xff] %vm27_vm0, %v14441_v31  ;;  %65 = vst.msk [vmem:[#allocation3 + $0x128] sm:$0xff] %vm27_vm0, %v14441_v31  ;;  %v440_v8 = vld [vmem:[%s14433_s1 + $0x720] sm:$0xff] }
  0x9b   :  { %2033 = vmatprep.subr.bf16.mxu0 %v8457_v10  ;;  %2074 = vmatprep.subr.bf16.mxu1 %v8459_v11  ;;  %66 = vst.msk [vmem:[#allocation3 + $0x130] sm:$0xff] %vm27_vm0, %v14441_v31  ;;  %67 = vst.msk [vmem:[#allocation3 + $0x138] sm:$0xff] %vm27_vm0, %v14441_v31  ;;  %v448_v9 = vld [vmem:[%s14433_s1 + $0x760] sm:$0xff]  ;;  %v441_v10 = vld [vmem:[%s14433_s1 + $0x728] sm:$0xff] }
  0x9c   :  { %68 = vst.msk [vmem:[#allocation3 + $0x140] sm:$0xff] %vm27_vm0, %v14441_v31  ;;  %69 = vst.msk [vmem:[#allocation3 + $0x148] sm:$0xff] %vm27_vm0, %v14441_v31  ;;  %v449_v11 = vld [vmem:[%s14433_s1 + $0x768] sm:$0xff]  ;;  %v8585_v14 = vcombine.high %v440_v8, %v448_v9  ;;  %v8584_v20 = vcombine.low %v440_v8, %v448_v9 }
  0x9d   :  { %70 = vst.msk [vmem:[#allocation3 + $0x150] sm:$0xff] %vm27_vm0, %v14441_v31  ;;  %71 = vst.msk [vmem:[#allocation3 + $0x158] sm:$0xff] %vm27_vm0, %v14441_v31  ;;  %v8587_v15 = vcombine.high %v441_v10, %v449_v11  ;;  %v8586_v22 = vcombine.low %v441_v10, %v449_v11  ;;  %v314_v11 = vld [vmem:[%s14433_s1 + $0x330] sm:$0xff] }
  0x9e   :  { %2034 = vmatpush1.bf16.msra.mxu0 %v8456_v16  ;;  %2075 = vmatpush1.bf16.msra.mxu1 %v8458_v17  ;;  %72 = vst.msk [vmem:[#allocation3 + $0x160] sm:$0xff] %vm27_vm0, %v14441_v31  ;;  %73 = vst.msk [vmem:[#allocation3 + $0x168] sm:$0xff] %vm27_vm0, %v14441_v31  ;;  %v456_v16 = vld [vmem:[%s14433_s1 + $0x7a0] sm:$0xff] }
  0x9f   :  { %2035 = vmatprep.subr.bf16.mxu0 %v8473_v18  ;;  %2076 = vmatprep.subr.bf16.mxu1 %v8475_v19  ;;  %74 = vst.msk [vmem:[#allocation3 + $0x170] sm:$0xff] %vm27_vm0, %v14441_v31  ;;  %75 = vst.msk [vmem:[#allocation3 + $0x178] sm:$0xff] %vm27_vm0, %v14441_v31  ;;  %v464_v17 = vld [vmem:[%s14433_s1 + $0x7e0] sm:$0xff]  ;;  %v457_v18 = vld [vmem:[%s14433_s1 + $0x7a8] sm:$0xff] }
  0xa0   :  { %76 = vst.msk [vmem:[#allocation3 + $0x180] sm:$0xff] %vm27_vm0, %v14441_v31  ;;  %77 = vst.msk [vmem:[#allocation3 + $0x188] sm:$0xff] %vm27_vm0, %v14441_v31  ;;  %v465_v19 = vld [vmem:[%s14433_s1 + $0x7e8] sm:$0xff]  ;;  %v8601_v23 = vcombine.high %v456_v16, %v464_v17  ;;  %v8600_v59 = vcombine.low %v456_v16, %v464_v17 }
  0xa1   :  { %78 = vst.msk [vmem:[#allocation3 + $0x190] sm:$0xff] %vm27_vm0, %v14441_v31  ;;  %79 = vst.msk [vmem:[#allocation3 + $0x198] sm:$0xff] %vm27_vm0, %v14441_v31  ;;  %v8603_v24 = vcombine.high %v457_v18, %v465_v19  ;;  %v8602_v28 = vcombine.low %v457_v18, %v465_v19  ;;  %v330_v19 = vld [vmem:[%s14433_s1 + $0x3b0] sm:$0xff] }
  0xa2   :  { %80 = vst.msk [vmem:[#allocation3 + $0x1a0] sm:$0xff] %vm27_vm0, %v14441_v31  ;;  %81 = vst.msk [vmem:[#allocation3 + $0x1a8] sm:$0xff] %vm27_vm0, %v14441_v31  ;;  %2036 = vmatpush1.bf16.msra.mxu0 %v8472_v25  ;;  %2077 = vmatpush1.bf16.msra.mxu1 %v8474_v26  ;;  %v218_v25 = vld [vmem:[%s14433_s1 + $0x30] sm:$0xff] }
  0xa3   :  { %82 = vst.msk [vmem:[#allocation3 + $0x1b0] sm:$0xff] %vm27_vm0, %v14441_v31  ;;  %83 = vst.msk [vmem:[#allocation3 + $0x1b8] sm:$0xff] %vm27_vm0, %v14441_v31  ;;  %2037 = vmatprep.subr.bf16.mxu0 %v8489_v27  ;;  %2078 = vmatprep.subr.bf16.mxu1 %v8491_v56  ;;  %v226_v26 = vld [vmem:[%s14433_s1 + $0x70] sm:$0xff]  ;;  %v219_v27 = vld [vmem:[%s14433_s1 + $0x38] sm:$0xff] }
  0xa4   :  { %84 = vst.msk [vmem:[#allocation3 + $0x1c0] sm:$0xff] %vm27_vm0, %v14441_v31  ;;  %85 = vst.msk [vmem:[#allocation3 + $0x1c8] sm:$0xff] %vm27_vm0, %v14441_v31  ;;  %v227_v56 = vld [vmem:[%s14433_s1 + $0x78] sm:$0xff]  ;;  %v8365_v29 = vcombine.high %v218_v25, %v226_v26  ;;  %v8364_v36 = vcombine.low %v218_v25, %v226_v26 }
  0xa5   :  { %86 = vst.msk [vmem:[#allocation3 + $0x1d0] sm:$0xff] %vm27_vm0, %v14441_v31  ;;  %87 = vst.msk [vmem:[#allocation3 + $0x1d8] sm:$0xff] %vm27_vm0, %v14441_v31  ;;  %v8367_v30 = vcombine.high %v219_v27, %v227_v56  ;;  %v8366_v37 = vcombine.low %v219_v27, %v227_v56  ;;  %v346_v56 = vld [vmem:[%s14433_s1 + $0x430] sm:$0xff] }
  0xa6   :  { %88 = vst.msk [vmem:[#allocation3 + $0x1e0] sm:$0xff] %vm27_vm0, %v14441_v31  ;;  %89 = vst.msk [vmem:[#allocation3 + $0x1e8] sm:$0xff] %vm27_vm0, %v14441_v31  ;;  %2038 = vmatpush1.bf16.msra.mxu0 %v8488_v32  ;;  %2079 = vmatpush1.bf16.msra.mxu1 %v8490_v33  ;;  %v234_v32 = vld [vmem:[%s14433_s1 + $0xb0] sm:$0xff] }
  0xa7   :  { %90 = vst.msk [vmem:[#allocation3 + $0x1f0] sm:$0xff] %vm27_vm0, %v14441_v31  ;;  %91 = vst.msk [vmem:[#allocation3 + $0x1f8] sm:$0xff] %vm27_vm0, %v14441_v31  ;;  %2039 = vmatprep.subr.bf16.mxu0 %v8505_v34  ;;  %2080 = vmatprep.subr.bf16.mxu1 %v8507_v35  ;;  %v242_v33 = vld [vmem:[%s14433_s1 + $0xf0] sm:$0xff]  ;;  %v235_v34 = vld [vmem:[%s14433_s1 + $0xb8] sm:$0xff] }
  0xa8   :  { %92 = vst.msk [vmem:[#allocation3 + $0x200] sm:$0xff] %vm27_vm0, %v14441_v31  ;;  %93 = vst.msk [vmem:[#allocation3 + $0x208] sm:$0xff] %vm27_vm0, %v14441_v31  ;;  %v243_v35 = vld [vmem:[%s14433_s1 + $0xf8] sm:$0xff]  ;;  %v8381_v38 = vcombine.high %v234_v32, %v242_v33  ;;  %v8380_v44 = vcombine.low %v234_v32, %v242_v33 }
  0xa9   :  { %94 = vst.msk [vmem:[#allocation3 + $0x210] sm:$0xff] %vm27_vm0, %v14441_v31  ;;  %95 = vst.msk [vmem:[#allocation3 + $0x218] sm:$0xff] %vm27_vm0, %v14441_v31  ;;  %v8383_v39 = vcombine.high %v235_v34, %v243_v35  ;;  %v8382_v45 = vcombine.low %v235_v34, %v243_v35  ;;  %v362_v35 = vld [vmem:[%s14433_s1 + $0x4b0] sm:$0xff] }
  0xaa   :  { %96 = vst.msk [vmem:[#allocation3 + $0x220] sm:$0xff] %vm27_vm0, %v14441_v31  ;;  %97 = vst.msk [vmem:[#allocation3 + $0x228] sm:$0xff] %vm27_vm0, %v14441_v31  ;;  %2040 = vmatpush1.bf16.msra.mxu0 %v8504_v40  ;;  %2081 = vmatpush1.bf16.msra.mxu1 %v8506_v41  ;;  %v250_v40 = vld [vmem:[%s14433_s1 + $0x130] sm:$0xff] }
  0xab   :  { %98 = vst.msk [vmem:[#allocation3 + $0x230] sm:$0xff] %vm27_vm0, %v14441_v31  ;;  %99 = vst.msk [vmem:[#allocation3 + $0x238] sm:$0xff] %vm27_vm0, %v14441_v31  ;;  %2041 = vmatprep.subr.bf16.mxu0 %v8521_v42  ;;  %2082 = vmatprep.subr.bf16.mxu1 %v8523_v43  ;;  %v258_v41 = vld [vmem:[%s14433_s1 + $0x170] sm:$0xff]  ;;  %v251_v42 = vld [vmem:[%s14433_s1 + $0x138] sm:$0xff] }
  0xac   :  { %100 = vst.msk [vmem:[#allocation3 + $0x240] sm:$0xff] %vm27_vm0, %v14441_v31  ;;  %101 = vst.msk [vmem:[#allocation3 + $0x248] sm:$0xff] %vm27_vm0, %v14441_v31  ;;  %v259_v43 = vld [vmem:[%s14433_s1 + $0x178] sm:$0xff]  ;;  %v8397_v47 = vcombine.high %v250_v40, %v258_v41  ;;  %v8396_v53 = vcombine.low %v250_v40, %v258_v41 }
  0xad   :  { %102 = vst.msk [vmem:[#allocation3 + $0x250] sm:$0xff] %vm27_vm0, %v14441_v31  ;;  %103 = vst.msk [vmem:[#allocation3 + $0x258] sm:$0xff] %vm27_vm0, %v14441_v31  ;;  %v8399_v48 = vcombine.high %v251_v42, %v259_v43  ;;  %v8398_v54 = vcombine.low %v251_v42, %v259_v43  ;;  %v378_v43 = vld [vmem:[%s14433_s1 + $0x530] sm:$0xff] }
  0xae   :  { %104 = vst.msk [vmem:[#allocation3 + $0x260] sm:$0xff] %vm27_vm0, %v14441_v31  ;;  %105 = vst.msk [vmem:[#allocation3 + $0x268] sm:$0xff] %vm27_vm0, %v14441_v31  ;;  %2042 = vmatpush1.bf16.msra.mxu0 %v8520_v49  ;;  %2083 = vmatpush1.bf16.msra.mxu1 %v8522_v50  ;;  %v266_v49 = vld [vmem:[%s14433_s1 + $0x1b0] sm:$0xff] }
  0xaf   :  { %106 = vst.msk [vmem:[#allocation3 + $0x270] sm:$0xff] %vm27_vm0, %v14441_v31  ;;  %107 = vst.msk [vmem:[#allocation3 + $0x278] sm:$0xff] %vm27_vm0, %v14441_v31  ;;  %2043 = vmatprep.subr.bf16.mxu0 %v8537_v51  ;;  %2084 = vmatprep.subr.bf16.mxu1 %v8539_v52  ;;  %v274_v50 = vld [vmem:[%s14433_s1 + $0x1f0] sm:$0xff]  ;;  %v267_v51 = vld [vmem:[%s14433_s1 + $0x1b8] sm:$0xff] }
  0xb0   :  { %108 = vst.msk [vmem:[#allocation3 + $0x280] sm:$0xff] %vm27_vm0, %v14441_v31  ;;  %109 = vst.msk [vmem:[#allocation3 + $0x288] sm:$0xff] %vm27_vm0, %v14441_v31  ;;  %v275_v52 = vld [vmem:[%s14433_s1 + $0x1f8] sm:$0xff]  ;;  %v8413_v55 = vcombine.high %v266_v49, %v274_v50 }
  0xb1   :  { %110 = vst.msk [vmem:[#allocation3 + $0x290] sm:$0xff] %vm27_vm0, %v14441_v31  ;;  %111 = vst.msk [vmem:[#allocation3 + $0x298] sm:$0xff] %vm27_vm0, %v14441_v31  ;;  %v8415_v57 = vcombine.high %v267_v51, %v275_v52  ;;  %v8414_v63 = vcombine.low %v267_v51, %v275_v52  ;;  %v394_v52 = vld [vmem:[%s14433_s1 + $0x5b0] sm:$0xff] }
  0xb2   :  { %112 = vst.msk [vmem:[#allocation3 + $0x2a0] sm:$0xff] %vm27_vm0, %v14441_v31  ;;  %113 = vst.msk [vmem:[#allocation3 + $0x2a8] sm:$0xff] %vm27_vm0, %v14441_v31  ;;  %2044 = vmatpush1.bf16.msra.mxu0 %v8536_v58  ;;  %2085 = vmatpush1.bf16.msra.mxu1 %v8538_v60  ;;  %v282_v58 = vld [vmem:[%s14433_s1 + $0x230] sm:$0xff] }
  0xb3   :  { %114 = vst.msk [vmem:[#allocation3 + $0x2b0] sm:$0xff] %vm27_vm0, %v14441_v31  ;;  %115 = vst.msk [vmem:[#allocation3 + $0x2b8] sm:$0xff] %vm27_vm0, %v14441_v31  ;;  %2045 = vmatprep.subr.bf16.mxu0 %v8553_v61  ;;  %2086 = vmatprep.subr.bf16.mxu1 %v8555_v62  ;;  %v290_v60 = vld [vmem:[%s14433_s1 + $0x270] sm:$0xff]  ;;  %v291_v61 = vld [vmem:[%s14433_s1 + $0x278] sm:$0xff]  ;;  %v8412_v62 = vcombine.low %v266_v49, %v274_v50 }
  0xb4   :  { %116 = vst.msk [vmem:[#allocation3 + $0x2c0] sm:$0xff] %vm27_vm0, %v14441_v31  ;;  %117 = vst.msk [vmem:[#allocation3 + $0x2c8] sm:$0xff] %vm27_vm0, %v14441_v31  ;;  %v8429_v0 = vcombine.high %v282_v58, %v290_v60 }
  0xb5   :  { %118 = vst.msk [vmem:[#allocation3 + $0x2d0] sm:$0xff] %vm27_vm0, %v14441_v31 }
  0xb6   :  { %2046 = vmatpush1.bf16.msra.mxu0 %v8552_v4  ;;  %2087 = vmatpush1.bf16.msra.mxu1 %v8554_v5  ;;  %v306_v4 = vld [vmem:[%s14433_s1 + $0x2f0] sm:$0xff]  ;;  %v299_v5 = vld [vmem:[%s14433_s1 + $0x2b8] sm:$0xff]  ;;  %120 = vst.msk [vmem:[#allocation4] sm:$0xff] %vm119_vm3, %v14441_v31  ;;  %121 = vst.msk [vmem:[#allocation4 + $0x8] sm:$0xff] %vm119_vm3, %v14441_v31 }
  0xb7   :  { %2047 = vmatprep.subr.bf16.mxu0 %v8569_v6  ;;  %2088 = vmatprep.subr.bf16.mxu1 %v8571_v7  ;;  %v307_v6 = vld [vmem:[%s14433_s1 + $0x2f8] sm:$0xff]  ;;  %v8428_v7 = vcombine.low %v282_v58, %v290_v60  ;;  %v8445_v9 = vcombine.high %v298_v2, %v306_v4  ;;  %122 = vst.msk [vmem:[#allocation4 + $0x10] sm:$0xff] %vm119_vm3, %v14441_v31  ;;  %123 = vst.msk [vmem:[#allocation4 + $0x18] sm:$0xff] %vm119_vm3, %v14441_v31 }
  0xb8   :  { %v8447_v10 = vcombine.high %v299_v5, %v307_v6  ;;  %v8446_v16 = vcombine.low %v299_v5, %v307_v6  ;;  %v426_v6 = vld [vmem:[%s14433_s1 + $0x6b0] sm:$0xff]  ;;  %124 = vst.msk [vmem:[#allocation4 + $0x20] sm:$0xff] %vm119_vm3, %v14441_v31  ;;  %125 = vst.msk [vmem:[#allocation4 + $0x28] sm:$0xff] %vm119_vm3, %v14441_v31 }
  0xb9   :  { %126 = vst.msk [vmem:[#allocation4 + $0x30] sm:$0xff] %vm119_vm3, %v14441_v31  ;;  %127 = vst.msk [vmem:[#allocation4 + $0x38] sm:$0xff] %vm119_vm3, %v14441_v31 }
  0xba   :  { %2048 = vmatpush1.bf16.msra.mxu0 %v8568_v12  ;;  %2089 = vmatpush1.bf16.msra.mxu1 %v8570_v13  ;;  %v322_v12 = vld [vmem:[%s14433_s1 + $0x370] sm:$0xff]  ;;  %v315_v13 = vld [vmem:[%s14433_s1 + $0x338] sm:$0xff]  ;;  %128 = vst.msk [vmem:[#allocation4 + $0x40] sm:$0xff] %vm119_vm3, %v14441_v31  ;;  %129 = vst.msk [vmem:[#allocation4 + $0x48] sm:$0xff] %vm119_vm3, %v14441_v31 }
  0xbb   :  { %2049 = vmatprep.subr.bf16.mxu0 %v8585_v14  ;;  %2090 = vmatprep.subr.bf16.mxu1 %v8587_v15  ;;  %v323_v14 = vld [vmem:[%s14433_s1 + $0x378] sm:$0xff]  ;;  %v8444_v15 = vcombine.low %v298_v2, %v306_v4  ;;  %v8461_v17 = vcombine.high %v314_v11, %v322_v12  ;;  %130 = vst.msk [vmem:[#allocation4 + $0x50] sm:$0xff] %vm119_vm3, %v14441_v31  ;;  %131 = vst.msk [vmem:[#allocation4 + $0x58] sm:$0xff] %vm119_vm3, %v14441_v31 }
  0xbc   :  { %v8463_v18 = vcombine.high %v315_v13, %v323_v14  ;;  %v8462_v25 = vcombine.low %v315_v13, %v323_v14  ;;  %v442_v14 = vld [vmem:[%s14433_s1 + $0x730] sm:$0xff]  ;;  %132 = vst.msk [vmem:[#allocation4 + $0x60] sm:$0xff] %vm119_vm3, %v14441_v31  ;;  %133 = vst.msk [vmem:[#allocation4 + $0x68] sm:$0xff] %vm119_vm3, %v14441_v31 }
  0xbd   :  { %134 = vst.msk [vmem:[#allocation4 + $0x70] sm:$0xff] %vm119_vm3, %v14441_v31  ;;  %135 = vst.msk [vmem:[#allocation4 + $0x78] sm:$0xff] %vm119_vm3, %v14441_v31 }
  0xbe   :  { %2050 = vmatpush1.bf16.msra.mxu0 %v8584_v20  ;;  %2091 = vmatpush1.bf16.msra.mxu1 %v8586_v22  ;;  %v338_v20 = vld [vmem:[%s14433_s1 + $0x3f0] sm:$0xff]  ;;  %v331_v22 = vld [vmem:[%s14433_s1 + $0x3b8] sm:$0xff]  ;;  %136 = vst.msk [vmem:[#allocation4 + $0x80] sm:$0xff] %vm119_vm3, %v14441_v31  ;;  %137 = vst.msk [vmem:[#allocation4 + $0x88] sm:$0xff] %vm119_vm3, %v14441_v31 }
  0xbf   :  { %2051 = vmatprep.subr.bf16.mxu0 %v8601_v23  ;;  %2092 = vmatprep.subr.bf16.mxu1 %v8603_v24  ;;  %v339_v23 = vld [vmem:[%s14433_s1 + $0x3f8] sm:$0xff]  ;;  %v8460_v24 = vcombine.low %v314_v11, %v322_v12  ;;  %v8477_v26 = vcombine.high %v330_v19, %v338_v20  ;;  %138 = vst.msk [vmem:[#allocation4 + $0x90] sm:$0xff] %vm119_vm3, %v14441_v31  ;;  %139 = vst.msk [vmem:[#allocation4 + $0x98] sm:$0xff] %vm119_vm3, %v14441_v31 }
  0xc0   :  { %v8479_v27 = vcombine.high %v331_v22, %v339_v23  ;;  %v8478_v32 = vcombine.low %v331_v22, %v339_v23  ;;  %v458_v23 = vld [vmem:[%s14433_s1 + $0x7b0] sm:$0xff]  ;;  %140 = vst.msk [vmem:[#allocation4 + $0xa0] sm:$0xff] %vm119_vm3, %v14441_v31  ;;  %141 = vst.msk [vmem:[#allocation4 + $0xa8] sm:$0xff] %vm119_vm3, %v14441_v31 }
  0xc1   :  { %142 = vst.msk [vmem:[#allocation4 + $0xb0] sm:$0xff] %vm119_vm3, %v14441_v31  ;;  %143 = vst.msk [vmem:[#allocation4 + $0xb8] sm:$0xff] %vm119_vm3, %v14441_v31 }
  0xc2   :  { %2052 = vmatpush1.bf16.msra.mxu0 %v8600_v59  ;;  %2093 = vmatpush1.bf16.msra.mxu1 %v8602_v28  ;;  %v354_v59 = vld [vmem:[%s14433_s1 + $0x470] sm:$0xff]  ;;  %v347_v28 = vld [vmem:[%s14433_s1 + $0x438] sm:$0xff]  ;;  %144 = vst.msk [vmem:[#allocation4 + $0xc0] sm:$0xff] %vm119_vm3, %v14441_v31  ;;  %145 = vst.msk [vmem:[#allocation4 + $0xc8] sm:$0xff] %vm119_vm3, %v14441_v31 }
  0xc3   :  { %2103 = vmatprep.subr.bf16.mxu0 %v8365_v29  ;;  %2144 = vmatprep.subr.bf16.mxu1 %v8367_v30  ;;  %v355_v29 = vld [vmem:[%s14433_s1 + $0x478] sm:$0xff]  ;;  %v8476_v30 = vcombine.low %v330_v19, %v338_v20  ;;  %v8493_v33 = vcombine.high %v346_v56, %v354_v59  ;;  %146 = vst.msk [vmem:[#allocation4 + $0xd0] sm:$0xff] %vm119_vm3, %v14441_v31  ;;  %147 = vst.msk [vmem:[#allocation4 + $0xd8] sm:$0xff] %vm119_vm3, %v14441_v31 }
  0xc4   :  { %v8495_v34 = vcombine.high %v347_v28, %v355_v29  ;;  %v8494_v40 = vcombine.low %v347_v28, %v355_v29  ;;  %148 = vst.msk [vmem:[#allocation4 + $0xe0] sm:$0xff] %vm119_vm3, %v14441_v31  ;;  %149 = vst.msk [vmem:[#allocation4 + $0xe8] sm:$0xff] %vm119_vm3, %v14441_v31 }
  0xc5   :  { %2054 = vmatmul.mubr.bf16.vlgmr.msra.gmra.mrb[8].mxu0 %v11195_v21  ;;  %2095 = vmatmul.mubr.bf16.vlgmr.msra.gmra.mrb[8].mxu1 %v11195_v21  ;;  %150 = vst.msk [vmem:[#allocation4 + $0xf0] sm:$0xff] %vm119_vm3, %v14441_v31  ;;  %151 = vst.msk [vmem:[#allocation4 + $0xf8] sm:$0xff] %vm119_vm3, %v14441_v31 }
  0xc6   :  { %2104 = vmatpush1.bf16.msra.mxu0 %v8364_v36  ;;  %2145 = vmatpush1.bf16.msra.mxu1 %v8366_v37  ;;  %v370_v36 = vld [vmem:[%s14433_s1 + $0x4f0] sm:$0xff]  ;;  %v363_v37 = vld [vmem:[%s14433_s1 + $0x4b8] sm:$0xff]  ;;  %152 = vst.msk [vmem:[#allocation4 + $0x100] sm:$0xff] %vm119_vm3, %v14441_v31  ;;  %153 = vst.msk [vmem:[#allocation4 + $0x108] sm:$0xff] %vm119_vm3, %v14441_v31 }
  0xc7   :  { %2105 = vmatprep.subr.bf16.mxu0 %v8381_v38  ;;  %2146 = vmatprep.subr.bf16.mxu1 %v8383_v39  ;;  %v371_v38 = vld [vmem:[%s14433_s1 + $0x4f8] sm:$0xff]  ;;  %v8492_v39 = vcombine.low %v346_v56, %v354_v59  ;;  %v8509_v41 = vcombine.high %v362_v35, %v370_v36  ;;  %154 = vst.msk [vmem:[#allocation4 + $0x110] sm:$0xff] %vm119_vm3, %v14441_v31  ;;  %155 = vst.msk [vmem:[#allocation4 + $0x118] sm:$0xff] %vm119_vm3, %v14441_v31 }
  0xc8   :  { %2135 = vmatprep.mubr.bf16.mxu0 %v11075_v3  ;;  %2176 = vmatprep.mubr.bf16.mxu1 %v11075_v3  ;;  %v283_v3 = vld [vmem:[%s14433_s1 + $0x238] sm:$0xff]  ;;  %v8511_v42 = vcombine.high %v363_v37, %v371_v38  ;;  %v8510_v49 = vcombine.low %v363_v37, %v371_v38  ;;  %v10921_v37 = vmov 1983009808   ;;  %156 = vst.msk [vmem:[#allocation4 + $0x120] sm:$0xff] %vm119_vm3, %v14441_v31  ;;  %157 = vst.msk [vmem:[#allocation4 + $0x128] sm:$0xff] %vm119_vm3, %v14441_v31 }
  0xc9   :  { %v8431_v1 = vcombine.high %v283_v3, %v291_v61  ;;  %v8430_v8 = vcombine.low %v283_v3, %v291_v61  ;;  %v410_v61 = vld [vmem:[%s14433_s1 + $0x630] sm:$0xff]  ;;  %v2220_v38 = vunpack.c.l.s4 %v10921_v37  ;;  %158 = vst.msk [vmem:[#allocation4 + $0x130] sm:$0xff] %vm119_vm3, %v14441_v31  ;;  %159 = vst.msk [vmem:[#allocation4 + $0x138] sm:$0xff] %vm119_vm3, %v14441_v31 }
  0xca   :  { %2106 = vmatpush1.bf16.msra.mxu0 %v8380_v44  ;;  %2147 = vmatpush1.bf16.msra.mxu1 %v8382_v45  ;;  %v386_v44 = vld [vmem:[%s14433_s1 + $0x570] sm:$0xff]  ;;  %v379_v45 = vld [vmem:[%s14433_s1 + $0x538] sm:$0xff]  ;;  %160 = vst.msk [vmem:[#allocation4 + $0x140] sm:$0xff] %vm119_vm3, %v14441_v31  ;;  %161 = vst.msk [vmem:[#allocation4 + $0x148] sm:$0xff] %vm119_vm3, %v14441_v31 }
  0xcb   :  { %2107 = vmatprep.subr.bf16.mxu0 %v8397_v47  ;;  %2148 = vmatprep.subr.bf16.mxu1 %v8399_v48  ;;  %v387_v47 = vld [vmem:[%s14433_s1 + $0x578] sm:$0xff]  ;;  %v8508_v48 = vcombine.low %v362_v35, %v370_v36  ;;  %v8525_v50 = vcombine.high %v378_v43, %v386_v44  ;;  %v478_v35 = vsub.s32 1, %v11038_v46  ;;  %v486_v36 = vsub.s32 3, %v11038_v46  ;;  %162 = vst.msk [vmem:[#allocation4 + $0x150] sm:$0xff] %vm119_vm3, %v14441_v31 }
  0xcc   :  { %v8527_v51 = vcombine.high %v379_v45, %v387_v47  ;;  %v8526_v58 = vcombine.low %v379_v45, %v387_v47  ;;  %163 = vst.msk [vmem:[#allocation4 + $0x158] sm:$0xff] %vm119_vm3, %v14441_v31  ;;  %164 = vst.msk [vmem:[#allocation4 + $0x160] sm:$0xff] %vm119_vm3, %v14441_v31 }
  0xcd   :  { %165 = vst.msk [vmem:[#allocation4 + $0x168] sm:$0xff] %vm119_vm3, %v14441_v31  ;;  %166 = vst.msk [vmem:[#allocation4 + $0x170] sm:$0xff] %vm119_vm3, %v14441_v31 }
  0xce   :  { %2108 = vmatpush1.bf16.msra.mxu0 %v8396_v53  ;;  %2149 = vmatpush1.bf16.msra.mxu1 %v8398_v54  ;;  %v402_v53 = vld [vmem:[%s14433_s1 + $0x5f0] sm:$0xff]  ;;  %v395_v54 = vld [vmem:[%s14433_s1 + $0x5b8] sm:$0xff]  ;;  %167 = vst.msk [vmem:[#allocation4 + $0x178] sm:$0xff] %vm119_vm3, %v14441_v31  ;;  %168 = vst.msk [vmem:[#allocation4 + $0x180] sm:$0xff] %vm119_vm3, %v14441_v31 }
  0xcf   :  { %2109 = vmatprep.subr.bf16.mxu0 %v8413_v55  ;;  %2150 = vmatprep.subr.bf16.mxu1 %v8415_v57  ;;  %v403_v55 = vld [vmem:[%s14433_s1 + $0x5f8] sm:$0xff]  ;;  %v8524_v57 = vcombine.low %v378_v43, %v386_v44  ;;  %v8541_v60 = vcombine.high %v394_v52, %v402_v53  ;;  %v2221_v43 = vunpack.c.0.s8 %v2220_v38  ;;  %169 = vst.msk [vmem:[#allocation4 + $0x188] sm:$0xff] %vm119_vm3, %v14441_v31  ;;  %170 = vst.msk [vmem:[#allocation4 + $0x190] sm:$0xff] %vm119_vm3, %v14441_v31 }
  0xd0   :  { %v8543_v3 = vcombine.high %v395_v54, %v403_v55  ;;  %v8542_v2 = vcombine.low %v395_v54, %v403_v55  ;;  %171 = vst.msk [vmem:[#allocation4 + $0x198] sm:$0xff] %vm119_vm3, %v14441_v31  ;;  %172 = vst.msk [vmem:[#allocation4 + $0x1a0] sm:$0xff] %vm119_vm3, %v14441_v31 }
  0xd1   :  { %173 = vst.msk [vmem:[#allocation4 + $0x1a8] sm:$0xff] %vm119_vm3, %v14441_v31  ;;  %174 = vst.msk [vmem:[#allocation4 + $0x1b0] sm:$0xff] %vm119_vm3, %v14441_v31 }
  0xd2   :  { %2110 = vmatpush1.bf16.msra.mxu0 %v8412_v62  ;;  %2151 = vmatpush1.bf16.msra.mxu1 %v8414_v63  ;;  %v418_v62 = vld [vmem:[%s14433_s1 + $0x670] sm:$0xff]  ;;  %v411_v63 = vld [vmem:[%s14433_s1 + $0x638] sm:$0xff]  ;;  %175 = vst.msk [vmem:[#allocation4 + $0x1b8] sm:$0xff] %vm119_vm3, %v14441_v31  ;;  %176 = vst.msk [vmem:[#allocation4 + $0x1c0] sm:$0xff] %vm119_vm3, %v14441_v31 }
  0xd3   :  { %2111 = vmatprep.subr.bf16.mxu0 %v8429_v0  ;;  %2152 = vmatprep.subr.bf16.mxu1 %v8431_v1  ;;  %v419_v0 = vld [vmem:[%s14433_s1 + $0x678] sm:$0xff]  ;;  %v8540_v1 = vcombine.low %v394_v52, %v402_v53  ;;  %v8557_v4 = vcombine.high %v410_v61, %v418_v62  ;;  %177 = vst.msk [vmem:[#allocation4 + $0x1c8] sm:$0xff] %vm119_vm3, %v14441_v31  ;;  %178 = vst.msk [vmem:[#allocation4 + $0x1d0] sm:$0xff] %vm119_vm3, %v14441_v31 }
  0xd4   :  { %v8559_v5 = vcombine.high %v411_v63, %v419_v0  ;;  %v8558_v11 = vcombine.low %v411_v63, %v419_v0  ;;  %179 = vst.msk [vmem:[#allocation4 + $0x1d8] sm:$0xff] %vm119_vm3, %v14441_v31  ;;  %180 = vst.msk [vmem:[#allocation4 + $0x1e0] sm:$0xff] %vm119_vm3, %v14441_v31 }
  0xd5   :  { %181 = vst.msk [vmem:[#allocation4 + $0x1e8] sm:$0xff] %vm119_vm3, %v14441_v31  ;;  %182 = vst.msk [vmem:[#allocation4 + $0x1f0] sm:$0xff] %vm119_vm3, %v14441_v31 }
  0xd6   :  { %2112 = vmatpush1.bf16.msra.mxu0 %v8428_v7  ;;  %2153 = vmatpush1.bf16.msra.mxu1 %v8430_v8  ;;  %v434_v7 = vld [vmem:[%s14433_s1 + $0x6f0] sm:$0xff]  ;;  %v427_v8 = vld [vmem:[%s14433_s1 + $0x6b8] sm:$0xff]  ;;  %183 = vst.msk [vmem:[#allocation4 + $0x1f8] sm:$0xff] %vm119_vm3, %v14441_v31  ;;  %184 = vst.msk [vmem:[#allocation4 + $0x200] sm:$0xff] %vm119_vm3, %v14441_v31 }
  0xd7   :  { %2113 = vmatprep.subr.bf16.mxu0 %v8445_v9  ;;  %2154 = vmatprep.subr.bf16.mxu1 %v8447_v10  ;;  %v435_v9 = vld [vmem:[%s14433_s1 + $0x6f8] sm:$0xff]  ;;  %v8556_v10 = vcombine.low %v410_v61, %v418_v62  ;;  %v8573_v12 = vcombine.high %v426_v6, %v434_v7  ;;  %185 = vst.msk [vmem:[#allocation4 + $0x208] sm:$0xff] %vm119_vm3, %v14441_v31  ;;  %186 = vst.msk [vmem:[#allocation4 + $0x210] sm:$0xff] %vm119_vm3, %v14441_v31 }
  0xd8   :  { %v8575_v13 = vcombine.high %v427_v8, %v435_v9  ;;  %v8574_v19 = vcombine.low %v427_v8, %v435_v9  ;;  %187 = vst.msk [vmem:[#allocation4 + $0x218] sm:$0xff] %vm119_vm3, %v14441_v31  ;;  %188 = vst.msk [vmem:[#allocation4 + $0x220] sm:$0xff] %vm119_vm3, %v14441_v31 }
  0xd9   :  { %189 = vst.msk [vmem:[#allocation4 + $0x228] sm:$0xff] %vm119_vm3, %v14441_v31  ;;  %190 = vst.msk [vmem:[#allocation4 + $0x230] sm:$0xff] %vm119_vm3, %v14441_v31 }
  0xda   :  { %2114 = vmatpush1.bf16.msra.mxu0 %v8444_v15  ;;  %2155 = vmatpush1.bf16.msra.mxu1 %v8446_v16  ;;  %v450_v15 = vld [vmem:[%s14433_s1 + $0x770] sm:$0xff]  ;;  %v443_v16 = vld [vmem:[%s14433_s1 + $0x738] sm:$0xff]  ;;  %191 = vst.msk [vmem:[#allocation4 + $0x238] sm:$0xff] %vm119_vm3, %v14441_v31  ;;  %192 = vst.msk [vmem:[#allocation4 + $0x240] sm:$0xff] %vm119_vm3, %v14441_v31 }
  0xdb   :  { %2115 = vmatprep.subr.bf16.mxu0 %v8461_v17  ;;  %2156 = vmatprep.subr.bf16.mxu1 %v8463_v18  ;;  %v451_v17 = vld [vmem:[%s14433_s1 + $0x778] sm:$0xff]  ;;  %v8572_v18 = vcombine.low %v426_v6, %v434_v7  ;;  %v8589_v20 = vcombine.high %v442_v14, %v450_v15  ;;  %v10767_v6 = vld [vmem:[%s14436_s2 + $0x8] sm:$0xff]   ;;  %193 = vst.msk [vmem:[#allocation4 + $0x248] sm:$0xff] %vm119_vm3, %v14441_v31  ;;  %194 = vst.msk [vmem:[#allocation4 + $0x250] sm:$0xff] %vm119_vm3, %v14441_v31 }
  0xdc   :  { %v8591_v22 = vcombine.high %v443_v16, %v451_v17  ;;  %v8590_v56 = vcombine.low %v443_v16, %v451_v17  ;;  %v490_v16 = vsub.s32 4, %v11038_v46  ;;  %v498_v17 = vsub.s32 6, %v11038_v46  ;;  %195 = vst.msk [vmem:[#allocation4 + $0x258] sm:$0xff] %vm119_vm3, %v14441_v31  ;;  %196 = vst.msk [vmem:[#allocation4 + $0x260] sm:$0xff] %vm119_vm3, %v14441_v31 }
  0xdd   :  { %197 = vst.msk [vmem:[#allocation4 + $0x268] sm:$0xff] %vm119_vm3, %v14441_v31  ;;  %198 = vst.msk [vmem:[#allocation4 + $0x270] sm:$0xff] %vm119_vm3, %v14441_v31 }
  0xde   :  { %2116 = vmatpush1.bf16.msra.mxu0 %v8460_v24  ;;  %2157 = vmatpush1.bf16.msra.mxu1 %v8462_v25  ;;  %v466_v24 = vld [vmem:[%s14433_s1 + $0x7f0] sm:$0xff]  ;;  %v459_v25 = vld [vmem:[%s14433_s1 + $0x7b8] sm:$0xff]  ;;  %199 = vst.msk [vmem:[#allocation4 + $0x278] sm:$0xff] %vm119_vm3, %v14441_v31  ;;  %200 = vst.msk [vmem:[#allocation4 + $0x280] sm:$0xff] %vm119_vm3, %v14441_v31 }
  0xdf   :  { %2117 = vmatprep.subr.bf16.mxu0 %v8477_v26  ;;  %2158 = vmatprep.subr.bf16.mxu1 %v8479_v27  ;;  %v467_v26 = vld [vmem:[%s14433_s1 + $0x7f8] sm:$0xff]  ;;  %v8588_v27 = vcombine.low %v442_v14, %v450_v15  ;;  %v8605_v59 = vcombine.high %v458_v23, %v466_v24  ;;  %v8604_v29 = vcombine.low %v458_v23, %v466_v24 }
  0xe0   :  { %v8607_v28 = vcombine.high %v459_v25, %v467_v26  ;;  %201 = vst.msk [vmem:[#allocation4 + $0x288] sm:$0xff] %vm119_vm3, %v14441_v31  ;;  %202 = vst.msk [vmem:[#allocation4 + $0x290] sm:$0xff] %vm119_vm3, %v14441_v31 }
  0xe1   :  { %203 = vst.msk [vmem:[#allocation4 + $0x298] sm:$0xff] %vm119_vm3, %v14441_v31  ;;  %204 = vst.msk [vmem:[#allocation4 + $0x2a0] sm:$0xff] %vm119_vm3, %v14441_v31 }
  0xe2   :  { %2118 = vmatpush1.bf16.msra.mxu0 %v8476_v30  ;;  %2159 = vmatpush1.bf16.msra.mxu1 %v8478_v32  ;;  %v8606_v30 = vcombine.low %v459_v25, %v467_v26  ;;  %v474_v32 = vsub.s32 0, %v11038_v46  ;;  %205 = vst.msk [vmem:[#allocation4 + $0x2a8] sm:$0xff] %vm119_vm3, %v14441_v31  ;;  %206 = vst.msk [vmem:[#allocation4 + $0x2b0] sm:$0xff] %vm119_vm3, %v14441_v31 }
  0xe3   :  { %2119 = vmatprep.subr.bf16.mxu0 %v8493_v33  ;;  %2160 = vmatprep.subr.bf16.mxu1 %v8495_v34  ;;  %v12017_v33 = vld [vmem:[%s14435_s4] sm:$0xff]  ;;  %v482_v34 = vsub.s32 2, %v11038_v46  ;;  %207 = vst.msk [vmem:[#allocation4 + $0x2b8] sm:$0xff] %vm119_vm3, %v14441_v31  ;;  %208 = vst.msk [vmem:[#allocation4 + $0x2c0] sm:$0xff] %vm119_vm3, %v14441_v31 }
  0xe4   :  { %209 = vst.msk [vmem:[#allocation4 + $0x2c8] sm:$0xff] %vm119_vm3, %v14441_v31  ;;  %210 = vst.msk [vmem:[#allocation4 + $0x2d0] sm:$0xff] %vm119_vm3, %v14441_v31 }
  0xe6   :  { %2120 = vmatpush1.bf16.msra.mxu0 %v8492_v39  ;;  %2161 = vmatpush1.bf16.msra.mxu1 %v8494_v40  ;;  %v475_v39 = vrot.slane %v12017_v33, %v474_v32  ;;  %v479_v40 = vrot.slane %v12017_v33, %v478_v35 }
  0xe7   :  { %2121 = vmatprep.subr.bf16.mxu0 %v8509_v41  ;;  %2162 = vmatprep.subr.bf16.mxu1 %v8511_v42  ;;  %v487_v41 = vrot.slane %v12017_v33, %v486_v36 }
  0xea   :  { %2122 = vmatpush1.bf16.msra.mxu0 %v8508_v48  ;;  %2163 = vmatpush1.bf16.msra.mxu1 %v8510_v49 }
  0xeb   :  { %2123 = vmatprep.subr.bf16.mxu0 %v8525_v50  ;;  %2164 = vmatprep.subr.bf16.mxu1 %v8527_v51 }
  0xee   :  { %2124 = vmatpush1.bf16.msra.mxu0 %v8524_v57  ;;  %2165 = vmatpush1.bf16.msra.mxu1 %v8526_v58 }
  0xef   :  { %2125 = vmatprep.subr.bf16.mxu0 %v8541_v60  ;;  %2166 = vmatprep.subr.bf16.mxu1 %v8543_v3  ;;  %v12035_v60 = vsub.s32 %v2221_v43, %v11038_v46 }
  0xf2   :  { %2126 = vmatpush1.bf16.msra.mxu0 %v8540_v1  ;;  %2167 = vmatpush1.bf16.msra.mxu1 %v8542_v2 }
  0xf3   :  { %2127 = vmatprep.subr.bf16.mxu0 %v8557_v4  ;;  %2168 = vmatprep.subr.bf16.mxu1 %v8559_v5  ;;  %v10765_v4 = vld [vmem:[%s14436_s2] sm:$0xff]   ;;  %v10766_v5 = vld [vmem:[%s14436_s2 + $0x10] sm:$0xff]  }
  0xf6   :  { %2128 = vmatpush1.bf16.msra.mxu0 %v8556_v10  ;;  %2169 = vmatpush1.bf16.msra.mxu1 %v8558_v11 }
  0xf7   :  { %2129 = vmatprep.subr.bf16.mxu0 %v8573_v12  ;;  %2170 = vmatprep.subr.bf16.mxu1 %v8575_v13  ;;  %v10768_v12 = vld [vmem:[%s14436_s2 + $0x18] sm:$0xff]  }
  0xfa   :  { %2130 = vmatpush1.bf16.msra.mxu0 %v8572_v18  ;;  %2171 = vmatpush1.bf16.msra.mxu1 %v8574_v19  ;;  %v494_v18 = vsub.s32 5, %v11038_v46  ;;  %v502_v19 = vsub.s32 7, %v11038_v46 }
  0xfb   :  { %2131 = vmatprep.subr.bf16.mxu0 %v8589_v20  ;;  %2172 = vmatprep.subr.bf16.mxu1 %v8591_v22  ;;  %v491_v20 = vrot.slane %v12017_v33, %v490_v16  ;;  %v499_v22 = vrot.slane %v12017_v33, %v498_v17 }
  0xfc   :  { %v495_v23 = vrot.slane %v12017_v33, %v494_v18  ;;  %v503_v24 = vrot.slane %v12017_v33, %v502_v19 }
  0xfe   :  { %2132 = vmatpush1.bf16.msra.mxu0 %v8588_v27  ;;  %2173 = vmatpush1.bf16.msra.mxu1 %v8590_v56 }
  0xff   :  { %2133 = vmatprep.subr.bf16.mxu0 %v8605_v59  ;;  %2174 = vmatprep.subr.bf16.mxu1 %v8607_v28 }
 0x102   :  { %2134 = vmatpush1.bf16.msra.mxu0 %v8604_v29  ;;  %2175 = vmatpush1.bf16.msra.mxu1 %v8606_v30 }
 0x103   :  { %9398 = vmatprep.subr.bf16.mxu0 %v14441_v31  ;;  %9566 = vmatprep.subr.bf16.mxu1 %v14441_v31 }
 0x105   :  { %2136 = vmatmul.mubr.bf16.vlgmr.msra.gmra.mrb[12].mxu0 %v11195_v21  ;;  %2177 = vmatmul.mubr.bf16.vlgmr.msra.gmra.mrb[12].mxu1 %v11195_v21  ;;  %v483_v21 = vrot.slane %v12017_v33, %v482_v34 }
 0x106   :  { %9567 = vmatpush3.bf16.msra.mxu1 %v10765_v4  ;;  %9399 = vmatpush3.bf16.msra.mxu0 %v10766_v5 }
 0x107   :  { %9568 = vmatprep.subr.bf16.mxu1 %v14441_v31  ;;  %9400 = vmatprep.subr.bf16.mxu0 %v14441_v31 }
 0x108   :  { %9570 = vmatprep.mubr.msk.bf16.mxu1 %vm10924_vm2, %v14441_v31  ;;  %9402 = vmatprep.mubr.msk.bf16.mxu0 %vm10924_vm2, %v14441_v31 }
 0x10a   :  { %9569 = vmatpush3.bf16.msra.mxu1 %v10767_v6  ;;  %9401 = vmatpush3.bf16.msra.mxu0 %v10768_v12 }
 0x10b   :  { %9902 = vmatprep.subr.bf16.mxu1 %v14441_v31  ;;  %9734 = vmatprep.subr.bf16.mxu0 %v14441_v31 }
 0x118   :  { %v1891_v42 = vpop.f32.mrb[0].mxu0  ;;  %v1932_v45 = vpop.f32.mrb[0].mxu1 }
 0x119   :  { %v1892_v44 = vadd.f32 %v1891_v42, %v475_v39  ;;  %v1893_v47 = vpop.f32.mrb[1].mxu0  ;;  %v1933_v48 = vadd.f32 %v1932_v45, %v483_v21  ;;  %v1934_v50 = vpop.f32.mrb[1].mxu1 }
 0x11a   :  { %v1894_v49 = vadd.f32 %v1893_v47, %v479_v40  ;;  %v1895_v51 = vpop.f32.mrb[2].mxu0  ;;  %v1935_v53 = vadd.f32 %v1934_v50, %v487_v41  ;;  %v1936_v54 = vpop.f32.mrb[2].mxu1 }
 0x11b   :  { %v2185_v52 = vmax.f32 %v1892_v44, 0.0  ;;  %v1896_v55 = vpop.f32.mrb[3].mxu0  ;;  %v2187_v57 = vmax.f32 %v1933_v48, 0.0  ;;  %v1937_v3 = vpop.f32.mrb[3].mxu1 }
 0x11c   :  { %v2186_v58 = vmax.f32 %v1894_v49, 0.0  ;;  %v2188_v61 = vmax.f32 %v1935_v53, 0.0 }
 0x11e   :  { %v2217_v62 = vcombine.low %v2185_v52, %v2186_v58  ;;  %v2218_v63 = vcombine.low %v2187_v57, %v2188_v61  ;;  %v12112_v58 = vld [vmem:[%s14435_s4 + $0x8] sm:$0xff] }
 0x11f   :  { %v507_v3 = vrot.slane %v12112_v58, %v474_v32  ;;  %v515_v61 = vrot.slane %v12112_v58, %v482_v34 }
 0x120   :  { %v2225_v0 = vrot.slane %v2217_v62, %v12035_v60  ;;  %v2232_v1 = vrot.slane %v2218_v63, %v12035_v60  ;;  %v511_v62 = vrot.slane %v12112_v58, %v478_v35  ;;  %v519_v63 = vrot.slane %v12112_v58, %v486_v36 }
 0x122   :  { %v2233_v2 = vcombine.low %v2225_v0, %v2232_v1 }
 0x124   :  { %2289 = vst [vmem:[#allocation2] sm:$0xff] %v2233_v2 }
 0x12b   :  { %v2293_v7 = vld [vmem:[#allocation2] sm:$0x3]  ;;  %v2335_v8 = vld [vmem:[#allocation2 + $0x2] sm:$0x3]  ;;  %v2376_v9 = vld [vmem:[#allocation2 + $0x4] sm:$0x3] }
 0x12c   :  { %2295 = vst.msk [vmem:[#allocation3] sm:$0x3] %vm2294_vm1, %v2293_v7  ;;  %v2417_v10 = vld [vmem:[#allocation2 + $0x6] sm:$0x3]  ;;  %2336 = vst.msk [vmem:[#allocation3 + $0x20] sm:$0x3] %vm2294_vm1, %v2335_v8 }
 0x12d   :  { %2377 = vst.msk [vmem:[#allocation3 + $0x48] sm:$0x3] %vm2294_vm1, %v2376_v9  ;;  %v8610_v11 = vld.sshfl [vmem:[#allocation2] sm:$0x3 pattern:$0x76325410] }
 0x12e   :  { %2418 = vst.msk [vmem:[#allocation3 + $0x68] sm:$0x3] %vm2294_vm1, %v2417_v10  ;;  %2331 = vrot.lane.b32.xlu1 %v8610_v11, %s10922_s0  ;;  %2305 = vrot.lane.b32.xlu0 %v8610_v11, %s10923_s20  ;;  %v8611_v13 = vld.sshfl [vmem:[#allocation2 + $0x2] sm:$0x3 pattern:$0x76325410] }
 0x12f   :  { %v8615_v14 = vld.sshfl [vmem:[#allocation2 + $0x4] sm:$0x3 pattern:$0x76325410] }
 0x130   :  { %v8617_v15 = vld.sshfl [vmem:[#allocation2 + $0x6] sm:$0x3 pattern:$0x76325410] }
 0x132   :  { %2346 = vrot.lane.b32.xlu1 %v8611_v13, %s10923_s20  ;;  %2318 = vrot.lane.b32.xlu0 %v8610_v11, %s10925_s23 }
 0x136   :  { %2372 = vrot.lane.b32.xlu1 %v8611_v13, %s10922_s0  ;;  %2359 = vrot.lane.b32.xlu0 %v8611_v13, %s10925_s23 }
 0x13a   :  { %2400 = vrot.lane.b32.xlu1 %v8615_v14, %s10925_s23  ;;  %2387 = vrot.lane.b32.xlu0 %v8615_v14, %s10923_s20 }
 0x13e   :  { %2428 = vrot.lane.b32.xlu1 %v8617_v15, %s10923_s20  ;;  %2413 = vrot.lane.b32.xlu0 %v8615_v14, %s10922_s0 }
 0x142   :  { %2454 = vrot.lane.b32.xlu1 %v8617_v15, %s10922_s0  ;;  %2441 = vrot.lane.b32.xlu0 %v8617_v15, %s10925_s23 }
 0x158   :  { %v1973_v25 = vpop.f32.mrb[4].mxu0  ;;  %v2014_v27 = vpop.f32.mrb[4].mxu1 }
 0x159   :  { %v1974_v26 = vadd.f32 %v1973_v25, %v491_v20  ;;  %v1975_v56 = vpop.f32.mrb[5].mxu0  ;;  %v2015_v59 = vadd.f32 %v2014_v27, %v499_v22  ;;  %v2016_v29 = vpop.f32.mrb[5].mxu1 }
 0x15a   :  { %v1976_v28 = vadd.f32 %v1975_v56, %v495_v23  ;;  %v1977_v30 = vpop.f32.mrb[6].mxu0  ;;  %v2017_v38 = vadd.f32 %v2016_v29, %v503_v24  ;;  %v2018_v39 = vpop.f32.mrb[6].mxu1  ;;  %v10770_v29 = vld [vmem:[%s14436_s2 + $0x30] sm:$0xff]  }
 0x15b   :  { %v2189_v37 = vmax.f32 %v1974_v26, 0.0  ;;  %v1978_v21 = vpop.f32.mrb[7].mxu0  ;;  %v2191_v40 = vmax.f32 %v2015_v59, 0.0  ;;  %v2019_v42 = vpop.f32.mrb[7].mxu1  ;;  %v2950_v59 = vld [vmem:[#allocation3] sm:$0xff] }
 0x15c   :  { %v2190_v41 = vmax.f32 %v1976_v28, 0.0  ;;  %v2192_v43 = vmax.f32 %v2017_v38, 0.0 }
 0x15e   :  { %v2234_v44 = vcombine.low %v2189_v37, %v2190_v41  ;;  %v2235_v45 = vcombine.low %v2191_v40, %v2192_v43 }
 0x160   :  { %v2242_v33 = vrot.slane %v2234_v44, %v12035_v60  ;;  %v2249_v47 = vrot.slane %v2235_v45, %v12035_v60  ;;  %v10769_v44 = vld [vmem:[%s14436_s2 + $0x20] sm:$0xff]  }
 0x162   :  { %v2250_v48 = vcombine.low %v2242_v33, %v2249_v47 }
 0x164   :  { %2290 = vst [vmem:[#allocation2 + $0x8] sm:$0xff] %v2250_v48 }
 0x16b   :  { %v2458_v49 = vld [vmem:[#allocation2 + $0x8] sm:$0x3]  ;;  %v2499_v50 = vld [vmem:[#allocation2 + $0xa] sm:$0x3]  ;;  %v2540_v51 = vld [vmem:[#allocation2 + $0xc] sm:$0x3] }
 0x16c   :  { %v2581_v52 = vld [vmem:[#allocation2 + $0xe] sm:$0x3]  ;;  %2459 = vst.msk [vmem:[#allocation3 + $0x90] sm:$0x3] %vm2294_vm1, %v2458_v49  ;;  %2500 = vst.msk [vmem:[#allocation3 + $0xb0] sm:$0x3] %vm2294_vm1, %v2499_v50 }
 0x16d   :  { %2541 = vst.msk [vmem:[#allocation3 + $0xd8] sm:$0x3] %vm2294_vm1, %v2540_v51  ;;  %v8621_v53 = vld.sshfl [vmem:[#allocation2 + $0x8] sm:$0x3 pattern:$0x76325410] }
 0x16e   :  { %2582 = vst.msk [vmem:[#allocation3 + $0xf8] sm:$0x3] %vm2294_vm1, %v2581_v52  ;;  %2482 = vrot.lane.b32.xlu1 %v8621_v53, %s10925_s23  ;;  %2469 = vrot.lane.b32.xlu0 %v8621_v53, %s10923_s20  ;;  %v8623_v54 = vld.sshfl [vmem:[#allocation2 + $0xa] sm:$0x3 pattern:$0x76325410] }
 0x16f   :  { %v8627_v55 = vld.sshfl [vmem:[#allocation2 + $0xc] sm:$0x3 pattern:$0x76325410] }
 0x170   :  { %v8629_v57 = vld.sshfl [vmem:[#allocation2 + $0xe] sm:$0x3 pattern:$0x76325410] }
 0x172   :  { %2510 = vrot.lane.b32.xlu1 %v8623_v54, %s10923_s20  ;;  %2495 = vrot.lane.b32.xlu0 %v8621_v53, %s10922_s0  ;;  %v2954_v53 = vld [vmem:[#allocation3 + $0x20] sm:$0xff] }
 0x176   :  { %2536 = vrot.lane.b32.xlu1 %v8623_v54, %s10922_s0  ;;  %2523 = vrot.lane.b32.xlu0 %v8623_v54, %s10925_s23 }
 0x17a   :  { %2564 = vrot.lane.b32.xlu1 %v8627_v55, %s10925_s23  ;;  %2551 = vrot.lane.b32.xlu0 %v8627_v55, %s10923_s20 }
 0x17e   :  { %2592 = vrot.lane.b32.xlu1 %v8629_v57, %s10923_s20  ;;  %2577 = vrot.lane.b32.xlu0 %v8627_v55, %s10922_s0 }
 0x182   :  { %2618 = vrot.lane.b32.xlu1 %v8629_v57, %s10922_s0  ;;  %2605 = vrot.lane.b32.xlu0 %v8629_v57, %s10925_s23 }
 0x198   :  { %v2055_v0 = vpop.f32.mrb[8].mxu0  ;;  %v2096_v2 = vpop.f32.mrb[8].mxu1 }
 0x199   :  { %v2056_v1 = vadd.f32 %v2055_v0, %v507_v3  ;;  %v2057_v4 = vpop.f32.mrb[9].mxu0  ;;  %v2097_v5 = vadd.f32 %v2096_v2, %v515_v61  ;;  %v2098_v7 = vpop.f32.mrb[9].mxu1  ;;  %v2958_v2 = vld [vmem:[#allocation3 + $0x40] sm:$0xff] }
 0x19a   :  { %v2058_v6 = vadd.f32 %v2057_v4, %v511_v62  ;;  %v2059_v32 = vpop.f32.mrb[10].mxu0  ;;  %v2099_v9 = vadd.f32 %v2098_v7, %v519_v63  ;;  %v2100_v10 = vpop.f32.mrb[10].mxu1  ;;  %v2959_v4 = vld [vmem:[#allocation3 + $0x48] sm:$0xff] }
 0x19b   :  { %v2193_v8 = vmax.f32 %v2056_v1, 0.0  ;;  %v2060_v34 = vpop.f32.mrb[11].mxu0  ;;  %v2195_v11 = vmax.f32 %v2097_v5, 0.0  ;;  %v2101_v13 = vpop.f32.mrb[11].mxu1  ;;  %v10771_v10 = vld [vmem:[%s14436_s2 + $0x28] sm:$0xff]  }
 0x19c   :  { %v2194_v12 = vmax.f32 %v2058_v6, 0.0  ;;  %v2196_v35 = vmax.f32 %v2099_v9, 0.0  ;;  %v3035_v6 = vpack.c.bf16 %v2959_v4, %v2958_v2  ;;  %v10772_v34 = vld [vmem:[%s14436_s2 + $0x38] sm:$0xff]   ;;  %v531_v13 = vrot.slane %v12112_v58, %v498_v17 }
 0x19e   :  { %v2251_v14 = vcombine.low %v2193_v8, %v2194_v12  ;;  %v2252_v15 = vcombine.low %v2195_v11, %v2196_v35  ;;  %v523_v12 = vrot.slane %v12112_v58, %v490_v16  ;;  %v527_v35 = vrot.slane %v12112_v58, %v494_v18 }
 0x1a0   :  { %v2259_v36 = vrot.slane %v2251_v14, %v12035_v60  ;;  %v2332_v20 = vpop.permute.xlu1 %2331  ;;  %v2306_v22 = vpop.permute.xlu0 %2305  ;;  %v2266_v23 = vrot.slane %v2252_v15, %v12035_v60  ;;  %v535_v15 = vrot.slane %v12112_v58, %v502_v19 }
 0x1a1   :  { %2334 = vst.msk [vmem:[#allocation3 + $0x18] sm:$0x3] %vm2294_vm1, %v2332_v20  ;;  %2308 = vst.msk [vmem:[#allocation3 + $0x8] sm:$0x3] %vm2294_vm1, %v2306_v22 }
 0x1a2   :  { %v2267_v24 = vcombine.low %v2259_v36, %v2266_v23  ;;  %v2963_v36 = vld [vmem:[#allocation3 + $0x68] sm:$0xff] }
 0x1a4   :  { %v2347_v25 = vpop.permute.xlu1 %2346  ;;  %v2319_v26 = vpop.permute.xlu0 %2318  ;;  %2291 = vst [vmem:[#allocation2 + $0x10] sm:$0xff] %v2267_v24 }
 0x1a5   :  { %2349 = vst.msk [vmem:[#allocation3 + $0x28] sm:$0x3] %vm2294_vm1, %v2347_v25  ;;  %2321 = vst.msk [vmem:[#allocation3 + $0x10] sm:$0x3] %vm2294_vm1, %v2319_v26 }
 0x1a8   :  { %v2373_v27 = vpop.permute.xlu1 %2372  ;;  %v2360_v56 = vpop.permute.xlu0 %2359  ;;  %v2951_v28 = vld [vmem:[#allocation3 + $0x8] sm:$0xff]  ;;  %v2953_v49 = vld [vmem:[#allocation3 + $0x18] sm:$0xff] }
 0x1a9   :  { %2375 = vst.msk [vmem:[#allocation3 + $0x38] sm:$0x3] %vm2294_vm1, %v2373_v27  ;;  %2362 = vst.msk [vmem:[#allocation3 + $0x30] sm:$0x3] %vm2294_vm1, %v2360_v56  ;;  %v3031_v30 = vpack.c.bf16 %v2951_v28, %v2950_v59  ;;  %v3078_v55 = vpack.c.bf16 %v2954_v53, %v2953_v49 }
 0x1ab   :  { %9571 = vmatmul.mubr.msk.bf16.vlgmr.msra.gmra.mrb[16].mxu1 %vm27_vm0, %v3031_v30  ;;  %v2622_v37 = vld [vmem:[#allocation2 + $0x10] sm:$0x3]  ;;  %v2663_v38 = vld [vmem:[#allocation2 + $0x12] sm:$0x3]  ;;  %v2704_v39 = vld [vmem:[#allocation2 + $0x14] sm:$0x3] }
 0x1ac   :  { %v2401_v21 = vpop.permute.xlu1 %2400  ;;  %v2388_v40 = vpop.permute.xlu0 %2387  ;;  %9903 = vmatpush3.bf16.msra.mxu1 %v10770_v29  ;;  %9574 = vmatprep.mubr.msk.bf16.mxu1 %vm10924_vm2, %v14441_v31  ;;  %v2745_v41 = vld [vmem:[#allocation2 + $0x16] sm:$0x3]  ;;  %2623 = vst.msk [vmem:[#allocation3 + $0x120] sm:$0x3] %vm2294_vm1, %v2622_v37  ;;  %2664 = vst.msk [vmem:[#allocation3 + $0x140] sm:$0x3] %vm2294_vm1, %v2663_v38 }
 0x1ad   :  { %2705 = vst.msk [vmem:[#allocation3 + $0x168] sm:$0x3] %vm2294_vm1, %v2704_v39  ;;  %2403 = vst.msk [vmem:[#allocation3 + $0x58] sm:$0x3] %vm2294_vm1, %v2401_v21  ;;  %9904 = vmatprep.subr.bf16.mxu1 %v14441_v31  ;;  %v2952_v43 = vld [vmem:[#allocation3 + $0x10] sm:$0xff]  ;;  %v2955_v54 = vld [vmem:[#allocation3 + $0x28] sm:$0xff] }
 0x1ae   :  { %2390 = vst.msk [vmem:[#allocation3 + $0x50] sm:$0x3] %vm2294_vm1, %v2388_v40  ;;  %v8633_v42 = vld.sshfl [vmem:[#allocation2 + $0x10] sm:$0x3 pattern:$0x76325410]  ;;  %v3077_v45 = vpack.c.bf16 %v2952_v43, %v2951_v28  ;;  %v3032_v50 = vpack.c.bf16 %v2953_v49, %v2952_v43  ;;  %v3033_v3 = vpack.c.bf16 %v2955_v54, %v2954_v53 }
 0x1af   :  { %2746 = vst.msk [vmem:[#allocation3 + $0x188] sm:$0x3] %vm2294_vm1, %v2745_v41  ;;  %2646 = vrot.lane.b32.xlu1 %v8633_v42, %s10925_s23  ;;  %2633 = vrot.lane.b32.xlu0 %v8633_v42, %s10923_s20  ;;  %v8635_v33 = vld.sshfl [vmem:[#allocation2 + $0x12] sm:$0x3 pattern:$0x76325410] }
 0x1b0   :  { %v2429_v47 = vpop.permute.xlu1 %2428  ;;  %v2414_v48 = vpop.permute.xlu0 %2413  ;;  %9403 = vmatmul.mubr.msk.bf16.vlgmr.msra.gmra.mrb[16].mxu0 %vm27_vm0, %v3077_v45  ;;  %v8639_v57 = vld.sshfl [vmem:[#allocation2 + $0x14] sm:$0x3 pattern:$0x76325410]  ;;  %v2957_v63 = vld [vmem:[#allocation3 + $0x38] sm:$0xff]  ;;  %9905 = vmatpush3.bf16.msra.mxu1 %v10772_v34 }
 0x1b1   :  { %2431 = vst.msk [vmem:[#allocation3 + $0x70] sm:$0x3] %vm2294_vm1, %v2429_v47  ;;  %2416 = vst.msk [vmem:[#allocation3 + $0x60] sm:$0x3] %vm2294_vm1, %v2414_v48  ;;  %9735 = vmatpush3.bf16.msra.mxu0 %v10769_v44  ;;  %9406 = vmatprep.mubr.msk.bf16.mxu0 %vm10924_vm2, %v14441_v31  ;;  %v2956_v62 = vld [vmem:[#allocation3 + $0x30] sm:$0xff]  ;;  %v3080_v5 = vpack.c.bf16 %v2958_v2, %v2957_v63 }
 0x1b2   :  { %9736 = vmatprep.subr.bf16.mxu0 %v14441_v31  ;;  %v8641_v61 = vld.sshfl [vmem:[#allocation2 + $0x16] sm:$0x3 pattern:$0x76325410]  ;;  %v3079_v0 = vpack.c.bf16 %v2956_v62, %v2955_v54  ;;  %v3034_v1 = vpack.c.bf16 %v2957_v63, %v2956_v62  ;;  %10242 = vmatprep.subr.bf16.mxu1 %v14441_v31 }
 0x1b3   :  { %2674 = vrot.lane.b32.xlu1 %v8635_v33, %s10923_s20  ;;  %2659 = vrot.lane.b32.xlu0 %v8633_v42, %s10922_s0  ;;  %v2968_v53 = vld [vmem:[#allocation3 + $0x90] sm:$0xff] }
 0x1b4   :  { %9575 = vmatmul.mubr.msk.bf16.gmra.mrb[20].mxu1 %vm27_vm0, %v3032_v50  ;;  %v2455_v51 = vpop.permute.xlu1 %2454  ;;  %v2442_v52 = vpop.permute.xlu0 %2441  ;;  %v2961_v32 = vld [vmem:[#allocation3 + $0x58] sm:$0xff] }
 0x1b5   :  { %9578 = vmatprep.mubr.msk.bf16.mxu1 %vm10924_vm2, %v14441_v31  ;;  %2457 = vst.msk [vmem:[#allocation3 + $0x80] sm:$0x3] %vm2294_vm1, %v2455_v51  ;;  %2444 = vst.msk [vmem:[#allocation3 + $0x78] sm:$0x3] %vm2294_vm1, %v2442_v52  ;;  %v2960_v7 = vld [vmem:[#allocation3 + $0x50] sm:$0xff]  ;;  %9737 = vmatpush3.bf16.msra.mxu0 %v10771_v10  ;;  %v2967_v51 = vld [vmem:[#allocation3 + $0x88] sm:$0xff] }
 0x1b6   :  { %v3081_v8 = vpack.c.bf16 %v2960_v7, %v2959_v4  ;;  %v3036_v9 = vpack.c.bf16 %v2961_v32, %v2960_v7  ;;  %10070 = vmatprep.subr.bf16.mxu0 %v14441_v31 }
 0x1b7   :  { %2700 = vrot.lane.b32.xlu1 %v8635_v33, %s10922_s0  ;;  %2687 = vrot.lane.b32.xlu0 %v8635_v33, %s10925_s23 }
 0x1b8   :  { %9407 = vmatmul.mubr.msk.bf16.gmra.mrb[20].mxu0 %vm27_vm0, %v3078_v55  ;;  %v2962_v11 = vld [vmem:[#allocation3 + $0x60] sm:$0xff]  ;;  %v2964_v28 = vld [vmem:[#allocation3 + $0x70] sm:$0xff] }
 0x1b9   :  { %9410 = vmatprep.mubr.msk.bf16.mxu0 %vm10924_vm2, %v14441_v31  ;;  %v3082_v14 = vpack.c.bf16 %v2962_v11, %v2961_v32  ;;  %v3037_v23 = vpack.c.bf16 %v2963_v36, %v2962_v11  ;;  %v3083_v21 = vpack.c.bf16 %v2964_v28, %v2963_v36 }
 0x1bb   :  { %2728 = vrot.lane.b32.xlu1 %v8639_v57, %s10925_s23  ;;  %2715 = vrot.lane.b32.xlu0 %v8639_v57, %s10923_s20 }
 0x1bc   :  { %9579 = vmatmul.mubr.msk.bf16.gmra.mrb[24].mxu1 %vm27_vm0, %v3033_v3  ;;  %v2965_v38 = vld [vmem:[#allocation3 + $0x78] sm:$0xff]  ;;  %v2966_v48 = vld [vmem:[#allocation3 + $0x80] sm:$0xff] }
 0x1bd   :  { %9582 = vmatprep.mubr.msk.bf16.mxu1 %vm10924_vm2, %v14441_v31  ;;  %v3038_v44 = vpack.c.bf16 %v2965_v38, %v2964_v28  ;;  %v3039_v52 = vpack.c.bf16 %v2967_v51, %v2966_v48  ;;  %v2981_v28 = vld [vmem:[#allocation3 + $0xf8] sm:$0xff] }
 0x1bf   :  { %2756 = vrot.lane.b32.xlu1 %v8641_v61, %s10923_s20  ;;  %2741 = vrot.lane.b32.xlu0 %v8639_v57, %s10922_s0 }
 0x1c0   :  { %9411 = vmatmul.mubr.msk.bf16.gmra.mrb[24].mxu0 %vm27_vm0, %v3079_v0 }
 0x1c1   :  { %9414 = vmatprep.mubr.msk.bf16.mxu0 %vm10924_vm2, %v14441_v31 }
 0x1c3   :  { %2782 = vrot.lane.b32.xlu1 %v8641_v61, %s10922_s0  ;;  %2769 = vrot.lane.b32.xlu0 %v8641_v61, %s10925_s23 }
 0x1c4   :  { %9583 = vmatmul.mubr.msk.bf16.gmra.mrb[28].mxu1 %vm27_vm0, %v3034_v1  ;;  %v3085_v1 = vpack.c.bf16 %v2968_v53, %v2967_v51  ;;  %v2986_v51 = vld [vmem:[#allocation3 + $0x120] sm:$0xff] }
 0x1c5   :  { %9586 = vmatprep.mubr.msk.bf16.mxu1 %vm10924_vm2, %v14441_v31 }
 0x1c8   :  { %9415 = vmatmul.mubr.msk.bf16.gmra.mrb[28].mxu0 %vm27_vm0, %v3080_v5 }
 0x1c9   :  { %9418 = vmatprep.mubr.msk.bf16.mxu0 %vm10924_vm2, %v14441_v31 }
 0x1cc   :  { %9587 = vmatmul.mubr.msk.bf16.gmra.mrb[32].mxu1 %vm27_vm0, %v3035_v6 }
 0x1cd   :  { %9590 = vmatprep.mubr.msk.bf16.mxu1 %vm10924_vm2, %v14441_v31 }
 0x1d0   :  { %9419 = vmatmul.mubr.msk.bf16.gmra.mrb[32].mxu0 %vm27_vm0, %v3081_v8 }
 0x1d1   :  { %9422 = vmatprep.mubr.msk.bf16.mxu0 %vm10924_vm2, %v14441_v31 }
 0x1d4   :  { %9591 = vmatmul.mubr.msk.bf16.gmra.mrb[36].mxu1 %vm27_vm0, %v3036_v9 }
 0x1d5   :  { %9594 = vmatprep.mubr.msk.bf16.mxu1 %vm10924_vm2, %v14441_v31 }
 0x1d8   :  { %v2137_v16 = vpop.f32.mrb[12].mxu0  ;;  %9423 = vmatmul.mubr.msk.bf16.gmra.mrb[36].mxu0 %vm27_vm0, %v3082_v14  ;;  %v2178_v22 = vpop.f32.mrb[12].mxu1 }
 0x1d9   :  { %v2138_v20 = vadd.f32 %v2137_v16, %v523_v12  ;;  %v2139_v17 = vpop.f32.mrb[13].mxu0  ;;  %v2179_v24 = vadd.f32 %v2178_v22, %v531_v13  ;;  %v2180_v18 = vpop.f32.mrb[13].mxu1  ;;  %9426 = vmatprep.mubr.msk.bf16.mxu0 %vm10924_vm2, %v14441_v31  ;;  %v2972_v13 = vld [vmem:[#allocation3 + $0xb0] sm:$0xff] }
 0x1da   :  { %v2140_v25 = vadd.f32 %v2139_v17, %v527_v35  ;;  %v2141_v26 = vpop.f32.mrb[14].mxu0  ;;  %v2181_v56 = vadd.f32 %v2180_v18, %v535_v15  ;;  %v2182_v46 = vpop.f32.mrb[14].mxu1  ;;  %v2976_v17 = vld [vmem:[#allocation3 + $0xd0] sm:$0xff] }
 0x1db   :  { %v2197_v27 = vmax.f32 %v2138_v20, 0.0  ;;  %v2142_v19 = vpop.f32.mrb[15].mxu0  ;;  %v2199_v58 = vmax.f32 %v2179_v24, 0.0  ;;  %v2183_v29 = vpop.f32.mrb[15].mxu1 }
 0x1dc   :  { %9595 = vmatmul.mubr.msk.bf16.gmra.mrb[40].mxu1 %vm27_vm0, %v3037_v23  ;;  %v2198_v59 = vmax.f32 %v2140_v25, 0.0  ;;  %v2200_v30 = vmax.f32 %v2181_v56, 0.0  ;;  %v2977_v23 = vld [vmem:[#allocation3 + $0xd8] sm:$0xff] }
 0x1dd   :  { %9598 = vmatprep.mubr.msk.bf16.mxu1 %vm10924_vm2, %v14441_v31  ;;  %v3044_v25 = vpack.c.bf16 %v2977_v23, %v2976_v17 }
 0x1de   :  { %v2268_v37 = vcombine.low %v2197_v27, %v2198_v59  ;;  %v2269_v39 = vcombine.low %v2199_v58, %v2200_v30 }
 0x1e0   :  { %v2276_v40 = vrot.slane %v2268_v37, %v12035_v60  ;;  %v2483_v41 = vpop.permute.xlu1 %2482  ;;  %v2470_v42 = vpop.permute.xlu0 %2469  ;;  %v2283_v43 = vrot.slane %v2269_v39, %v12035_v60  ;;  %9427 = vmatmul.mubr.msk.bf16.gmra.mrb[40].mxu0 %vm27_vm0, %v3083_v21  ;;  %v3084_v60 = vpack.c.bf16 %v2966_v48, %v2965_v38  ;;  %v2985_v48 = vld [vmem:[#allocation3 + $0x118] sm:$0xff] }
 0x1e1   :  { %2485 = vst.msk [vmem:[#allocation3 + $0xa0] sm:$0x3] %vm2294_vm1, %v2483_v41  ;;  %2472 = vst.msk [vmem:[#allocation3 + $0x98] sm:$0x3] %vm2294_vm1, %v2470_v42  ;;  %9430 = vmatprep.mubr.msk.bf16.mxu0 %vm10924_vm2, %v14441_v31 }
 0x1e2   :  { %v2284_v45 = vcombine.low %v2276_v40, %v2283_v43 }
 0x1e4   :  { %9599 = vmatmul.mubr.msk.bf16.gmra.mrb[44].mxu1 %vm27_vm0, %v3038_v44  ;;  %v2511_v33 = vpop.permute.xlu1 %2510  ;;  %v2496_v47 = vpop.permute.xlu0 %2495  ;;  %2292 = vst [vmem:[#allocation2 + $0x18] sm:$0xff] %v2284_v45 }
 0x1e5   :  { %9602 = vmatprep.mubr.msk.bf16.mxu1 %vm10924_vm2, %v14441_v31  ;;  %2513 = vst.msk [vmem:[#allocation3 + $0xb8] sm:$0x3] %vm2294_vm1, %v2511_v33  ;;  %2498 = vst.msk [vmem:[#allocation3 + $0xa8] sm:$0x3] %vm2294_vm1, %v2496_v47 }
 0x1e8   :  { %v2537_v49 = vpop.permute.xlu1 %2536  ;;  %v2524_v50 = vpop.permute.xlu0 %2523  ;;  %9431 = vmatmul.mubr.msk.bf16.gmra.mrb[44].mxu0 %vm27_vm0, %v3084_v60  ;;  %v2969_v0 = vld [vmem:[#allocation3 + $0x98] sm:$0xff]  ;;  %v2970_v7 = vld [vmem:[#allocation3 + $0xa0] sm:$0xff] }
 0x1e9   :  { %2539 = vst.msk [vmem:[#allocation3 + $0xc8] sm:$0x3] %vm2294_vm1, %v2537_v49  ;;  %2526 = vst.msk [vmem:[#allocation3 + $0xc0] sm:$0x3] %vm2294_vm1, %v2524_v50  ;;  %9434 = vmatprep.mubr.msk.bf16.mxu0 %vm10924_vm2, %v14441_v31  ;;  %v3040_v6 = vpack.c.bf16 %v2969_v0, %v2968_v53  ;;  %v3086_v9 = vpack.c.bf16 %v2970_v7, %v2969_v0 }
 0x1eb   :  { %v2786_v54 = vld [vmem:[#allocation2 + $0x18] sm:$0x3]  ;;  %v2827_v55 = vld [vmem:[#allocation2 + $0x1a] sm:$0x3]  ;;  %v2868_v57 = vld [vmem:[#allocation2 + $0x1c] sm:$0x3] }
 0x1ec   :  { %9603 = vmatmul.mubr.msk.bf16.gmra.mrb[48].mxu1 %vm27_vm0, %v3039_v52  ;;  %v2565_v3 = vpop.permute.xlu1 %2564  ;;  %v2552_v61 = vpop.permute.xlu0 %2551  ;;  %v2909_v62 = vld [vmem:[#allocation2 + $0x1e] sm:$0x3]  ;;  %2787 = vst.msk [vmem:[#allocation3 + $0x1b0] sm:$0x3] %vm2294_vm1, %v2786_v54  ;;  %2828 = vst.msk [vmem:[#allocation3 + $0x1d0] sm:$0x3] %vm2294_vm1, %v2827_v55  ;;  %v3094_v54 = vpack.c.bf16 %v2986_v51, %v2985_v48 }
 0x1ed   :  { %9606 = vmatprep.mubr.msk.bf16.mxu1 %vm10924_vm2, %v14441_v31  ;;  %2869 = vst.msk [vmem:[#allocation3 + $0x1f8] sm:$0x3] %vm2294_vm1, %v2868_v57  ;;  %2567 = vst.msk [vmem:[#allocation3 + $0xe8] sm:$0x3] %vm2294_vm1, %v2565_v3  ;;  %v2971_v34 = vld [vmem:[#allocation3 + $0xa8] sm:$0xff]  ;;  %v2973_v35 = vld [vmem:[#allocation3 + $0xb8] sm:$0xff] }
 0x1ee   :  { %2554 = vst.msk [vmem:[#allocation3 + $0xe0] sm:$0x3] %vm2294_vm1, %v2552_v61  ;;  %v8645_v63 = vld.sshfl [vmem:[#allocation2 + $0x18] sm:$0x3 pattern:$0x76325410]  ;;  %v3041_v11 = vpack.c.bf16 %v2971_v34, %v2970_v7  ;;  %v3087_v14 = vpack.c.bf16 %v2972_v13, %v2971_v34  ;;  %v3042_v15 = vpack.c.bf16 %v2973_v35, %v2972_v13 }
 0x1ef   :  { %2910 = vst.msk [vmem:[#allocation3 + $0x218] sm:$0x3] %vm2294_vm1, %v2909_v62  ;;  %2810 = vrot.lane.b32.xlu1 %v8645_v63, %s10925_s23  ;;  %2797 = vrot.lane.b32.xlu0 %v8645_v63, %s10923_s20  ;;  %v8647_v2 = vld.sshfl [vmem:[#allocation2 + $0x1a] sm:$0x3 pattern:$0x76325410] }
 0x1f0   :  { %v2593_v4 = vpop.permute.xlu1 %2592  ;;  %v2578_v5 = vpop.permute.xlu0 %2577  ;;  %9435 = vmatmul.mubr.msk.bf16.gmra.mrb[48].mxu0 %vm27_vm0, %v3085_v1  ;;  %v8651_v10 = vld.sshfl [vmem:[#allocation2 + $0x1c] sm:$0x3 pattern:$0x76325410]  ;;  %v2974_v16 = vld [vmem:[#allocation3 + $0xc0] sm:$0xff]  ;;  %v2975_v36 = vld [vmem:[#allocation3 + $0xc8] sm:$0xff] }
 0x1f1   :  { %2595 = vst.msk [vmem:[#allocation3 + $0x100] sm:$0x3] %vm2294_vm1, %v2593_v4  ;;  %2580 = vst.msk [vmem:[#allocation3 + $0xf0] sm:$0x3] %vm2294_vm1, %v2578_v5  ;;  %9438 = vmatprep.mubr.msk.bf16.mxu0 %vm10924_vm2, %v14441_v31  ;;  %v3088_v20 = vpack.c.bf16 %v2974_v16, %v2973_v35  ;;  %v3043_v22 = vpack.c.bf16 %v2975_v36, %v2974_v16  ;;  %v3089_v24 = vpack.c.bf16 %v2976_v17, %v2975_v36 }
 0x1f2   :  { %v8653_v12 = vld.sshfl [vmem:[#allocation2 + $0x1e] sm:$0x3 pattern:$0x76325410] }
 0x1f3   :  { %2838 = vrot.lane.b32.xlu1 %v8647_v2, %s10923_s20  ;;  %2823 = vrot.lane.b32.xlu0 %v8645_v63, %s10922_s0  ;;  %v2990_v63 = vld [vmem:[#allocation3 + $0x140] sm:$0xff] }
 0x1f4   :  { %9607 = vmatmul.mubr.msk.bf16.gmra.mrb[52].mxu1 %vm27_vm0, %v3040_v6  ;;  %v2619_v32 = vpop.permute.xlu1 %2618  ;;  %v2606_v8 = vpop.permute.xlu0 %2605  ;;  %v2979_v26 = vld [vmem:[#allocation3 + $0xe8] sm:$0xff] }
 0x1f5   :  { %9610 = vmatprep.mubr.msk.bf16.mxu1 %vm10924_vm2, %v14441_v31  ;;  %2621 = vst.msk [vmem:[#allocation3 + $0x110] sm:$0x3] %vm2294_vm1, %v2619_v32  ;;  %2608 = vst.msk [vmem:[#allocation3 + $0x108] sm:$0x3] %vm2294_vm1, %v2606_v8  ;;  %v2978_v18 = vld [vmem:[#allocation3 + $0xe0] sm:$0xff]  ;;  %v2995_v8 = vld [vmem:[#allocation3 + $0x168] sm:$0xff] }
 0x1f6   :  { %v3090_v27 = vpack.c.bf16 %v2978_v18, %v2977_v23  ;;  %v3045_v56 = vpack.c.bf16 %v2979_v26, %v2978_v18  ;;  %v2994_v32 = vld [vmem:[#allocation3 + $0x160] sm:$0xff]  ;;  %v2999_v23 = vld [vmem:[#allocation3 + $0x188] sm:$0xff] }
 0x1f7   :  { %2864 = vrot.lane.b32.xlu1 %v8647_v2, %s10922_s0  ;;  %2851 = vrot.lane.b32.xlu0 %v8647_v2, %s10925_s23 }
 0x1f8   :  { %9439 = vmatmul.mubr.msk.bf16.gmra.mrb[52].mxu0 %vm27_vm0, %v3086_v9  ;;  %v2980_v46 = vld [vmem:[#allocation3 + $0xf0] sm:$0xff]  ;;  %v2982_v37 = vld [vmem:[#allocation3 + $0x100] sm:$0xff] }
 0x1f9   :  { %9442 = vmatprep.mubr.msk.bf16.mxu0 %vm10924_vm2, %v14441_v31  ;;  %v3091_v19 = vpack.c.bf16 %v2980_v46, %v2979_v26  ;;  %v3046_v29 = vpack.c.bf16 %v2981_v28, %v2980_v46  ;;  %v3092_v21 = vpack.c.bf16 %v2982_v37, %v2981_v28 }
 0x1fb   :  { %2892 = vrot.lane.b32.xlu1 %v8651_v10, %s10925_s23  ;;  %2879 = vrot.lane.b32.xlu0 %v8651_v10, %s10923_s20 }
 0x1fc   :  { %9611 = vmatmul.mubr.msk.bf16.gmra.mrb[56].mxu1 %vm27_vm0, %v3041_v11  ;;  %v2983_v39 = vld [vmem:[#allocation3 + $0x108] sm:$0xff]  ;;  %v2984_v44 = vld [vmem:[#allocation3 + $0x110] sm:$0xff] }
 0x1fd   :  { %9614 = vmatprep.mubr.msk.bf16.mxu1 %vm10924_vm2, %v14441_v31  ;;  %v3047_v42 = vpack.c.bf16 %v2983_v39, %v2982_v37  ;;  %v3093_v33 = vpack.c.bf16 %v2984_v44, %v2983_v39  ;;  %v3048_v49 = vpack.c.bf16 %v2985_v48, %v2984_v44  ;;  %v3003_v37 = vld [vmem:[#allocation3 + $0x1a8] sm:$0xff]  ;;  %v3004_v39 = vld [vmem:[#allocation3 + $0x1b0] sm:$0xff] }
 0x1ff   :  { %2920 = vrot.lane.b32.xlu1 %v8653_v12, %s10923_s20  ;;  %2905 = vrot.lane.b32.xlu0 %v8651_v10, %s10922_s0  ;;  %v3053_v10 = vpack.c.bf16 %v2995_v8, %v2994_v32 }
 0x200   :  { %9443 = vmatmul.mubr.msk.bf16.gmra.mrb[56].mxu0 %vm27_vm0, %v3087_v14 }
 0x201   :  { %9446 = vmatprep.mubr.msk.bf16.mxu0 %vm10924_vm2, %v14441_v31 }
 0x203   :  { %2946 = vrot.lane.b32.xlu1 %v8653_v12, %s10922_s0  ;;  %2933 = vrot.lane.b32.xlu0 %v8653_v12, %s10925_s23 }
 0x204   :  { %9615 = vmatmul.mubr.msk.bf16.gmra.mrb[60].mxu1 %vm27_vm0, %v3042_v15 }
 0x205   :  { %9618 = vmatprep.mubr.msk.bf16.mxu1 %vm10924_vm2, %v14441_v31 }
 0x208   :  { %9447 = vmatmul.mubr.msk.bf16.gmra.mrb[60].mxu0 %vm27_vm0, %v3088_v20 }
 0x209   :  { %9450 = vmatprep.mubr.msk.bf16.mxu0 %vm10924_vm2, %v14441_v31 }
 0x20c   :  { %9619 = vmatmul.mubr.msk.bf16.gmra.mrb[64].mxu1 %vm27_vm0, %v3043_v22 }
 0x20d   :  { %9622 = vmatprep.mubr.msk.bf16.mxu1 %vm10924_vm2, %v14441_v31 }
 0x210   :  { %9451 = vmatmul.mubr.msk.bf16.gmra.mrb[64].mxu0 %vm27_vm0, %v3089_v24 }
 0x211   :  { %9454 = vmatprep.mubr.msk.bf16.mxu0 %vm10924_vm2, %v14441_v31 }
 0x214   :  { %9623 = vmatmul.mubr.msk.bf16.gmra.mrb[68].mxu1 %vm27_vm0, %v3044_v25 }
 0x215   :  { %9626 = vmatprep.mubr.msk.bf16.mxu1 %vm10924_vm2, %v14441_v31 }
 0x218   :  { %9455 = vmatmul.mubr.msk.bf16.gmra.mrb[68].mxu0 %vm27_vm0, %v3090_v27 }
 0x219   :  { %9458 = vmatprep.mubr.msk.bf16.mxu0 %vm10924_vm2, %v14441_v31 }
 0x21c   :  { %9627 = vmatmul.mubr.msk.bf16.gmra.mrb[72].mxu1 %vm27_vm0, %v3045_v56 }
 0x21d   :  { %9630 = vmatprep.mubr.msk.bf16.mxu1 %vm10924_vm2, %v14441_v31 }
 0x220   :  { %9459 = vmatmul.mubr.msk.bf16.gmra.mrb[72].mxu0 %vm27_vm0, %v3091_v19 }
 0x221   :  { %v2647_v58 = vpop.permute.xlu1 %2646  ;;  %v2634_v59 = vpop.permute.xlu0 %2633  ;;  %9462 = vmatprep.mubr.msk.bf16.mxu0 %vm10924_vm2, %v14441_v31 }
 0x222   :  { %2649 = vst.msk [vmem:[#allocation3 + $0x130] sm:$0x3] %vm2294_vm1, %v2647_v58  ;;  %2636 = vst.msk [vmem:[#allocation3 + $0x128] sm:$0x3] %vm2294_vm1, %v2634_v59 }
 0x224   :  { %9631 = vmatmul.mubr.msk.bf16.gmra.mrb[76].mxu1 %vm27_vm0, %v3046_v29 }
 0x225   :  { %v2675_v30 = vpop.permute.xlu1 %2674  ;;  %9634 = vmatprep.mubr.msk.bf16.mxu1 %vm10924_vm2, %v14441_v31  ;;  %v2660_v38 = vpop.permute.xlu0 %2659 }
 0x226   :  { %2677 = vst.msk [vmem:[#allocation3 + $0x148] sm:$0x3] %vm2294_vm1, %v2675_v30  ;;  %2662 = vst.msk [vmem:[#allocation3 + $0x138] sm:$0x3] %vm2294_vm1, %v2660_v38 }
 0x228   :  { %9463 = vmatmul.mubr.msk.bf16.gmra.mrb[76].mxu0 %vm27_vm0, %v3092_v21 }
 0x229   :  { %v2701_v40 = vpop.permute.xlu1 %2700  ;;  %v2688_v41 = vpop.permute.xlu0 %2687  ;;  %9466 = vmatprep.mubr.msk.bf16.mxu0 %vm10924_vm2, %v14441_v31  ;;  %v2987_v53 = vld [vmem:[#allocation3 + $0x128] sm:$0xff]  ;;  %v2988_v57 = vld [vmem:[#allocation3 + $0x130] sm:$0xff] }
 0x22a   :  { %2703 = vst.msk [vmem:[#allocation3 + $0x158] sm:$0x3] %vm2294_vm1, %v2701_v40  ;;  %2690 = vst.msk [vmem:[#allocation3 + $0x150] sm:$0x3] %vm2294_vm1, %v2688_v41  ;;  %v3049_v55 = vpack.c.bf16 %v2987_v53, %v2986_v51  ;;  %v3095_v3 = vpack.c.bf16 %v2988_v57, %v2987_v53  ;;  %v3103_v41 = vpack.c.bf16 %v3004_v39, %v3003_v37 }
 0x22c   :  { %9635 = vmatmul.mubr.msk.bf16.gmra.mrb[80].mxu1 %vm27_vm0, %v3047_v42 }
 0x22d   :  { %v2729_v43 = vpop.permute.xlu1 %2728  ;;  %9638 = vmatprep.mubr.msk.bf16.mxu1 %vm10924_vm2, %v14441_v31  ;;  %v2716_v45 = vpop.permute.xlu0 %2715  ;;  %v2989_v61 = vld [vmem:[#allocation3 + $0x138] sm:$0xff]  ;;  %v2991_v0 = vld [vmem:[#allocation3 + $0x148] sm:$0xff] }
 0x22e   :  { %2731 = vst.msk [vmem:[#allocation3 + $0x178] sm:$0x3] %vm2294_vm1, %v2729_v43  ;;  %2718 = vst.msk [vmem:[#allocation3 + $0x170] sm:$0x3] %vm2294_vm1, %v2716_v45  ;;  %v3050_v62 = vpack.c.bf16 %v2989_v61, %v2988_v57  ;;  %v3096_v1 = vpack.c.bf16 %v2990_v63, %v2989_v61  ;;  %v3051_v2 = vpack.c.bf16 %v2991_v0, %v2990_v63 }
 0x230   :  { %9467 = vmatmul.mubr.msk.bf16.gmra.mrb[80].mxu0 %vm27_vm0, %v3093_v33 }
 0x231   :  { %v2757_v47 = vpop.permute.xlu1 %2756  ;;  %v2742_v60 = vpop.permute.xlu0 %2741  ;;  %9470 = vmatprep.mubr.msk.bf16.mxu0 %vm10924_vm2, %v14441_v31  ;;  %v2992_v4 = vld [vmem:[#allocation3 + $0x150] sm:$0xff]  ;;  %v2993_v5 = vld [vmem:[#allocation3 + $0x158] sm:$0xff] }
 0x232   :  { %2759 = vst.msk [vmem:[#allocation3 + $0x190] sm:$0x3] %vm2294_vm1, %v2757_v47  ;;  %2744 = vst.msk [vmem:[#allocation3 + $0x180] sm:$0x3] %vm2294_vm1, %v2742_v60  ;;  %v3097_v6 = vpack.c.bf16 %v2992_v4, %v2991_v0  ;;  %v3052_v7 = vpack.c.bf16 %v2993_v5, %v2992_v4  ;;  %v3098_v9 = vpack.c.bf16 %v2994_v32, %v2993_v5  ;;  %v3008_v4 = vld [vmem:[#allocation3 + $0x1d0] sm:$0xff] }
 0x234   :  { %9639 = vmatmul.mubr.msk.bf16.gmra.mrb[84].mxu1 %vm27_vm0, %v3048_v49 }
 0x235   :  { %v2783_v50 = vpop.permute.xlu1 %2782  ;;  %9642 = vmatprep.mubr.msk.bf16.mxu1 %vm10924_vm2, %v14441_v31  ;;  %v2770_v52 = vpop.permute.xlu0 %2769  ;;  %v2996_v34 = vld [vmem:[#allocation3 + $0x170] sm:$0xff]  ;;  %v2997_v11 = vld [vmem:[#allocation3 + $0x178] sm:$0xff] }
 0x236   :  { %2785 = vst.msk [vmem:[#allocation3 + $0x1a0] sm:$0x3] %vm2294_vm1, %v2783_v50  ;;  %2772 = vst.msk [vmem:[#allocation3 + $0x198] sm:$0x3] %vm2294_vm1, %v2770_v52  ;;  %v3099_v12 = vpack.c.bf16 %v2996_v34, %v2995_v8  ;;  %v3054_v14 = vpack.c.bf16 %v2997_v11, %v2996_v34 }
 0x238   :  { %9471 = vmatmul.mubr.msk.bf16.gmra.mrb[84].mxu0 %vm27_vm0, %v3094_v54 }
 0x239   :  { %9474 = vmatprep.mubr.msk.bf16.mxu0 %vm10924_vm2, %v14441_v31  ;;  %v2998_v36 = vld [vmem:[#allocation3 + $0x180] sm:$0xff]  ;;  %v3000_v26 = vld [vmem:[#allocation3 + $0x190] sm:$0xff] }
 0x23a   :  { %v3100_v20 = vpack.c.bf16 %v2998_v36, %v2997_v11  ;;  %v3055_v24 = vpack.c.bf16 %v2999_v23, %v2998_v36  ;;  %v3101_v56 = vpack.c.bf16 %v3000_v26, %v2999_v23 }
 0x23c   :  { %9643 = vmatmul.mubr.msk.bf16.gmra.mrb[88].mxu1 %vm27_vm0, %v3049_v55 }
 0x23d   :  { %9646 = vmatprep.mubr.msk.bf16.mxu1 %vm10924_vm2, %v14441_v31  ;;  %v3001_v27 = vld [vmem:[#allocation3 + $0x198] sm:$0xff]  ;;  %v3002_v59 = vld [vmem:[#allocation3 + $0x1a0] sm:$0xff] }
 0x23e   :  { %v3056_v58 = vpack.c.bf16 %v3001_v27, %v3000_v26  ;;  %v3102_v30 = vpack.c.bf16 %v3002_v59, %v3001_v27  ;;  %v3057_v38 = vpack.c.bf16 %v3003_v37, %v3002_v59 }
 0x240   :  { %9475 = vmatmul.mubr.msk.bf16.gmra.mrb[88].mxu0 %vm27_vm0, %v3095_v3 }
 0x241   :  { %9478 = vmatprep.mubr.msk.bf16.mxu0 %vm10924_vm2, %v14441_v31 }
 0x244   :  { %9647 = vmatmul.mubr.msk.bf16.gmra.mrb[92].mxu1 %vm27_vm0, %v3050_v62 }
 0x245   :  { %9650 = vmatprep.mubr.msk.bf16.mxu1 %vm10924_vm2, %v14441_v31 }
 0x248   :  { %9479 = vmatmul.mubr.msk.bf16.gmra.mrb[92].mxu0 %vm27_vm0, %v3096_v1 }
 0x249   :  { %9482 = vmatprep.mubr.msk.bf16.mxu0 %vm10924_vm2, %v14441_v31 }
 0x24c   :  { %9651 = vmatmul.mubr.msk.bf16.gmra.mrb[96].mxu1 %vm27_vm0, %v3051_v2 }
 0x24d   :  { %9654 = vmatprep.mubr.msk.bf16.mxu1 %vm10924_vm2, %v14441_v31 }
 0x250   :  { %9483 = vmatmul.mubr.msk.bf16.gmra.mrb[96].mxu0 %vm27_vm0, %v3097_v6 }
 0x251   :  { %9486 = vmatprep.mubr.msk.bf16.mxu0 %vm10924_vm2, %v14441_v31 }
 0x254   :  { %9655 = vmatmul.mubr.msk.bf16.gmra.mrb[100].mxu1 %vm27_vm0, %v3052_v7 }
 0x255   :  { %9658 = vmatprep.mubr.msk.bf16.mxu1 %vm10924_vm2, %v14441_v31 }
 0x258   :  { %9487 = vmatmul.mubr.msk.bf16.gmra.mrb[100].mxu0 %vm27_vm0, %v3098_v9 }
 0x259   :  { %9490 = vmatprep.mubr.msk.bf16.mxu0 %vm10924_vm2, %v14441_v31 }
 0x25c   :  { %9659 = vmatmul.mubr.msk.bf16.gmra.mrb[104].mxu1 %vm27_vm0, %v3053_v10 }
 0x25d   :  { %9662 = vmatprep.mubr.msk.bf16.mxu1 %vm10924_vm2, %v14441_v31 }
 0x260   :  { %9491 = vmatmul.mubr.msk.bf16.gmra.mrb[104].mxu0 %vm27_vm0, %v3099_v12 }
 0x261   :  { %v2811_v13 = vpop.permute.xlu1 %2810  ;;  %v2798_v35 = vpop.permute.xlu0 %2797  ;;  %9494 = vmatprep.mubr.msk.bf16.mxu0 %vm10924_vm2, %v14441_v31 }
 0x262   :  { %2813 = vst.msk [vmem:[#allocation3 + $0x1c0] sm:$0x3] %vm2294_vm1, %v2811_v13  ;;  %2800 = vst.msk [vmem:[#allocation3 + $0x1b8] sm:$0x3] %vm2294_vm1, %v2798_v35 }
 0x264   :  { %9663 = vmatmul.mubr.msk.bf16.gmra.mrb[108].mxu1 %vm27_vm0, %v3054_v14 }
 0x265   :  { %v2839_v15 = vpop.permute.xlu1 %2838  ;;  %v2824_v16 = vpop.permute.xlu0 %2823  ;;  %9666 = vmatprep.mubr.msk.bf16.mxu1 %vm10924_vm2, %v14441_v31 }
 0x266   :  { %2841 = vst.msk [vmem:[#allocation3 + $0x1d8] sm:$0x3] %vm2294_vm1, %v2839_v15  ;;  %2826 = vst.msk [vmem:[#allocation3 + $0x1c8] sm:$0x3] %vm2294_vm1, %v2824_v16 }
 0x268   :  { %9495 = vmatmul.mubr.msk.bf16.gmra.mrb[108].mxu0 %vm27_vm0, %v3100_v20 }
 0x269   :  { %v2865_v22 = vpop.permute.xlu1 %2864  ;;  %v2852_v17 = vpop.permute.xlu0 %2851  ;;  %9498 = vmatprep.mubr.msk.bf16.mxu0 %vm10924_vm2, %v14441_v31  ;;  %v3005_v40 = vld [vmem:[#allocation3 + $0x1b8] sm:$0xff]  ;;  %v3006_v33 = vld [vmem:[#allocation3 + $0x1c0] sm:$0xff] }
 0x26a   :  { %2867 = vst.msk [vmem:[#allocation3 + $0x1e8] sm:$0x3] %vm2294_vm1, %v2865_v22  ;;  %2854 = vst.msk [vmem:[#allocation3 + $0x1e0] sm:$0x3] %vm2294_vm1, %v2852_v17  ;;  %v3058_v45 = vpack.c.bf16 %v3005_v40, %v3004_v39  ;;  %v3104_v49 = vpack.c.bf16 %v3006_v33, %v3005_v40 }
 0x26c   :  { %9667 = vmatmul.mubr.msk.bf16.gmra.mrb[112].mxu1 %vm27_vm0, %v3055_v24 }
 0x26d   :  { %v2893_v25 = vpop.permute.xlu1 %2892  ;;  %v2880_v18 = vpop.permute.xlu0 %2879  ;;  %9670 = vmatprep.mubr.msk.bf16.mxu1 %vm10924_vm2, %v14441_v31  ;;  %v3007_v57 = vld [vmem:[#allocation3 + $0x1c8] sm:$0xff]  ;;  %v3009_v5 = vld [vmem:[#allocation3 + $0x1d8] sm:$0xff] }
 0x26e   :  { %2895 = vst.msk [vmem:[#allocation3 + $0x208] sm:$0x3] %vm2294_vm1, %v2893_v25  ;;  %2882 = vst.msk [vmem:[#allocation3 + $0x200] sm:$0x3] %vm2294_vm1, %v2880_v18  ;;  %v3059_v61 = vpack.c.bf16 %v3007_v57, %v3006_v33  ;;  %v3105_v32 = vpack.c.bf16 %v3008_v4, %v3007_v57  ;;  %v3060_v34 = vpack.c.bf16 %v3009_v5, %v3008_v4 }
 0x270   :  { %9499 = vmatmul.mubr.msk.bf16.gmra.mrb[112].mxu0 %vm27_vm0, %v3101_v56 }
 0x271   :  { %v2921_v46 = vpop.permute.xlu1 %2920  ;;  %v2906_v19 = vpop.permute.xlu0 %2905  ;;  %9502 = vmatprep.mubr.msk.bf16.mxu0 %vm10924_vm2, %v14441_v31  ;;  %v3010_v12 = vld [vmem:[#allocation3 + $0x1e0] sm:$0xff]  ;;  %v3011_v16 = vld [vmem:[#allocation3 + $0x1e8] sm:$0xff] }
 0x272   :  { %2923 = vst.msk [vmem:[#allocation3 + $0x220] sm:$0x3] %vm2294_vm1, %v2921_v46  ;;  %2908 = vst.msk [vmem:[#allocation3 + $0x210] sm:$0x3] %vm2294_vm1, %v2906_v19  ;;  %v3106_v22 = vpack.c.bf16 %v3010_v12, %v3009_v5  ;;  %v3061_v25 = vpack.c.bf16 %v3011_v16, %v3010_v12  ;;  %v3012_v19 = vld [vmem:[#allocation3 + $0x1f0] sm:$0xff]  ;;  %v3017_v5 = vld [vmem:[#allocation3 + $0x218] sm:$0xff] }
 0x274   :  { %9671 = vmatmul.mubr.msk.bf16.gmra.mrb[116].mxu1 %vm27_vm0, %v3056_v58  ;;  %v3013_v58 = vld [vmem:[#allocation3 + $0x1f8] sm:$0xff] }
 0x275   :  { %9674 = vmatprep.mubr.msk.bf16.mxu1 %vm10924_vm2, %v14441_v31  ;;  %v2947_v28 = vpop.permute.xlu1 %2946  ;;  %v2934_v29 = vpop.permute.xlu0 %2933  ;;  %v3062_v39 = vpack.c.bf16 %v3013_v58, %v3012_v19  ;;  %v3014_v40 = vld [vmem:[#allocation3 + $0x200] sm:$0xff] }
 0x276   :  { %2949 = vst.msk [vmem:[#allocation3 + $0x230] sm:$0x3] %vm2294_vm1, %v2947_v28  ;;  %2936 = vst.msk [vmem:[#allocation3 + $0x228] sm:$0x3] %vm2294_vm1, %v2934_v29  ;;  %v3107_v29 = vpack.c.bf16 %v3012_v19, %v3011_v16  ;;  %v3021_v19 = vld [vmem:[#allocation3 + $0x238] sm:$0xff] }
 0x278   :  { %9503 = vmatmul.mubr.msk.bf16.gmra.mrb[116].mxu0 %vm27_vm0, %v3102_v30 }
 0x279   :  { %9506 = vmatprep.mubr.msk.bf16.mxu0 %vm10924_vm2, %v14441_v31 }
 0x27c   :  { %9675 = vmatmul.mubr.msk.bf16.gmra.mrb[120].mxu1 %vm27_vm0, %v3057_v38 }
 0x27d   :  { %9678 = vmatprep.mubr.msk.bf16.mxu1 %vm10924_vm2, %v14441_v31 }
 0x27e   :  { %v3770_v21 = vpop.f32.mrb[16].mxu1 }
 0x27f   :  { %v9572_v42 = vpop.f32.mrb[17].mxu1 }
 0x280   :  { %v3773_v43 = vpop.f32.mrb[18].mxu1  ;;  %9507 = vmatmul.mubr.msk.bf16.gmra.mrb[120].mxu0 %vm27_vm0, %v3103_v41 }
 0x281   :  { %v9573_v44 = vpop.f32.mrb[19].mxu1  ;;  %9510 = vmatprep.mubr.msk.bf16.mxu0 %vm10924_vm2, %v14441_v31 }
 0x282   :  { %v3015_v44 = vld [vmem:[#allocation3 + $0x208] sm:$0xff] }
 0x283   :  { %v3292_v47 = vpop.f32.mrb[16].mxu0 }
 0x284   :  { %9679 = vmatmul.mubr.msk.bf16.gmra.mrb[124].mxu1 %vm27_vm0, %v3058_v45  ;;  %v12403_v48 = vadd.f32 %v3770_v21, %v3292_v47  ;;  %v9404_v60 = vpop.f32.mrb[17].mxu0  ;;  %v3108_v47 = vpack.c.bf16 %v3014_v40, %v3013_v58 }
 0x285   :  { %9682 = vmatprep.mubr.msk.bf16.mxu1 %vm10924_vm2, %v14441_v31  ;;  %v3295_v50 = vpop.f32.mrb[18].mxu0 }
 0x286   :  { %v12405_v52 = vadd.f32 %v3773_v43, %v3295_v50  ;;  %v9405_v53 = vpop.f32.mrb[19].mxu0 }
 0x287   :  { %v3778_v51 = vpop.f32.mrb[20].mxu1 }
 0x288   :  { %v9576_v54 = vpop.f32.mrb[21].mxu1  ;;  %9511 = vmatmul.mubr.msk.bf16.gmra.mrb[124].mxu0 %vm27_vm0, %v3104_v49 }
 0x289   :  { %v3781_v55 = vpop.f32.mrb[22].mxu1  ;;  %9514 = vmatprep.mubr.msk.bf16.mxu0 %vm10924_vm2, %v14441_v31 }
 0x28a   :  { %v9577_v3 = vpop.f32.mrb[23].mxu1 }
 0x28b   :  { %v3300_v62 = vpop.f32.mrb[20].mxu0 }
 0x28c   :  { %9683 = vmatmul.mubr.msk.bf16.gmra.mrb[128].mxu1 %vm27_vm0, %v3059_v61  ;;  %v12413_v63 = vadd.f32 %v3778_v51, %v3300_v62  ;;  %v9408_v0 = vpop.f32.mrb[21].mxu0  ;;  %v3063_v51 = vpack.c.bf16 %v3015_v44, %v3014_v40  ;;  %v3016_v61 = vld [vmem:[#allocation3 + $0x210] sm:$0xff] }
 0x28d   :  { %9686 = vmatprep.mubr.msk.bf16.mxu1 %vm10924_vm2, %v14441_v31  ;;  %v3303_v1 = vpop.f32.mrb[22].mxu0 }
 0x28e   :  { %v12415_v6 = vadd.f32 %v3781_v55, %v3303_v1  ;;  %v9409_v7 = vpop.f32.mrb[23].mxu0  ;;  %v3109_v1 = vpack.c.bf16 %v3016_v61, %v3015_v44 }
 0x28f   :  { %v3786_v2 = vpop.f32.mrb[24].mxu1 }
 0x290   :  { %v9580_v8 = vpop.f32.mrb[25].mxu1  ;;  %9515 = vmatmul.mubr.msk.bf16.gmra.mrb[128].mxu0 %vm27_vm0, %v3105_v32  ;;  %v3064_v32 = vpack.c.bf16 %v3017_v5, %v3016_v61 }
 0x291   :  { %v3789_v9 = vpop.f32.mrb[26].mxu1  ;;  %9518 = vmatprep.mubr.msk.bf16.mxu0 %vm10924_vm2, %v14441_v31 }
 0x292   :  { %v9581_v10 = vpop.f32.mrb[27].mxu1 }
 0x293   :  { %v3308_v11 = vpop.f32.mrb[24].mxu0 }
 0x294   :  { %9687 = vmatmul.mubr.msk.bf16.gmra.mrb[132].mxu1 %vm27_vm0, %v3060_v34  ;;  %v12423_v13 = vadd.f32 %v3786_v2, %v3308_v11  ;;  %v9412_v35 = vpop.f32.mrb[25].mxu0 }
 0x295   :  { %9690 = vmatprep.mubr.msk.bf16.mxu1 %vm10924_vm2, %v14441_v31  ;;  %v3311_v14 = vpop.f32.mrb[26].mxu0  ;;  %v3019_v35 = vld [vmem:[#allocation3 + $0x228] sm:$0xff] }
 0x296   :  { %v12425_v36 = vadd.f32 %v3789_v9, %v3311_v14  ;;  %v9413_v20 = vpop.f32.mrb[27].mxu0  ;;  %v3018_v9 = vld [vmem:[#allocation3 + $0x220] sm:$0xff] }
 0x297   :  { %v3794_v15 = vpop.f32.mrb[28].mxu1  ;;  %v3110_v16 = vpack.c.bf16 %v3018_v9, %v3017_v5 }
 0x298   :  { %v9584_v17 = vpop.f32.mrb[29].mxu1  ;;  %9519 = vmatmul.mubr.msk.bf16.gmra.mrb[132].mxu0 %vm27_vm0, %v3106_v22 }
 0x299   :  { %v3797_v23 = vpop.f32.mrb[30].mxu1  ;;  %9522 = vmatprep.mubr.msk.bf16.mxu0 %vm10924_vm2, %v14441_v31 }
 0x29a   :  { %v9585_v24 = vpop.f32.mrb[31].mxu1 }
 0x29b   :  { %v3316_v18 = vpop.f32.mrb[28].mxu0 }
 0x29c   :  { %9691 = vmatmul.mubr.msk.bf16.gmra.mrb[136].mxu1 %vm27_vm0, %v3061_v25  ;;  %v12433_v26 = vadd.f32 %v3794_v15, %v3316_v18  ;;  %v9416_v27 = vpop.f32.mrb[29].mxu0  ;;  %v3020_v25 = vld [vmem:[#allocation3 + $0x230] sm:$0xff] }
 0x29d   :  { %9694 = vmatprep.mubr.msk.bf16.mxu1 %vm10924_vm2, %v14441_v31  ;;  %v3319_v56 = vpop.f32.mrb[30].mxu0 }
 0x29e   :  { %v12435_v59 = vadd.f32 %v3797_v23, %v3319_v56  ;;  %v9417_v28 = vpop.f32.mrb[31].mxu0  ;;  %v3065_v23 = vpack.c.bf16 %v3019_v35, %v3018_v9 }
 0x29f   :  { %v3802_v46 = vpop.f32.mrb[32].mxu1 }
 0x2a0   :  { %v9588_v30 = vpop.f32.mrb[33].mxu1  ;;  %9523 = vmatmul.mubr.msk.bf16.gmra.mrb[136].mxu0 %vm27_vm0, %v3107_v29  ;;  %v3111_v29 = vpack.c.bf16 %v3020_v25, %v3019_v35  ;;  %v3027_v35 = vld [vmem:[#allocation3 + $0x268] sm:$0xff] }
 0x2a1   :  { %v3804_v37 = vpop.f32.mrb[34].mxu1  ;;  %9526 = vmatprep.mubr.msk.bf16.mxu0 %vm10924_vm2, %v14441_v31 }
 0x2a2   :  { %v9589_v38 = vpop.f32.mrb[35].mxu1 }
 0x2a3   :  { %v3324_v21 = vpop.f32.mrb[32].mxu0 }
 0x2a4   :  { %9695 = vmatmul.mubr.msk.bf16.gmra.mrb[140].mxu1 %vm27_vm0, %v3062_v39  ;;  %v9420_v41 = vpop.f32.mrb[33].mxu0  ;;  %v3066_v39 = vpack.c.bf16 %v3021_v19, %v3020_v25  ;;  %v3022_v21 = vld [vmem:[#allocation3 + $0x240] sm:$0xff] }
 0x2a5   :  { %9698 = vmatprep.mubr.msk.bf16.mxu1 %vm10924_vm2, %v14441_v31  ;;  %v3326_v42 = vpop.f32.mrb[34].mxu0  ;;  %v3023_v41 = vld [vmem:[#allocation3 + $0x248] sm:$0xff]  ;;  %v3112_v44 = vpack.c.bf16 %v3022_v21, %v3021_v19  ;;  %v3028_v19 = vld [vmem:[#allocation3 + $0x270] sm:$0xff] }
 0x2a6   :  { %v12443_v45 = vadd.f32 %v3804_v37, %v3326_v42  ;;  %v9421_v33 = vpop.f32.mrb[35].mxu0 }
 0x2a7   :  { %v3809_v43 = vpop.f32.mrb[36].mxu1 }
 0x2a8   :  { %v9592_v60 = vpop.f32.mrb[37].mxu1  ;;  %9527 = vmatmul.mubr.msk.bf16.gmra.mrb[140].mxu0 %vm27_vm0, %v3108_v47 }
 0x2a9   :  { %v3812_v49 = vpop.f32.mrb[38].mxu1  ;;  %9530 = vmatprep.mubr.msk.bf16.mxu0 %vm10924_vm2, %v14441_v31 }
 0x2aa   :  { %v9593_v50 = vpop.f32.mrb[39].mxu1 }
 0x2ab   :  { %v3331_v53 = vpop.f32.mrb[36].mxu0  ;;  %v3067_v50 = vpack.c.bf16 %v3023_v41, %v3022_v21 }
 0x2ac   :  { %9699 = vmatmul.mubr.msk.bf16.gmra.mrb[144].mxu1 %vm27_vm0, %v3063_v51  ;;  %v12451_v54 = vadd.f32 %v3809_v43, %v3331_v53  ;;  %v9424_v55 = vpop.f32.mrb[37].mxu0 }
 0x2ad   :  { %9702 = vmatprep.mubr.msk.bf16.mxu1 %vm10924_vm2, %v14441_v31  ;;  %v3334_v57 = vpop.f32.mrb[38].mxu0  ;;  %v3024_v55 = vld [vmem:[#allocation3 + $0x250] sm:$0xff] }
 0x2ae   :  { %v12453_v62 = vadd.f32 %v3812_v49, %v3334_v57  ;;  %v9425_v0 = vpop.f32.mrb[39].mxu0 }
 0x2af   :  { %v3817_v3 = vpop.f32.mrb[40].mxu1 }
 0x2b0   :  { %v9596_v2 = vpop.f32.mrb[41].mxu1  ;;  %9531 = vmatmul.mubr.msk.bf16.gmra.mrb[144].mxu0 %vm27_vm0, %v3109_v1  ;;  %v3113_v1 = vpack.c.bf16 %v3024_v55, %v3023_v41 }
 0x2b1   :  { %v3820_v4 = vpop.f32.mrb[42].mxu1  ;;  %9534 = vmatprep.mubr.msk.bf16.mxu0 %vm10924_vm2, %v14441_v31 }
 0x2b2   :  { %v9597_v7 = vpop.f32.mrb[43].mxu1 }
 0x2b3   :  { %v3339_v8 = vpop.f32.mrb[40].mxu0 }
 0x2b4   :  { %9703 = vmatmul.mubr.msk.bf16.gmra.mrb[148].mxu1 %vm27_vm0, %v3064_v32  ;;  %v12461_v10 = vadd.f32 %v3817_v3, %v3339_v8  ;;  %v9428_v34 = vpop.f32.mrb[41].mxu0  ;;  %v3025_v3 = vld [vmem:[#allocation3 + $0x258] sm:$0xff] }
 0x2b5   :  { %9706 = vmatprep.mubr.msk.bf16.mxu1 %vm10924_vm2, %v14441_v31  ;;  %v3342_v11 = vpop.f32.mrb[42].mxu0  ;;  %v3068_v8 = vpack.c.bf16 %v3025_v3, %v3024_v55 }
 0x2b6   :  { %v12463_v14 = vadd.f32 %v3820_v4, %v3342_v11  ;;  %v9429_v15 = vpop.f32.mrb[43].mxu0  ;;  %v3026_v11 = vld [vmem:[#allocation3 + $0x260] sm:$0xff] }
 0x2b7   :  { %v3825_v12 = vpop.f32.mrb[44].mxu1 }
 0x2b8   :  { %v9600_v20 = vpop.f32.mrb[45].mxu1  ;;  %9535 = vmatmul.mubr.msk.bf16.gmra.mrb[148].mxu0 %vm27_vm0, %v3110_v16 }
 0x2b9   :  { %v3828_v22 = vpop.f32.mrb[46].mxu1  ;;  %9538 = vmatprep.mubr.msk.bf16.mxu0 %vm10924_vm2, %v14441_v31  ;;  %v3114_v20 = vpack.c.bf16 %v3026_v11, %v3025_v3 }
 0x2ba   :  { %v9601_v17 = vpop.f32.mrb[47].mxu1 }
 0x2bb   :  { %v3347_v24 = vpop.f32.mrb[44].mxu0 }
 0x2bc   :  { %9707 = vmatmul.mubr.msk.bf16.gmra.mrb[152].mxu1 %vm27_vm0, %v3065_v23  ;;  %v12471_v18 = vadd.f32 %v3825_v12, %v3347_v24  ;;  %v9432_v27 = vpop.f32.mrb[45].mxu0 }
 0x2bd   :  { %9710 = vmatprep.mubr.msk.bf16.mxu1 %vm10924_vm2, %v14441_v31  ;;  %v3350_v56 = vpop.f32.mrb[46].mxu0  ;;  %v3069_v27 = vpack.c.bf16 %v3027_v35, %v3026_v11 }
 0x2be   :  { %v12473_v58 = vadd.f32 %v3828_v22, %v3350_v56  ;;  %v9433_v28 = vpop.f32.mrb[47].mxu0 }
 0x2bf   :  { %v3833_v46 = vpop.f32.mrb[48].mxu1 }
 0x2c0   :  { %v9604_v30 = vpop.f32.mrb[49].mxu1  ;;  %9539 = vmatmul.mubr.msk.bf16.gmra.mrb[152].mxu0 %vm27_vm0, %v3111_v29  ;;  %v3029_v29 = vld [vmem:[#allocation3 + $0x278] sm:$0xff] }
 0x2c1   :  { %v3836_v37 = vpop.f32.mrb[50].mxu1  ;;  %9542 = vmatprep.mubr.msk.bf16.mxu0 %vm10924_vm2, %v14441_v31 }
 0x2c2   :  { %v9605_v38 = vpop.f32.mrb[51].mxu1 }
 0x2c3   :  { %v3355_v40 = vpop.f32.mrb[48].mxu0  ;;  %v3115_v38 = vpack.c.bf16 %v3028_v19, %v3027_v35  ;;  %v4748_v35 = vld [vmem:[#allocation3 + $0x50] sm:$0xff] }
 0x2c4   :  { %9711 = vmatmul.mubr.msk.bf16.gmra.mrb[156].mxu1 %vm27_vm0, %v3066_v39  ;;  %v12481_v42 = vadd.f32 %v3833_v46, %v3355_v40  ;;  %v9436_v43 = vpop.f32.mrb[49].mxu0 }
 0x2c5   :  { %9714 = vmatprep.mubr.msk.bf16.mxu1 %vm10924_vm2, %v14441_v31  ;;  %v3358_v33 = vpop.f32.mrb[50].mxu0 }
 0x2c6   :  { %v9437_v60 = vpop.f32.mrb[51].mxu0 }
 0x2c7   :  { %v3840_v47 = vpop.f32.mrb[52].mxu1  ;;  %v3030_v60 = vld [vmem:[#allocation3 + $0x280] sm:$0xff] }
 0x2c8   :  { %v9608_v49 = vpop.f32.mrb[53].mxu1  ;;  %9543 = vmatmul.mubr.msk.bf16.gmra.mrb[156].mxu0 %vm27_vm0, %v3112_v44  ;;  %v3070_v44 = vpack.c.bf16 %v3029_v29, %v3028_v19  ;;  %v10776_v19 = vld [vmem:[%s14437_s3 + $0x8] sm:$0xff]  }
 0x2c9   :  { %v3843_v51 = vpop.f32.mrb[54].mxu1  ;;  %9546 = vmatprep.mubr.msk.bf16.mxu0 %vm10924_vm2, %v14441_v31 }
 0x2ca   :  { %v9609_v53 = vpop.f32.mrb[55].mxu1 }
 0x2cb   :  { %v3362_v57 = vpop.f32.mrb[52].mxu0  ;;  %v3116_v53 = vpack.c.bf16 %v3030_v60, %v3029_v29 }
 0x2cc   :  { %9715 = vmatmul.mubr.msk.bf16.gmra.mrb[160].mxu1 %vm27_vm0, %v3067_v50  ;;  %v12489_v61 = vadd.f32 %v3840_v47, %v3362_v57  ;;  %v9440_v0 = vpop.f32.mrb[53].mxu0 }
 0x2cd   :  { %9718 = vmatprep.mubr.msk.bf16.mxu1 %vm10924_vm2, %v14441_v31  ;;  %v3365_v2 = vpop.f32.mrb[54].mxu0 }
 0x2ce   :  { %v12491_v5 = vadd.f32 %v3843_v51, %v3365_v2  ;;  %v9441_v7 = vpop.f32.mrb[55].mxu0  ;;  %v3071_v2 = vpack.c.bf16 %v3030_v60, %v3030_v60 }
 0x2cf   :  { %v3848_v4 = vpop.f32.mrb[56].mxu1 }
 0x2d0   :  { %v9612_v32 = vpop.f32.mrb[57].mxu1  ;;  %9547 = vmatmul.mubr.msk.bf16.gmra.mrb[160].mxu0 %vm27_vm0, %v3113_v1 }
 0x2d1   :  { %v3851_v9 = vpop.f32.mrb[58].mxu1  ;;  %9550 = vmatprep.mubr.msk.bf16.mxu0 %vm10924_vm2, %v14441_v31  ;;  %v3076_v32 = vld [vmem:[#allocation3 + $0x288] sm:$0xff] }
 0x2d2   :  { %v9613_v34 = vpop.f32.mrb[59].mxu1 }
 0x2d3   :  { %v3370_v12 = vpop.f32.mrb[56].mxu0  ;;  %v3117_v34 = vpack.c.bf16 %v3076_v32, %v3076_v32 }
 0x2d4   :  { %9719 = vmatmul.mubr.msk.bf16.gmra.mrb[164].mxu1 %vm27_vm0, %v3068_v8  ;;  %v12499_v15 = vadd.f32 %v3848_v4, %v3370_v12  ;;  %v9444_v16 = vpop.f32.mrb[57].mxu0 }
 0x2d5   :  { %9722 = vmatprep.mubr.msk.bf16.mxu1 %vm10924_vm2, %v14441_v31  ;;  %v3373_v22 = vpop.f32.mrb[58].mxu0  ;;  %v4749_v16 = vld [vmem:[#allocation3 + $0x58] sm:$0xff] }
 0x2d6   :  { %v12501_v23 = vadd.f32 %v3851_v9, %v3373_v22  ;;  %v9445_v24 = vpop.f32.mrb[59].mxu0 }
 0x2d7   :  { %v3856_v17 = vpop.f32.mrb[60].mxu1 }
 0x2d8   :  { %v9616_v25 = vpop.f32.mrb[61].mxu1  ;;  %9551 = vmatmul.mubr.msk.bf16.gmra.mrb[164].mxu0 %vm27_vm0, %v3114_v20 }
 0x2d9   :  { %v3859_v56 = vpop.f32.mrb[62].mxu1  ;;  %9554 = vmatprep.mubr.msk.bf16.mxu0 %vm10924_vm2, %v14441_v31  ;;  %v10774_v25 = vld [vmem:[%s14437_s3] sm:$0xff]  }
 0x2da   :  { %v9617_v46 = vpop.f32.mrb[63].mxu1 }
 0x2db   :  { %v3378_v28 = vpop.f32.mrb[60].mxu0 }
 0x2dc   :  { %9723 = vmatmul.mubr.msk.bf16.gmra.mrb[168].mxu1 %vm27_vm0, %v3069_v27  ;;  %v12509_v30 = vadd.f32 %v3856_v17, %v3378_v28  ;;  %v9448_v37 = vpop.f32.mrb[61].mxu0 }
 0x2dd   :  { %9726 = vmatprep.mubr.msk.bf16.mxu1 %vm10924_vm2, %v14441_v31  ;;  %v3381_v39 = vpop.f32.mrb[62].mxu0 }
 0x2de   :  { %v12511_v40 = vadd.f32 %v3859_v56, %v3381_v39  ;;  %v9449_v41 = vpop.f32.mrb[63].mxu0  ;;  %v4829_v56 = vpack.c.bf16 %v4749_v16, %v4748_v35  ;;  %v4079_v39 = vld [vmem:[#allocation3 + $0x48] sm:$0xff] }
 0x2df   :  { %v3864_v21 = vpop.f32.mrb[64].mxu1  ;;  %v4750_v41 = vld [vmem:[#allocation3 + $0x60] sm:$0xff] }
 0x2e0   :  { %v9620_v43 = vpop.f32.mrb[65].mxu1  ;;  %9555 = vmatmul.mubr.msk.bf16.gmra.mrb[168].mxu0 %vm27_vm0, %v3115_v38 }
 0x2e1   :  { %v3867_v33 = vpop.f32.mrb[66].mxu1  ;;  %9558 = vmatprep.mubr.msk.bf16.mxu0 %vm10924_vm2, %v14441_v31 }
 0x2e2   :  { %v9621_v47 = vpop.f32.mrb[67].mxu1 }
 0x2e3   :  { %v3386_v49 = vpop.f32.mrb[64].mxu0  ;;  %v4160_v47 = vpack.c.bf16 %v4748_v35, %v4079_v39  ;;  %v4755_v39 = vld [vmem:[#allocation3 + $0x88] sm:$0xff] }
 0x2e4   :  { %9727 = vmatmul.mubr.msk.bf16.gmra.mrb[172].mxu1 %vm27_vm0, %v3070_v44  ;;  %v12519_v50 = vadd.f32 %v3864_v21, %v3386_v49  ;;  %v9452_v51 = vpop.f32.mrb[65].mxu0  ;;  %v10773_v21 = vld [vmem:[%s14437_s3 + $0x20] sm:$0xff]   ;;  %v4751_v49 = vld [vmem:[#allocation3 + $0x68] sm:$0xff] }
 0x2e5   :  { %9730 = vmatprep.mubr.msk.bf16.mxu1 %vm10924_vm2, %v14441_v31  ;;  %v3389_v55 = vpop.f32.mrb[66].mxu0 }
 0x2e6   :  { %v12521_v3 = vadd.f32 %v3867_v33, %v3389_v55  ;;  %v9453_v0 = vpop.f32.mrb[67].mxu0  ;;  %v10775_v55 = vld [vmem:[%s14437_s3 + $0x28] sm:$0xff]  }
 0x2e7   :  { %v3872_v57 = vpop.f32.mrb[68].mxu1 }
 0x2e8   :  { %v9624_v1 = vpop.f32.mrb[69].mxu1  ;;  %9559 = vmatmul.mubr.msk.bf16.gmra.mrb[172].mxu0 %vm27_vm0, %v3116_v53  ;;  %v4830_v53 = vpack.c.bf16 %v4751_v49, %v4750_v41 }
 0x2e9   :  { %v3874_v4 = vpop.f32.mrb[70].mxu1  ;;  %9562 = vmatprep.mubr.msk.bf16.mxu0 %vm10924_vm2, %v14441_v31 }
 0x2ea   :  { %v9625_v7 = vpop.f32.mrb[71].mxu1 }
 0x2eb   :  { %v3394_v8 = vpop.f32.mrb[68].mxu0  ;;  %v4753_v7 = vld [vmem:[#allocation3 + $0x78] sm:$0xff] }
 0x2ec   :  { %9731 = vmatmul.mubr.msk.bf16.gmra.mrb[176].mxu1 %vm27_vm0, %v3071_v2  ;;  %v9456_v9 = vpop.f32.mrb[69].mxu0 }
 0x2ed   :  { %9906 = vmatprep.mubr.msk.bf16.mxu1 %vm10924_vm2, %v14441_v31  ;;  %v3396_v11 = vpop.f32.mrb[70].mxu0 }
 0x2ee   :  { %v12529_v20 = vadd.f32 %v3874_v4, %v3396_v11  ;;  %v9457_v22 = vpop.f32.mrb[71].mxu0 }
 0x2ef   :  { %v3879_v12 = vpop.f32.mrb[72].mxu1 }
 0x2f0   :  { %v9628_v17 = vpop.f32.mrb[73].mxu1  ;;  %9563 = vmatmul.mubr.msk.bf16.gmra.mrb[176].mxu0 %vm27_vm0, %v3117_v34  ;;  %v4161_v34 = vpack.c.bf16 %v4750_v41, %v4749_v16 }
 0x2f1   :  { %v3882_v24 = vpop.f32.mrb[74].mxu1  ;;  %9738 = vmatprep.mubr.msk.bf16.mxu0 %vm10924_vm2, %v14441_v31 }
 0x2f2   :  { %v9629_v27 = vpop.f32.mrb[75].mxu1 }
 0x2f3   :  { %v3401_v46 = vpop.f32.mrb[72].mxu0 }
 0x2f4   :  { %9907 = vmatmul.mubr.msk.bf16.vlgmr.msra.gmra.mrb[180].mxu1 %vm27_vm0, %v4829_v56  ;;  %v12543_v28 = vadd.f32 %v3879_v12, %v3401_v46  ;;  %v9460_v29 = vpop.f32.mrb[73].mxu0  ;;  %v4752_v12 = vld [vmem:[#allocation3 + $0x70] sm:$0xff]  ;;  %v4754_v56 = vld [vmem:[#allocation3 + $0x80] sm:$0xff] }
 0x2f5   :  { %10243 = vmatpush3.bf16.msra.mxu1 %v10774_v25  ;;  %9910 = vmatprep.mubr.msk.bf16.mxu1 %vm10924_vm2, %v14441_v31  ;;  %v3404_v37 = vpop.f32.mrb[74].mxu0  ;;  %v4831_v22 = vpack.c.bf16 %v4753_v7, %v4752_v12  ;;  %v4832_v41 = vpack.c.bf16 %v4755_v39, %v4754_v56 }
 0x2f6   :  { %10244 = vmatprep.subr.bf16.mxu1 %v14441_v31  ;;  %v12549_v43 = vadd.f32 %v3882_v24, %v3404_v37  ;;  %v9461_v44 = vpop.f32.mrb[75].mxu0  ;;  %v4162_v37 = vpack.c.bf16 %v4752_v12, %v4751_v49 }
 0x2f7   :  { %v3887_v38 = vpop.f32.mrb[76].mxu1 }
 0x2f8   :  { %v9632_v33 = vpop.f32.mrb[77].mxu1  ;;  %9739 = vmatmul.mubr.msk.bf16.vlgmr.msra.gmra.mrb[180].mxu0 %vm27_vm0, %v4160_v47 }
 0x2f9   :  { %v3890_v60 = vpop.f32.mrb[78].mxu1  ;;  %10245 = vmatpush3.bf16.msra.mxu1 %v10776_v19  ;;  %10071 = vmatpush3.bf16.msra.mxu0 %v10773_v21 }
 0x2fa   :  { %v9633_v51 = vpop.f32.mrb[79].mxu1  ;;  %10246 = vmatprep.subr.bf16.mxu1 %v14441_v31  ;;  %9742 = vmatprep.mubr.msk.bf16.mxu0 %vm10924_vm2, %v14441_v31 }
 0x2fb   :  { %10072 = vmatprep.subr.bf16.mxu0 %v14441_v31  ;;  %v3409_v57 = vpop.f32.mrb[76].mxu0  ;;  %v4757_v51 = vld [vmem:[#allocation3 + $0x98] sm:$0xff] }
 0x2fc   :  { %9911 = vmatmul.mubr.msk.bf16.gmra.mrb[184].mxu1 %vm27_vm0, %v4830_v53  ;;  %v12562_v0 = vadd.f32 %v3887_v38, %v3409_v57  ;;  %v9464_v1 = vpop.f32.mrb[77].mxu0  ;;  %v4163_v57 = vpack.c.bf16 %v4754_v56, %v4753_v7  ;;  %v4759_v56 = vld [vmem:[#allocation3 + $0xa8] sm:$0xff] }
 0x2fd   :  { %9914 = vmatprep.mubr.msk.bf16.mxu1 %vm10924_vm2, %v14441_v31  ;;  %v3412_v2 = vpop.f32.mrb[78].mxu0  ;;  %10073 = vmatpush3.bf16.msra.mxu0 %v10775_v55 }
 0x2fe   :  { %v12564_v32 = vadd.f32 %v3890_v60, %v3412_v2  ;;  %v9465_v8 = vpop.f32.mrb[79].mxu0  ;;  %10074 = vmatprep.subr.bf16.mxu0 %v14441_v31  ;;  %v4756_v2 = vld [vmem:[#allocation3 + $0x90] sm:$0xff] }
 0x2ff   :  { %v3895_v4 = vpop.f32.mrb[80].mxu1  ;;  %v4833_v8 = vpack.c.bf16 %v4757_v51, %v4756_v2 }
 0x300   :  { %v9636_v9 = vpop.f32.mrb[81].mxu1  ;;  %9743 = vmatmul.mubr.msk.bf16.gmra.mrb[184].mxu0 %vm27_vm0, %v4161_v34 }
 0x301   :  { %v3898_v11 = vpop.f32.mrb[82].mxu1  ;;  %9746 = vmatprep.mubr.msk.bf16.mxu0 %vm10924_vm2, %v14441_v31 }
 0x302   :  { %v9637_v35 = vpop.f32.mrb[83].mxu1 }
 0x303   :  { %v3417_v17 = vpop.f32.mrb[80].mxu0  ;;  %v4758_v35 = vld [vmem:[#allocation3 + $0xa0] sm:$0xff] }
 0x304   :  { %9915 = vmatmul.mubr.msk.bf16.gmra.mrb[188].mxu1 %vm27_vm0, %v4831_v22  ;;  %v12573_v24 = vadd.f32 %v3895_v4, %v3417_v17  ;;  %v9468_v16 = vpop.f32.mrb[81].mxu0 }
 0x305   :  { %9918 = vmatprep.mubr.msk.bf16.mxu1 %vm10924_vm2, %v14441_v31  ;;  %v3420_v25 = vpop.f32.mrb[82].mxu0 }
 0x306   :  { %v12575_v46 = vadd.f32 %v3898_v11, %v3420_v25  ;;  %v9469_v19 = vpop.f32.mrb[83].mxu0  ;;  %v4164_v25 = vpack.c.bf16 %v4756_v2, %v4755_v39  ;;  %v10777_v39 = vld [vmem:[%s14437_s3 + $0x30] sm:$0xff]  }
 0x307   :  { %v3903_v27 = vpop.f32.mrb[84].mxu1  ;;  %10075 = vmatpush3.bf16.msra.mxu0 %v10777_v39  ;;  %v4760_v2 = vld [vmem:[#allocation3 + $0xb0] sm:$0xff] }
 0x308   :  { %v9640_v29 = vpop.f32.mrb[85].mxu1  ;;  %9747 = vmatmul.mubr.msk.bf16.gmra.mrb[188].mxu0 %vm27_vm0, %v4162_v37  ;;  %10076 = vmatprep.subr.bf16.mxu0 %v14441_v31 }
 0x309   :  { %v3906_v38 = vpop.f32.mrb[86].mxu1  ;;  %9750 = vmatprep.mubr.msk.bf16.mxu0 %vm10924_vm2, %v14441_v31  ;;  %v4834_v29 = vpack.c.bf16 %v4759_v56, %v4758_v35 }
 0x30a   :  { %v9641_v21 = vpop.f32.mrb[87].mxu1 }
 0x30b   :  { %v3425_v44 = vpop.f32.mrb[84].mxu0 }
 0x30c   :  { %9919 = vmatmul.mubr.msk.bf16.gmra.mrb[192].mxu1 %vm27_vm0, %v4832_v41  ;;  %v12583_v33 = vadd.f32 %v3903_v27, %v3425_v44  ;;  %v9472_v47 = vpop.f32.mrb[85].mxu0  ;;  %v10778_v41 = vld [vmem:[%s14437_s3 + $0x10] sm:$0xff]  }
 0x30d   :  { %9922 = vmatprep.mubr.msk.bf16.mxu1 %vm10924_vm2, %v14441_v31  ;;  %v3428_v60 = vpop.f32.mrb[86].mxu0  ;;  %10247 = vmatpush3.bf16.msra.mxu1 %v10778_v41 }
 0x30e   :  { %v9473_v53 = vpop.f32.mrb[87].mxu0  ;;  %v4761_v60 = vld [vmem:[#allocation3 + $0xb8] sm:$0xff]  ;;  %10248 = vmatprep.subr.bf16.mxu1 %v14441_v31 }
 0x30f   :  { %v3910_v49 = vpop.f32.mrb[88].mxu1 }
 0x310   :  { %v9644_v55 = vpop.f32.mrb[89].mxu1  ;;  %9751 = vmatmul.mubr.msk.bf16.gmra.mrb[192].mxu0 %vm27_vm0, %v4163_v57  ;;  %v4165_v57 = vpack.c.bf16 %v4758_v35, %v4757_v51  ;;  %v4762_v35 = vld [vmem:[#allocation3 + $0xc0] sm:$0xff] }
 0x311   :  { %v3913_v1 = vpop.f32.mrb[90].mxu1  ;;  %9754 = vmatprep.mubr.msk.bf16.mxu0 %vm10924_vm2, %v14441_v31 }
 0x312   :  { %v9645_v4 = vpop.f32.mrb[91].mxu1 }
 0x313   :  { %v3432_v9 = vpop.f32.mrb[88].mxu0 }
 0x314   :  { %9923 = vmatmul.mubr.msk.bf16.gmra.mrb[196].mxu1 %vm27_vm0, %v4833_v8  ;;  %v12591_v34 = vadd.f32 %v3910_v49, %v3432_v9  ;;  %v9476_v11 = vpop.f32.mrb[89].mxu0  ;;  %v4835_v8 = vpack.c.bf16 %v4761_v60, %v4760_v2 }
 0x315   :  { %9926 = vmatprep.mubr.msk.bf16.mxu1 %vm10924_vm2, %v14441_v31  ;;  %v3435_v12 = vpop.f32.mrb[90].mxu0 }
 0x316   :  { %v12593_v22 = vadd.f32 %v3913_v1, %v3435_v12  ;;  %v9477_v17 = vpop.f32.mrb[91].mxu0 }
 0x317   :  { %v3918_v7 = vpop.f32.mrb[92].mxu1  ;;  %v4763_v17 = vld [vmem:[#allocation3 + $0xc8] sm:$0xff] }
 0x318   :  { %v9648_v16 = vpop.f32.mrb[93].mxu1  ;;  %9755 = vmatmul.mubr.msk.bf16.gmra.mrb[196].mxu0 %vm27_vm0, %v4164_v25 }
 0x319   :  { %v3921_v27 = vpop.f32.mrb[94].mxu1  ;;  %9758 = vmatprep.mubr.msk.bf16.mxu0 %vm10924_vm2, %v14441_v31 }
 0x31a   :  { %v9649_v19 = vpop.f32.mrb[95].mxu1 }
 0x31b   :  { %v3440_v37 = vpop.f32.mrb[92].mxu0  ;;  %v4166_v19 = vpack.c.bf16 %v4760_v2, %v4759_v56  ;;  %v4764_v56 = vld [vmem:[#allocation3 + $0xd0] sm:$0xff] }
 0x31c   :  { %9927 = vmatmul.mubr.msk.bf16.gmra.mrb[200].mxu1 %vm27_vm0, %v4834_v29  ;;  %v12601_v38 = vadd.f32 %v3918_v7, %v3440_v37  ;;  %v9480_v21 = vpop.f32.mrb[93].mxu0 }
 0x31d   :  { %9930 = vmatprep.mubr.msk.bf16.mxu1 %vm10924_vm2, %v14441_v31  ;;  %v3443_v44 = vpop.f32.mrb[94].mxu0  ;;  %v4836_v21 = vpack.c.bf16 %v4763_v17, %v4762_v35 }
 0x31e   :  { %v12609_v49 = vadd.f32 %v3921_v27, %v3443_v44  ;;  %v9481_v53 = vpop.f32.mrb[95].mxu0 }
 0x31f   :  { %v3926_v47 = vpop.f32.mrb[96].mxu1 }
 0x320   :  { %v9652_v55 = vpop.f32.mrb[97].mxu1  ;;  %9759 = vmatmul.mubr.msk.bf16.gmra.mrb[200].mxu0 %vm27_vm0, %v4165_v57 }
 0x321   :  { %v3929_v1 = vpop.f32.mrb[98].mxu1  ;;  %9762 = vmatprep.mubr.msk.bf16.mxu0 %vm10924_vm2, %v14441_v31  ;;  %v4765_v55 = vld [vmem:[#allocation3 + $0xd8] sm:$0xff] }
 0x322   :  { %v9653_v4 = vpop.f32.mrb[99].mxu1 }
 0x323   :  { %v3448_v9 = vpop.f32.mrb[96].mxu0  ;;  %v4167_v4 = vpack.c.bf16 %v4762_v35, %v4761_v60 }
 0x324   :  { %9931 = vmatmul.mubr.msk.bf16.gmra.mrb[204].mxu1 %vm27_vm0, %v4835_v8  ;;  %v12619_v51 = vadd.f32 %v3926_v47, %v3448_v9  ;;  %v9484_v11 = vpop.f32.mrb[97].mxu0 }
 0x325   :  { %9934 = vmatprep.mubr.msk.bf16.mxu1 %vm10924_vm2, %v14441_v31  ;;  %v3451_v12 = vpop.f32.mrb[98].mxu0  ;;  %v4837_v11 = vpack.c.bf16 %v4765_v55, %v4764_v56 }
 0x326   :  { %v12621_v16 = vadd.f32 %v3929_v1, %v3451_v12  ;;  %v9485_v25 = vpop.f32.mrb[99].mxu0 }
 0x327   :  { %v3934_v7 = vpop.f32.mrb[100].mxu1 }
 0x328   :  { %v9656_v27 = vpop.f32.mrb[101].mxu1  ;;  %9763 = vmatmul.mubr.msk.bf16.gmra.mrb[204].mxu0 %vm27_vm0, %v4166_v19  ;;  %v4766_v19 = vld [vmem:[#allocation3 + $0xe0] sm:$0xff] }
 0x329   :  { %v3937_v29 = vpop.f32.mrb[102].mxu1  ;;  %9766 = vmatprep.mubr.msk.bf16.mxu0 %vm10924_vm2, %v14441_v31 }
 0x32a   :  { %v9657_v37 = vpop.f32.mrb[103].mxu1 }
 0x32b   :  { %v3456_v39 = vpop.f32.mrb[100].mxu0 }
 0x32c   :  { %9935 = vmatmul.mubr.msk.bf16.gmra.mrb[208].mxu1 %vm27_vm0, %v4836_v21  ;;  %v12629_v41 = vadd.f32 %v3934_v7, %v3456_v39  ;;  %v9488_v44 = vpop.f32.mrb[101].mxu0  ;;  %v4168_v21 = vpack.c.bf16 %v4764_v56, %v4763_v17  ;;  %v4768_v17 = vld [vmem:[#allocation3 + $0xf0] sm:$0xff] }
 0x32d   :  { %9938 = vmatprep.mubr.msk.bf16.mxu1 %vm10924_vm2, %v14441_v31  ;;  %v3459_v47 = vpop.f32.mrb[102].mxu0 }
 0x32e   :  { %v12631_v57 = vadd.f32 %v3937_v29, %v3459_v47  ;;  %v9489_v1 = vpop.f32.mrb[103].mxu0  ;;  %v4767_v29 = vld [vmem:[#allocation3 + $0xe8] sm:$0xff] }
 0x32f   :  { %v3942_v53 = vpop.f32.mrb[104].mxu1  ;;  %v4838_v47 = vpack.c.bf16 %v4767_v29, %v4766_v19 }
 0x330   :  { %v9660_v2 = vpop.f32.mrb[105].mxu1  ;;  %9767 = vmatmul.mubr.msk.bf16.gmra.mrb[208].mxu0 %vm27_vm0, %v4167_v4 }
 0x331   :  { %v3944_v8 = vpop.f32.mrb[106].mxu1  ;;  %9770 = vmatprep.mubr.msk.bf16.mxu0 %vm10924_vm2, %v14441_v31 }
 0x332   :  { %v9661_v9 = vpop.f32.mrb[107].mxu1 }
 0x333   :  { %v3464_v12 = vpop.f32.mrb[104].mxu0 }
 0x334   :  { %9939 = vmatmul.mubr.msk.bf16.gmra.mrb[212].mxu1 %vm27_vm0, %v4837_v11  ;;  %v9492_v7 = vpop.f32.mrb[105].mxu0  ;;  %v4169_v12 = vpack.c.bf16 %v4766_v19, %v4765_v55 }
 0x335   :  { %9942 = vmatprep.mubr.msk.bf16.mxu1 %vm10924_vm2, %v14441_v31  ;;  %v3466_v25 = vpop.f32.mrb[106].mxu0 }
 0x336   :  { %v12639_v60 = vadd.f32 %v3944_v8, %v3466_v25  ;;  %v9493_v35 = vpop.f32.mrb[107].mxu0  ;;  %v12651_v25 = vld [vmem:[#allocation3 + $0xf8] sm:$0xff] }
 0x337   :  { %v3949_v27 = vpop.f32.mrb[108].mxu1 }
 0x338   :  { %v9664_v37 = vpop.f32.mrb[109].mxu1  ;;  %9771 = vmatmul.mubr.msk.bf16.gmra.mrb[212].mxu0 %vm27_vm0, %v4168_v21 }
 0x339   :  { %v3952_v39 = vpop.f32.mrb[110].mxu1  ;;  %9774 = vmatprep.mubr.msk.bf16.mxu0 %vm10924_vm2, %v14441_v31  ;;  %v4839_v37 = vpack.c.bf16 %v12651_v25, %v4768_v17 }
 0x33a   :  { %v9665_v44 = vpop.f32.mrb[111].mxu1 }
 0x33b   :  { %v3471_v53 = vpop.f32.mrb[108].mxu0  ;;  %v12664_v44 = vld [vmem:[#allocation3 + $0x108] sm:$0xff] }
 0x33c   :  { %9943 = vmatmul.mubr.msk.bf16.gmra.mrb[216].mxu1 %vm27_vm0, %v4838_v47  ;;  %v12647_v1 = vadd.f32 %v3949_v27, %v3471_v53  ;;  %v9496_v2 = vpop.f32.mrb[109].mxu0 }
 0x33d   :  { %9946 = vmatprep.mubr.msk.bf16.mxu1 %vm10924_vm2, %v14441_v31  ;;  %v3474_v4 = vpop.f32.mrb[110].mxu0 }
 0x33e   :  { %v12649_v56 = vadd.f32 %v3952_v39, %v3474_v4  ;;  %v9497_v9 = vpop.f32.mrb[111].mxu0  ;;  %v4170_v4 = vpack.c.bf16 %v4768_v17, %v4767_v29 }
 0x33f   :  { %v3957_v8 = vpop.f32.mrb[112].mxu1 }
 0x340   :  { %14443 = vst [vmem:[#allocation5_spill] sm:$0xff] %v12649_v56  ;;  %v9668_v11 = vpop.f32.mrb[113].mxu1  ;;  %9775 = vmatmul.mubr.msk.bf16.gmra.mrb[216].mxu0 %vm27_vm0, %v4169_v12 }
 0x341   :  { %v3960_v7 = vpop.f32.mrb[114].mxu1  ;;  %9778 = vmatprep.mubr.msk.bf16.mxu0 %vm10924_vm2, %v14441_v31  ;;  %v12670_v11 = vld [vmem:[#allocation3 + $0x100] sm:$0xff] }
 0x342   :  { %v9669_v35 = vpop.f32.mrb[115].mxu1 }
 0x343   :  { %v3479_v27 = vpop.f32.mrb[112].mxu0 }
 0x344   :  { %9947 = vmatmul.mubr.msk.bf16.gmra.mrb[220].mxu1 %vm27_vm0, %v4839_v37  ;;  %v12660_v21 = vadd.f32 %v3957_v8, %v3479_v27  ;;  %v9500_v55 = vpop.f32.mrb[113].mxu0  ;;  %v4840_v8 = vpack.c.bf16 %v12664_v44, %v12670_v11  ;;  %v4772_v27 = vld [vmem:[#allocation3 + $0x110] sm:$0xff] }
 0x345   :  { %9950 = vmatprep.mubr.msk.bf16.mxu1 %vm10924_vm2, %v14441_v31  ;;  %v3482_v19 = vpop.f32.mrb[114].mxu0 }
 0x346   :  { %14444 = vst [vmem:[#allocation6_spill] sm:$0xff] %v12660_v21  ;;  %v12666_v47 = vadd.f32 %v3960_v7, %v3482_v19  ;;  %v9501_v53 = vpop.f32.mrb[115].mxu0 }
 0x347   :  { %v12662_v39 = vpop.f32.mrb[116].mxu1 }
 0x348   :  { %14445 = vst [vmem:[#allocation7_spill] sm:$0xff] %v12666_v47  ;;  %v9672_v2 = vpop.f32.mrb[117].mxu1  ;;  %9779 = vmatmul.mubr.msk.bf16.gmra.mrb[220].mxu0 %vm27_vm0, %v4170_v4 }
 0x349   :  { %v12668_v9 = vpop.f32.mrb[118].mxu1  ;;  %9782 = vmatprep.mubr.msk.bf16.mxu0 %vm10924_vm2, %v14441_v31  ;;  %v4171_v2 = vpack.c.bf16 %v12670_v11, %v12651_v25  ;;  %v4775_v11 = vld [vmem:[#allocation3 + $0x128] sm:$0xff] }
 0x34a   :  { %v9673_v12 = vpop.f32.mrb[119].mxu1 }
 0x34b   :  { %v3487_v29 = vpop.f32.mrb[116].mxu0  ;;  %v4773_v12 = vld [vmem:[#allocation3 + $0x118] sm:$0xff] }
 0x34c   :  { %9951 = vmatmul.mubr.msk.bf16.gmra.mrb[224].mxu1 %vm27_vm0, %v4840_v8  ;;  %v12866_v17 = vadd.f32 %v12662_v39, %v3487_v29  ;;  %v9504_v7 = vpop.f32.mrb[117].mxu0  ;;  %v14448_v39 = vmov 0.0  }
 0x34d   :  { %9954 = vmatprep.mubr.msk.bf16.mxu1 %vm10924_vm2, %v14441_v31  ;;  %v3490_v35 = vpop.f32.mrb[118].mxu0  ;;  %v4841_v31 = vpack.c.bf16 %v4773_v12, %v4772_v27 }
 0x34e   :  { %14446 = vst [vmem:[#allocation8_spill] sm:$0xff] %v12866_v17  ;;  %v12869_v55 = vadd.f32 %v12668_v9, %v3490_v35  ;;  %v9505_v19 = vpop.f32.mrb[119].mxu0  ;;  %v4777_v17 = vld [vmem:[#allocation3 + $0x138] sm:$0xff] }
 0x34f   :  { %v3973_v37 = vpop.f32.mrb[120].mxu1 }
 0x350   :  { %14447 = vst [vmem:[#allocation9_spill] sm:$0xff] %v12869_v55  ;;  %v9676_v53 = vpop.f32.mrb[121].mxu1  ;;  %9783 = vmatmul.mubr.msk.bf16.gmra.mrb[224].mxu0 %vm27_vm0, %v4171_v2  ;;  %v4172_v2 = vpack.c.bf16 %v4772_v27, %v12664_v44  ;;  %v4776_v27 = vld [vmem:[#allocation3 + $0x130] sm:$0xff] }
 0x351   :  { %v3976_v4 = vpop.f32.mrb[122].mxu1  ;;  %9786 = vmatprep.mubr.msk.bf16.mxu0 %vm10924_vm2, %v14448_v39  ;;  %v4843_v47 = vpack.c.bf16 %v4777_v17, %v4776_v27 }
 0x352   :  { %v9677_v8 = vpop.f32.mrb[123].mxu1 }
 0x353   :  { %v3495_v29 = vpop.f32.mrb[120].mxu0  ;;  %v4774_v8 = vld [vmem:[#allocation3 + $0x120] sm:$0xff] }
 0x354   :  { %9955 = vmatmul.mubr.msk.bf16.gmra.mrb[228].mxu1 %vm27_vm0, %v4841_v31  ;;  %v12879_v9 = vadd.f32 %v3973_v37, %v3495_v29  ;;  %v9508_v7 = vpop.f32.mrb[121].mxu0  ;;  %v4842_v31 = vpack.c.bf16 %v4775_v11, %v4774_v8 }
 0x355   :  { %9958 = vmatprep.mubr.msk.bf16.mxu1 %vm10924_vm2, %v14448_v39  ;;  %v3498_v35 = vpop.f32.mrb[122].mxu0 }
 0x356   :  { %14449 = vst [vmem:[#allocation10_spill] sm:$0xff] %v12879_v9  ;;  %v9509_v19 = vpop.f32.mrb[123].mxu0 }
 0x357   :  { %v3980_v25 = vpop.f32.mrb[124].mxu1 }
 0x358   :  { %v9680_v53 = vpop.f32.mrb[125].mxu1  ;;  %9787 = vmatmul.mubr.msk.bf16.gmra.mrb[228].mxu0 %vm27_vm0, %v4172_v2  ;;  %v4173_v2 = vpack.c.bf16 %v4774_v8, %v4773_v12  ;;  %v4779_v8 = vld [vmem:[#allocation3 + $0x148] sm:$0xff] }
 0x359   :  { %v3983_v4 = vpop.f32.mrb[126].mxu1  ;;  %9790 = vmatprep.mubr.msk.bf16.mxu0 %vm10924_vm2, %v14448_v39 }
 0x35a   :  { %v9681_v55 = vpop.f32.mrb[127].mxu1 }
 0x35b   :  { %v3502_v37 = vpop.f32.mrb[124].mxu0 }
 0x35c   :  { %9959 = vmatmul.mubr.msk.bf16.gmra.mrb[232].mxu1 %vm27_vm0, %v4842_v31  ;;  %v12888_v29 = vadd.f32 %v3980_v25, %v3502_v37  ;;  %v9512_v7 = vpop.f32.mrb[125].mxu0 }
 0x35d   :  { %9962 = vmatprep.mubr.msk.bf16.mxu1 %vm10924_vm2, %v14448_v39  ;;  %v3505_v35 = vpop.f32.mrb[126].mxu0 }
 0x35e   :  { %14450 = vst [vmem:[#allocation11_spill] sm:$0xff] %v12888_v29  ;;  %v12890_v19 = vadd.f32 %v3983_v4, %v3505_v35  ;;  %v9513_v53 = vpop.f32.mrb[127].mxu0 }
 0x35f   :  { %v3988_v44 = vpop.f32.mrb[128].mxu1 }
 0x360   :  { %14451 = vst [vmem:[#allocation12_spill] sm:$0xff] %v12890_v19  ;;  %v9684_v55 = vpop.f32.mrb[129].mxu1  ;;  %9791 = vmatmul.mubr.msk.bf16.gmra.mrb[232].mxu0 %vm27_vm0, %v4173_v2  ;;  %v4174_v2 = vpack.c.bf16 %v4776_v27, %v4775_v11  ;;  %v4778_v19 = vld [vmem:[#allocation3 + $0x140] sm:$0xff]  ;;  %v4780_v27 = vld [vmem:[#allocation3 + $0x150] sm:$0xff] }
 0x361   :  { %v3991_v9 = vpop.f32.mrb[130].mxu1  ;;  %9794 = vmatprep.mubr.msk.bf16.mxu0 %vm10924_vm2, %v14448_v39  ;;  %v4844_v29 = vpack.c.bf16 %v4779_v8, %v4778_v19 }
 0x362   :  { %v9685_v31 = vpop.f32.mrb[131].mxu1 }
 0x363   :  { %v3510_v25 = vpop.f32.mrb[128].mxu0 }
 0x364   :  { %9963 = vmatmul.mubr.msk.bf16.gmra.mrb[236].mxu1 %vm27_vm0, %v4843_v47  ;;  %v12898_v4 = vadd.f32 %v3988_v44, %v3510_v25  ;;  %v9516_v37 = vpop.f32.mrb[129].mxu0 }
 0x365   :  { %9966 = vmatprep.mubr.msk.bf16.mxu1 %vm10924_vm2, %v14448_v39  ;;  %v3513_v7 = vpop.f32.mrb[130].mxu0 }
 0x366   :  { %14452 = vst [vmem:[#allocation13_spill] sm:$0xff] %v12898_v4  ;;  %v12900_v35 = vadd.f32 %v3991_v9, %v3513_v7  ;;  %v9517_v53 = vpop.f32.mrb[131].mxu0  ;;  %v4781_v7 = vld [vmem:[#allocation3 + $0x158] sm:$0xff] }
 0x367   :  { %v3996_v12 = vpop.f32.mrb[132].mxu1  ;;  %v4845_v4 = vpack.c.bf16 %v4781_v7, %v4780_v27 }
 0x368   :  { %14453 = vst [vmem:[#allocation14_spill] sm:$0xff] %v12900_v35  ;;  %v9688_v55 = vpop.f32.mrb[133].mxu1  ;;  %9795 = vmatmul.mubr.msk.bf16.gmra.mrb[236].mxu0 %vm27_vm0, %v4174_v2 }
 0x369   :  { %v3999_v31 = vpop.f32.mrb[134].mxu1  ;;  %9798 = vmatprep.mubr.msk.bf16.mxu0 %vm10924_vm2, %v14448_v39 }
 0x36a   :  { %v9689_v47 = vpop.f32.mrb[135].mxu1 }
 0x36b   :  { %v3518_v44 = vpop.f32.mrb[132].mxu0  ;;  %v4175_v47 = vpack.c.bf16 %v4778_v19, %v4777_v17  ;;  %v4782_v17 = vld [vmem:[#allocation3 + $0x160] sm:$0xff]  ;;  %v4783_v19 = vld [vmem:[#allocation3 + $0x168] sm:$0xff] }
 0x36c   :  { %9967 = vmatmul.mubr.msk.bf16.gmra.mrb[240].mxu1 %vm27_vm0, %v4844_v29  ;;  %v12908_v9 = vadd.f32 %v3996_v12, %v3518_v44  ;;  %v9520_v25 = vpop.f32.mrb[133].mxu0 }
 0x36d   :  { %9970 = vmatprep.mubr.msk.bf16.mxu1 %vm10924_vm2, %v14448_v39  ;;  %v3521_v37 = vpop.f32.mrb[134].mxu0 }
 0x36e   :  { %14454 = vst [vmem:[#allocation15_spill] sm:$0xff] %v12908_v9  ;;  %v12910_v53 = vadd.f32 %v3999_v31, %v3521_v37  ;;  %v9521_v55 = vpop.f32.mrb[135].mxu0  ;;  %v4846_v9 = vpack.c.bf16 %v4783_v19, %v4782_v17 }
 0x36f   :  { %v4004_v11 = vpop.f32.mrb[136].mxu1 }
 0x370   :  { %14455 = vst [vmem:[#allocation16_spill] sm:$0xff] %v12910_v53  ;;  %v9692_v2 = vpop.f32.mrb[137].mxu1  ;;  %9799 = vmatmul.mubr.msk.bf16.gmra.mrb[240].mxu0 %vm27_vm0, %v4175_v47 }
 0x371   :  { %v4007_v35 = vpop.f32.mrb[138].mxu1  ;;  %9802 = vmatprep.mubr.msk.bf16.mxu0 %vm10924_vm2, %v14448_v39 }
 0x372   :  { %v9693_v29 = vpop.f32.mrb[139].mxu1 }
 0x373   :  { %v3526_v12 = vpop.f32.mrb[136].mxu0  ;;  %v4176_v29 = vpack.c.bf16 %v4780_v27, %v4779_v8  ;;  %v10779_v8 = vld [vmem:[%s14437_s3 + $0x38] sm:$0xff]  }
 0x374   :  { %9971 = vmatmul.mubr.msk.bf16.gmra.mrb[244].mxu1 %vm27_vm0, %v4845_v4  ;;  %v12918_v44 = vadd.f32 %v4004_v11, %v3526_v12  ;;  %v9524_v31 = vpop.f32.mrb[137].mxu0  ;;  %v10780_v27 = vld [vmem:[%s14437_s3 + $0x18] sm:$0xff]   ;;  %10077 = vmatpush3.bf16.msra.mxu0 %v10779_v8 }
 0x375   :  { %9974 = vmatprep.mubr.msk.bf16.mxu1 %vm10924_vm2, %v14448_v39  ;;  %v3529_v25 = vpop.f32.mrb[138].mxu0  ;;  %10249 = vmatpush3.bf16.msra.mxu1 %v10780_v27  ;;  %v4786_v27 = vld [vmem:[#allocation3 + $0x180] sm:$0xff] }
 0x376   :  { %14456 = vst [vmem:[#allocation17_spill] sm:$0xff] %v12918_v44  ;;  %v12920_v55 = vadd.f32 %v4007_v35, %v3529_v25  ;;  %v9525_v2 = vpop.f32.mrb[139].mxu0  ;;  %v4785_v25 = vld [vmem:[#allocation3 + $0x178] sm:$0xff]  ;;  %10414 = vmatprep.subr.bf16.mxu0 %v14448_v39  ;;  %10586 = vmatprep.subr.bf16.mxu1 %v14448_v39 }
 0x377   :  { %v4012_v37 = vpop.f32.mrb[140].mxu1 }
 0x378   :  { %14457 = vst [vmem:[#allocation18_spill] sm:$0xff] %v12920_v55  ;;  %v9696_v47 = vpop.f32.mrb[141].mxu1  ;;  %9803 = vmatmul.mubr.msk.bf16.gmra.mrb[244].mxu0 %vm27_vm0, %v4176_v29  ;;  %v4787_v55 = vld [vmem:[#allocation3 + $0x188] sm:$0xff] }
 0x379   :  { %v4014_v53 = vpop.f32.mrb[142].mxu1  ;;  %9806 = vmatprep.mubr.msk.bf16.mxu0 %vm10924_vm2, %v14448_v39  ;;  %v4177_v47 = vpack.c.bf16 %v4782_v17, %v4781_v7  ;;  %v4848_v44 = vpack.c.bf16 %v4787_v55, %v4786_v27 }
 0x37a   :  { %v9697_v4 = vpop.f32.mrb[143].mxu1 }
 0x37b   :  { %v3534_v11 = vpop.f32.mrb[140].mxu0  ;;  %v4784_v4 = vld [vmem:[#allocation3 + $0x170] sm:$0xff] }
 0x37c   :  { %9975 = vmatmul.mubr.msk.bf16.gmra.mrb[248].mxu1 %vm27_vm0, %v4846_v9  ;;  %v9528_v12 = vpop.f32.mrb[141].mxu0 }
 0x37d   :  { %9978 = vmatprep.mubr.msk.bf16.mxu1 %vm10924_vm2, %v14448_v39  ;;  %v3536_v35 = vpop.f32.mrb[142].mxu0  ;;  %v4847_v12 = vpack.c.bf16 %v4785_v25, %v4784_v4 }
 0x37e   :  { %v12934_v37 = vadd.f32 %v4014_v53, %v3536_v35  ;;  %v9529_v2 = vpop.f32.mrb[143].mxu0 }
 0x37f   :  { %v4019_v31 = vpop.f32.mrb[144].mxu1 }
 0x380   :  { %14458 = vst [vmem:[#allocation19_spill] sm:$0xff] %v12934_v37  ;;  %v9700_v9 = vpop.f32.mrb[145].mxu1  ;;  %9807 = vmatmul.mubr.msk.bf16.gmra.mrb[248].mxu0 %vm27_vm0, %v4177_v47 }
 0x381   :  { %v4022_v29 = vpop.f32.mrb[146].mxu1  ;;  %9810 = vmatprep.mubr.msk.bf16.mxu0 %vm10924_vm2, %v14448_v39 }
 0x382   :  { %v9701_v11 = vpop.f32.mrb[147].mxu1 }
 0x383   :  { %v3541_v53 = vpop.f32.mrb[144].mxu0  ;;  %v4178_v11 = vpack.c.bf16 %v4784_v4, %v4783_v19  ;;  %v4789_v4 = vld [vmem:[#allocation3 + $0x198] sm:$0xff] }
 0x384   :  { %9979 = vmatmul.mubr.msk.bf16.gmra.mrb[252].mxu1 %vm27_vm0, %v4847_v12  ;;  %v12944_v7 = vadd.f32 %v4019_v31, %v3541_v53  ;;  %v9532_v17 = vpop.f32.mrb[145].mxu0 }
 0x385   :  { %9982 = vmatprep.mubr.msk.bf16.mxu1 %vm10924_vm2, %v14448_v39  ;;  %v3544_v35 = vpop.f32.mrb[146].mxu0 }
 0x386   :  { %14459 = vst [vmem:[#allocation20_spill] sm:$0xff] %v12944_v7  ;;  %v12946_v2 = vadd.f32 %v4022_v29, %v3544_v35  ;;  %v9533_v9 = vpop.f32.mrb[147].mxu0 }
 0x387   :  { %v4027_v8 = vpop.f32.mrb[148].mxu1 }
 0x388   :  { %14460 = vst [vmem:[#allocation21_spill] sm:$0xff] %v12946_v2  ;;  %v9704_v47 = vpop.f32.mrb[149].mxu1  ;;  %9811 = vmatmul.mubr.msk.bf16.gmra.mrb[252].mxu0 %vm27_vm0, %v4178_v11  ;;  %v4179_v11 = vpack.c.bf16 %v4786_v27, %v4785_v25  ;;  %v4788_v2 = vld [vmem:[#allocation3 + $0x190] sm:$0xff]  ;;  %v4790_v27 = vld [vmem:[#allocation3 + $0x1a0] sm:$0xff] }
 0x389   :  { %v4030_v37 = vpop.f32.mrb[150].mxu1  ;;  %9814 = vmatprep.mubr.msk.bf16.mxu0 %vm10924_vm2, %v14448_v39  ;;  %v4849_v7 = vpack.c.bf16 %v4789_v4, %v4788_v2 }
 0x38a   :  { %v9705_v12 = vpop.f32.mrb[151].mxu1 }
 0x38b   :  { %v3549_v31 = vpop.f32.mrb[148].mxu0 }
 0x38c   :  { %9983 = vmatmul.mubr.msk.bf16.gmra.mrb[0].mxu1 %vm27_vm0, %v4848_v44  ;;  %v12954_v29 = vadd.f32 %v4027_v8, %v3549_v31  ;;  %v9536_v53 = vpop.f32.mrb[149].mxu0 }
 0x38d   :  { %9986 = vmatprep.mubr.msk.bf16.mxu1 %vm10924_vm2, %v14448_v39  ;;  %v3552_v17 = vpop.f32.mrb[150].mxu0 }
 0x38e   :  { %14461 = vst [vmem:[#allocation22_spill] sm:$0xff] %v12954_v29  ;;  %v12956_v35 = vadd.f32 %v4030_v37, %v3552_v17  ;;  %v9537_v9 = vpop.f32.mrb[151].mxu0 }
 0x38f   :  { %v4035_v19 = vpop.f32.mrb[152].mxu1 }
 0x390   :  { %14462 = vst [vmem:[#allocation23_spill] sm:$0xff] %v12956_v35  ;;  %v9708_v47 = vpop.f32.mrb[153].mxu1  ;;  %9815 = vmatmul.mubr.msk.bf16.gmra.mrb[0].mxu0 %vm27_vm0, %v4179_v11  ;;  %v4180_v11 = vpack.c.bf16 %v4788_v2, %v4787_v55  ;;  %v4791_v35 = vld [vmem:[#allocation3 + $0x1a8] sm:$0xff]  ;;  %v4793_v2 = vld [vmem:[#allocation3 + $0x1b8] sm:$0xff] }
 0x391   :  { %v4038_v12 = vpop.f32.mrb[154].mxu1  ;;  %9818 = vmatprep.mubr.msk.bf16.mxu0 %vm10924_vm2, %v14448_v39  ;;  %v4850_v29 = vpack.c.bf16 %v4791_v35, %v4790_v27 }
 0x392   :  { %v9709_v44 = vpop.f32.mrb[155].mxu1 }
 0x393   :  { %v3557_v8 = vpop.f32.mrb[152].mxu0 }
 0x394   :  { %9987 = vmatmul.mubr.msk.bf16.gmra.mrb[4].mxu1 %vm27_vm0, %v4849_v7  ;;  %v12964_v37 = vadd.f32 %v4035_v19, %v3557_v8  ;;  %v9540_v31 = vpop.f32.mrb[153].mxu0 }
 0x395   :  { %9990 = vmatprep.mubr.msk.bf16.mxu1 %vm10924_vm2, %v14448_v39  ;;  %v3560_v53 = vpop.f32.mrb[154].mxu0 }
 0x396   :  { %14463 = vst [vmem:[#allocation24_spill] sm:$0xff] %v12964_v37  ;;  %v12966_v17 = vadd.f32 %v4038_v12, %v3560_v53  ;;  %v9541_v9 = vpop.f32.mrb[155].mxu0  ;;  %v4805_v37 = vld [vmem:[#allocation3 + $0x218] sm:$0xff] }
 0x397   :  { %v4043_v25 = vpop.f32.mrb[156].mxu1  ;;  %v4181_v9 = vpack.c.bf16 %v4790_v27, %v4789_v4  ;;  %v4794_v4 = vld [vmem:[#allocation3 + $0x1c0] sm:$0xff] }
 0x398   :  { %14464 = vst [vmem:[#allocation25_spill] sm:$0xff] %v12966_v17  ;;  %v9712_v47 = vpop.f32.mrb[157].mxu1  ;;  %9819 = vmatmul.mubr.msk.bf16.gmra.mrb[4].mxu0 %vm27_vm0, %v4180_v11 }
 0x399   :  { %v4046_v44 = vpop.f32.mrb[158].mxu1  ;;  %9822 = vmatprep.mubr.msk.bf16.mxu0 %vm10924_vm2, %v14448_v39 }
 0x39a   :  { %v9713_v7 = vpop.f32.mrb[159].mxu1  ;;  %v4792_v44 = vld [vmem:[#allocation3 + $0x1b0] sm:$0xff] }
 0x39b   :  { %v3565_v19 = vpop.f32.mrb[156].mxu0  ;;  %v4851_v17 = vpack.c.bf16 %v4793_v2, %v4792_v44 }
 0x39c   :  { %9991 = vmatmul.mubr.msk.bf16.gmra.mrb[8].mxu1 %vm27_vm0, %v4850_v29  ;;  %v12974_v12 = vadd.f32 %v4043_v25, %v3565_v19  ;;  %v9544_v8 = vpop.f32.mrb[157].mxu0 }
 0x39d   :  { %9994 = vmatprep.mubr.msk.bf16.mxu1 %vm10924_vm2, %v14448_v39  ;;  %v3568_v31 = vpop.f32.mrb[158].mxu0 }
 0x39e   :  { %14465 = vst [vmem:[#allocation26_spill] sm:$0xff] %v12974_v12  ;;  %v9545_v53 = vpop.f32.mrb[159].mxu0  ;;  %v4182_v31 = vpack.c.bf16 %v4792_v44, %v4791_v35  ;;  %v4797_v35 = vld [vmem:[#allocation3 + $0x1d8] sm:$0xff] }
 0x39f   :  { %v4050_v55 = vpop.f32.mrb[160].mxu1 }
 0x3a0   :  { %v9716_v47 = vpop.f32.mrb[161].mxu1  ;;  %9823 = vmatmul.mubr.msk.bf16.gmra.mrb[8].mxu0 %vm27_vm0, %v4181_v9  ;;  %v4795_v9 = vld [vmem:[#allocation3 + $0x1c8] sm:$0xff] }
 0x3a1   :  { %v4052_v11 = vpop.f32.mrb[162].mxu1  ;;  %9826 = vmatprep.mubr.msk.bf16.mxu0 %vm10924_vm2, %v14448_v39 }
 0x3a2   :  { %v9717_v7 = vpop.f32.mrb[163].mxu1  ;;  %v4852_v11 = vpack.c.bf16 %v4795_v9, %v4794_v4 }
 0x3a3   :  { %v3572_v29 = vpop.f32.mrb[160].mxu0 }
 0x3a4   :  { %9995 = vmatmul.mubr.msk.bf16.gmra.mrb[12].mxu1 %vm27_vm0, %v4851_v17  ;;  %v9548_v25 = vpop.f32.mrb[161].mxu0 }
 0x3a5   :  { %9998 = vmatprep.mubr.msk.bf16.mxu1 %vm10924_vm2, %v14448_v39  ;;  %v3574_v19 = vpop.f32.mrb[162].mxu0 }
 0x3a6   :  { %v9549_v27 = vpop.f32.mrb[163].mxu0  ;;  %v4183_v19 = vpack.c.bf16 %v4794_v4, %v4793_v2  ;;  %v4798_v2 = vld [vmem:[#allocation3 + $0x1e0] sm:$0xff]  ;;  %v4799_v4 = vld [vmem:[#allocation3 + $0x1e8] sm:$0xff] }
 0x3a7   :  { %v4056_v8 = vpop.f32.mrb[164].mxu1 }
 0x3a8   :  { %v9720_v55 = vpop.f32.mrb[165].mxu1  ;;  %9827 = vmatmul.mubr.msk.bf16.gmra.mrb[12].mxu0 %vm27_vm0, %v4182_v31  ;;  %v4796_v31 = vld [vmem:[#allocation3 + $0x1d0] sm:$0xff] }
 0x3a9   :  { %v4058_v53 = vpop.f32.mrb[166].mxu1  ;;  %9830 = vmatprep.mubr.msk.bf16.mxu0 %vm10924_vm2, %v14448_v39 }
 0x3aa   :  { %v9721_v47 = vpop.f32.mrb[167].mxu1  ;;  %v4853_v53 = vpack.c.bf16 %v4797_v35, %v4796_v31 }
 0x3ab   :  { %v3578_v17 = vpop.f32.mrb[164].mxu0 }
 0x3ac   :  { %9999 = vmatmul.mubr.msk.bf16.gmra.mrb[16].mxu1 %vm27_vm0, %v4852_v11  ;;  %v9552_v7 = vpop.f32.mrb[165].mxu0 }
 0x3ad   :  { %10002 = vmatprep.mubr.msk.bf16.mxu1 %vm10924_vm2, %v14448_v39  ;;  %v3580_v29 = vpop.f32.mrb[166].mxu0 }
 0x3ae   :  { %v9553_v44 = vpop.f32.mrb[167].mxu0 }
 0x3af   :  { %v4062_v25 = vpop.f32.mrb[168].mxu1 }
 0x3b0   :  { %v9724_v8 = vpop.f32.mrb[169].mxu1  ;;  %9831 = vmatmul.mubr.msk.bf16.gmra.mrb[16].mxu0 %vm27_vm0, %v4183_v19  ;;  %v4184_v25 = vpack.c.bf16 %v4796_v31, %v4795_v9  ;;  %v4801_v9 = vld [vmem:[#allocation3 + $0x1f8] sm:$0xff] }
 0x3b1   :  { %v4064_v27 = vpop.f32.mrb[170].mxu1  ;;  %9834 = vmatprep.mubr.msk.bf16.mxu0 %vm10924_vm2, %v14448_v39 }
 0x3b2   :  { %v9725_v55 = vpop.f32.mrb[171].mxu1  ;;  %v4854_v27 = vpack.c.bf16 %v4799_v4, %v4798_v2 }
 0x3b3   :  { %v3584_v47 = vpop.f32.mrb[168].mxu0 }
 0x3b4   :  { %10003 = vmatmul.mubr.msk.bf16.gmra.mrb[20].mxu1 %vm27_vm0, %v4853_v53  ;;  %v9556_v11 = vpop.f32.mrb[169].mxu0 }
 0x3b5   :  { %10006 = vmatprep.mubr.msk.bf16.mxu1 %vm10924_vm2, %v14448_v39  ;;  %v3586_v17 = vpop.f32.mrb[170].mxu0 }
 0x3b6   :  { %v9557_v29 = vpop.f32.mrb[171].mxu0  ;;  %v4800_v17 = vld [vmem:[#allocation3 + $0x1f0] sm:$0xff] }
 0x3b7   :  { %v4068_v7 = vpop.f32.mrb[172].mxu1 }
 0x3b8   :  { %v9728_v44 = vpop.f32.mrb[173].mxu1  ;;  %9835 = vmatmul.mubr.msk.bf16.gmra.mrb[20].mxu0 %vm27_vm0, %v4184_v25  ;;  %v4185_v7 = vpack.c.bf16 %v4798_v2, %v4797_v35  ;;  %v4186_v2 = vpack.c.bf16 %v4800_v17, %v4799_v4  ;;  %v13016_v4 = vld [vmem:[%s14438_s5] ss:$0 sm:$0xff] }
 0x3b9   :  { %v4070_v19 = vpop.f32.mrb[174].mxu1  ;;  %9838 = vmatprep.mubr.msk.bf16.mxu0 %vm10924_vm2, %v14448_v39 }
 0x3ba   :  { %v9729_v8 = vpop.f32.mrb[175].mxu1  ;;  %v4855_v19 = vpack.c.bf16 %v4801_v9, %v4800_v17 }
 0x3bb   :  { %v3590_v55 = vpop.f32.mrb[172].mxu0 }
 0x3bc   :  { %10007 = vmatmul.mubr.msk.bf16.gmra.mrb[24].mxu1 %vm27_vm0, %v4854_v27  ;;  %v9560_v53 = vpop.f32.mrb[173].mxu0 }
 0x3bd   :  { %10010 = vmatprep.mubr.msk.bf16.mxu1 %vm10924_vm2, %v14448_v39  ;;  %v3592_v47 = vpop.f32.mrb[174].mxu0 }
 0x3be   :  { %v9561_v31 = vpop.f32.mrb[175].mxu0  ;;  %v4803_v47 = vld [vmem:[#allocation3 + $0x208] sm:$0xff] }
 0x3bf   :  { %v4074_v11 = vpop.f32.mrb[176].mxu1 }
 0x3c0   :  { %v9732_v29 = vpop.f32.mrb[177].mxu1  ;;  %9839 = vmatmul.mubr.msk.bf16.gmra.mrb[24].mxu0 %vm27_vm0, %v4185_v7  ;;  %v4802_v7 = vld [vmem:[#allocation3 + $0x200] sm:$0xff] }
 0x3c1   :  { %v4076_v25 = vpop.f32.mrb[178].mxu1  ;;  %9842 = vmatprep.mubr.msk.bf16.mxu0 %vm10924_vm2, %v14448_v39 }
 0x3c2   :  { %v9733_v44 = vpop.f32.mrb[179].mxu1  ;;  %v4856_v25 = vpack.c.bf16 %v4803_v47, %v4802_v7 }
 0x3c3   :  { %v3596_v8 = vpop.f32.mrb[176].mxu0 }
 0x3c4   :  { %10011 = vmatmul.mubr.msk.bf16.gmra.mrb[28].mxu1 %vm27_vm0, %v4855_v19  ;;  %v9564_v27 = vpop.f32.mrb[177].mxu0 }
 0x3c5   :  { %10014 = vmatprep.mubr.msk.bf16.mxu1 %vm10924_vm2, %v14448_v39  ;;  %v3598_v55 = vpop.f32.mrb[178].mxu0 }
 0x3c6   :  { %v9565_v35 = vpop.f32.mrb[179].mxu0  ;;  %v4804_v55 = vld [vmem:[#allocation3 + $0x210] sm:$0xff] }
 0x3c7   :  { %v5044_v53 = vpop.f32.mrb[180].mxu1 }
 0x3c8   :  { %v9908_v11 = vpop.f32.mrb[181].mxu1  ;;  %9843 = vmatmul.mubr.msk.bf16.gmra.mrb[28].mxu0 %vm27_vm0, %v4186_v2 }
 0x3c9   :  { %v5047_v31 = vpop.f32.mrb[182].mxu1  ;;  %9846 = vmatprep.mubr.msk.bf16.mxu0 %vm10924_vm2, %v14448_v39 }
 0x3ca   :  { %v9909_v29 = vpop.f32.mrb[183].mxu1 }
 0x3cb   :  { %v4375_v44 = vpop.f32.mrb[180].mxu0  ;;  %v4187_v29 = vpack.c.bf16 %v4802_v7, %v4801_v9 }
 0x3cc   :  { %10015 = vmatmul.mubr.msk.bf16.gmra.mrb[32].mxu1 %vm27_vm0, %v4856_v25  ;;  %v4684_v19 = vadd.f32 %v4375_v44, %v12403_v48  ;;  %v9740_v8 = vpop.f32.mrb[181].mxu0 }
 0x3cd   :  { %10018 = vmatprep.mubr.msk.bf16.mxu1 %vm10924_vm2, %v14448_v39  ;;  %v4378_v17 = vpop.f32.mrb[182].mxu0  ;;  %v4857_v8 = vpack.c.bf16 %v4805_v37, %v4804_v55 }
 0x3ce   :  { %v5353_v35 = vadd.f32 %v5044_v53, %v4684_v19  ;;  %v4685_v2 = vadd.f32 %v4378_v17, %v12405_v52  ;;  %v9741_v11 = vpop.f32.mrb[183].mxu0 }
 0x3cf   :  { %v5052_v27 = vpop.f32.mrb[184].mxu1 }
 0x3d0   :  { %v9912_v25 = vpop.f32.mrb[185].mxu1  ;;  %v5424_v21 = vadd.f32 %v13016_v4, %v5353_v35  ;;  %v5354_v48 = vadd.f32 %v5047_v31, %v4685_v2  ;;  %9847 = vmatmul.mubr.msk.bf16.gmra.mrb[32].mxu0 %vm27_vm0, %v4187_v29  ;;  %v13029_v35 = vld [vmem:[#allocation3 + $0x228] sm:$0xff]  ;;  %v4188_v29 = vpack.c.bf16 %v4804_v55, %v4803_v47 }
 0x3d1   :  { %v5055_v12 = vpop.f32.mrb[186].mxu1  ;;  %9850 = vmatprep.mubr.msk.bf16.mxu0 %vm10924_vm2, %v14448_v39 }
 0x3d2   :  { %v9913_v44 = vpop.f32.mrb[187].mxu1  ;;  %v5488_v56 = vmax.f32 %v5424_v21, 0.0  ;;  %v5425_v53 = vadd.f32 %v13016_v4, %v5354_v48 }
 0x3d3   :  { %v4383_v52 = vpop.f32.mrb[184].mxu0  ;;  %v4806_v44 = vld [vmem:[#allocation3 + $0x220] sm:$0xff] }
 0x3d4   :  { %10019 = vmatmul.mubr.msk.bf16.gmra.mrb[36].mxu1 %vm27_vm0, %v4857_v8  ;;  %5552 = vst.msk [vmem:[#allocation4] sm:$0xff] %vm119_vm3, %v5488_v56  ;;  %v5489_v9 = vmax.f32 %v5425_v53, 0.0  ;;  %v4686_v31 = vadd.f32 %v4383_v52, %v12413_v63  ;;  %v9744_v7 = vpop.f32.mrb[185].mxu0  ;;  %v4858_v53 = vpack.c.bf16 %v13029_v35, %v4806_v44 }
 0x3d5   :  { %10022 = vmatprep.mubr.msk.bf16.mxu1 %vm10924_vm2, %v14448_v39  ;;  %v4386_v19 = vpop.f32.mrb[186].mxu0  ;;  %v4808_v7 = vld [vmem:[#allocation3 + $0x230] sm:$0xff] }
 0x3d6   :  { %5553 = vst.msk [vmem:[#allocation4 + $0x8] sm:$0xff] %vm119_vm3, %v5489_v9  ;;  %v5355_v21 = vadd.f32 %v5052_v27, %v4686_v31  ;;  %v4687_v2 = vadd.f32 %v4386_v19, %v12415_v6  ;;  %v9745_v11 = vpop.f32.mrb[187].mxu0  ;;  %v4809_v19 = vld [vmem:[#allocation3 + $0x238] sm:$0xff] }
 0x3d7   :  { %v5060_v17 = vpop.f32.mrb[188].mxu1 }
 0x3d8   :  { %v9916_v25 = vpop.f32.mrb[189].mxu1  ;;  %v5426_v56 = vadd.f32 %v13016_v4, %v5355_v21  ;;  %v5356_v8 = vadd.f32 %v5055_v12, %v4687_v2  ;;  %9851 = vmatmul.mubr.msk.bf16.gmra.mrb[36].mxu0 %vm27_vm0, %v4188_v29  ;;  %v4189_v29 = vpack.c.bf16 %v4806_v44, %v4805_v37  ;;  %v4810_v37 = vld [vmem:[#allocation3 + $0x240] sm:$0xff] }
 0x3d9   :  { %v5063_v48 = vpop.f32.mrb[190].mxu1  ;;  %9854 = vmatprep.mubr.msk.bf16.mxu0 %vm10924_vm2, %v14448_v39 }
 0x3da   :  { %v9917_v63 = vpop.f32.mrb[191].mxu1  ;;  %v5490_v52 = vmax.f32 %v5426_v56, 0.0  ;;  %v5427_v27 = vadd.f32 %v13016_v4, %v5356_v8 }
 0x3db   :  { %v4391_v6 = vpop.f32.mrb[188].mxu0 }
 0x3dc   :  { %10023 = vmatmul.mubr.msk.bf16.gmra.mrb[40].mxu1 %vm27_vm0, %v4858_v53  ;;  %5554 = vst.msk [vmem:[#allocation4 + $0x10] sm:$0xff] %vm119_vm3, %v5490_v52  ;;  %v5491_v12 = vmax.f32 %v5427_v27, 0.0  ;;  %v4688_v47 = vadd.f32 %v4391_v6, %v12423_v13  ;;  %v9748_v55 = vpop.f32.mrb[189].mxu0  ;;  %v4859_v53 = vpack.c.bf16 %v4809_v19, %v4808_v7 }
 0x3dd   :  { %10026 = vmatprep.mubr.msk.bf16.mxu1 %vm10924_vm2, %v14448_v39  ;;  %v4394_v9 = vpop.f32.mrb[190].mxu0 }
 0x3de   :  { %5555 = vst.msk [vmem:[#allocation4 + $0x18] sm:$0xff] %vm119_vm3, %v5491_v12  ;;  %v5357_v21 = vadd.f32 %v5060_v17, %v4688_v47  ;;  %v4689_v2 = vadd.f32 %v4394_v9, %v12425_v36  ;;  %v9749_v11 = vpop.f32.mrb[191].mxu0  ;;  %v13054_v17 = vld [vmem:[#allocation3 + $0x248] sm:$0xff] }
 0x3df   :  { %v5068_v31 = vpop.f32.mrb[192].mxu1 }
 0x3e0   :  { %v9920_v25 = vpop.f32.mrb[193].mxu1  ;;  %v5428_v8 = vadd.f32 %v13016_v4, %v5357_v21  ;;  %v5358_v63 = vadd.f32 %v5063_v48, %v4689_v2  ;;  %9855 = vmatmul.mubr.msk.bf16.gmra.mrb[40].mxu0 %vm27_vm0, %v4189_v29  ;;  %v4190_v2 = vpack.c.bf16 %v4808_v7, %v13029_v35  ;;  %v4860_v29 = vpack.c.bf16 %v13054_v17, %v4810_v37  ;;  %v4812_v35 = vld [vmem:[#allocation3 + $0x250] sm:$0xff]  ;;  %v13070_v7 = vld [vmem:[#allocation3 + $0x258] sm:$0xff] }
 0x3e1   :  { %v5071_v56 = vpop.f32.mrb[194].mxu1  ;;  %9858 = vmatprep.mubr.msk.bf16.mxu0 %vm10924_vm2, %v14448_v39 }
 0x3e2   :  { %v9921_v13 = vpop.f32.mrb[195].mxu1  ;;  %v5492_v52 = vmax.f32 %v5428_v8, 0.0  ;;  %v5429_v27 = vadd.f32 %v13016_v4, %v5358_v63 }
 0x3e3   :  { %v4399_v36 = vpop.f32.mrb[192].mxu0 }
 0x3e4   :  { %10027 = vmatmul.mubr.msk.bf16.gmra.mrb[44].mxu1 %vm27_vm0, %v4859_v53  ;;  %5556 = vst.msk [vmem:[#allocation4 + $0x20] sm:$0xff] %vm119_vm3, %v5492_v52  ;;  %v5493_v48 = vmax.f32 %v5429_v27, 0.0  ;;  %v4690_v44 = vadd.f32 %v4399_v36, %v12433_v26  ;;  %v9752_v6 = vpop.f32.mrb[193].mxu0  ;;  %v4191_v52 = vpack.c.bf16 %v4810_v37, %v4809_v19 }
 0x3e5   :  { %10030 = vmatprep.mubr.msk.bf16.mxu1 %vm10924_vm2, %v14448_v39  ;;  %v4402_v12 = vpop.f32.mrb[194].mxu0 }
 0x3e6   :  { %5557 = vst.msk [vmem:[#allocation4 + $0x28] sm:$0xff] %vm119_vm3, %v5493_v48  ;;  %v5359_v55 = vadd.f32 %v5068_v31, %v4690_v44  ;;  %v4691_v9 = vadd.f32 %v4402_v12, %v12435_v59  ;;  %v9753_v21 = vpop.f32.mrb[195].mxu0  ;;  %v4861_v12 = vpack.c.bf16 %v13070_v7, %v4812_v35 }
 0x3e7   :  { %v5076_v47 = vpop.f32.mrb[196].mxu1  ;;  %v13083_v21 = vld [vmem:[#allocation3 + $0x268] sm:$0xff] }
 0x3e8   :  { %v9924_v11 = vpop.f32.mrb[197].mxu1  ;;  %v5430_v8 = vadd.f32 %v13016_v4, %v5359_v55  ;;  %v5360_v63 = vadd.f32 %v5071_v56, %v4691_v9  ;;  %9859 = vmatmul.mubr.msk.bf16.gmra.mrb[44].mxu0 %vm27_vm0, %v4190_v2 }
 0x3e9   :  { %v5078_v25 = vpop.f32.mrb[198].mxu1  ;;  %9862 = vmatprep.mubr.msk.bf16.mxu0 %vm10924_vm2, %v14448_v39 }
 0x3ea   :  { %v9925_v26 = vpop.f32.mrb[199].mxu1  ;;  %v5494_v13 = vmax.f32 %v5430_v8, 0.0  ;;  %v5431_v31 = vadd.f32 %v13016_v4, %v5360_v63 }
 0x3eb   :  { %v4407_v59 = vpop.f32.mrb[196].mxu0 }
 0x3ec   :  { %10031 = vmatmul.mubr.msk.bf16.gmra.mrb[48].mxu1 %vm27_vm0, %v4860_v29  ;;  %5558 = vst.msk [vmem:[#allocation4 + $0x30] sm:$0xff] %vm119_vm3, %v5494_v13  ;;  %v5495_v56 = vmax.f32 %v5431_v31, 0.0  ;;  %v9756_v53 = vpop.f32.mrb[197].mxu0 }
 0x3ed   :  { %10034 = vmatprep.mubr.msk.bf16.mxu1 %vm10924_vm2, %v14448_v39  ;;  %v4409_v27 = vpop.f32.mrb[198].mxu0 }
 0x3ee   :  { %5559 = vst.msk [vmem:[#allocation4 + $0x38] sm:$0xff] %vm119_vm3, %v5495_v56  ;;  %v4692_v48 = vadd.f32 %v4409_v27, %v12443_v45  ;;  %v9757_v44 = vpop.f32.mrb[199].mxu0  ;;  %v4814_v45 = vld [vmem:[#allocation3 + $0x260] sm:$0xff] }
 0x3ef   :  { %v5083_v36 = vpop.f32.mrb[200].mxu1  ;;  %v4862_v56 = vpack.c.bf16 %v13083_v21, %v4814_v45 }
 0x3f0   :  { %v9928_v6 = vpop.f32.mrb[201].mxu1  ;;  %v5361_v55 = vadd.f32 %v5078_v25, %v4692_v48  ;;  %9863 = vmatmul.mubr.msk.bf16.gmra.mrb[48].mxu0 %vm27_vm0, %v4191_v52  ;;  %v4192_v25 = vpack.c.bf16 %v4812_v35, %v13054_v17  ;;  %v13098_v48 = vld [vmem:[#allocation3 + $0x278] sm:$0xff] }
 0x3f1   :  { %v5086_v47 = vpop.f32.mrb[202].mxu1  ;;  %9866 = vmatprep.mubr.msk.bf16.mxu0 %vm10924_vm2, %v14448_v39 }
 0x3f2   :  { %v9929_v9 = vpop.f32.mrb[203].mxu1  ;;  %v5432_v19 = vadd.f32 %v13016_v4, %v5361_v55 }
 0x3f3   :  { %v4414_v37 = vpop.f32.mrb[200].mxu0 }
 0x3f4   :  { %10035 = vmatmul.mubr.msk.bf16.gmra.mrb[52].mxu1 %vm27_vm0, %v4861_v12  ;;  %v5496_v2 = vmax.f32 %v5432_v19, 0.0  ;;  %v4693_v11 = vadd.f32 %v4414_v37, %v12451_v54  ;;  %v9760_v29 = vpop.f32.mrb[201].mxu0 }
 0x3f5   :  { %10038 = vmatprep.mubr.msk.bf16.mxu1 %vm10924_vm2, %v14448_v39  ;;  %v4417_v8 = vpop.f32.mrb[202].mxu0 }
 0x3f6   :  { %5560 = vst.msk [vmem:[#allocation4 + $0x48] sm:$0xff] %vm119_vm3, %v5496_v2  ;;  %v5362_v26 = vadd.f32 %v5083_v36, %v4693_v11  ;;  %v4694_v13 = vadd.f32 %v4417_v8, %v12453_v62  ;;  %v9761_v31 = vpop.f32.mrb[203].mxu0  ;;  %v4816_v36 = vld [vmem:[#allocation3 + $0x270] sm:$0xff] }
 0x3f7   :  { %v5091_v63 = vpop.f32.mrb[204].mxu1  ;;  %v4863_v29 = vpack.c.bf16 %v13098_v48, %v4816_v36 }
 0x3f8   :  { %v9932_v59 = vpop.f32.mrb[205].mxu1  ;;  %v5433_v52 = vadd.f32 %v13016_v4, %v5362_v26  ;;  %v5363_v27 = vadd.f32 %v5086_v47, %v4694_v13  ;;  %9867 = vmatmul.mubr.msk.bf16.gmra.mrb[52].mxu0 %vm27_vm0, %v4192_v25  ;;  %v4193_v47 = vpack.c.bf16 %v4814_v45, %v13070_v7  ;;  %v13114_v13 = vld [vmem:[#allocation3 + $0x288] sm:$0xff] }
 0x3f9   :  { %v5094_v53 = vpop.f32.mrb[206].mxu1  ;;  %9870 = vmatprep.mubr.msk.bf16.mxu0 %vm10924_vm2, %v14448_v39 }
 0x3fa   :  { %v9933_v54 = vpop.f32.mrb[207].mxu1  ;;  %v5497_v17 = vmax.f32 %v5433_v52, 0.0  ;;  %v5434_v35 = vadd.f32 %v13016_v4, %v5363_v27 }
 0x3fb   :  { %v4422_v62 = vpop.f32.mrb[204].mxu0 }
 0x3fc   :  { %10039 = vmatmul.mubr.msk.bf16.gmra.mrb[56].mxu1 %vm27_vm0, %v4862_v56  ;;  %5561 = vst.msk [vmem:[#allocation4 + $0x50] sm:$0xff] %vm119_vm3, %v5497_v17  ;;  %v5498_v44 = vmax.f32 %v5434_v35, 0.0  ;;  %v4695_v6 = vadd.f32 %v4422_v62, %v12461_v10  ;;  %v9764_v12 = vpop.f32.mrb[205].mxu0 }
 0x3fd   :  { %10042 = vmatprep.mubr.msk.bf16.mxu1 %vm10924_vm2, %v14448_v39  ;;  %v4425_v55 = vpop.f32.mrb[206].mxu0 }
 0x3fe   :  { %5562 = vst.msk [vmem:[#allocation4 + $0x58] sm:$0xff] %vm119_vm3, %v5498_v44  ;;  %v5364_v19 = vadd.f32 %v5091_v63, %v4695_v6  ;;  %v4696_v37 = vadd.f32 %v4425_v55, %v12463_v14  ;;  %v9765_v2 = vpop.f32.mrb[207].mxu0  ;;  %v4818_v63 = vld [vmem:[#allocation3 + $0x280] sm:$0xff]  ;;  %v4820_v55 = vld [vmem:[#allocation3 + $0x290] sm:$0xff] }
 0x3ff   :  { %v5099_v9 = vpop.f32.mrb[208].mxu1  ;;  %v4864_v44 = vpack.c.bf16 %v13114_v13, %v4818_v63 }
 0x400   :  { %v9936_v11 = vpop.f32.mrb[209].mxu1  ;;  %v5435_v8 = vadd.f32 %v13016_v4, %v5364_v19  ;;  %v5365_v26 = vadd.f32 %v5094_v53, %v4696_v37  ;;  %9871 = vmatmul.mubr.msk.bf16.gmra.mrb[56].mxu0 %vm27_vm0, %v4193_v47  ;;  %v4194_v53 = vpack.c.bf16 %v4816_v36, %v13083_v21 }
 0x401   :  { %v5102_v25 = vpop.f32.mrb[210].mxu1  ;;  %9874 = vmatprep.mubr.msk.bf16.mxu0 %vm10924_vm2, %v14448_v39  ;;  %v4195_v11 = vpack.c.bf16 %v4818_v63, %v13098_v48  ;;  %v4822_v63 = vld [vmem:[#allocation3 + $0x2a0] sm:$0xff] }
 0x402   :  { %v9937_v10 = vpop.f32.mrb[211].mxu1  ;;  %v5499_v7 = vmax.f32 %v5435_v8, 0.0  ;;  %v5436_v45 = vadd.f32 %v13016_v4, %v5365_v26 }
 0x403   :  { %v4430_v14 = vpop.f32.mrb[208].mxu0 }
 0x404   :  { %10043 = vmatmul.mubr.msk.bf16.gmra.mrb[60].mxu1 %vm27_vm0, %v4863_v29  ;;  %5563 = vst.msk [vmem:[#allocation4 + $0x60] sm:$0xff] %vm119_vm3, %v5499_v7  ;;  %v5500_v31 = vmax.f32 %v5436_v45, 0.0  ;;  %v4697_v59 = vadd.f32 %v4430_v14, %v12471_v18  ;;  %v9768_v56 = vpop.f32.mrb[209].mxu0 }
 0x405   :  { %10046 = vmatprep.mubr.msk.bf16.mxu1 %vm10924_vm2, %v14448_v39  ;;  %v4433_v52 = vpop.f32.mrb[210].mxu0 }
 0x406   :  { %5564 = vst.msk [vmem:[#allocation4 + $0x68] sm:$0xff] %vm119_vm3, %v5500_v31  ;;  %v5366_v54 = vadd.f32 %v5099_v9, %v4697_v59  ;;  %v4698_v17 = vadd.f32 %v4433_v52, %v12473_v58  ;;  %v9769_v35 = vpop.f32.mrb[211].mxu0  ;;  %v13130_v9 = vld [vmem:[#allocation3 + $0x298] sm:$0xff]  ;;  %v13144_v59 = vld [vmem:[#allocation3 + $0x2a8] sm:$0xff]  ;;  %v4196_v52 = vpack.c.bf16 %v4820_v55, %v13114_v13 }
 0x407   :  { %v5107_v27 = vpop.f32.mrb[212].mxu1  ;;  %v4865_v7 = vpack.c.bf16 %v13130_v9, %v4820_v55 }
 0x408   :  { %v9940_v62 = vpop.f32.mrb[213].mxu1  ;;  %v5437_v12 = vadd.f32 %v13016_v4, %v5366_v54  ;;  %v5367_v47 = vadd.f32 %v5102_v25, %v4698_v17  ;;  %9875 = vmatmul.mubr.msk.bf16.gmra.mrb[60].mxu0 %vm27_vm0, %v4194_v53 }
 0x409   :  { %v5110_v6 = vpop.f32.mrb[214].mxu1  ;;  %9878 = vmatprep.mubr.msk.bf16.mxu0 %vm10924_vm2, %v14448_v39 }
 0x40a   :  { %v9941_v18 = vpop.f32.mrb[215].mxu1  ;;  %v5501_v21 = vmax.f32 %v5437_v12, 0.0  ;;  %v5438_v36 = vadd.f32 %v13016_v4, %v5367_v47  ;;  %v4866_v6 = vpack.c.bf16 %v13144_v59, %v4822_v63 }
 0x40b   :  { %v4438_v58 = vpop.f32.mrb[212].mxu0 }
 0x40c   :  { %10047 = vmatmul.mubr.msk.bf16.gmra.mrb[64].mxu1 %vm27_vm0, %v4864_v44  ;;  %5565 = vst.msk [vmem:[#allocation4 + $0x70] sm:$0xff] %vm119_vm3, %v5501_v21  ;;  %v5502_v19 = vmax.f32 %v5438_v36, 0.0  ;;  %v4699_v37 = vadd.f32 %v4438_v58, %v12481_v42  ;;  %v9772_v2 = vpop.f32.mrb[213].mxu0  ;;  %v4824_v36 = vld [vmem:[#allocation3 + $0x2b0] sm:$0xff]  ;;  %v13159_v58 = vld [vmem:[#allocation3 + $0x2b8] sm:$0xff] }
 0x40d   :  { %10050 = vmatprep.mubr.msk.bf16.mxu1 %vm10924_vm2, %v14448_v39  ;;  %v4441_v29 = vpop.f32.mrb[214].mxu0  ;;  %v4197_v2 = vpack.c.bf16 %v4822_v63, %v13130_v9  ;;  %v13175_v63 = vld [vmem:[#allocation3 + $0x2c8] sm:$0xff] }
 0x40e   :  { %5566 = vst.msk [vmem:[#allocation4 + $0x78] sm:$0xff] %vm119_vm3, %v5502_v19  ;;  %v5368_v8 = vadd.f32 %v5107_v27, %v4699_v37  ;;  %v9773_v26 = vpop.f32.mrb[215].mxu0 }
 0x40f   :  { %v5114_v25 = vpop.f32.mrb[216].mxu1 }
 0x410   :  { %v9944_v10 = vpop.f32.mrb[217].mxu1  ;;  %v5439_v14 = vadd.f32 %v13016_v4, %v5368_v8  ;;  %9879 = vmatmul.mubr.msk.bf16.gmra.mrb[64].mxu0 %vm27_vm0, %v4195_v11 }
 0x411   :  { %v5117_v45 = vpop.f32.mrb[218].mxu1  ;;  %9882 = vmatprep.mubr.msk.bf16.mxu0 %vm10924_vm2, %v14448_v39 }
 0x412   :  { %v9945_v31 = vpop.f32.mrb[219].mxu1  ;;  %v5503_v42 = vmax.f32 %v5439_v14, 0.0 }
 0x413   :  { %v4445_v48 = vpop.f32.mrb[216].mxu0 }
 0x414   :  { %10051 = vmatmul.mubr.msk.bf16.gmra.mrb[68].mxu1 %vm27_vm0, %v4865_v7  ;;  %5567 = vst.msk [vmem:[#allocation4 + $0x80] sm:$0xff] %vm119_vm3, %v5503_v42  ;;  %v4700_v56 = vadd.f32 %v4445_v48, %v12489_v61  ;;  %v9776_v53 = vpop.f32.mrb[217].mxu0  ;;  %v4867_v7 = vpack.c.bf16 %v13159_v58, %v4824_v36  ;;  %v4826_v48 = vld [vmem:[#allocation3 + $0x2c0] sm:$0xff] }
 0x415   :  { %10054 = vmatprep.mubr.msk.bf16.mxu1 %vm10924_vm2, %v14448_v39  ;;  %v4448_v27 = vpop.f32.mrb[218].mxu0 }
 0x416   :  { %v5369_v17 = vadd.f32 %v5114_v25, %v4700_v56  ;;  %v4701_v35 = vadd.f32 %v4448_v27, %v12491_v5  ;;  %v9777_v62 = vpop.f32.mrb[219].mxu0  ;;  %v4198_v27 = vpack.c.bf16 %v4824_v36, %v13144_v59 }
 0x417   :  { %v5122_v54 = vpop.f32.mrb[220].mxu1 }
 0x418   :  { %v9948_v44 = vpop.f32.mrb[221].mxu1  ;;  %v5440_v47 = vadd.f32 %v13016_v4, %v5369_v17  ;;  %v5370_v18 = vadd.f32 %v5117_v45, %v4701_v35  ;;  %9883 = vmatmul.mubr.msk.bf16.gmra.mrb[68].mxu0 %vm27_vm0, %v4196_v52 }
 0x419   :  { %v5125_v12 = vpop.f32.mrb[222].mxu1  ;;  %9886 = vmatprep.mubr.msk.bf16.mxu0 %vm10924_vm2, %v14448_v39 }
 0x41a   :  { %v9949_v21 = vpop.f32.mrb[223].mxu1  ;;  %v5504_v61 = vmax.f32 %v5440_v47, 0.0  ;;  %v5441_v13 = vadd.f32 %v13016_v4, %v5370_v18 }
 0x41b   :  { %v4453_v5 = vpop.f32.mrb[220].mxu0 }
 0x41c   :  { %10055 = vmatmul.mubr.msk.bf16.gmra.mrb[72].mxu1 %vm27_vm0, %v4866_v6  ;;  %5568 = vst.msk [vmem:[#allocation4 + $0x90] sm:$0xff] %vm119_vm3, %v5504_v61  ;;  %v5505_v55 = vmax.f32 %v5441_v13, 0.0  ;;  %v4702_v19 = vadd.f32 %v4453_v5, %v12499_v15  ;;  %v9780_v37 = vpop.f32.mrb[221].mxu0  ;;  %v4828_v13 = vld [vmem:[#allocation3 + $0x2d0] sm:$0xff] }
 0x41d   :  { %10058 = vmatprep.mubr.msk.bf16.mxu1 %vm10924_vm2, %v14448_v39  ;;  %v4456_v11 = vpop.f32.mrb[222].mxu0 }
 0x41e   :  { %5569 = vst.msk [vmem:[#allocation4 + $0x98] sm:$0xff] %vm119_vm3, %v5505_v55  ;;  %v5371_v25 = vadd.f32 %v5122_v54, %v4702_v19  ;;  %v4703_v8 = vadd.f32 %v4456_v11, %v12501_v23  ;;  %v9781_v26 = vpop.f32.mrb[223].mxu0  ;;  %v4199_v19 = vpack.c.bf16 %v4826_v48, %v13159_v58 }
 0x41f   :  { %v5130_v29 = vpop.f32.mrb[224].mxu1  ;;  %v4869_v26 = vpack.c.bf16 %v4828_v13, %v4828_v13 }
 0x420   :  { %v9952_v10 = vpop.f32.mrb[225].mxu1  ;;  %v5442_v14 = vadd.f32 %v13016_v4, %v5371_v25  ;;  %v5372_v31 = vadd.f32 %v5125_v12, %v4703_v8  ;;  %9887 = vmatmul.mubr.msk.bf16.gmra.mrb[72].mxu0 %vm27_vm0, %v4197_v2  ;;  %v4868_v12 = vpack.c.bf16 %v13175_v63, %v4826_v48 }
 0x421   :  { %v5133_v45 = vpop.f32.mrb[226].mxu1  ;;  %9890 = vmatprep.mubr.msk.bf16.mxu0 %vm10924_vm2, %v14448_v39 }
 0x422   :  { %v9953_v15 = vpop.f32.mrb[227].mxu1  ;;  %v5506_v9 = vmax.f32 %v5442_v14, 0.0  ;;  %v5443_v42 = vadd.f32 %v13016_v4, %v5372_v31 }
 0x423   :  { %v4461_v23 = vpop.f32.mrb[224].mxu0 }
 0x424   :  { %10059 = vmatmul.mubr.msk.bf16.gmra.mrb[76].mxu1 %vm27_vm0, %v4867_v7  ;;  %5570 = vst.msk [vmem:[#allocation4 + $0xa0] sm:$0xff] %vm119_vm3, %v5506_v9  ;;  %v5507_v56 = vmax.f32 %v5443_v42, 0.0  ;;  %v4704_v53 = vadd.f32 %v4461_v23, %v12509_v30  ;;  %v9784_v52 = vpop.f32.mrb[225].mxu0  ;;  %v4200_v9 = vpack.c.bf16 %v13175_v63, %v13175_v63  ;;  %v5617_v42 = vld [vmem:[#allocation4 + $0x8] sm:$0xff] }
 0x425   :  { %10062 = vmatprep.mubr.msk.bf16.mxu1 %vm10924_vm2, %v14448_v39  ;;  %v4464_v54 = vpop.f32.mrb[226].mxu0 }
 0x426   :  { %5571 = vst.msk [vmem:[#allocation4 + $0xa8] sm:$0xff] %vm119_vm3, %v5507_v56  ;;  %v5373_v35 = vadd.f32 %v5130_v29, %v4704_v53  ;;  %v4705_v62 = vadd.f32 %v4464_v54, %v12511_v40  ;;  %v9785_v44 = vpop.f32.mrb[227].mxu0 }
 0x427   :  { %v5138_v17 = vpop.f32.mrb[228].mxu1 }
 0x428   :  { %v9956_v6 = vpop.f32.mrb[229].mxu1  ;;  %v5444_v18 = vadd.f32 %v13016_v4, %v5373_v35  ;;  %v5374_v21 = vadd.f32 %v5133_v45, %v4705_v62  ;;  %9891 = vmatmul.mubr.msk.bf16.gmra.mrb[76].mxu0 %vm27_vm0, %v4198_v27  ;;  %v5616_v27 = vld [vmem:[#allocation4] sm:$0xff] }
 0x429   :  { %v5141_v47 = vpop.f32.mrb[230].mxu1  ;;  %9894 = vmatprep.mubr.msk.bf16.mxu0 %vm10924_vm2, %v14448_v39  ;;  %v5697_v35 = vpack.c.bf16 %v5617_v42, %v5616_v27 }
 0x42a   :  { %v9957_v30 = vpop.f32.mrb[231].mxu1  ;;  %v5508_v59 = vmax.f32 %v5444_v18, 0.0  ;;  %v5445_v61 = vadd.f32 %v13016_v4, %v5374_v21 }
 0x42b   :  { %v4469_v40 = vpop.f32.mrb[228].mxu0 }
 0x42c   :  { %10063 = vmatmul.mubr.msk.bf16.gmra.mrb[80].mxu1 %vm27_vm0, %v4868_v12  ;;  %5572 = vst.msk [vmem:[#allocation4 + $0xb0] sm:$0xff] %vm119_vm3, %v5508_v59  ;;  %v5509_v5 = vmax.f32 %v5445_v61, 0.0  ;;  %v4706_v36 = vadd.f32 %v4469_v40, %v12519_v50  ;;  %v9788_v55 = vpop.f32.mrb[229].mxu0  ;;  %v10784_v12 = vld [vmem:[%s14437_s3 + $0x68] sm:$0xff]   ;;  %v10781_v61 = vld [vmem:[%s14437_s3 + $0x40] sm:$0xff]   ;;  %v5619_v40 = vld [vmem:[#allocation4 + $0x18] sm:$0xff] }
 0x42d   :  { %10066 = vmatprep.mubr.msk.bf16.mxu1 %vm10924_vm2, %v14448_v39  ;;  %v4472_v37 = vpop.f32.mrb[230].mxu0 }
 0x42e   :  { %5573 = vst.msk [vmem:[#allocation4 + $0xb8] sm:$0xff] %vm119_vm3, %v5509_v5  ;;  %v5375_v11 = vadd.f32 %v5138_v17, %v4706_v36  ;;  %v4707_v29 = vadd.f32 %v4472_v37, %v12521_v3  ;;  %v9789_v25 = vpop.f32.mrb[231].mxu0  ;;  %v10782_v17 = vld [vmem:[%s14437_s3 + $0x60] sm:$0xff]  }
 0x42f   :  { %v5146_v2 = vpop.f32.mrb[232].mxu1 }
 0x430   :  { %v9960_v8 = vpop.f32.mrb[233].mxu1  ;;  %v5446_v7 = vadd.f32 %v13016_v4, %v5375_v11  ;;  %v5376_v45 = vadd.f32 %v5141_v47, %v4707_v29  ;;  %9895 = vmatmul.mubr.msk.bf16.gmra.mrb[80].mxu0 %vm27_vm0, %v4199_v19 }
 0x431   :  { %v5148_v10 = vpop.f32.mrb[234].mxu1  ;;  %9898 = vmatprep.mubr.msk.bf16.mxu0 %vm10924_vm2, %v14448_v39 }
 0x432   :  { %v9961_v50 = vpop.f32.mrb[235].mxu1  ;;  %v5510_v58 = vmax.f32 %v5446_v7, 0.0  ;;  %v5447_v14 = vadd.f32 %v13016_v4, %v5376_v45 }
 0x433   :  { %v4477_v31 = vpop.f32.mrb[232].mxu0 }
 0x434   :  { %10067 = vmatmul.mubr.msk.bf16.gmra.mrb[84].mxu1 %vm27_vm0, %v4869_v26  ;;  %5574 = vst.msk [vmem:[#allocation4 + $0xc0] sm:$0xff] %vm119_vm3, %v5510_v58  ;;  %v5511_v3 = vmax.f32 %v5447_v14, 0.0  ;;  %v9792_v15 = vpop.f32.mrb[233].mxu0  ;;  %v5621_v31 = vld [vmem:[#allocation4 + $0x28] sm:$0xff] }
 0x435   :  { %10250 = vmatprep.mubr.msk.bf16.mxu1 %vm10924_vm2, %v14448_v39  ;;  %v4479_v23 = vpop.f32.mrb[234].mxu0 }
 0x436   :  { %5575 = vst.msk [vmem:[#allocation4 + $0xc8] sm:$0xff] %vm119_vm3, %v5511_v3  ;;  %v4708_v56 = vadd.f32 %v4479_v23, %v12529_v20  ;;  %v9793_v53 = vpop.f32.mrb[235].mxu0  ;;  %v5618_v20 = vld [vmem:[#allocation4 + $0x10] sm:$0xff] }
 0x437   :  { %v5153_v48 = vpop.f32.mrb[236].mxu1  ;;  %v5747_v13 = vpack.c.bf16 %v5618_v20, %v5617_v42  ;;  %v5698_v29 = vpack.c.bf16 %v5619_v40, %v5618_v20 }
 0x438   :  { %v9964_v52 = vpop.f32.mrb[237].mxu1  ;;  %v5377_v62 = vadd.f32 %v5148_v10, %v4708_v56  ;;  %9899 = vmatmul.mubr.msk.bf16.gmra.mrb[84].mxu0 %vm27_vm0, %v4200_v9  ;;  %v5620_v10 = vld [vmem:[#allocation4 + $0x20] sm:$0xff] }
 0x439   :  { %v5156_v54 = vpop.f32.mrb[238].mxu1  ;;  %10078 = vmatprep.mubr.msk.bf16.mxu0 %vm10924_vm2, %v14448_v39  ;;  %v5748_v23 = vpack.c.bf16 %v5620_v10, %v5619_v40  ;;  %v5699_v52 = vpack.c.bf16 %v5621_v31, %v5620_v10 }
 0x43a   :  { %v9965_v63 = vpop.f32.mrb[239].mxu1  ;;  %v5448_v44 = vadd.f32 %v13016_v4, %v5377_v62 }
 0x43b   :  { %v4484_v6 = vpop.f32.mrb[236].mxu0 }
 0x43c   :  { %10251 = vmatmul.mubr.msk.bf16.vlgmr.msra.gmra.mrb[88].mxu1 %vm119_vm3, %v5697_v35  ;;  %v5512_v47 = vmax.f32 %v5448_v44, 0.0  ;;  %v4709_v18 = vadd.f32 %v4484_v6, %v12543_v28  ;;  %v9796_v21 = vpop.f32.mrb[237].mxu0  ;;  %v5623_v6 = vld [vmem:[#allocation4 + $0x38] sm:$0xff] }
 0x43d   :  { %10587 = vmatpush3.bf16.msra.mxu1 %v10782_v17  ;;  %10254 = vmatprep.mubr.msk.bf16.mxu1 %vm10924_vm2, %v14448_v39  ;;  %v4487_v30 = vpop.f32.mrb[238].mxu0  ;;  %v5622_v17 = vld [vmem:[#allocation4 + $0x30] sm:$0xff] }
 0x43e   :  { %10588 = vmatprep.subr.bf16.mxu1 %v14448_v39  ;;  %5576 = vst.msk [vmem:[#allocation4 + $0xd8] sm:$0xff] %vm119_vm3, %v5512_v47  ;;  %v5378_v5 = vadd.f32 %v5153_v48, %v4709_v18  ;;  %v4710_v36 = vadd.f32 %v4487_v30, %v12549_v43  ;;  %v9797_v55 = vpop.f32.mrb[239].mxu0  ;;  %v10783_v43 = vld [vmem:[%s14437_s3 + $0x48] sm:$0xff]   ;;  %v5749_v30 = vpack.c.bf16 %v5622_v17, %v5621_v31 }
 0x43f   :  { %v5161_v59 = vpop.f32.mrb[240].mxu1  ;;  %v5624_v55 = vld [vmem:[#allocation4 + $0x40] sm:$0xff] }
 0x440   :  { %v9968_v19 = vpop.f32.mrb[241].mxu1  ;;  %v5449_v28 = vadd.f32 %v13016_v4, %v5378_v5  ;;  %v5379_v2 = vadd.f32 %v5156_v54, %v4710_v36  ;;  %10079 = vmatmul.mubr.msk.bf16.vlgmr.msra.gmra.mrb[88].mxu0 %vm119_vm3, %v5747_v13 }
 0x441   :  { %v5164_v37 = vpop.f32.mrb[242].mxu1  ;;  %10589 = vmatpush3.bf16.msra.mxu1 %v10784_v12  ;;  %10415 = vmatpush3.bf16.msra.mxu0 %v10781_v61 }
 0x442   :  { %v9969_v11 = vpop.f32.mrb[243].mxu1  ;;  %10590 = vmatprep.subr.bf16.mxu1 %v14448_v39  ;;  %10082 = vmatprep.mubr.msk.bf16.mxu0 %vm10924_vm2, %v14448_v39  ;;  %v5513_v25 = vmax.f32 %v5449_v28, 0.0  ;;  %v5450_v8 = vadd.f32 %v13016_v4, %v5379_v2  ;;  %v6777_v2 = vld [vmem:[#allocation4 + $0x48] sm:$0xff] }
 0x443   :  { %10416 = vmatprep.subr.bf16.mxu0 %v14448_v39  ;;  %v4492_v26 = vpop.f32.mrb[240].mxu0 }
 0x444   :  { %10255 = vmatmul.mubr.msk.bf16.gmra.mrb[92].mxu1 %vm119_vm3, %v5698_v29  ;;  %5577 = vst.msk [vmem:[#allocation4 + $0xe0] sm:$0xff] %vm119_vm3, %v5513_v25  ;;  %v5514_v7 = vmax.f32 %v5450_v8, 0.0  ;;  %v4711_v45 = vadd.f32 %v4492_v26, %v12562_v0  ;;  %v9800_v50 = vpop.f32.mrb[241].mxu0  ;;  %v5750_v26 = vpack.c.bf16 %v5624_v55, %v5623_v6 }
 0x445   :  { %10258 = vmatprep.mubr.msk.bf16.mxu1 %vm10924_vm2, %v14448_v39  ;;  %v4495_v58 = vpop.f32.mrb[242].mxu0  ;;  %10417 = vmatpush3.bf16.msra.mxu0 %v10783_v43  ;;  %v5701_v50 = vpack.c.bf16 %v6777_v2, %v5624_v55  ;;  %v5630_v55 = vld [vmem:[#allocation4 + $0x70] sm:$0xff] }
 0x446   :  { %5578 = vst.msk [vmem:[#allocation4 + $0xe8] sm:$0xff] %vm119_vm3, %v5514_v7  ;;  %v5380_v3 = vadd.f32 %v5161_v59, %v4711_v45  ;;  %v4712_v15 = vadd.f32 %v4495_v58, %v12564_v32  ;;  %v9801_v9 = vpop.f32.mrb[243].mxu0  ;;  %10418 = vmatprep.subr.bf16.mxu0 %v14448_v39  ;;  %v6778_v58 = vld [vmem:[#allocation4 + $0x50] sm:$0xff] }
 0x447   :  { %v5169_v14 = vpop.f32.mrb[244].mxu1 }
 0x448   :  { %v9972_v42 = vpop.f32.mrb[245].mxu1  ;;  %v5451_v56 = vadd.f32 %v13016_v4, %v5380_v3  ;;  %v5381_v53 = vadd.f32 %v5164_v37, %v4712_v15  ;;  %10083 = vmatmul.mubr.msk.bf16.gmra.mrb[92].mxu0 %vm119_vm3, %v5748_v23  ;;  %v7463_v15 = vld [vmem:[#allocation4 + $0x58] sm:$0xff]  ;;  %v13279_v23 = vpack.c.bf16 %v6778_v58, %v6777_v2 }
 0x449   :  { %v5172_v48 = vpop.f32.mrb[246].mxu1  ;;  %10086 = vmatprep.mubr.msk.bf16.mxu0 %vm10924_vm2, %v14448_v39  ;;  %v10785_v2 = vld [vmem:[%s14437_s3 + $0x50] sm:$0xff]  }
 0x44a   :  { %v9973_v0 = vpop.f32.mrb[247].mxu1  ;;  %v5515_v27 = vmax.f32 %v5451_v56, 0.0  ;;  %v5452_v54 = vadd.f32 %v13016_v4, %v5381_v53  ;;  %10419 = vmatpush3.bf16.msra.mxu0 %v10785_v2 }
 0x44b   :  { %v4500_v32 = vpop.f32.mrb[244].mxu0  ;;  %10420 = vmatprep.subr.bf16.mxu0 %v14448_v39 }
 0x44c   :  { %10259 = vmatmul.mubr.msk.bf16.gmra.mrb[96].mxu1 %vm119_vm3, %v5699_v52  ;;  %5579 = vst.msk [vmem:[#allocation4 + $0xf0] sm:$0xff] %vm119_vm3, %v5515_v27  ;;  %v5516_v35 = vmax.f32 %v5452_v54, 0.0  ;;  %v4713_v62 = vadd.f32 %v4500_v32, %v12573_v24  ;;  %v9804_v63 = vpop.f32.mrb[245].mxu0  ;;  %v5700_v24 = vpack.c.bf16 %v5623_v6, %v5622_v17  ;;  %v13282_v27 = vpack.c.bf16 %v7463_v15, %v6778_v58 }
 0x44d   :  { %10262 = vmatprep.mubr.msk.bf16.mxu1 %vm10924_vm2, %v14448_v39  ;;  %v4503_v44 = vpop.f32.mrb[246].mxu0 }
 0x44e   :  { %5580 = vst.msk [vmem:[#allocation4 + $0xf8] sm:$0xff] %vm119_vm3, %v5516_v35  ;;  %v5382_v12 = vadd.f32 %v5169_v14, %v4713_v62  ;;  %v4714_v47 = vadd.f32 %v4503_v44, %v12575_v46  ;;  %v9805_v18 = vpop.f32.mrb[247].mxu0  ;;  %v5628_v62 = vld [vmem:[#allocation4 + $0x60] sm:$0xff] }
 0x44f   :  { %v5177_v20 = vpop.f32.mrb[248].mxu1 }
 0x450   :  { %v9976_v21 = vpop.f32.mrb[249].mxu1  ;;  %v5453_v61 = vadd.f32 %v13016_v4, %v5382_v12  ;;  %v5383_v40 = vadd.f32 %v5172_v48, %v4714_v47  ;;  %10087 = vmatmul.mubr.msk.bf16.gmra.mrb[96].mxu0 %vm119_vm3, %v5749_v30  ;;  %v5629_v47 = vld [vmem:[#allocation4 + $0x68] sm:$0xff] }
 0x451   :  { %v5180_v59 = vpop.f32.mrb[250].mxu1  ;;  %10090 = vmatprep.mubr.msk.bf16.mxu0 %vm10924_vm2, %v14448_v39 }
 0x452   :  { %v9977_v13 = vpop.f32.mrb[251].mxu1  ;;  %v5517_v5 = vmax.f32 %v5453_v61, 0.0  ;;  %v5454_v36 = vadd.f32 %v13016_v4, %v5383_v40  ;;  %v5752_v61 = vpack.c.bf16 %v5628_v62, %v7463_v15  ;;  %v5632_v15 = vld [vmem:[#allocation4 + $0x80] sm:$0xff] }
 0x453   :  { %v4508_v46 = vpop.f32.mrb[248].mxu0 }
 0x454   :  { %10263 = vmatmul.mubr.msk.bf16.gmra.mrb[100].mxu1 %vm119_vm3, %v5700_v24  ;;  %5581 = vst.msk [vmem:[#allocation4 + $0x100] sm:$0xff] %vm119_vm3, %v5517_v5  ;;  %v5518_v19 = vmax.f32 %v5454_v36, 0.0  ;;  %v4715_v37 = vadd.f32 %v4508_v46, %v12583_v33  ;;  %v9808_v28 = vpop.f32.mrb[249].mxu0 }
 0x455   :  { %10266 = vmatprep.mubr.msk.bf16.mxu1 %vm10924_vm2, %v14448_v39  ;;  %v4511_v11 = vpop.f32.mrb[250].mxu0 }
 0x456   :  { %5582 = vst.msk [vmem:[#allocation4 + $0x108] sm:$0xff] %vm119_vm3, %v5518_v19  ;;  %v5384_v43 = vadd.f32 %v5177_v20, %v4715_v37  ;;  %v9809_v25 = vpop.f32.mrb[251].mxu0 }
 0x457   :  { %v5184_v29 = vpop.f32.mrb[252].mxu1 }
 0x458   :  { %v9980_v8 = vpop.f32.mrb[253].mxu1  ;;  %v5455_v7 = vadd.f32 %v13016_v4, %v5384_v43  ;;  %10091 = vmatmul.mubr.msk.bf16.gmra.mrb[100].mxu0 %vm119_vm3, %v5750_v26  ;;  %v5631_v43 = vld [vmem:[#allocation4 + $0x78] sm:$0xff] }
 0x459   :  { %v5187_v10 = vpop.f32.mrb[254].mxu1  ;;  %10094 = vmatprep.mubr.msk.bf16.mxu0 %vm10924_vm2, %v14448_v39  ;;  %v5704_v58 = vpack.c.bf16 %v5631_v43, %v5630_v55 }
 0x45a   :  { %v9981_v45 = vpop.f32.mrb[255].mxu1  ;;  %v5519_v33 = vmax.f32 %v5455_v7, 0.0 }
 0x45b   :  { %v4515_v14 = vpop.f32.mrb[252].mxu0  ;;  %v13321_v45 = vld [vmem:[%s14438_s5] ss:$0 sm:$0xff] }
 0x45c   :  { %10267 = vmatmul.mubr.msk.bf16.gmra.mrb[104].mxu1 %vm119_vm3, %v5701_v50  ;;  %5583 = vst.msk [vmem:[#allocation4 + $0x110] sm:$0xff] %vm119_vm3, %v5519_v33  ;;  %v4716_v31 = vadd.f32 %v4515_v14, %v12591_v34  ;;  %v9812_v3 = vpop.f32.mrb[253].mxu0 }
 0x45d   :  { %10270 = vmatprep.mubr.msk.bf16.mxu1 %vm10924_vm2, %v14448_v39  ;;  %v4518_v9 = vpop.f32.mrb[254].mxu0 }
 0x45e   :  { %v5385_v48 = vadd.f32 %v5184_v29, %v4716_v31  ;;  %v4717_v56 = vadd.f32 %v4518_v9, %v12593_v22  ;;  %v9813_v53 = vpop.f32.mrb[255].mxu0 }
 0x45f   :  { %v5192_v42 = vpop.f32.mrb[0].mxu1 }
 0x460   :  { %v9984_v0 = vpop.f32.mrb[1].mxu1  ;;  %v5456_v54 = vadd.f32 %v13016_v4, %v5385_v48  ;;  %v5386_v32 = vadd.f32 %v5187_v10, %v4717_v56  ;;  %10095 = vmatmul.mubr.msk.bf16.gmra.mrb[104].mxu0 %vm119_vm3, %v13279_v23 }
 0x461   :  { %v5195_v52 = vpop.f32.mrb[2].mxu1  ;;  %10098 = vmatprep.mubr.msk.bf16.mxu0 %vm10924_vm2, %v14448_v39  ;;  %v5633_v0 = vld [vmem:[#allocation4 + $0x88] sm:$0xff] }
 0x462   :  { %v9985_v34 = vpop.f32.mrb[3].mxu1  ;;  %v5520_v17 = vmax.f32 %v5456_v54, 0.0  ;;  %v5457_v35 = vadd.f32 %v13016_v4, %v5386_v32 }
 0x463   :  { %v4523_v22 = vpop.f32.mrb[0].mxu0 }
 0x464   :  { %10271 = vmatmul.mubr.msk.bf16.gmra.mrb[108].mxu1 %vm119_vm3, %v13282_v27  ;;  %5584 = vst.msk [vmem:[#allocation4 + $0x120] sm:$0xff] %vm119_vm3, %v5520_v17  ;;  %v5521_v63 = vmax.f32 %v5457_v35, 0.0  ;;  %v4718_v44 = vadd.f32 %v4523_v22, %v12601_v38  ;;  %v9816_v20 = vpop.f32.mrb[1].mxu0  ;;  %v5703_v38 = vpack.c.bf16 %v5629_v47, %v5628_v62  ;;  %v5754_v17 = vpack.c.bf16 %v5632_v15, %v5631_v43 }
 0x465   :  { %10274 = vmatprep.mubr.msk.bf16.mxu1 %vm10924_vm2, %v14448_v39  ;;  %v4526_v6 = vpop.f32.mrb[2].mxu0 }
 0x466   :  { %5585 = vst.msk [vmem:[#allocation4 + $0x128] sm:$0xff] %vm119_vm3, %v5521_v63  ;;  %v5387_v18 = vadd.f32 %v5192_v42, %v4718_v44  ;;  %v4719_v21 = vadd.f32 %v4526_v6, %v12609_v49  ;;  %v9817_v30 = vpop.f32.mrb[3].mxu0  ;;  %v5634_v6 = vld [vmem:[#allocation4 + $0x90] sm:$0xff] }
 0x467   :  { %v5200_v12 = vpop.f32.mrb[4].mxu1  ;;  %v5635_v30 = vld [vmem:[#allocation4 + $0x98] sm:$0xff] }
 0x468   :  { %v9988_v59 = vpop.f32.mrb[5].mxu1  ;;  %v5458_v13 = vadd.f32 %v13016_v4, %v5387_v18  ;;  %v5388_v24 = vadd.f32 %v5195_v52, %v4719_v21  ;;  %10099 = vmatmul.mubr.msk.bf16.gmra.mrb[108].mxu0 %vm119_vm3, %v5752_v61 }
 0x469   :  { %v5203_v40 = vpop.f32.mrb[6].mxu1  ;;  %10102 = vmatprep.mubr.msk.bf16.mxu0 %vm10924_vm2, %v14448_v39 }
 0x46a   :  { %v9989_v5 = vpop.f32.mrb[7].mxu1  ;;  %v5522_v36 = vmax.f32 %v5458_v13, 0.0  ;;  %v5459_v46 = vadd.f32 %v13016_v4, %v5388_v24  ;;  %v10786_v4 = vld [vmem:[%s14437_s3 + $0x70] sm:$0xff]   ;;  %v5755_v13 = vpack.c.bf16 %v5634_v6, %v5633_v0 }
 0x46b   :  { %v4531_v49 = vpop.f32.mrb[4].mxu0  ;;  %10591 = vmatpush3.bf16.msra.mxu1 %v10786_v4  ;;  %v5637_v4 = vld [vmem:[#allocation4 + $0xa8] sm:$0xff] }
 0x46c   :  { %10275 = vmatmul.mubr.msk.bf16.gmra.mrb[112].mxu1 %vm119_vm3, %v5703_v38  ;;  %5586 = vst.msk [vmem:[#allocation4 + $0x130] sm:$0xff] %vm119_vm3, %v5522_v36  ;;  %v5523_v19 = vmax.f32 %v5459_v46, 0.0  ;;  %v4720_v37 = vadd.f32 %v4531_v49, %v12619_v51  ;;  %v9820_v28 = vpop.f32.mrb[5].mxu0  ;;  %v5753_v51 = vpack.c.bf16 %v5630_v55, %v5629_v47  ;;  %10592 = vmatprep.subr.bf16.mxu1 %v14448_v39  ;;  %v5636_v55 = vld [vmem:[#allocation4 + $0xa0] sm:$0xff] }
 0x46d   :  { %10278 = vmatprep.mubr.msk.bf16.mxu1 %vm10924_vm2, %v14448_v39  ;;  %v4534_v11 = vpop.f32.mrb[6].mxu0  ;;  %v5706_v36 = vpack.c.bf16 %v5635_v30, %v5634_v6 }
 0x46e   :  { %5587 = vst.msk [vmem:[#allocation4 + $0x138] sm:$0xff] %vm119_vm3, %v5523_v19  ;;  %v5389_v25 = vadd.f32 %v5200_v12, %v4720_v37  ;;  %v4721_v8 = vadd.f32 %v4534_v11, %v12621_v16  ;;  %v9821_v26 = vpop.f32.mrb[7].mxu0 }
 0x46f   :  { %v5208_v29 = vpop.f32.mrb[8].mxu1  ;;  %v5756_v26 = vpack.c.bf16 %v5636_v55, %v5635_v30 }
 0x470   :  { %v9992_v10 = vpop.f32.mrb[9].mxu1  ;;  %v5460_v50 = vadd.f32 %v13321_v45, %v5389_v25  ;;  %v5390_v33 = vadd.f32 %v5203_v40, %v4721_v8  ;;  %10103 = vmatmul.mubr.msk.bf16.gmra.mrb[112].mxu0 %vm119_vm3, %v5753_v51 }
 0x471   :  { %v5211_v7 = vpop.f32.mrb[10].mxu1  ;;  %10106 = vmatprep.mubr.msk.bf16.mxu0 %vm10924_vm2, %v14448_v39 }
 0x472   :  { %v9993_v16 = vpop.f32.mrb[11].mxu1  ;;  %v5524_v14 = vmax.f32 %v5460_v50, 0.0  ;;  %v5461_v31 = vadd.f32 %v13321_v45, %v5390_v33 }
 0x473   :  { %v4539_v3 = vpop.f32.mrb[8].mxu0 }
 0x474   :  { %10279 = vmatmul.mubr.msk.bf16.gmra.mrb[116].mxu1 %vm119_vm3, %v5704_v58  ;;  %5588 = vst.msk [vmem:[#allocation4 + $0x140] sm:$0xff] %vm119_vm3, %v5524_v14  ;;  %v5525_v9 = vmax.f32 %v5461_v31, 0.0  ;;  %v4722_v42 = vadd.f32 %v4539_v3, %v12629_v41  ;;  %v9824_v48 = vpop.f32.mrb[9].mxu0  ;;  %v5705_v41 = vpack.c.bf16 %v5633_v0, %v5632_v15  ;;  %v5638_v14 = vld [vmem:[#allocation4 + $0xb0] sm:$0xff]  ;;  %v14467_v3 = vld [vmem:[#allocation6_spill] sm:$0xff]  ;;  %v14468_v0 = vld [vmem:[#allocation7_spill] sm:$0xff] }
 0x475   :  { %10282 = vmatprep.mubr.msk.bf16.mxu1 %vm10924_vm2, %v14448_v39  ;;  %v4542_v56 = vpop.f32.mrb[10].mxu0 }
 0x476   :  { %5589 = vst.msk [vmem:[#allocation4 + $0x148] sm:$0xff] %vm119_vm3, %v5525_v9  ;;  %v5391_v52 = vadd.f32 %v5208_v29, %v4722_v42  ;;  %v4723_v54 = vadd.f32 %v4542_v56, %v12631_v57  ;;  %v9825_v32 = vpop.f32.mrb[11].mxu0  ;;  %v14466_v29 = vld [vmem:[#allocation5_spill] sm:$0xff] }
 0x477   :  { %v5216_v53 = vpop.f32.mrb[12].mxu1  ;;  %v5639_v56 = vld [vmem:[#allocation4 + $0xb8] sm:$0xff] }
 0x478   :  { %v9996_v34 = vpop.f32.mrb[13].mxu1  ;;  %v5462_v22 = vadd.f32 %v13321_v45, %v5391_v52  ;;  %v5392_v62 = vadd.f32 %v5211_v7, %v4723_v54  ;;  %10107 = vmatmul.mubr.msk.bf16.gmra.mrb[116].mxu0 %vm119_vm3, %v5754_v17 }
 0x479   :  { %v5218_v35 = vpop.f32.mrb[14].mxu1  ;;  %10110 = vmatprep.mubr.msk.bf16.mxu0 %vm10924_vm2, %v14448_v39  ;;  %v5757_v34 = vpack.c.bf16 %v5638_v14, %v5637_v4 }
 0x47a   :  { %v9997_v63 = vpop.f32.mrb[15].mxu1  ;;  %v5526_v44 = vmax.f32 %v5462_v22, 0.0  ;;  %v5463_v20 = vadd.f32 %v13321_v45, %v5392_v62 }
 0x47b   :  { %v4547_v57 = vpop.f32.mrb[12].mxu0  ;;  %v5708_v63 = vpack.c.bf16 %v5639_v56, %v5638_v14 }
 0x47c   :  { %10283 = vmatmul.mubr.msk.bf16.gmra.mrb[120].mxu1 %vm119_vm3, %v5705_v41  ;;  %5590 = vst.msk [vmem:[#allocation4 + $0x150] sm:$0xff] %vm119_vm3, %v5526_v44  ;;  %v5527_v12 = vmax.f32 %v5463_v20, 0.0  ;;  %v9828_v47 = vpop.f32.mrb[13].mxu0  ;;  %v5640_v57 = vld [vmem:[#allocation4 + $0xc0] sm:$0xff] }
 0x47d   :  { %10286 = vmatprep.mubr.msk.bf16.mxu1 %vm10924_vm2, %v14448_v39  ;;  %v4549_v18 = vpop.f32.mrb[14].mxu0 }
 0x47e   :  { %5591 = vst.msk [vmem:[#allocation4 + $0x158] sm:$0xff] %vm119_vm3, %v5527_v12  ;;  %v4724_v59 = vadd.f32 %v4549_v18, %v12639_v60  ;;  %v9829_v61 = vpop.f32.mrb[15].mxu0  ;;  %v14469_v12 = vld [vmem:[#allocation8_spill] sm:$0xff] }
 0x47f   :  { %v5223_v21 = vpop.f32.mrb[16].mxu1 }
 0x480   :  { %v10000_v40 = vpop.f32.mrb[17].mxu1  ;;  %v5393_v5 = vadd.f32 %v5218_v35, %v4724_v59  ;;  %10111 = vmatmul.mubr.msk.bf16.gmra.mrb[120].mxu0 %vm119_vm3, %v5755_v13  ;;  %v5641_v59 = vld [vmem:[#allocation4 + $0xc8] sm:$0xff] }
 0x481   :  { %v5226_v24 = vpop.f32.mrb[18].mxu1  ;;  %10114 = vmatprep.mubr.msk.bf16.mxu0 %vm10924_vm2, %v14448_v39  ;;  %v14470_v40 = vld [vmem:[#allocation9_spill] sm:$0xff] }
 0x482   :  { %v10001_v38 = vpop.f32.mrb[19].mxu1  ;;  %v5464_v46 = vadd.f32 %v13321_v45, %v5393_v5 }
 0x483   :  { %v4554_v49 = vpop.f32.mrb[16].mxu0  ;;  %v5758_v38 = vpack.c.bf16 %v5640_v57, %v5639_v56 }
 0x484   :  { %10287 = vmatmul.mubr.msk.bf16.gmra.mrb[124].mxu1 %vm119_vm3, %v5706_v36  ;;  %v5528_v60 = vmax.f32 %v5464_v46, 0.0  ;;  %v4725_v19 = vadd.f32 %v4554_v49, %v12647_v1  ;;  %v9832_v37 = vpop.f32.mrb[17].mxu0  ;;  %v5707_v1 = vpack.c.bf16 %v5637_v4, %v5636_v55 }
 0x485   :  { %10290 = vmatprep.mubr.msk.bf16.mxu1 %vm10924_vm2, %v14448_v39  ;;  %v4557_v28 = vpop.f32.mrb[18].mxu0 }
 0x486   :  { %5592 = vst.msk [vmem:[#allocation4 + $0x168] sm:$0xff] %vm119_vm3, %v5528_v60  ;;  %v5394_v11 = vadd.f32 %v5223_v21, %v4725_v19  ;;  %v4726_v43 = vadd.f32 %v4557_v28, %v14466_v29  ;;  %v9833_v25 = vpop.f32.mrb[19].mxu0  ;;  %v5709_v60 = vpack.c.bf16 %v5641_v59, %v5640_v57 }
 0x487   :  { %v5231_v2 = vpop.f32.mrb[20].mxu1 }
 0x488   :  { %v10004_v8 = vpop.f32.mrb[21].mxu1  ;;  %v5465_v51 = vadd.f32 %v13321_v45, %v5394_v11  ;;  %v5395_v7 = vadd.f32 %v5226_v24, %v4726_v43  ;;  %10115 = vmatmul.mubr.msk.bf16.gmra.mrb[124].mxu0 %vm119_vm3, %v5756_v26  ;;  %v14471_v11 = vld [vmem:[#allocation10_spill] sm:$0xff]  ;;  %v5643_v26 = vld [vmem:[#allocation4 + $0xd8] sm:$0xff] }
 0x489   :  { %v5234_v10 = vpop.f32.mrb[22].mxu1  ;;  %10118 = vmatprep.mubr.msk.bf16.mxu0 %vm10924_vm2, %v14448_v39 }
 0x48a   :  { %v10005_v50 = vpop.f32.mrb[23].mxu1  ;;  %v5529_v33 = vmax.f32 %v5465_v51, 0.0  ;;  %v5466_v16 = vadd.f32 %v13321_v45, %v5395_v7 }
 0x48b   :  { %v4562_v58 = vpop.f32.mrb[20].mxu0 }
 0x48c   :  { %10291 = vmatmul.mubr.msk.bf16.gmra.mrb[128].mxu1 %vm119_vm3, %v5707_v1  ;;  %5593 = vst.msk [vmem:[#allocation4 + $0x170] sm:$0xff] %vm119_vm3, %v5529_v33  ;;  %v5530_v31 = vmax.f32 %v5466_v16, 0.0  ;;  %v4727_v15 = vadd.f32 %v4562_v58, %v14467_v3  ;;  %v9836_v9 = vpop.f32.mrb[21].mxu0  ;;  %v5644_v3 = vld [vmem:[#allocation4 + $0xe0] sm:$0xff] }
 0x48d   :  { %10294 = vmatprep.mubr.msk.bf16.mxu1 %vm10924_vm2, %v14448_v39  ;;  %v4565_v42 = vpop.f32.mrb[22].mxu0 }
 0x48e   :  { %5594 = vst.msk [vmem:[#allocation4 + $0x178] sm:$0xff] %vm119_vm3, %v5530_v31  ;;  %v5396_v53 = vadd.f32 %v5231_v2, %v4727_v15  ;;  %v4728_v52 = vadd.f32 %v4565_v42, %v14468_v0  ;;  %v9837_v54 = vpop.f32.mrb[23].mxu0  ;;  %v5642_v2 = vld [vmem:[#allocation4 + $0xd0] sm:$0xff]  ;;  %v14472_v15 = vld [vmem:[#allocation11_spill] sm:$0xff] }
 0x48f   :  { %v5239_v48 = vpop.f32.mrb[24].mxu1  ;;  %v5759_v50 = vpack.c.bf16 %v5642_v2, %v5641_v59  ;;  %v5710_v58 = vpack.c.bf16 %v5643_v26, %v5642_v2 }
 0x490   :  { %v10008_v32 = vpop.f32.mrb[25].mxu1  ;;  %v5467_v35 = vadd.f32 %v13321_v45, %v5396_v53  ;;  %v5397_v22 = vadd.f32 %v5234_v10, %v4728_v52  ;;  %10119 = vmatmul.mubr.msk.bf16.gmra.mrb[128].mxu0 %vm119_vm3, %v5757_v34  ;;  %v5645_v53 = vld [vmem:[#allocation4 + $0xe8] sm:$0xff]  ;;  %v14473_v52 = vld [vmem:[#allocation12_spill] sm:$0xff] }
 0x491   :  { %v5242_v17 = vpop.f32.mrb[26].mxu1  ;;  %10122 = vmatprep.mubr.msk.bf16.mxu0 %vm10924_vm2, %v14448_v39 }
 0x492   :  { %v10009_v62 = vpop.f32.mrb[27].mxu1  ;;  %v5531_v41 = vmax.f32 %v5467_v35, 0.0  ;;  %v5468_v44 = vadd.f32 %v13321_v45, %v5397_v22 }
 0x493   :  { %v4570_v20 = vpop.f32.mrb[24].mxu0 }
 0x494   :  { %10295 = vmatmul.mubr.msk.bf16.gmra.mrb[132].mxu1 %vm119_vm3, %v5708_v63  ;;  %5595 = vst.msk [vmem:[#allocation4 + $0x180] sm:$0xff] %vm119_vm3, %v5531_v41  ;;  %v5532_v6 = vmax.f32 %v5468_v44, 0.0  ;;  %v4729_v47 = vadd.f32 %v4570_v20, %v14469_v12  ;;  %v9840_v18 = vpop.f32.mrb[25].mxu0  ;;  %v5711_v41 = vpack.c.bf16 %v5645_v53, %v5644_v3 }
 0x495   :  { %10298 = vmatprep.mubr.msk.bf16.mxu1 %vm10924_vm2, %v14448_v39  ;;  %v4573_v21 = vpop.f32.mrb[26].mxu0 }
 0x496   :  { %5596 = vst.msk [vmem:[#allocation4 + $0x188] sm:$0xff] %vm119_vm3, %v5532_v6  ;;  %v5398_v61 = vadd.f32 %v5239_v48, %v4729_v47  ;;  %v4730_v13 = vadd.f32 %v4573_v21, %v14470_v40  ;;  %v9841_v24 = vpop.f32.mrb[27].mxu0  ;;  %v5646_v6 = vld [vmem:[#allocation4 + $0xf0] sm:$0xff]  ;;  %v14474_v47 = vld [vmem:[#allocation13_spill] sm:$0xff] }
 0x497   :  { %v5247_v30 = vpop.f32.mrb[28].mxu1 }
 0x498   :  { %v10012_v5 = vpop.f32.mrb[29].mxu1  ;;  %v5469_v46 = vadd.f32 %v13321_v45, %v5398_v61  ;;  %v5399_v49 = vadd.f32 %v5242_v17, %v4730_v13  ;;  %10123 = vmatmul.mubr.msk.bf16.gmra.mrb[132].mxu0 %vm119_vm3, %v5758_v38  ;;  %v5760_v17 = vpack.c.bf16 %v5644_v3, %v5643_v26  ;;  %v5647_v61 = vld [vmem:[#allocation4 + $0xf8] sm:$0xff]  ;;  %v14475_v13 = vld [vmem:[#allocation14_spill] sm:$0xff] }
 0x499   :  { %v5250_v36 = vpop.f32.mrb[30].mxu1  ;;  %10126 = vmatprep.mubr.msk.bf16.mxu0 %vm10924_vm2, %v14448_v39 }
 0x49a   :  { %v10013_v55 = vpop.f32.mrb[31].mxu1  ;;  %v5533_v19 = vmax.f32 %v5469_v46, 0.0  ;;  %v5470_v37 = vadd.f32 %v13321_v45, %v5399_v49  ;;  %v5761_v36 = vpack.c.bf16 %v5646_v6, %v5645_v53 }
 0x49b   :  { %v4578_v28 = vpop.f32.mrb[28].mxu0 }
 0x49c   :  { %10299 = vmatmul.mubr.msk.bf16.gmra.mrb[136].mxu1 %vm119_vm3, %v5709_v60  ;;  %5597 = vst.msk [vmem:[#allocation4 + $0x190] sm:$0xff] %vm119_vm3, %v5533_v19  ;;  %v5534_v4 = vmax.f32 %v5470_v37, 0.0  ;;  %v4731_v29 = vadd.f32 %v4578_v28, %v14471_v11  ;;  %v9844_v43 = vpop.f32.mrb[29].mxu0  ;;  %v5712_v19 = vpack.c.bf16 %v5647_v61, %v5646_v6 }
 0x49d   :  { %10302 = vmatprep.mubr.msk.bf16.mxu1 %vm10924_vm2, %v14448_v39  ;;  %v4581_v25 = vpop.f32.mrb[30].mxu0 }
 0x49e   :  { %5598 = vst.msk [vmem:[#allocation4 + $0x198] sm:$0xff] %vm119_vm3, %v5534_v4  ;;  %v5400_v10 = vadd.f32 %v5247_v30, %v4731_v29  ;;  %v9845_v51 = vpop.f32.mrb[31].mxu0  ;;  %v5648_v4 = vld [vmem:[#allocation4 + $0x100] sm:$0xff]  ;;  %v14476_v29 = vld [vmem:[#allocation15_spill] sm:$0xff] }
 0x49f   :  { %v5254_v8 = vpop.f32.mrb[32].mxu1 }
 0x4a0   :  { %v10016_v7 = vpop.f32.mrb[33].mxu1  ;;  %v5471_v33 = vadd.f32 %v13321_v45, %v5400_v10  ;;  %10127 = vmatmul.mubr.msk.bf16.gmra.mrb[136].mxu0 %vm119_vm3, %v5759_v50  ;;  %v5649_v10 = vld [vmem:[#allocation4 + $0x108] sm:$0xff] }
 0x4a1   :  { %v5257_v1 = vpop.f32.mrb[34].mxu1  ;;  %10130 = vmatprep.mubr.msk.bf16.mxu0 %vm10924_vm2, %v14448_v39  ;;  %v14477_v7 = vld [vmem:[#allocation16_spill] sm:$0xff] }
 0x4a2   :  { %v10017_v16 = vpop.f32.mrb[35].mxu1  ;;  %v5535_v14 = vmax.f32 %v5471_v33, 0.0 }
 0x4a3   :  { %v4585_v31 = vpop.f32.mrb[32].mxu0  ;;  %v5762_v16 = vpack.c.bf16 %v5648_v4, %v5647_v61 }
 0x4a4   :  { %10303 = vmatmul.mubr.msk.bf16.gmra.mrb[140].mxu1 %vm119_vm3, %v5710_v58  ;;  %5599 = vst.msk [vmem:[#allocation4 + $0x1a0] sm:$0xff] %vm119_vm3, %v5535_v14  ;;  %v4732_v9 = vadd.f32 %v4585_v31, %v14472_v15  ;;  %v9848_v42 = vpop.f32.mrb[33].mxu0  ;;  %v10787_v58 = vld [vmem:[%s14437_s3 + $0x58] sm:$0xff]  }
 0x4a5   :  { %10306 = vmatprep.mubr.msk.bf16.mxu1 %vm10924_vm2, %v14448_v39  ;;  %v4588_v48 = vpop.f32.mrb[34].mxu0  ;;  %v10788_v14 = vld [vmem:[%s14437_s3 + $0x78] sm:$0xff]   ;;  %v5713_v42 = vpack.c.bf16 %v5649_v10, %v5648_v4  ;;  %10421 = vmatpush3.bf16.msra.mxu0 %v10787_v58 }
 0x4a6   :  { %v5401_v0 = vadd.f32 %v5254_v8, %v4732_v9  ;;  %v4733_v54 = vadd.f32 %v4588_v48, %v14473_v52  ;;  %v9849_v32 = vpop.f32.mrb[35].mxu0  ;;  %10593 = vmatpush3.bf16.msra.mxu1 %v10788_v14 }
 0x4a7   :  { %v5262_v56 = vpop.f32.mrb[36].mxu1 }
 0x4a8   :  { %v10020_v34 = vpop.f32.mrb[37].mxu1  ;;  %v5472_v22 = vadd.f32 %v13321_v45, %v5401_v0  ;;  %v5402_v62 = vadd.f32 %v5257_v1, %v4733_v54  ;;  %10131 = vmatmul.mubr.msk.bf16.gmra.mrb[140].mxu0 %vm119_vm3, %v5760_v17  ;;  %v5650_v0 = vld [vmem:[#allocation4 + $0x110] sm:$0xff]  ;;  %v14478_v54 = vld [vmem:[#allocation17_spill] sm:$0xff] }
 0x4a9   :  { %v5265_v35 = vpop.f32.mrb[38].mxu1  ;;  %10134 = vmatprep.mubr.msk.bf16.mxu0 %vm10924_vm2, %v14448_v39 }
 0x4aa   :  { %v10021_v63 = vpop.f32.mrb[39].mxu1  ;;  %v5536_v44 = vmax.f32 %v5472_v22, 0.0  ;;  %v5473_v20 = vadd.f32 %v13321_v45, %v5402_v62  ;;  %v5651_v22 = vld [vmem:[#allocation4 + $0x118] sm:$0xff] }
 0x4ab   :  { %v4593_v57 = vpop.f32.mrb[36].mxu0  ;;  %v14479_v63 = vld [vmem:[#allocation18_spill] sm:$0xff] }
 0x4ac   :  { %10307 = vmatmul.mubr.msk.bf16.gmra.mrb[144].mxu1 %vm119_vm3, %v5711_v41  ;;  %5600 = vst.msk [vmem:[#allocation4 + $0x1b0] sm:$0xff] %vm119_vm3, %v5536_v44  ;;  %v5537_v12 = vmax.f32 %v5473_v20, 0.0  ;;  %v4734_v18 = vadd.f32 %v4593_v57, %v14474_v47  ;;  %v9852_v21 = vpop.f32.mrb[37].mxu0  ;;  %v5763_v20 = vpack.c.bf16 %v5650_v0, %v5649_v10 }
 0x4ad   :  { %10310 = vmatprep.mubr.msk.bf16.mxu1 %vm10924_vm2, %v14448_v39  ;;  %v4596_v30 = vpop.f32.mrb[38].mxu0  ;;  %v5714_v21 = vpack.c.bf16 %v5651_v22, %v5650_v0 }
 0x4ae   :  { %5601 = vst.msk [vmem:[#allocation4 + $0x1b8] sm:$0xff] %vm119_vm3, %v5537_v12  ;;  %v5403_v40 = vadd.f32 %v5262_v56, %v4734_v18  ;;  %v4735_v24 = vadd.f32 %v4596_v30, %v14475_v13  ;;  %v9853_v5 = vpop.f32.mrb[39].mxu0 }
 0x4af   :  { %v5270_v59 = vpop.f32.mrb[40].mxu1 }
 0x4b0   :  { %v10024_v38 = vpop.f32.mrb[41].mxu1  ;;  %v5474_v49 = vadd.f32 %v13321_v45, %v5403_v40  ;;  %v5404_v55 = vadd.f32 %v5265_v35, %v4735_v24  ;;  %10135 = vmatmul.mubr.msk.bf16.gmra.mrb[144].mxu0 %vm119_vm3, %v5761_v36  ;;  %v5652_v40 = vld [vmem:[#allocation4 + $0x120] sm:$0xff]  ;;  %v5653_v36 = vld [vmem:[#allocation4 + $0x128] sm:$0xff] }
 0x4b1   :  { %v5273_v46 = vpop.f32.mrb[42].mxu1  ;;  %10138 = vmatprep.mubr.msk.bf16.mxu0 %vm10924_vm2, %v14448_v39  ;;  %v5715_v4 = vpack.c.bf16 %v5653_v36, %v5652_v40 }
 0x4b2   :  { %v10025_v60 = vpop.f32.mrb[43].mxu1  ;;  %v5538_v37 = vmax.f32 %v5474_v49, 0.0  ;;  %v5475_v28 = vadd.f32 %v13321_v45, %v5404_v55 }
 0x4b3   :  { %v4601_v2 = vpop.f32.mrb[40].mxu0  ;;  %v5764_v60 = vpack.c.bf16 %v5652_v40, %v5651_v22 }
 0x4b4   :  { %10311 = vmatmul.mubr.msk.bf16.gmra.mrb[148].mxu1 %vm119_vm3, %v5712_v19  ;;  %5602 = vst.msk [vmem:[#allocation4 + $0x1c0] sm:$0xff] %vm119_vm3, %v5538_v37  ;;  %v5539_v11 = vmax.f32 %v5475_v28, 0.0  ;;  %v4736_v43 = vadd.f32 %v4601_v2, %v14476_v29  ;;  %v9856_v25 = vpop.f32.mrb[41].mxu0 }
 0x4b5   :  { %10314 = vmatprep.mubr.msk.bf16.mxu1 %vm10924_vm2, %v14448_v39  ;;  %v4604_v8 = vpop.f32.mrb[42].mxu0 }
 0x4b6   :  { %5603 = vst.msk [vmem:[#allocation4 + $0x1c8] sm:$0xff] %vm119_vm3, %v5539_v11  ;;  %v5405_v51 = vadd.f32 %v5270_v59, %v4736_v43  ;;  %v4737_v50 = vadd.f32 %v4604_v8, %v14477_v7  ;;  %v9857_v1 = vpop.f32.mrb[43].mxu0  ;;  %v5654_v43 = vld [vmem:[#allocation4 + $0x130] sm:$0xff] }
 0x4b7   :  { %v5278_v26 = vpop.f32.mrb[44].mxu1  ;;  %v14481_v8 = vld [vmem:[#allocation20_spill] sm:$0xff]  ;;  %v5765_v14 = vpack.c.bf16 %v5654_v43, %v5653_v36 }
 0x4b8   :  { %v10028_v33 = vpop.f32.mrb[45].mxu1  ;;  %v5476_v3 = vadd.f32 %v13321_v45, %v5405_v51  ;;  %v5406_v15 = vadd.f32 %v5273_v46, %v4737_v50  ;;  %10139 = vmatmul.mubr.msk.bf16.gmra.mrb[148].mxu0 %vm119_vm3, %v5762_v16  ;;  %v14480_v46 = vld [vmem:[#allocation19_spill] sm:$0xff]  ;;  %v5655_v50 = vld [vmem:[#allocation4 + $0x138] sm:$0xff] }
 0x4b9   :  { %v5281_v31 = vpop.f32.mrb[46].mxu1  ;;  %10142 = vmatprep.mubr.msk.bf16.mxu0 %vm10924_vm2, %v14448_v39  ;;  %v14482_v33 = vld [vmem:[#allocation21_spill] sm:$0xff] }
 0x4ba   :  { %v10029_v9 = vpop.f32.mrb[47].mxu1  ;;  %v5540_v48 = vmax.f32 %v5476_v3, 0.0  ;;  %v5477_v56 = vadd.f32 %v13321_v45, %v5406_v15 }
 0x4bb   :  { %v4609_v53 = vpop.f32.mrb[44].mxu0 }
 0x4bc   :  { %10315 = vmatmul.mubr.msk.bf16.gmra.mrb[152].mxu1 %vm119_vm3, %v5713_v42  ;;  %5604 = vst.msk [vmem:[#allocation4 + $0x1d0] sm:$0xff] %vm119_vm3, %v5540_v48  ;;  %v5541_v52 = vmax.f32 %v5477_v56, 0.0  ;;  %v4738_v32 = vadd.f32 %v4609_v53, %v14478_v54  ;;  %v9860_v34 = vpop.f32.mrb[45].mxu0  ;;  %v5716_v48 = vpack.c.bf16 %v5655_v50, %v5654_v43 }
 0x4bd   :  { %10318 = vmatprep.mubr.msk.bf16.mxu1 %vm10924_vm2, %v14448_v39  ;;  %v4612_v17 = vpop.f32.mrb[46].mxu0 }
 0x4be   :  { %5605 = vst.msk [vmem:[#allocation4 + $0x1d8] sm:$0xff] %vm119_vm3, %v5541_v52  ;;  %v5407_v62 = vadd.f32 %v5278_v26, %v4738_v32  ;;  %v4739_v41 = vadd.f32 %v4612_v17, %v14479_v63  ;;  %v9861_v44 = vpop.f32.mrb[47].mxu0  ;;  %v5656_v52 = vld [vmem:[#allocation4 + $0x140] sm:$0xff] }
 0x4bf   :  { %v5286_v35 = vpop.f32.mrb[48].mxu1  ;;  %v14483_v32 = vld [vmem:[#allocation22_spill] sm:$0xff] }
 0x4c0   :  { %v10032_v57 = vpop.f32.mrb[49].mxu1  ;;  %v5478_v12 = vadd.f32 %v13321_v45, %v5407_v62  ;;  %v5408_v47 = vadd.f32 %v5281_v31, %v4739_v41  ;;  %10143 = vmatmul.mubr.msk.bf16.gmra.mrb[152].mxu0 %vm119_vm3, %v5763_v20  ;;  %v5657_v62 = vld [vmem:[#allocation4 + $0x148] sm:$0xff] }
 0x4c1   :  { %v5288_v6 = vpop.f32.mrb[50].mxu1  ;;  %10146 = vmatprep.mubr.msk.bf16.mxu0 %vm10924_vm2, %v14448_v39  ;;  %v14484_v41 = vld [vmem:[#allocation23_spill] sm:$0xff]  ;;  %v5766_v57 = vpack.c.bf16 %v5656_v52, %v5655_v50 }
 0x4c2   :  { %v10033_v18 = vpop.f32.mrb[51].mxu1  ;;  %v5542_v30 = vmax.f32 %v5478_v12, 0.0  ;;  %v5479_v59 = vadd.f32 %v13321_v45, %v5408_v47 }
 0x4c3   :  { %v4617_v61 = vpop.f32.mrb[48].mxu0 }
 0x4c4   :  { %10319 = vmatmul.mubr.msk.bf16.gmra.mrb[156].mxu1 %vm119_vm3, %v5714_v21  ;;  %5606 = vst.msk [vmem:[#allocation4 + $0x1e0] sm:$0xff] %vm119_vm3, %v5542_v30  ;;  %v5543_v13 = vmax.f32 %v5479_v59, 0.0  ;;  %v9864_v24 = vpop.f32.mrb[49].mxu0  ;;  %v5717_v30 = vpack.c.bf16 %v5657_v62, %v5656_v52 }
 0x4c5   :  { %10322 = vmatprep.mubr.msk.bf16.mxu1 %vm10924_vm2, %v14448_v39  ;;  %v4619_v5 = vpop.f32.mrb[50].mxu0 }
 0x4c6   :  { %5607 = vst.msk [vmem:[#allocation4 + $0x1e8] sm:$0xff] %vm119_vm3, %v5543_v13  ;;  %v4740_v49 = vadd.f32 %v4619_v5, %v14480_v46  ;;  %v9865_v55 = vpop.f32.mrb[51].mxu0  ;;  %v5658_v13 = vld [vmem:[#allocation4 + $0x150] sm:$0xff] }
 0x4c7   :  { %v5293_v38 = vpop.f32.mrb[52].mxu1  ;;  %v14485_v5 = vld [vmem:[#allocation24_spill] sm:$0xff]  ;;  %v5659_v55 = vld [vmem:[#allocation4 + $0x158] sm:$0xff] }
 0x4c8   :  { %v10036_v19 = vpop.f32.mrb[53].mxu1  ;;  %v5409_v28 = vadd.f32 %v5288_v6, %v4740_v49  ;;  %10147 = vmatmul.mubr.msk.bf16.gmra.mrb[156].mxu0 %vm119_vm3, %v5764_v60 }
 0x4c9   :  { %v5296_v37 = vpop.f32.mrb[54].mxu1  ;;  %10150 = vmatprep.mubr.msk.bf16.mxu0 %vm10924_vm2, %v14448_v39  ;;  %v14486_v19 = vld [vmem:[#allocation25_spill] sm:$0xff] }
 0x4ca   :  { %v10037_v2 = vpop.f32.mrb[55].mxu1  ;;  %v5480_v11 = vadd.f32 %v13321_v45, %v5409_v28 }
 0x4cb   :  { %v4624_v29 = vpop.f32.mrb[52].mxu0  ;;  %v5767_v2 = vpack.c.bf16 %v5658_v13, %v5657_v62 }
 0x4cc   :  { %10323 = vmatmul.mubr.msk.bf16.gmra.mrb[160].mxu1 %vm119_vm3, %v5715_v4  ;;  %v5544_v25 = vmax.f32 %v5480_v11, 0.0  ;;  %v4741_v26 = vadd.f32 %v4624_v29, %v14481_v8  ;;  %v9868_v10 = vpop.f32.mrb[53].mxu0  ;;  %v5718_v8 = vpack.c.bf16 %v5659_v55, %v5658_v13 }
 0x4cd   :  { %10326 = vmatprep.mubr.msk.bf16.mxu1 %vm10924_vm2, %v14448_v39  ;;  %v4627_v51 = vpop.f32.mrb[54].mxu0 }
 0x4ce   :  { %5608 = vst.msk [vmem:[#allocation4 + $0x1f8] sm:$0xff] %vm119_vm3, %v5544_v25  ;;  %v5410_v1 = vadd.f32 %v5293_v38, %v4741_v26  ;;  %v4742_v16 = vadd.f32 %v4627_v51, %v14482_v33  ;;  %v9869_v58 = vpop.f32.mrb[55].mxu0 }
 0x4cf   :  { %v5301_v7 = vpop.f32.mrb[56].mxu1 }
 0x4d0   :  { %v10040_v31 = vpop.f32.mrb[57].mxu1  ;;  %v5481_v15 = vadd.f32 %v13321_v45, %v5410_v1  ;;  %v5411_v9 = vadd.f32 %v5296_v37, %v4742_v16  ;;  %10151 = vmatmul.mubr.msk.bf16.gmra.mrb[160].mxu0 %vm119_vm3, %v5765_v14  ;;  %v14487_v1 = vld [vmem:[#allocation26_spill] sm:$0xff] }
 0x4d1   :  { %v5304_v3 = vpop.f32.mrb[58].mxu1  ;;  %10154 = vmatprep.mubr.msk.bf16.mxu0 %vm10924_vm2, %v14448_v39  ;;  %v5661_v31 = vld [vmem:[#allocation4 + $0x168] sm:$0xff] }
 0x4d2   :  { %v10041_v42 = vpop.f32.mrb[59].mxu1  ;;  %v5545_v56 = vmax.f32 %v5481_v15, 0.0  ;;  %v5482_v53 = vadd.f32 %v13321_v45, %v5411_v9 }
 0x4d3   :  { %v4632_v0 = vpop.f32.mrb[56].mxu0 }
 0x4d4   :  { %10327 = vmatmul.mubr.msk.bf16.gmra.mrb[164].mxu1 %vm119_vm3, %v5716_v48  ;;  %5609 = vst.msk [vmem:[#allocation4 + $0x200] sm:$0xff] %vm119_vm3, %v5545_v56  ;;  %v5546_v54 = vmax.f32 %v5482_v53, 0.0  ;;  %v4743_v34 = vadd.f32 %v4632_v0, %v14483_v32  ;;  %v9872_v17 = vpop.f32.mrb[57].mxu0  ;;  %v5662_v32 = vld [vmem:[#allocation4 + $0x170] sm:$0xff] }
 0x4d5   :  { %10330 = vmatprep.mubr.msk.bf16.mxu1 %vm10924_vm2, %v14448_v39  ;;  %v4635_v35 = vpop.f32.mrb[58].mxu0  ;;  %v5769_v62 = vpack.c.bf16 %v5662_v32, %v5661_v31 }
 0x4d6   :  { %5610 = vst.msk [vmem:[#allocation4 + $0x208] sm:$0xff] %vm119_vm3, %v5546_v54  ;;  %v5412_v63 = vadd.f32 %v5301_v7, %v4743_v34  ;;  %v4744_v44 = vadd.f32 %v4635_v35, %v14484_v41  ;;  %v9873_v20 = vpop.f32.mrb[59].mxu0  ;;  %v5660_v7 = vld [vmem:[#allocation4 + $0x160] sm:$0xff]  ;;  %v5663_v35 = vld [vmem:[#allocation4 + $0x178] sm:$0xff] }
 0x4d7   :  { %v5309_v22 = vpop.f32.mrb[60].mxu1  ;;  %v5768_v9 = vpack.c.bf16 %v5660_v7, %v5659_v55  ;;  %v5719_v0 = vpack.c.bf16 %v5661_v31, %v5660_v7  ;;  %v5720_v20 = vpack.c.bf16 %v5663_v35, %v5662_v32  ;;  %v5667_v55 = vld [vmem:[#allocation4 + $0x198] sm:$0xff] }
 0x4d8   :  { %v10044_v6 = vpop.f32.mrb[61].mxu1  ;;  %v5483_v47 = vadd.f32 %v13321_v45, %v5412_v63  ;;  %v5413_v18 = vadd.f32 %v5304_v3, %v4744_v44  ;;  %10155 = vmatmul.mubr.msk.bf16.gmra.mrb[164].mxu0 %vm119_vm3, %v5766_v57 }
 0x4d9   :  { %v5312_v12 = vpop.f32.mrb[62].mxu1  ;;  %10158 = vmatprep.mubr.msk.bf16.mxu0 %vm10924_vm2, %v14448_v39  ;;  %v5664_v6 = vld [vmem:[#allocation4 + $0x180] sm:$0xff] }
 0x4da   :  { %v10045_v21 = vpop.f32.mrb[63].mxu1  ;;  %v5547_v59 = vmax.f32 %v5483_v47, 0.0  ;;  %v5484_v61 = vadd.f32 %v13321_v45, %v5413_v18 }
 0x4db   :  { %v4640_v40 = vpop.f32.mrb[60].mxu0  ;;  %v5665_v21 = vld [vmem:[#allocation4 + $0x188] sm:$0xff] }
 0x4dc   :  { %10331 = vmatmul.mubr.msk.bf16.gmra.mrb[168].mxu1 %vm119_vm3, %v5717_v30  ;;  %5611 = vst.msk [vmem:[#allocation4 + $0x210] sm:$0xff] %vm119_vm3, %v5547_v59  ;;  %v5548_v24 = vmax.f32 %v5484_v61, 0.0  ;;  %v4745_v38 = vadd.f32 %v4640_v40, %v14485_v5  ;;  %v9876_v36 = vpop.f32.mrb[61].mxu0  ;;  %v5770_v59 = vpack.c.bf16 %v5664_v6, %v5663_v35  ;;  %v5673_v35 = vld [vmem:[#allocation4 + $0x1c8] sm:$0xff] }
 0x4dd   :  { %10334 = vmatprep.mubr.msk.bf16.mxu1 %vm10924_vm2, %v14448_v39  ;;  %v4643_v46 = vpop.f32.mrb[62].mxu0 }
 0x4de   :  { %5612 = vst.msk [vmem:[#allocation4 + $0x218] sm:$0xff] %vm119_vm3, %v5548_v24  ;;  %v5414_v60 = vadd.f32 %v5309_v22, %v4745_v38  ;;  %v4746_v37 = vadd.f32 %v4643_v46, %v14486_v19  ;;  %v9877_v28 = vpop.f32.mrb[63].mxu0  ;;  %v5721_v24 = vpack.c.bf16 %v5665_v21, %v5664_v6  ;;  %v5666_v38 = vld [vmem:[#allocation4 + $0x190] sm:$0xff] }
 0x4df   :  { %v5317_v49 = vpop.f32.mrb[64].mxu1  ;;  %v5771_v19 = vpack.c.bf16 %v5666_v38, %v5665_v21 }
 0x4e0   :  { %v10048_v4 = vpop.f32.mrb[65].mxu1  ;;  %v5485_v29 = vadd.f32 %v13321_v45, %v5414_v60  ;;  %v5415_v43 = vadd.f32 %v5312_v12, %v4746_v37  ;;  %10159 = vmatmul.mubr.msk.bf16.gmra.mrb[168].mxu0 %vm119_vm3, %v5767_v2 }
 0x4e1   :  { %v5320_v11 = vpop.f32.mrb[66].mxu1  ;;  %10162 = vmatprep.mubr.msk.bf16.mxu0 %vm10924_vm2, %v14448_v39  ;;  %v5722_v4 = vpack.c.bf16 %v5667_v55, %v5666_v38 }
 0x4e2   :  { %v10049_v25 = vpop.f32.mrb[67].mxu1  ;;  %v5549_v26 = vmax.f32 %v5485_v29, 0.0  ;;  %v5486_v10 = vadd.f32 %v13321_v45, %v5415_v43  ;;  %v5668_v29 = vld [vmem:[#allocation4 + $0x1a0] sm:$0xff] }
 0x4e3   :  { %v4648_v51 = vpop.f32.mrb[64].mxu0 }
 0x4e4   :  { %10335 = vmatmul.mubr.msk.bf16.gmra.mrb[172].mxu1 %vm119_vm3, %v5718_v8  ;;  %5613 = vst.msk [vmem:[#allocation4 + $0x220] sm:$0xff] %vm119_vm3, %v5549_v26  ;;  %v5550_v50 = vmax.f32 %v5486_v10, 0.0  ;;  %v4747_v33 = vadd.f32 %v4648_v51, %v14487_v1  ;;  %v9880_v16 = vpop.f32.mrb[65].mxu0  ;;  %v5669_v26 = vld [vmem:[#allocation4 + $0x1a8] sm:$0xff]  ;;  %v5772_v51 = vpack.c.bf16 %v5668_v29, %v5667_v55 }
 0x4e5   :  { %10338 = vmatprep.mubr.msk.bf16.mxu1 %vm10924_vm2, %v14448_v39  ;;  %v4651_v58 = vpop.f32.mrb[66].mxu0 }
 0x4e6   :  { %5614 = vst.msk [vmem:[#allocation4 + $0x228] sm:$0xff] %vm119_vm3, %v5550_v50  ;;  %v5416_v3 = vadd.f32 %v5317_v49, %v4747_v33  ;;  %v9881_v15 = vpop.f32.mrb[67].mxu0  ;;  %v5723_v33 = vpack.c.bf16 %v5669_v26, %v5668_v29  ;;  %v5670_v58 = vld [vmem:[#allocation4 + $0x1b0] sm:$0xff] }
 0x4e7   :  { %v5324_v14 = vpop.f32.mrb[68].mxu1  ;;  %v5671_v15 = vld [vmem:[#allocation4 + $0x1b8] sm:$0xff] }
 0x4e8   :  { %v10052_v42 = vpop.f32.mrb[69].mxu1  ;;  %v5487_v56 = vadd.f32 %v13321_v45, %v5416_v3  ;;  %10163 = vmatmul.mubr.msk.bf16.gmra.mrb[172].mxu0 %vm119_vm3, %v5768_v9 }
 0x4e9   :  { %v5326_v48 = vpop.f32.mrb[70].mxu1  ;;  %10166 = vmatprep.mubr.msk.bf16.mxu0 %vm10924_vm2, %v14448_v39  ;;  %v5773_v42 = vpack.c.bf16 %v5670_v58, %v5669_v26 }
 0x4ea   :  { %v10053_v53 = vpop.f32.mrb[71].mxu1  ;;  %v5551_v52 = vmax.f32 %v5487_v56, 0.0 }
 0x4eb   :  { %v4655_v54 = vpop.f32.mrb[68].mxu0 }
 0x4ec   :  { %10339 = vmatmul.mubr.msk.bf16.gmra.mrb[176].mxu1 %vm119_vm3, %v5719_v0  ;;  %5615 = vst.msk [vmem:[#allocation4 + $0x230] sm:$0xff] %vm119_vm3, %v5551_v52  ;;  %v9884_v34 = vpop.f32.mrb[69].mxu0  ;;  %v5724_v0 = vpack.c.bf16 %v5671_v15, %v5670_v58  ;;  %v5672_v54 = vld [vmem:[#allocation4 + $0x1c0] sm:$0xff] }
 0x4ed   :  { %10342 = vmatprep.mubr.msk.bf16.mxu1 %vm10924_vm2, %v14448_v39  ;;  %v4657_v17 = vpop.f32.mrb[70].mxu0 }
 0x4ee   :  { %v9885_v22 = vpop.f32.mrb[71].mxu0 }
 0x4ef   :  { %v5330_v45 = vpop.f32.mrb[72].mxu1 }
 0x4f0   :  { %v10056_v63 = vpop.f32.mrb[73].mxu1  ;;  %10167 = vmatmul.mubr.msk.bf16.gmra.mrb[176].mxu0 %vm119_vm3, %v5769_v62  ;;  %v5774_v62 = vpack.c.bf16 %v5672_v54, %v5671_v15 }
 0x4f1   :  { %v5332_v41 = vpop.f32.mrb[74].mxu1  ;;  %10170 = vmatprep.mubr.msk.bf16.mxu0 %vm10924_vm2, %v14448_v39 }
 0x4f2   :  { %v10057_v44 = vpop.f32.mrb[75].mxu1 }
 0x4f3   :  { %v4661_v57 = vpop.f32.mrb[72].mxu0 }
 0x4f4   :  { %10343 = vmatmul.mubr.msk.bf16.gmra.mrb[180].mxu1 %vm119_vm3, %v5720_v20  ;;  %v9888_v12 = vpop.f32.mrb[73].mxu0  ;;  %v5725_v57 = vpack.c.bf16 %v5673_v35, %v5672_v54 }
 0x4f5   :  { %10346 = vmatprep.mubr.msk.bf16.mxu1 %vm10924_vm2, %v14448_v39  ;;  %v4663_v47 = vpop.f32.mrb[74].mxu0  ;;  %v5674_v12 = vld [vmem:[#allocation4 + $0x1d0] sm:$0xff] }
 0x4f6   :  { %v9889_v30 = vpop.f32.mrb[75].mxu0 }
 0x4f7   :  { %v5336_v18 = vpop.f32.mrb[76].mxu1 }
 0x4f8   :  { %v10060_v61 = vpop.f32.mrb[77].mxu1  ;;  %10171 = vmatmul.mubr.msk.bf16.gmra.mrb[180].mxu0 %vm119_vm3, %v5770_v59  ;;  %v5675_v59 = vld [vmem:[#allocation4 + $0x1d8] sm:$0xff] }
 0x4f9   :  { %v5338_v40 = vpop.f32.mrb[78].mxu1  ;;  %10174 = vmatprep.mubr.msk.bf16.mxu0 %vm10924_vm2, %v14448_v39 }
 0x4fa   :  { %v10061_v13 = vpop.f32.mrb[79].mxu1  ;;  %v5775_v40 = vpack.c.bf16 %v5674_v12, %v5673_v35 }
 0x4fb   :  { %v4667_v5 = vpop.f32.mrb[76].mxu0 }
 0x4fc   :  { %10347 = vmatmul.mubr.msk.bf16.gmra.mrb[184].mxu1 %vm119_vm3, %v5721_v24  ;;  %v9892_v36 = vpop.f32.mrb[77].mxu0 }
 0x4fd   :  { %10350 = vmatprep.mubr.msk.bf16.mxu1 %vm10924_vm2, %v14448_v39  ;;  %v4669_v46 = vpop.f32.mrb[78].mxu0  ;;  %v5726_v36 = vpack.c.bf16 %v5675_v59, %v5674_v12 }
 0x4fe   :  { %v9893_v60 = vpop.f32.mrb[79].mxu0 }
 0x4ff   :  { %v5342_v49 = vpop.f32.mrb[80].mxu1 }
 0x500   :  { %v10064_v37 = vpop.f32.mrb[81].mxu1  ;;  %10175 = vmatmul.mubr.msk.bf16.gmra.mrb[184].mxu0 %vm119_vm3, %v5771_v19  ;;  %v5676_v49 = vld [vmem:[#allocation4 + $0x1e0] sm:$0xff] }
 0x501   :  { %v5344_v28 = vpop.f32.mrb[82].mxu1  ;;  %10178 = vmatprep.mubr.msk.bf16.mxu0 %vm10924_vm2, %v14448_v39 }
 0x502   :  { %v10065_v2 = vpop.f32.mrb[83].mxu1  ;;  %v5677_v28 = vld [vmem:[#allocation4 + $0x1e8] sm:$0xff] }
 0x503   :  { %v4673_v11 = vpop.f32.mrb[80].mxu0 }
 0x504   :  { %10351 = vmatmul.mubr.msk.bf16.gmra.mrb[188].mxu1 %vm119_vm3, %v5722_v4  ;;  %v9896_v43 = vpop.f32.mrb[81].mxu0  ;;  %v5776_v4 = vpack.c.bf16 %v5676_v49, %v5675_v59 }
 0x505   :  { %10354 = vmatprep.mubr.msk.bf16.mxu1 %vm10924_vm2, %v14448_v39  ;;  %v4675_v25 = vpop.f32.mrb[82].mxu0 }
 0x506   :  { %v9897_v10 = vpop.f32.mrb[83].mxu0 }
 0x507   :  { %v5348_v8 = vpop.f32.mrb[84].mxu1  ;;  %v5678_v10 = vld [vmem:[#allocation4 + $0x1f0] sm:$0xff] }
 0x508   :  { %v10068_v7 = vpop.f32.mrb[85].mxu1  ;;  %10179 = vmatmul.mubr.msk.bf16.gmra.mrb[188].mxu0 %vm119_vm3, %v5772_v51  ;;  %v5727_v8 = vpack.c.bf16 %v5677_v28, %v5676_v49  ;;  %v5777_v58 = vpack.c.bf16 %v5678_v10, %v5677_v28 }
 0x509   :  { %v5350_v50 = vpop.f32.mrb[86].mxu1  ;;  %10182 = vmatprep.mubr.msk.bf16.mxu0 %vm10924_vm2, %v14448_v39 }
 0x50a   :  { %v10069_v1 = vpop.f32.mrb[87].mxu1 }
 0x50b   :  { %v4679_v16 = vpop.f32.mrb[84].mxu0 }
 0x50c   :  { %10355 = vmatmul.mubr.msk.bf16.gmra.mrb[192].mxu1 %vm119_vm3, %v5723_v33  ;;  %v9900_v14 = vpop.f32.mrb[85].mxu0  ;;  %v5679_v33 = vld [vmem:[#allocation4 + $0x1f8] sm:$0xff] }
 0x50d   :  { %10358 = vmatprep.mubr.msk.bf16.mxu1 %vm10924_vm2, %v14448_v39  ;;  %v4681_v31 = vpop.f32.mrb[86].mxu0 }
 0x50e   :  { %v9901_v9 = vpop.f32.mrb[87].mxu0 }
 0x50f   :  { %v6468_v3 = vpop.f32.mrb[88].mxu1  ;;  %v5728_v9 = vpack.c.bf16 %v5679_v33, %v5678_v10  ;;  %v5686_v10 = vld [vmem:[#allocation4 + $0x230] sm:$0xff] }
 0x510   :  { %v10252_v48 = vpop.f32.mrb[89].mxu1  ;;  %10183 = vmatmul.mubr.msk.bf16.gmra.mrb[192].mxu0 %vm119_vm3, %v5773_v42 }
 0x511   :  { %v6471_v56 = vpop.f32.mrb[90].mxu1  ;;  %10186 = vmatprep.mubr.msk.bf16.mxu0 %vm10924_vm2, %v14448_v39  ;;  %v5680_v48 = vld [vmem:[#allocation4 + $0x200] sm:$0xff] }
 0x512   :  { %v10253_v53 = vpop.f32.mrb[91].mxu1 }
 0x513   :  { %v5978_v52 = vpop.f32.mrb[88].mxu0 }
 0x514   :  { %10359 = vmatmul.mubr.msk.bf16.gmra.mrb[196].mxu1 %vm119_vm3, %v5724_v0  ;;  %v10080_v32 = vpop.f32.mrb[89].mxu0  ;;  %v13537_v34 = vadd.f32 %v6468_v3, %v5978_v52  ;;  %v5681_v52 = vld [vmem:[#allocation4 + $0x208] sm:$0xff] }
 0x515   :  { %10362 = vmatprep.mubr.msk.bf16.mxu1 %vm10924_vm2, %v14448_v39  ;;  %v5981_v17 = vpop.f32.mrb[90].mxu0  ;;  %v5778_v32 = vpack.c.bf16 %v5680_v48, %v5679_v33 }
 0x516   :  { %v10081_v22 = vpop.f32.mrb[91].mxu0  ;;  %v13539_v41 = vadd.f32 %v6471_v56, %v5981_v17 }
 0x517   :  { %v6476_v45 = vpop.f32.mrb[92].mxu1 }
 0x518   :  { %v10256_v63 = vpop.f32.mrb[93].mxu1  ;;  %10187 = vmatmul.mubr.msk.bf16.gmra.mrb[196].mxu0 %vm119_vm3, %v5774_v62  ;;  %v5729_v62 = vpack.c.bf16 %v5681_v52, %v5680_v48 }
 0x519   :  { %v6479_v44 = vpop.f32.mrb[94].mxu1  ;;  %10190 = vmatprep.mubr.msk.bf16.mxu0 %vm10924_vm2, %v14448_v39 }
 0x51a   :  { %v10257_v20 = vpop.f32.mrb[95].mxu1 }
 0x51b   :  { %v5986_v6 = vpop.f32.mrb[92].mxu0 }
 0x51c   :  { %10363 = vmatmul.mubr.msk.bf16.gmra.mrb[200].mxu1 %vm119_vm3, %v5725_v57  ;;  %v10084_v47 = vpop.f32.mrb[93].mxu0  ;;  %v13547_v18 = vadd.f32 %v6476_v45, %v5986_v6 }
 0x51d   :  { %10366 = vmatprep.mubr.msk.bf16.mxu1 %vm10924_vm2, %v14448_v39  ;;  %v5989_v21 = vpop.f32.mrb[94].mxu0  ;;  %v5683_v47 = vld [vmem:[#allocation4 + $0x218] sm:$0xff] }
 0x51e   :  { %v10085_v61 = vpop.f32.mrb[95].mxu0  ;;  %v13549_v24 = vadd.f32 %v6479_v44, %v5989_v21  ;;  %v5682_v44 = vld [vmem:[#allocation4 + $0x210] sm:$0xff] }
 0x51f   :  { %v6484_v30 = vpop.f32.mrb[96].mxu1 }
 0x520   :  { %v10260_v13 = vpop.f32.mrb[97].mxu1  ;;  %10191 = vmatmul.mubr.msk.bf16.gmra.mrb[200].mxu0 %vm119_vm3, %v5775_v40 }
 0x521   :  { %v6487_v5 = vpop.f32.mrb[98].mxu1  ;;  %10194 = vmatprep.mubr.msk.bf16.mxu0 %vm10924_vm2, %v14448_v39 }
 0x522   :  { %v10261_v38 = vpop.f32.mrb[99].mxu1 }
 0x523   :  { %v5994_v46 = vpop.f32.mrb[96].mxu0 }
 0x524   :  { %10367 = vmatmul.mubr.msk.bf16.gmra.mrb[204].mxu1 %vm119_vm3, %v5726_v36  ;;  %v10088_v55 = vpop.f32.mrb[97].mxu0  ;;  %v13557_v60 = vadd.f32 %v6484_v30, %v5994_v46  ;;  %v5779_v30 = vpack.c.bf16 %v5682_v44, %v5681_v52  ;;  %v5684_v36 = vld [vmem:[#allocation4 + $0x220] sm:$0xff] }
 0x525   :  { %10370 = vmatprep.mubr.msk.bf16.mxu1 %vm10924_vm2, %v14448_v39  ;;  %v5997_v19 = vpop.f32.mrb[98].mxu0 }
 0x526   :  { %v10089_v2 = vpop.f32.mrb[99].mxu0  ;;  %v13559_v29 = vadd.f32 %v6487_v5, %v5997_v19  ;;  %v5730_v5 = vpack.c.bf16 %v5683_v47, %v5682_v44 }
 0x527   :  { %v6492_v37 = vpop.f32.mrb[100].mxu1  ;;  %v5780_v2 = vpack.c.bf16 %v5684_v36, %v5683_v47  ;;  %v5691_v47 = vld [vmem:[#allocation4 + $0x258] sm:$0xff] }
 0x528   :  { %v10264_v11 = vpop.f32.mrb[101].mxu1  ;;  %10195 = vmatmul.mubr.msk.bf16.gmra.mrb[204].mxu0 %vm119_vm3, %v5776_v4 }
 0x529   :  { %v6495_v43 = vpop.f32.mrb[102].mxu1  ;;  %10198 = vmatprep.mubr.msk.bf16.mxu0 %vm10924_vm2, %v14448_v39 }
 0x52a   :  { %v10265_v25 = vpop.f32.mrb[103].mxu1 }
 0x52b   :  { %v6002_v26 = vpop.f32.mrb[100].mxu0 }
 0x52c   :  { %10371 = vmatmul.mubr.msk.bf16.gmra.mrb[208].mxu1 %vm119_vm3, %v5727_v8  ;;  %v10092_v51 = vpop.f32.mrb[101].mxu0  ;;  %v13567_v7 = vadd.f32 %v6492_v37, %v6002_v26  ;;  %v5685_v37 = vld [vmem:[#allocation4 + $0x228] sm:$0xff] }
 0x52d   :  { %10374 = vmatprep.mubr.msk.bf16.mxu1 %vm10924_vm2, %v14448_v39  ;;  %v6005_v50 = vpop.f32.mrb[102].mxu0  ;;  %v5731_v8 = vpack.c.bf16 %v5685_v37, %v5684_v36 }
 0x52e   :  { %v10093_v16 = vpop.f32.mrb[103].mxu0  ;;  %v13569_v31 = vadd.f32 %v6495_v43, %v6005_v50 }
 0x52f   :  { %v6500_v1 = vpop.f32.mrb[104].mxu1  ;;  %v5687_v16 = vld [vmem:[#allocation4 + $0x238] sm:$0xff] }
 0x530   :  { %v10268_v14 = vpop.f32.mrb[105].mxu1  ;;  %10199 = vmatmul.mubr.msk.bf16.gmra.mrb[208].mxu0 %vm119_vm3, %v5777_v58  ;;  %v5732_v48 = vpack.c.bf16 %v5687_v16, %v5686_v10 }
 0x531   :  { %v6502_v3 = vpop.f32.mrb[106].mxu1  ;;  %10202 = vmatprep.mubr.msk.bf16.mxu0 %vm10924_vm2, %v14448_v39  ;;  %v5781_v14 = vpack.c.bf16 %v5686_v10, %v5685_v37  ;;  %v5692_v37 = vld [vmem:[#allocation4 + $0x260] sm:$0xff] }
 0x532   :  { %v10269_v15 = vpop.f32.mrb[107].mxu1 }
 0x533   :  { %v6010_v42 = vpop.f32.mrb[104].mxu0 }
 0x534   :  { %10375 = vmatmul.mubr.msk.bf16.gmra.mrb[212].mxu1 %vm119_vm3, %v5728_v9  ;;  %v10096_v56 = vpop.f32.mrb[105].mxu0 }
 0x535   :  { %10378 = vmatprep.mubr.msk.bf16.mxu1 %vm10924_vm2, %v14448_v39  ;;  %v6012_v53 = vpop.f32.mrb[106].mxu0  ;;  %v5688_v56 = vld [vmem:[#allocation4 + $0x240] sm:$0xff] }
 0x536   :  { %v10097_v54 = vpop.f32.mrb[107].mxu0  ;;  %v13577_v45 = vadd.f32 %v6502_v3, %v6012_v53 }
 0x537   :  { %v6507_v0 = vpop.f32.mrb[108].mxu1  ;;  %v5782_v54 = vpack.c.bf16 %v5688_v56, %v5687_v16 }
 0x538   :  { %v10272_v17 = vpop.f32.mrb[109].mxu1  ;;  %10203 = vmatmul.mubr.msk.bf16.gmra.mrb[212].mxu0 %vm119_vm3, %v5778_v32 }
 0x539   :  { %v6510_v35 = vpop.f32.mrb[110].mxu1  ;;  %10206 = vmatprep.mubr.msk.bf16.mxu0 %vm10924_vm2, %v14448_v39 }
 0x53a   :  { %v10273_v22 = vpop.f32.mrb[111].mxu1 }
 0x53b   :  { %v6017_v63 = vpop.f32.mrb[108].mxu0 }
 0x53c   :  { %10379 = vmatmul.mubr.msk.bf16.gmra.mrb[216].mxu1 %vm119_vm3, %v5729_v62  ;;  %v10100_v20 = vpop.f32.mrb[109].mxu0  ;;  %v13585_v57 = vadd.f32 %v6507_v0, %v6017_v63  ;;  %v5689_v0 = vld [vmem:[#allocation4 + $0x248] sm:$0xff] }
 0x53d   :  { %10382 = vmatprep.mubr.msk.bf16.mxu1 %vm10924_vm2, %v14448_v39  ;;  %v6020_v6 = vpop.f32.mrb[110].mxu0  ;;  %v5733_v63 = vpack.c.bf16 %v5689_v0, %v5688_v56 }
 0x53e   :  { %v10101_v21 = vpop.f32.mrb[111].mxu0  ;;  %v13587_v61 = vadd.f32 %v6510_v35, %v6020_v6  ;;  %v5690_v6 = vld [vmem:[#allocation4 + $0x250] sm:$0xff] }
 0x53f   :  { %v6515_v12 = vpop.f32.mrb[112].mxu1  ;;  %v5734_v36 = vpack.c.bf16 %v5691_v47, %v5690_v6 }
 0x540   :  { %v10276_v59 = vpop.f32.mrb[113].mxu1  ;;  %10207 = vmatmul.mubr.msk.bf16.gmra.mrb[216].mxu0 %vm119_vm3, %v5779_v30  ;;  %v5783_v30 = vpack.c.bf16 %v5690_v6, %v5689_v0 }
 0x541   :  { %v6518_v40 = vpop.f32.mrb[114].mxu1  ;;  %10210 = vmatprep.mubr.msk.bf16.mxu0 %vm10924_vm2, %v14448_v39 }
 0x542   :  { %v10277_v13 = vpop.f32.mrb[115].mxu1 }
 0x543   :  { %v6025_v38 = vpop.f32.mrb[112].mxu0 }
 0x544   :  { %10383 = vmatmul.mubr.msk.bf16.gmra.mrb[220].mxu1 %vm119_vm3, %v5730_v5  ;;  %v10104_v46 = vpop.f32.mrb[113].mxu0  ;;  %v13595_v49 = vadd.f32 %v6515_v12, %v6025_v38 }
 0x545   :  { %10386 = vmatprep.mubr.msk.bf16.mxu1 %vm10924_vm2, %v14448_v39  ;;  %v6028_v55 = vpop.f32.mrb[114].mxu0 }
 0x546   :  { %v10105_v28 = vpop.f32.mrb[115].mxu0  ;;  %v13597_v11 = vadd.f32 %v6518_v40, %v6028_v55 }
 0x547   :  { %v6523_v19 = vpop.f32.mrb[116].mxu1 }
 0x548   :  { %v10280_v4 = vpop.f32.mrb[117].mxu1  ;;  %10211 = vmatmul.mubr.msk.bf16.gmra.mrb[220].mxu0 %vm119_vm3, %v5780_v2  ;;  %v5693_v2 = vld [vmem:[#allocation4 + $0x268] sm:$0xff] }
 0x549   :  { %v6526_v43 = vpop.f32.mrb[118].mxu1  ;;  %10214 = vmatprep.mubr.msk.bf16.mxu0 %vm10924_vm2, %v14448_v39 }
 0x54a   :  { %v10281_v25 = vpop.f32.mrb[119].mxu1 }
 0x54b   :  { %v6033_v26 = vpop.f32.mrb[116].mxu0 }
 0x54c   :  { %10387 = vmatmul.mubr.msk.bf16.gmra.mrb[224].mxu1 %vm119_vm3, %v5731_v8  ;;  %v10108_v51 = vpop.f32.mrb[117].mxu0  ;;  %v13605_v50 = vadd.f32 %v6523_v19, %v6033_v26 }
 0x54d   :  { %10390 = vmatprep.mubr.msk.bf16.mxu1 %vm10924_vm2, %v14448_v39  ;;  %v6036_v1 = vpop.f32.mrb[118].mxu0 }
 0x54e   :  { %v10109_v58 = vpop.f32.mrb[119].mxu0  ;;  %v13607_v15 = vadd.f32 %v6526_v43, %v6036_v1  ;;  %v5784_v43 = vpack.c.bf16 %v5692_v37, %v5691_v47  ;;  %v5735_v1 = vpack.c.bf16 %v5693_v2, %v5692_v37 }
 0x54f   :  { %v6531_v33 = vpop.f32.mrb[120].mxu1 }
 0x550   :  { %v10284_v3 = vpop.f32.mrb[121].mxu1  ;;  %10215 = vmatmul.mubr.msk.bf16.gmra.mrb[224].mxu0 %vm119_vm3, %v5781_v14  ;;  %v5694_v14 = vld [vmem:[#allocation4 + $0x270] sm:$0xff] }
 0x551   :  { %v6534_v9 = vpop.f32.mrb[122].mxu1  ;;  %10218 = vmatprep.mubr.msk.bf16.mxu0 %vm10924_vm2, %v14448_v39 }
 0x552   :  { %v10285_v42 = vpop.f32.mrb[123].mxu1  ;;  %v5695_v9 = vld [vmem:[#allocation4 + $0x278] sm:$0xff] }
 0x553   :  { %v6041_v53 = vpop.f32.mrb[120].mxu0 }
 0x554   :  { %10391 = vmatmul.mubr.msk.bf16.gmra.mrb[228].mxu1 %vm119_vm3, %v5732_v48  ;;  %v10112_v52 = vpop.f32.mrb[121].mxu0  ;;  %v13615_v32 = vadd.f32 %v6531_v33, %v6041_v53  ;;  %v5785_v48 = vpack.c.bf16 %v5694_v14, %v5693_v2 }
 0x555   :  { %10394 = vmatprep.mubr.msk.bf16.mxu1 %vm10924_vm2, %v14448_v39  ;;  %v6044_v17 = vpop.f32.mrb[122].mxu0 }
 0x556   :  { %v10113_v22 = vpop.f32.mrb[123].mxu0  ;;  %v5736_v17 = vpack.c.bf16 %v5695_v9, %v5694_v14 }
 0x557   :  { %v6538_v35 = vpop.f32.mrb[124].mxu1 }
 0x558   :  { %v10288_v62 = vpop.f32.mrb[125].mxu1  ;;  %10219 = vmatmul.mubr.msk.bf16.gmra.mrb[228].mxu0 %vm119_vm3, %v5782_v54 }
 0x559   :  { %v6541_v44 = vpop.f32.mrb[126].mxu1  ;;  %10222 = vmatprep.mubr.msk.bf16.mxu0 %vm10924_vm2, %v14448_v39 }
 0x55a   :  { %v10289_v20 = vpop.f32.mrb[127].mxu1 }
 0x55b   :  { %v6048_v12 = vpop.f32.mrb[124].mxu0 }
 0x55c   :  { %10395 = vmatmul.mubr.msk.bf16.gmra.mrb[232].mxu1 %vm119_vm3, %v5733_v63  ;;  %v10116_v21 = vpop.f32.mrb[125].mxu0  ;;  %v13623_v59 = vadd.f32 %v6538_v35, %v6048_v12  ;;  %v5696_v63 = vld [vmem:[#allocation4 + $0x280] sm:$0xff] }
 0x55d   :  { %10398 = vmatprep.mubr.msk.bf16.mxu1 %vm10924_vm2, %v14448_v39  ;;  %v6051_v40 = vpop.f32.mrb[126].mxu0  ;;  %v5786_v6 = vpack.c.bf16 %v5696_v63, %v5695_v9  ;;  %v7465_v9 = vld [vmem:[#allocation4 + $0x68] sm:$0xff] }
 0x55e   :  { %v10117_v5 = vpop.f32.mrb[127].mxu0  ;;  %v13625_v46 = vadd.f32 %v6541_v44, %v6051_v40 }
 0x55f   :  { %v6546_v13 = vpop.f32.mrb[128].mxu1 }
 0x560   :  { %v10292_v38 = vpop.f32.mrb[129].mxu1  ;;  %10223 = vmatmul.mubr.msk.bf16.gmra.mrb[232].mxu0 %vm119_vm3, %v5783_v30 }
 0x561   :  { %v6549_v55 = vpop.f32.mrb[130].mxu1  ;;  %10226 = vmatprep.mubr.msk.bf16.mxu0 %vm10924_vm2, %v14448_v39 }
 0x562   :  { %v10293_v19 = vpop.f32.mrb[131].mxu1 }
 0x563   :  { %v6056_v28 = vpop.f32.mrb[128].mxu0 }
 0x564   :  { %10399 = vmatmul.mubr.msk.bf16.gmra.mrb[236].mxu1 %vm119_vm3, %v5734_v36  ;;  %v10120_v4 = vpop.f32.mrb[129].mxu0  ;;  %v13633_v25 = vadd.f32 %v6546_v13, %v6056_v28  ;;  %v5737_v13 = vpack.c.bf16 %v5696_v63, %v5696_v63 }
 0x565   :  { %10402 = vmatprep.mubr.msk.bf16.mxu1 %vm10924_vm2, %v14448_v39  ;;  %v6059_v8 = vpop.f32.mrb[130].mxu0 }
 0x566   :  { %v10121_v10 = vpop.f32.mrb[131].mxu0  ;;  %v13635_v33 = vadd.f32 %v6549_v55, %v6059_v8  ;;  %v5746_v55 = vld [vmem:[#allocation4 + $0x288] sm:$0xff] }
 0x567   :  { %v6554_v26 = vpop.f32.mrb[132].mxu1  ;;  %v5787_v28 = vpack.c.bf16 %v5746_v55, %v5746_v55 }
 0x568   :  { %v10296_v51 = vpop.f32.mrb[133].mxu1  ;;  %10227 = vmatmul.mubr.msk.bf16.gmra.mrb[236].mxu0 %vm119_vm3, %v5784_v43 }
 0x569   :  { %v6557_v16 = vpop.f32.mrb[134].mxu1  ;;  %10230 = vmatprep.mubr.msk.bf16.mxu0 %vm10924_vm2, %v14448_v39 }
 0x56a   :  { %v10297_v58 = vpop.f32.mrb[135].mxu1 }
 0x56b   :  { %v6064_v3 = vpop.f32.mrb[132].mxu0 }
 0x56c   :  { %10403 = vmatmul.mubr.msk.bf16.gmra.mrb[240].mxu1 %vm119_vm3, %v5735_v1  ;;  %v10124_v42 = vpop.f32.mrb[133].mxu0  ;;  %v13643_v56 = vadd.f32 %v6554_v26, %v6064_v3 }
 0x56d   :  { %10406 = vmatprep.mubr.msk.bf16.mxu1 %vm10924_vm2, %v14448_v39  ;;  %v6067_v53 = vpop.f32.mrb[134].mxu0 }
 0x56e   :  { %v10125_v52 = vpop.f32.mrb[135].mxu0  ;;  %v13645_v35 = vadd.f32 %v6557_v16, %v6067_v53 }
 0x56f   :  { %v6562_v0 = vpop.f32.mrb[136].mxu1  ;;  %v7464_v52 = vld [vmem:[#allocation4 + $0x60] sm:$0xff] }
 0x570   :  { %v10300_v54 = vpop.f32.mrb[137].mxu1  ;;  %10231 = vmatmul.mubr.msk.bf16.gmra.mrb[240].mxu0 %vm119_vm3, %v5785_v48 }
 0x571   :  { %v6565_v22 = vpop.f32.mrb[138].mxu1  ;;  %10234 = vmatprep.mubr.msk.bf16.mxu0 %vm10924_vm2, %v14448_v39  ;;  %v7544_v54 = vpack.c.bf16 %v7465_v9, %v7464_v52 }
 0x572   :  { %v10301_v62 = vpop.f32.mrb[139].mxu1 }
 0x573   :  { %v6072_v44 = vpop.f32.mrb[136].mxu0 }
 0x574   :  { %10407 = vmatmul.mubr.msk.bf16.gmra.mrb[244].mxu1 %vm119_vm3, %v5736_v17  ;;  %v10128_v20 = vpop.f32.mrb[137].mxu0  ;;  %v13653_v12 = vadd.f32 %v6562_v0, %v6072_v44 }
 0x575   :  { %10410 = vmatprep.mubr.msk.bf16.mxu1 %vm10924_vm2, %v14448_v39  ;;  %v6075_v47 = vpop.f32.mrb[138].mxu0  ;;  %v6779_v20 = vld [vmem:[#allocation4 + $0x58] sm:$0xff] }
 0x576   :  { %v10129_v30 = vpop.f32.mrb[139].mxu0  ;;  %v13655_v5 = vadd.f32 %v6565_v22, %v6075_v47 }
 0x577   :  { %v6570_v21 = vpop.f32.mrb[140].mxu1 }
 0x578   :  { %v10304_v40 = vpop.f32.mrb[141].mxu1  ;;  %10235 = vmatmul.mubr.msk.bf16.gmra.mrb[244].mxu0 %vm119_vm3, %v5786_v6  ;;  %v7467_v6 = vld [vmem:[#allocation4 + $0x78] sm:$0xff]  ;;  %v6859_v21 = vpack.c.bf16 %v7464_v52, %v6779_v20 }
 0x579   :  { %v6572_v38 = vpop.f32.mrb[142].mxu1  ;;  %10238 = vmatprep.mubr.msk.bf16.mxu0 %vm10924_vm2, %v14448_v39 }
 0x57a   :  { %v10305_v36 = vpop.f32.mrb[143].mxu1 }
 0x57b   :  { %v6080_v19 = vpop.f32.mrb[140].mxu0 }
 0x57c   :  { %10411 = vmatmul.mubr.msk.bf16.gmra.mrb[248].mxu1 %vm119_vm3, %v5737_v13  ;;  %v10132_v37 = vpop.f32.mrb[141].mxu0  ;;  %v7466_v13 = vld [vmem:[#allocation4 + $0x70] sm:$0xff] }
 0x57d   :  { %10594 = vmatprep.mubr.msk.bf16.mxu1 %vm10924_vm2, %v14448_v39  ;;  %v6082_v2 = vpop.f32.mrb[142].mxu0  ;;  %v7545_v36 = vpack.c.bf16 %v7467_v6, %v7466_v13 }
 0x57e   :  { %v10133_v43 = vpop.f32.mrb[143].mxu0  ;;  %v13663_v26 = vadd.f32 %v6572_v38, %v6082_v2 }
 0x57f   :  { %v6577_v4 = vpop.f32.mrb[144].mxu1  ;;  %v7469_v43 = vld [vmem:[#allocation4 + $0x88] sm:$0xff] }
 0x580   :  { %v10308_v8 = vpop.f32.mrb[145].mxu1  ;;  %10239 = vmatmul.mubr.msk.bf16.gmra.mrb[248].mxu0 %vm119_vm3, %v5787_v28 }
 0x581   :  { %v6580_v10 = vpop.f32.mrb[146].mxu1  ;;  %10422 = vmatprep.mubr.msk.bf16.mxu0 %vm10924_vm2, %v14448_v39 }
 0x582   :  { %v10309_v51 = vpop.f32.mrb[147].mxu1 }
 0x583   :  { %v6087_v1 = vpop.f32.mrb[144].mxu0  ;;  %v6860_v51 = vpack.c.bf16 %v7466_v13, %v7465_v9 }
 0x584   :  { %10595 = vmatmul.mubr.msk.bf16.vlgmr.msra.gmra.mrb[252].mxu1 %vm119_vm3, %v13282_v27  ;;  %v10136_v16 = vpop.f32.mrb[145].mxu0  ;;  %v13672_v58 = vadd.f32 %v6577_v4, %v6087_v1  ;;  %v7468_v4 = vld [vmem:[#allocation4 + $0x80] sm:$0xff] }
 0x585   :  { %10598 = vmatprep.mubr.msk.bf16.mxu1 %vm10924_vm2, %v14448_v39  ;;  %v6090_v14 = vpop.f32.mrb[146].mxu0 }
 0x586   :  { %v10137_v42 = vpop.f32.mrb[147].mxu0  ;;  %v13674_v53 = vadd.f32 %v6580_v10, %v6090_v14 }
 0x587   :  { %v6585_v3 = vpop.f32.mrb[148].mxu1 }
 0x588   :  { %v10312_v48 = vpop.f32.mrb[149].mxu1  ;;  %10423 = vmatmul.mubr.msk.bf16.vlgmr.msra.gmra.mrb[252].mxu0 %vm119_vm3, %v13279_v23 }
 0x589   :  { %v6588_v0 = vpop.f32.mrb[150].mxu1  ;;  %10426 = vmatprep.mubr.msk.bf16.mxu0 %vm10924_vm2, %v14448_v39 }
 0x58a   :  { %v10313_v27 = vpop.f32.mrb[151].mxu1 }
 0x58b   :  { %v6095_v17 = vpop.f32.mrb[148].mxu0  ;;  %v7471_v27 = vld [vmem:[#allocation4 + $0x98] sm:$0xff] }
 0x58c   :  { %10599 = vmatmul.mubr.msk.bf16.gmra.mrb[0].mxu1 %vm119_vm3, %v7544_v54  ;;  %v10140_v22 = vpop.f32.mrb[149].mxu0  ;;  %v13683_v62 = vadd.f32 %v6585_v3, %v6095_v17  ;;  %v7546_v3 = vpack.c.bf16 %v7469_v43, %v7468_v4 }
 0x58d   :  { %10602 = vmatprep.mubr.msk.bf16.mxu1 %vm10924_vm2, %v14448_v39  ;;  %v6098_v63 = vpop.f32.mrb[150].mxu0  ;;  %v6861_v22 = vpack.c.bf16 %v7468_v4, %v7467_v6  ;;  %v7472_v4 = vld [vmem:[#allocation4 + $0xa0] sm:$0xff] }
 0x58e   :  { %v10141_v47 = vpop.f32.mrb[151].mxu0  ;;  %v13685_v30 = vadd.f32 %v6588_v0, %v6098_v63 }
 0x58f   :  { %v6593_v44 = vpop.f32.mrb[152].mxu1 }
 0x590   :  { %v10316_v23 = vpop.f32.mrb[153].mxu1  ;;  %10427 = vmatmul.mubr.msk.bf16.gmra.mrb[0].mxu0 %vm119_vm3, %v6859_v21 }
 0x591   :  { %v6596_v40 = vpop.f32.mrb[154].mxu1  ;;  %10430 = vmatprep.mubr.msk.bf16.mxu0 %vm10924_vm2, %v14448_v39 }
 0x592   :  { %v10317_v38 = vpop.f32.mrb[155].mxu1 }
 0x593   :  { %v6103_v55 = vpop.f32.mrb[152].mxu0  ;;  %v7473_v38 = vld [vmem:[#allocation4 + $0xa8] sm:$0xff] }
 0x594   :  { %10603 = vmatmul.mubr.msk.bf16.gmra.mrb[4].mxu1 %vm119_vm3, %v7545_v36  ;;  %v10144_v19 = vpop.f32.mrb[153].mxu0  ;;  %v13693_v37 = vadd.f32 %v6593_v44, %v6103_v55  ;;  %v7470_v44 = vld [vmem:[#allocation4 + $0x90] sm:$0xff] }
 0x595   :  { %10606 = vmatprep.mubr.msk.bf16.mxu1 %vm10924_vm2, %v14448_v39  ;;  %v6106_v28 = vpop.f32.mrb[154].mxu0  ;;  %v7547_v47 = vpack.c.bf16 %v7471_v27, %v7470_v44 }
 0x596   :  { %v10145_v8 = vpop.f32.mrb[155].mxu0  ;;  %v13695_v1 = vadd.f32 %v6596_v40, %v6106_v28  ;;  %v6862_v28 = vpack.c.bf16 %v7470_v44, %v7469_v43 }
 0x597   :  { %v6601_v2 = vpop.f32.mrb[156].mxu1 }
 0x598   :  { %v10320_v10 = vpop.f32.mrb[157].mxu1  ;;  %10431 = vmatmul.mubr.msk.bf16.gmra.mrb[4].mxu0 %vm119_vm3, %v6860_v51 }
 0x599   :  { %v6604_v16 = vpop.f32.mrb[158].mxu1  ;;  %10434 = vmatprep.mubr.msk.bf16.mxu0 %vm10924_vm2, %v14448_v39  ;;  %v7548_v10 = vpack.c.bf16 %v7473_v38, %v7472_v4 }
 0x59a   :  { %v10321_v14 = vpop.f32.mrb[159].mxu1 }
 0x59b   :  { %v6111_v42 = vpop.f32.mrb[156].mxu0 }
 0x59c   :  { %10607 = vmatmul.mubr.msk.bf16.gmra.mrb[8].mxu1 %vm119_vm3, %v7546_v3  ;;  %v10148_v48 = vpop.f32.mrb[157].mxu0  ;;  %v13703_v0 = vadd.f32 %v6601_v2, %v6111_v42  ;;  %v7475_v42 = vld [vmem:[#allocation4 + $0xb8] sm:$0xff] }
 0x59d   :  { %10610 = vmatprep.mubr.msk.bf16.mxu1 %vm10924_vm2, %v14448_v39  ;;  %v6114_v9 = vpop.f32.mrb[158].mxu0 }
 0x59e   :  { %v10149_v54 = vpop.f32.mrb[159].mxu0 }
 0x59f   :  { %v6608_v52 = vpop.f32.mrb[160].mxu1  ;;  %v6863_v54 = vpack.c.bf16 %v7472_v4, %v7471_v27  ;;  %v7476_v4 = vld [vmem:[#allocation4 + $0xc0] sm:$0xff] }
 0x5a0   :  { %v10324_v17 = vpop.f32.mrb[161].mxu1  ;;  %10435 = vmatmul.mubr.msk.bf16.gmra.mrb[8].mxu0 %vm119_vm3, %v6861_v22  ;;  %v7474_v22 = vld [vmem:[#allocation4 + $0xb0] sm:$0xff] }
 0x5a1   :  { %v6611_v63 = vpop.f32.mrb[162].mxu1  ;;  %10438 = vmatprep.mubr.msk.bf16.mxu0 %vm10924_vm2, %v14448_v39  ;;  %v7549_v44 = vpack.c.bf16 %v7475_v42, %v7474_v22 }
 0x5a2   :  { %v10325_v20 = vpop.f32.mrb[163].mxu1 }
 0x5a3   :  { %v6118_v23 = vpop.f32.mrb[160].mxu0 }
 0x5a4   :  { %10611 = vmatmul.mubr.msk.bf16.gmra.mrb[12].mxu1 %vm119_vm3, %v7547_v47  ;;  %v13711_v21 = vadd.f32 %v6608_v52, %v6118_v23  ;;  %v10152_v40 = vpop.f32.mrb[161].mxu0 }
 0x5a5   :  { %10614 = vmatprep.mubr.msk.bf16.mxu1 %vm10924_vm2, %v14448_v39  ;;  %v6121_v13 = vpop.f32.mrb[162].mxu0 }
 0x5a6   :  { %v13713_v36 = vadd.f32 %v6611_v63, %v6121_v13  ;;  %v10153_v55 = vpop.f32.mrb[163].mxu0  ;;  %v7477_v13 = vld [vmem:[#allocation4 + $0xc8] sm:$0xff] }
 0x5a7   :  { %v6616_v6 = vpop.f32.mrb[164].mxu1 }
 0x5a8   :  { %v10328_v19 = vpop.f32.mrb[165].mxu1  ;;  %10439 = vmatmul.mubr.msk.bf16.gmra.mrb[12].mxu0 %vm119_vm3, %v6862_v28  ;;  %v6864_v28 = vpack.c.bf16 %v7474_v22, %v7473_v38  ;;  %v6865_v22 = vpack.c.bf16 %v7476_v4, %v7475_v42 }
 0x5a9   :  { %v6619_v2 = vpop.f32.mrb[166].mxu1  ;;  %10442 = vmatprep.mubr.msk.bf16.mxu0 %vm10924_vm2, %v14448_v39 }
 0x5aa   :  { %v10329_v8 = vpop.f32.mrb[167].mxu1 }
 0x5ab   :  { %v6126_v51 = vpop.f32.mrb[164].mxu0 }
 0x5ac   :  { %10615 = vmatmul.mubr.msk.bf16.gmra.mrb[16].mxu1 %vm119_vm3, %v7548_v10  ;;  %v13721_v16 = vadd.f32 %v6616_v6, %v6126_v51  ;;  %v10156_v14 = vpop.f32.mrb[165].mxu0  ;;  %v7550_v10 = vpack.c.bf16 %v7477_v13, %v7476_v4 }
 0x5ad   :  { %10618 = vmatprep.mubr.msk.bf16.mxu1 %vm10924_vm2, %v14448_v39  ;;  %v6129_v3 = vpop.f32.mrb[166].mxu0 }
 0x5ae   :  { %v13723_v48 = vadd.f32 %v6619_v2, %v6129_v3  ;;  %v10157_v9 = vpop.f32.mrb[167].mxu0 }
 0x5af   :  { %v6624_v43 = vpop.f32.mrb[168].mxu1  ;;  %v7479_v9 = vld [vmem:[#allocation4 + $0xd8] sm:$0xff] }
 0x5b0   :  { %v10332_v52 = vpop.f32.mrb[169].mxu1  ;;  %10443 = vmatmul.mubr.msk.bf16.gmra.mrb[16].mxu0 %vm119_vm3, %v6863_v54 }
 0x5b1   :  { %v6627_v17 = vpop.f32.mrb[170].mxu1  ;;  %10446 = vmatprep.mubr.msk.bf16.mxu0 %vm10924_vm2, %v14448_v39 }
 0x5b2   :  { %v10333_v63 = vpop.f32.mrb[171].mxu1 }
 0x5b3   :  { %v6134_v20 = vpop.f32.mrb[168].mxu0 }
 0x5b4   :  { %10619 = vmatmul.mubr.msk.bf16.gmra.mrb[20].mxu1 %vm119_vm3, %v7549_v44  ;;  %v13731_v47 = vadd.f32 %v6624_v43, %v6134_v20  ;;  %v10160_v23 = vpop.f32.mrb[169].mxu0  ;;  %v7478_v44 = vld [vmem:[#allocation4 + $0xd0] sm:$0xff] }
 0x5b5   :  { %10622 = vmatprep.mubr.msk.bf16.mxu1 %vm10924_vm2, %v14448_v39  ;;  %v6137_v40 = vpop.f32.mrb[170].mxu0  ;;  %v7551_v23 = vpack.c.bf16 %v7479_v9, %v7478_v44 }
 0x5b6   :  { %v13733_v6 = vadd.f32 %v6627_v17, %v6137_v40  ;;  %v10161_v55 = vpop.f32.mrb[171].mxu0 }
 0x5b7   :  { %v6632_v27 = vpop.f32.mrb[172].mxu1 }
 0x5b8   :  { %v10336_v19 = vpop.f32.mrb[173].mxu1  ;;  %10447 = vmatmul.mubr.msk.bf16.gmra.mrb[20].mxu0 %vm119_vm3, %v6864_v28  ;;  %v7481_v28 = vld [vmem:[#allocation4 + $0xe8] sm:$0xff] }
 0x5b9   :  { %v6635_v2 = vpop.f32.mrb[174].mxu1  ;;  %10450 = vmatprep.mubr.msk.bf16.mxu0 %vm10924_vm2, %v14448_v39 }
 0x5ba   :  { %v10337_v8 = vpop.f32.mrb[175].mxu1 }
 0x5bb   :  { %v6142_v51 = vpop.f32.mrb[172].mxu0  ;;  %v6866_v8 = vpack.c.bf16 %v7478_v44, %v7477_v13 }
 0x5bc   :  { %10623 = vmatmul.mubr.msk.bf16.gmra.mrb[24].mxu1 %vm119_vm3, %v7550_v10  ;;  %v13741_v14 = vadd.f32 %v6632_v27, %v6142_v51  ;;  %v10164_v3 = vpop.f32.mrb[173].mxu0  ;;  %v7480_v51 = vld [vmem:[#allocation4 + $0xe0] sm:$0xff] }
 0x5bd   :  { %10626 = vmatprep.mubr.msk.bf16.mxu1 %vm10924_vm2, %v14448_v39  ;;  %v6145_v43 = vpop.f32.mrb[174].mxu0 }
 0x5be   :  { %v13743_v52 = vadd.f32 %v6635_v2, %v6145_v43  ;;  %v10165_v54 = vpop.f32.mrb[175].mxu0  ;;  %v7552_v43 = vpack.c.bf16 %v7481_v28, %v7480_v51 }
 0x5bf   :  { %v6640_v38 = vpop.f32.mrb[176].mxu1 }
 0x5c0   :  { %v10340_v17 = vpop.f32.mrb[177].mxu1  ;;  %10451 = vmatmul.mubr.msk.bf16.gmra.mrb[24].mxu0 %vm119_vm3, %v6865_v22 }
 0x5c1   :  { %v6642_v63 = vpop.f32.mrb[178].mxu1  ;;  %10454 = vmatprep.mubr.msk.bf16.mxu0 %vm10924_vm2, %v14448_v39 }
 0x5c2   :  { %v10341_v20 = vpop.f32.mrb[179].mxu1 }
 0x5c3   :  { %v6150_v40 = vpop.f32.mrb[176].mxu0 }
 0x5c4   :  { %10627 = vmatmul.mubr.msk.bf16.gmra.mrb[28].mxu1 %vm119_vm3, %v7551_v23  ;;  %v10168_v27 = vpop.f32.mrb[177].mxu0  ;;  %v6867_v40 = vpack.c.bf16 %v7480_v51, %v7479_v9  ;;  %v7485_v51 = vld [vmem:[#allocation4 + $0x108] sm:$0xff] }
 0x5c5   :  { %10630 = vmatprep.mubr.msk.bf16.mxu1 %vm10924_vm2, %v14448_v39  ;;  %v6152_v55 = vpop.f32.mrb[178].mxu0 }
 0x5c6   :  { %v13751_v42 = vadd.f32 %v6642_v63, %v6152_v55  ;;  %v10169_v2 = vpop.f32.mrb[179].mxu0  ;;  %v7483_v63 = vld [vmem:[#allocation4 + $0xf8] sm:$0xff]  ;;  %v7482_v55 = vld [vmem:[#allocation4 + $0xf0] sm:$0xff] }
 0x5c7   :  { %v6647_v19 = vpop.f32.mrb[180].mxu1 }
 0x5c8   :  { %v10344_v4 = vpop.f32.mrb[181].mxu1  ;;  %10455 = vmatmul.mubr.msk.bf16.gmra.mrb[28].mxu0 %vm119_vm3, %v6866_v8 }
 0x5c9   :  { %v6650_v10 = vpop.f32.mrb[182].mxu1  ;;  %10458 = vmatprep.mubr.msk.bf16.mxu0 %vm10924_vm2, %v14448_v39  ;;  %v7553_v4 = vpack.c.bf16 %v7483_v63, %v7482_v55 }
 0x5ca   :  { %v10345_v3 = vpop.f32.mrb[183].mxu1 }
 0x5cb   :  { %v6157_v38 = vpop.f32.mrb[180].mxu0 }
 0x5cc   :  { %10631 = vmatmul.mubr.msk.bf16.gmra.mrb[32].mxu1 %vm119_vm3, %v7552_v43  ;;  %v13759_v54 = vadd.f32 %v6647_v19, %v6157_v38  ;;  %v10172_v17 = vpop.f32.mrb[181].mxu0 }
 0x5cd   :  { %10634 = vmatprep.mubr.msk.bf16.mxu1 %vm10924_vm2, %v14448_v39  ;;  %v6160_v22 = vpop.f32.mrb[182].mxu0 }
 0x5ce   :  { %v13761_v44 = vadd.f32 %v6650_v10, %v6160_v22  ;;  %v10173_v20 = vpop.f32.mrb[183].mxu0  ;;  %v6868_v22 = vpack.c.bf16 %v7482_v55, %v7481_v28  ;;  %v7486_v55 = vld [vmem:[#allocation4 + $0x110] sm:$0xff] }
 0x5cf   :  { %v6655_v13 = vpop.f32.mrb[184].mxu1 }
 0x5d0   :  { %v10348_v23 = vpop.f32.mrb[185].mxu1  ;;  %10459 = vmatmul.mubr.msk.bf16.gmra.mrb[32].mxu0 %vm119_vm3, %v6867_v40 }
 0x5d1   :  { %v6658_v27 = vpop.f32.mrb[186].mxu1  ;;  %10462 = vmatprep.mubr.msk.bf16.mxu0 %vm10924_vm2, %v14448_v39  ;;  %v7484_v23 = vld [vmem:[#allocation4 + $0x100] sm:$0xff] }
 0x5d2   :  { %v10349_v2 = vpop.f32.mrb[187].mxu1 }
 0x5d3   :  { %v6165_v19 = vpop.f32.mrb[184].mxu0  ;;  %v7554_v2 = vpack.c.bf16 %v7485_v51, %v7484_v23 }
 0x5d4   :  { %10635 = vmatmul.mubr.msk.bf16.gmra.mrb[36].mxu1 %vm119_vm3, %v7553_v4  ;;  %v13769_v8 = vadd.f32 %v6655_v13, %v6165_v19  ;;  %v10176_v10 = vpop.f32.mrb[185].mxu0 }
 0x5d5   :  { %10638 = vmatprep.mubr.msk.bf16.mxu1 %vm10924_vm2, %v14448_v39  ;;  %v6168_v3 = vpop.f32.mrb[186].mxu0  ;;  %v7487_v10 = vld [vmem:[#allocation4 + $0x118] sm:$0xff] }
 0x5d6   :  { %14488 = vst [vmem:[#allocation5_spill] sm:$0xff] %v13769_v8  ;;  %v13771_v43 = vadd.f32 %v6658_v27, %v6168_v3  ;;  %v10177_v38 = vpop.f32.mrb[187].mxu0 }
 0x5d7   :  { %v6663_v9 = vpop.f32.mrb[188].mxu1 }
 0x5d8   :  { %14489 = vst [vmem:[#allocation6_spill] sm:$0xff] %v13771_v43  ;;  %v10352_v17 = vpop.f32.mrb[189].mxu1  ;;  %10463 = vmatmul.mubr.msk.bf16.gmra.mrb[36].mxu0 %vm119_vm3, %v6868_v22  ;;  %v6869_v22 = vpack.c.bf16 %v7484_v23, %v7483_v63  ;;  %v7555_v43 = vpack.c.bf16 %v7487_v10, %v7486_v55  ;;  %v7489_v63 = vld [vmem:[#allocation4 + $0x128] sm:$0xff] }
 0x5d9   :  { %v6666_v20 = vpop.f32.mrb[190].mxu1  ;;  %10466 = vmatprep.mubr.msk.bf16.mxu0 %vm10924_vm2, %v14448_v39 }
 0x5da   :  { %v10353_v40 = vpop.f32.mrb[191].mxu1 }
 0x5db   :  { %v6173_v13 = vpop.f32.mrb[188].mxu0 }
 0x5dc   :  { %10639 = vmatmul.mubr.msk.bf16.gmra.mrb[40].mxu1 %vm119_vm3, %v7554_v2  ;;  %v13779_v27 = vadd.f32 %v6663_v9, %v6173_v13  ;;  %v10180_v4 = vpop.f32.mrb[189].mxu0 }
 0x5dd   :  { %10642 = vmatprep.mubr.msk.bf16.mxu1 %vm10924_vm2, %v14448_v39  ;;  %v6176_v19 = vpop.f32.mrb[190].mxu0 }
 0x5de   :  { %14490 = vst [vmem:[#allocation7_spill] sm:$0xff] %v13779_v27  ;;  %v13781_v3 = vadd.f32 %v6666_v20, %v6176_v19  ;;  %v10181_v38 = vpop.f32.mrb[191].mxu0 }
 0x5df   :  { %v6671_v28 = vpop.f32.mrb[192].mxu1 }
 0x5e0   :  { %14491 = vst [vmem:[#allocation8_spill] sm:$0xff] %v13781_v3  ;;  %v10356_v17 = vpop.f32.mrb[193].mxu1  ;;  %10467 = vmatmul.mubr.msk.bf16.gmra.mrb[40].mxu0 %vm119_vm3, %v6869_v22 }
 0x5e1   :  { %v6674_v40 = vpop.f32.mrb[194].mxu1  ;;  %10470 = vmatprep.mubr.msk.bf16.mxu0 %vm10924_vm2, %v14448_v39  ;;  %v6870_v17 = vpack.c.bf16 %v7486_v55, %v7485_v51  ;;  %v7491_v55 = vld [vmem:[#allocation4 + $0x138] sm:$0xff] }
 0x5e2   :  { %v10357_v2 = vpop.f32.mrb[195].mxu1  ;;  %v7488_v40 = vld [vmem:[#allocation4 + $0x120] sm:$0xff] }
 0x5e3   :  { %v6181_v9 = vpop.f32.mrb[192].mxu0  ;;  %v7556_v3 = vpack.c.bf16 %v7489_v63, %v7488_v40 }
 0x5e4   :  { %10643 = vmatmul.mubr.msk.bf16.gmra.mrb[44].mxu1 %vm119_vm3, %v7555_v43  ;;  %v13789_v13 = vadd.f32 %v6671_v28, %v6181_v9  ;;  %v10184_v20 = vpop.f32.mrb[193].mxu0 }
 0x5e5   :  { %10646 = vmatprep.mubr.msk.bf16.mxu1 %vm10924_vm2, %v14448_v39  ;;  %v6184_v4 = vpop.f32.mrb[194].mxu0 }
 0x5e6   :  { %14492 = vst [vmem:[#allocation9_spill] sm:$0xff] %v13789_v13  ;;  %v10185_v23 = vpop.f32.mrb[195].mxu0  ;;  %v7490_v13 = vld [vmem:[#allocation4 + $0x130] sm:$0xff] }
 0x5e7   :  { %v6678_v19 = vpop.f32.mrb[196].mxu1  ;;  %v7557_v27 = vpack.c.bf16 %v7491_v55, %v7490_v13 }
 0x5e8   :  { %v10360_v38 = vpop.f32.mrb[197].mxu1  ;;  %10471 = vmatmul.mubr.msk.bf16.gmra.mrb[44].mxu0 %vm119_vm3, %v6870_v17  ;;  %v6871_v17 = vpack.c.bf16 %v7488_v40, %v7487_v10  ;;  %v7493_v40 = vld [vmem:[#allocation4 + $0x148] sm:$0xff] }
 0x5e9   :  { %v6681_v22 = vpop.f32.mrb[198].mxu1  ;;  %10474 = vmatprep.mubr.msk.bf16.mxu0 %vm10924_vm2, %v14448_v39 }
 0x5ea   :  { %v10361_v2 = vpop.f32.mrb[199].mxu1 }
 0x5eb   :  { %v6188_v43 = vpop.f32.mrb[196].mxu0 }
 0x5ec   :  { %10647 = vmatmul.mubr.msk.bf16.gmra.mrb[48].mxu1 %vm119_vm3, %v7556_v3  ;;  %v13797_v28 = vadd.f32 %v6678_v19, %v6188_v43  ;;  %v10188_v9 = vpop.f32.mrb[197].mxu0 }
 0x5ed   :  { %10650 = vmatprep.mubr.msk.bf16.mxu1 %vm10924_vm2, %v14448_v39  ;;  %v6191_v20 = vpop.f32.mrb[198].mxu0 }
 0x5ee   :  { %14493 = vst [vmem:[#allocation10_spill] sm:$0xff] %v13797_v28  ;;  %v13799_v4 = vadd.f32 %v6681_v22, %v6191_v20  ;;  %v10189_v23 = vpop.f32.mrb[199].mxu0 }
 0x5ef   :  { %v6686_v51 = vpop.f32.mrb[200].mxu1 }
 0x5f0   :  { %14494 = vst [vmem:[#allocation11_spill] sm:$0xff] %v13799_v4  ;;  %v10364_v38 = vpop.f32.mrb[201].mxu1  ;;  %10475 = vmatmul.mubr.msk.bf16.gmra.mrb[48].mxu0 %vm119_vm3, %v6871_v17  ;;  %v6872_v17 = vpack.c.bf16 %v7490_v13, %v7489_v63  ;;  %v7492_v4 = vld [vmem:[#allocation4 + $0x140] sm:$0xff]  ;;  %v7495_v63 = vld [vmem:[#allocation4 + $0x158] sm:$0xff] }
 0x5f1   :  { %v6689_v2 = vpop.f32.mrb[202].mxu1  ;;  %10478 = vmatprep.mubr.msk.bf16.mxu0 %vm10924_vm2, %v14448_v39  ;;  %v7558_v28 = vpack.c.bf16 %v7493_v40, %v7492_v4 }
 0x5f2   :  { %v10365_v3 = vpop.f32.mrb[203].mxu1 }
 0x5f3   :  { %v6196_v19 = vpop.f32.mrb[200].mxu0 }
 0x5f4   :  { %10651 = vmatmul.mubr.msk.bf16.gmra.mrb[52].mxu1 %vm119_vm3, %v7557_v27  ;;  %v13807_v22 = vadd.f32 %v6686_v51, %v6196_v19  ;;  %v10192_v43 = vpop.f32.mrb[201].mxu0 }
 0x5f5   :  { %10654 = vmatprep.mubr.msk.bf16.mxu1 %vm10924_vm2, %v14448_v39  ;;  %v6199_v9 = vpop.f32.mrb[202].mxu0 }
 0x5f6   :  { %14495 = vst [vmem:[#allocation12_spill] sm:$0xff] %v13807_v22  ;;  %v13809_v20 = vadd.f32 %v6689_v2, %v6199_v9  ;;  %v10193_v23 = vpop.f32.mrb[203].mxu0 }
 0x5f7   :  { %v6694_v10 = vpop.f32.mrb[204].mxu1 }
 0x5f8   :  { %14496 = vst [vmem:[#allocation13_spill] sm:$0xff] %v13809_v20  ;;  %v10368_v38 = vpop.f32.mrb[205].mxu1  ;;  %10479 = vmatmul.mubr.msk.bf16.gmra.mrb[52].mxu0 %vm119_vm3, %v6872_v17  ;;  %v6873_v17 = vpack.c.bf16 %v7492_v4, %v7491_v55  ;;  %v7494_v20 = vld [vmem:[#allocation4 + $0x150] sm:$0xff]  ;;  %v7497_v4 = vld [vmem:[#allocation4 + $0x168] sm:$0xff] }
 0x5f9   :  { %v6697_v3 = vpop.f32.mrb[206].mxu1  ;;  %10482 = vmatprep.mubr.msk.bf16.mxu0 %vm10924_vm2, %v14448_v39  ;;  %v7559_v22 = vpack.c.bf16 %v7495_v63, %v7494_v20 }
 0x5fa   :  { %v10369_v27 = vpop.f32.mrb[207].mxu1 }
 0x5fb   :  { %v6204_v51 = vpop.f32.mrb[204].mxu0 }
 0x5fc   :  { %10655 = vmatmul.mubr.msk.bf16.gmra.mrb[56].mxu1 %vm119_vm3, %v7558_v28  ;;  %v13817_v2 = vadd.f32 %v6694_v10, %v6204_v51  ;;  %v10196_v19 = vpop.f32.mrb[205].mxu0 }
 0x5fd   :  { %10658 = vmatprep.mubr.msk.bf16.mxu1 %vm10924_vm2, %v14448_v39  ;;  %v6207_v43 = vpop.f32.mrb[206].mxu0 }
 0x5fe   :  { %14497 = vst [vmem:[#allocation14_spill] sm:$0xff] %v13817_v2  ;;  %v13819_v9 = vadd.f32 %v6697_v3, %v6207_v43  ;;  %v10197_v23 = vpop.f32.mrb[207].mxu0 }
 0x5ff   :  { %v6702_v13 = vpop.f32.mrb[208].mxu1 }
 0x600   :  { %14498 = vst [vmem:[#allocation15_spill] sm:$0xff] %v13819_v9  ;;  %v10372_v38 = vpop.f32.mrb[209].mxu1  ;;  %10483 = vmatmul.mubr.msk.bf16.gmra.mrb[56].mxu0 %vm119_vm3, %v6873_v17  ;;  %v6874_v17 = vpack.c.bf16 %v7494_v20, %v7493_v40  ;;  %v7496_v9 = vld [vmem:[#allocation4 + $0x160] sm:$0xff] }
 0x601   :  { %v6705_v27 = vpop.f32.mrb[210].mxu1  ;;  %10486 = vmatprep.mubr.msk.bf16.mxu0 %vm10924_vm2, %v14448_v39  ;;  %v7560_v2 = vpack.c.bf16 %v7497_v4, %v7496_v9 }
 0x602   :  { %v10373_v28 = vpop.f32.mrb[211].mxu1 }
 0x603   :  { %v6212_v10 = vpop.f32.mrb[208].mxu0 }
 0x604   :  { %10659 = vmatmul.mubr.msk.bf16.gmra.mrb[60].mxu1 %vm119_vm3, %v7559_v22  ;;  %v13827_v3 = vadd.f32 %v6702_v13, %v6212_v10  ;;  %v10200_v51 = vpop.f32.mrb[209].mxu0 }
 0x605   :  { %10662 = vmatprep.mubr.msk.bf16.mxu1 %vm10924_vm2, %v14448_v39  ;;  %v6215_v19 = vpop.f32.mrb[210].mxu0 }
 0x606   :  { %14499 = vst [vmem:[#allocation16_spill] sm:$0xff] %v13827_v3  ;;  %v13829_v43 = vadd.f32 %v6705_v27, %v6215_v19  ;;  %v10201_v23 = vpop.f32.mrb[211].mxu0  ;;  %v7499_v19 = vld [vmem:[#allocation4 + $0x178] sm:$0xff] }
 0x607   :  { %v6710_v55 = vpop.f32.mrb[212].mxu1  ;;  %v6875_v23 = vpack.c.bf16 %v7496_v9, %v7495_v63  ;;  %v7501_v9 = vld [vmem:[#allocation4 + $0x188] sm:$0xff] }
 0x608   :  { %14500 = vst [vmem:[#allocation17_spill] sm:$0xff] %v13829_v43  ;;  %v10376_v38 = vpop.f32.mrb[213].mxu1  ;;  %10487 = vmatmul.mubr.msk.bf16.gmra.mrb[60].mxu0 %vm119_vm3, %v6874_v17  ;;  %v7498_v17 = vld [vmem:[#allocation4 + $0x170] sm:$0xff] }
 0x609   :  { %v6712_v28 = vpop.f32.mrb[214].mxu1  ;;  %10490 = vmatprep.mubr.msk.bf16.mxu0 %vm10924_vm2, %v14448_v39  ;;  %v7561_v43 = vpack.c.bf16 %v7499_v19, %v7498_v17 }
 0x60a   :  { %v10377_v22 = vpop.f32.mrb[215].mxu1 }
 0x60b   :  { %v6220_v13 = vpop.f32.mrb[212].mxu0 }
 0x60c   :  { %10663 = vmatmul.mubr.msk.bf16.gmra.mrb[64].mxu1 %vm119_vm3, %v7560_v2  ;;  %v10204_v27 = vpop.f32.mrb[213].mxu0 }
 0x60d   :  { %10666 = vmatprep.mubr.msk.bf16.mxu1 %vm10924_vm2, %v14448_v39  ;;  %v6222_v10 = vpop.f32.mrb[214].mxu0 }
 0x60e   :  { %v13837_v40 = vadd.f32 %v6712_v28, %v6222_v10  ;;  %v10205_v20 = vpop.f32.mrb[215].mxu0 }
 0x60f   :  { %v6717_v51 = vpop.f32.mrb[216].mxu1 }
 0x610   :  { %14501 = vst [vmem:[#allocation18_spill] sm:$0xff] %v13837_v40  ;;  %v10380_v55 = vpop.f32.mrb[217].mxu1  ;;  %10491 = vmatmul.mubr.msk.bf16.gmra.mrb[64].mxu0 %vm119_vm3, %v6875_v23  ;;  %v6876_v23 = vpack.c.bf16 %v7498_v17, %v7497_v4  ;;  %v7500_v40 = vld [vmem:[#allocation4 + $0x180] sm:$0xff]  ;;  %v7503_v17 = vld [vmem:[#allocation4 + $0x198] sm:$0xff] }
 0x611   :  { %v6720_v38 = vpop.f32.mrb[218].mxu1  ;;  %10494 = vmatprep.mubr.msk.bf16.mxu0 %vm10924_vm2, %v14448_v39  ;;  %v7562_v3 = vpack.c.bf16 %v7501_v9, %v7500_v40 }
 0x612   :  { %v10381_v22 = vpop.f32.mrb[219].mxu1 }
 0x613   :  { %v6227_v2 = vpop.f32.mrb[216].mxu0 }
 0x614   :  { %10667 = vmatmul.mubr.msk.bf16.gmra.mrb[68].mxu1 %vm119_vm3, %v7561_v43  ;;  %v13845_v28 = vadd.f32 %v6717_v51, %v6227_v2  ;;  %v10208_v13 = vpop.f32.mrb[217].mxu0 }
 0x615   :  { %10670 = vmatprep.mubr.msk.bf16.mxu1 %vm10924_vm2, %v14448_v39  ;;  %v6230_v27 = vpop.f32.mrb[218].mxu0 }
 0x616   :  { %14502 = vst [vmem:[#allocation19_spill] sm:$0xff] %v13845_v28  ;;  %v13847_v10 = vadd.f32 %v6720_v38, %v6230_v27  ;;  %v10209_v20 = vpop.f32.mrb[219].mxu0 }
 0x617   :  { %v6725_v63 = vpop.f32.mrb[220].mxu1 }
 0x618   :  { %14503 = vst [vmem:[#allocation20_spill] sm:$0xff] %v13847_v10  ;;  %v10384_v55 = vpop.f32.mrb[221].mxu1  ;;  %10495 = vmatmul.mubr.msk.bf16.gmra.mrb[68].mxu0 %vm119_vm3, %v6876_v23  ;;  %v6877_v23 = vpack.c.bf16 %v7500_v40, %v7499_v19  ;;  %v7502_v10 = vld [vmem:[#allocation4 + $0x190] sm:$0xff]  ;;  %v7504_v40 = vld [vmem:[#allocation4 + $0x1a0] sm:$0xff] }
 0x619   :  { %v6728_v22 = vpop.f32.mrb[222].mxu1  ;;  %10498 = vmatprep.mubr.msk.bf16.mxu0 %vm10924_vm2, %v14448_v39  ;;  %v7563_v28 = vpack.c.bf16 %v7503_v17, %v7502_v10 }
 0x61a   :  { %v10385_v43 = vpop.f32.mrb[223].mxu1 }
 0x61b   :  { %v6235_v51 = vpop.f32.mrb[220].mxu0 }
 0x61c   :  { %10671 = vmatmul.mubr.msk.bf16.gmra.mrb[72].mxu1 %vm119_vm3, %v7562_v3  ;;  %v13855_v38 = vadd.f32 %v6725_v63, %v6235_v51  ;;  %v10212_v2 = vpop.f32.mrb[221].mxu0 }
 0x61d   :  { %10674 = vmatprep.mubr.msk.bf16.mxu1 %vm10924_vm2, %v14448_v39  ;;  %v6238_v13 = vpop.f32.mrb[222].mxu0 }
 0x61e   :  { %14504 = vst [vmem:[#allocation21_spill] sm:$0xff] %v13855_v38  ;;  %v13857_v27 = vadd.f32 %v6728_v22, %v6238_v13  ;;  %v10213_v20 = vpop.f32.mrb[223].mxu0  ;;  %v7505_v13 = vld [vmem:[#allocation4 + $0x1a8] sm:$0xff] }
 0x61f   :  { %v6733_v4 = vpop.f32.mrb[224].mxu1  ;;  %v7564_v38 = vpack.c.bf16 %v7505_v13, %v7504_v40 }
 0x620   :  { %14505 = vst [vmem:[#allocation22_spill] sm:$0xff] %v13857_v27  ;;  %v10388_v55 = vpop.f32.mrb[225].mxu1  ;;  %10499 = vmatmul.mubr.msk.bf16.gmra.mrb[72].mxu0 %vm119_vm3, %v6877_v23 }
 0x621   :  { %v6736_v43 = vpop.f32.mrb[226].mxu1  ;;  %10502 = vmatprep.mubr.msk.bf16.mxu0 %vm10924_vm2, %v14448_v39 }
 0x622   :  { %v10389_v3 = vpop.f32.mrb[227].mxu1 }
 0x623   :  { %v6243_v63 = vpop.f32.mrb[224].mxu0  ;;  %v6878_v3 = vpack.c.bf16 %v7502_v10, %v7501_v9  ;;  %v7507_v9 = vld [vmem:[#allocation4 + $0x1b8] sm:$0xff] }
 0x624   :  { %10675 = vmatmul.mubr.msk.bf16.gmra.mrb[76].mxu1 %vm119_vm3, %v7563_v28  ;;  %v13865_v22 = vadd.f32 %v6733_v4, %v6243_v63  ;;  %v10216_v51 = vpop.f32.mrb[225].mxu0 }
 0x625   :  { %10678 = vmatprep.mubr.msk.bf16.mxu1 %vm10924_vm2, %v14448_v39  ;;  %v6246_v2 = vpop.f32.mrb[226].mxu0 }
 0x626   :  { %14506 = vst [vmem:[#allocation23_spill] sm:$0xff] %v13865_v22  ;;  %v13867_v20 = vadd.f32 %v6736_v43, %v6246_v2  ;;  %v10217_v55 = vpop.f32.mrb[227].mxu0  ;;  %v7518_v22 = vld [vmem:[#allocation4 + $0x210] sm:$0xff] }
 0x627   :  { %v6741_v19 = vpop.f32.mrb[228].mxu1 }
 0x628   :  { %14507 = vst [vmem:[#allocation24_spill] sm:$0xff] %v13867_v20  ;;  %v10392_v23 = vpop.f32.mrb[229].mxu1  ;;  %10503 = vmatmul.mubr.msk.bf16.gmra.mrb[76].mxu0 %vm119_vm3, %v6878_v3  ;;  %v7506_v3 = vld [vmem:[#allocation4 + $0x1b0] sm:$0xff] }
 0x629   :  { %v6744_v27 = vpop.f32.mrb[230].mxu1  ;;  %10506 = vmatprep.mubr.msk.bf16.mxu0 %vm10924_vm2, %v14448_v39  ;;  %v7565_v20 = vpack.c.bf16 %v7507_v9, %v7506_v3 }
 0x62a   :  { %v10393_v28 = vpop.f32.mrb[231].mxu1  ;;  %v6879_v27 = vpack.c.bf16 %v7504_v40, %v7503_v17  ;;  %v7509_v17 = vld [vmem:[#allocation4 + $0x1c8] sm:$0xff] }
 0x62b   :  { %v6251_v4 = vpop.f32.mrb[228].mxu0 }
 0x62c   :  { %10679 = vmatmul.mubr.msk.bf16.gmra.mrb[80].mxu1 %vm119_vm3, %v7564_v38  ;;  %v13875_v63 = vadd.f32 %v6741_v19, %v6251_v4  ;;  %v10220_v43 = vpop.f32.mrb[229].mxu0 }
 0x62d   :  { %10682 = vmatprep.mubr.msk.bf16.mxu1 %vm10924_vm2, %v14448_v39  ;;  %v6254_v51 = vpop.f32.mrb[230].mxu0 }
 0x62e   :  { %14508 = vst [vmem:[#allocation25_spill] sm:$0xff] %v13875_v63  ;;  %v10221_v10 = vpop.f32.mrb[231].mxu0  ;;  %v6880_v51 = vpack.c.bf16 %v7506_v3, %v7505_v13  ;;  %v7511_v13 = vld [vmem:[#allocation4 + $0x1d8] sm:$0xff] }
 0x62f   :  { %v6748_v2 = vpop.f32.mrb[232].mxu1 }
 0x630   :  { %v10396_v55 = vpop.f32.mrb[233].mxu1  ;;  %10507 = vmatmul.mubr.msk.bf16.gmra.mrb[80].mxu0 %vm119_vm3, %v6879_v27  ;;  %v7508_v27 = vld [vmem:[#allocation4 + $0x1c0] sm:$0xff] }
 0x631   :  { %v6750_v23 = vpop.f32.mrb[234].mxu1  ;;  %10510 = vmatprep.mubr.msk.bf16.mxu0 %vm10924_vm2, %v14448_v39 }
 0x632   :  { %v10397_v28 = vpop.f32.mrb[235].mxu1  ;;  %v7566_v23 = vpack.c.bf16 %v7509_v17, %v7508_v27 }
 0x633   :  { %v6258_v38 = vpop.f32.mrb[232].mxu0 }
 0x634   :  { %10683 = vmatmul.mubr.msk.bf16.gmra.mrb[84].mxu1 %vm119_vm3, %v7565_v20  ;;  %v10224_v19 = vpop.f32.mrb[233].mxu0 }
 0x635   :  { %10686 = vmatprep.mubr.msk.bf16.mxu1 %vm10924_vm2, %v14448_v39  ;;  %v6260_v4 = vpop.f32.mrb[234].mxu0 }
 0x636   :  { %v10225_v40 = vpop.f32.mrb[235].mxu0  ;;  %v6881_v4 = vpack.c.bf16 %v7508_v27, %v7507_v9  ;;  %v7513_v9 = vld [vmem:[#allocation4 + $0x1e8] sm:$0xff] }
 0x637   :  { %v6754_v43 = vpop.f32.mrb[236].mxu1 }
 0x638   :  { %v10400_v2 = vpop.f32.mrb[237].mxu1  ;;  %10511 = vmatmul.mubr.msk.bf16.gmra.mrb[84].mxu0 %vm119_vm3, %v6880_v51  ;;  %v7510_v51 = vld [vmem:[#allocation4 + $0x1d0] sm:$0xff] }
 0x639   :  { %v6756_v10 = vpop.f32.mrb[238].mxu1  ;;  %10514 = vmatprep.mubr.msk.bf16.mxu0 %vm10924_vm2, %v14448_v39 }
 0x63a   :  { %v10401_v55 = vpop.f32.mrb[239].mxu1  ;;  %v7567_v10 = vpack.c.bf16 %v7511_v13, %v7510_v51 }
 0x63b   :  { %v6264_v20 = vpop.f32.mrb[236].mxu0 }
 0x63c   :  { %10687 = vmatmul.mubr.msk.bf16.gmra.mrb[88].mxu1 %vm119_vm3, %v7566_v23  ;;  %v10228_v28 = vpop.f32.mrb[237].mxu0 }
 0x63d   :  { %10690 = vmatprep.mubr.msk.bf16.mxu1 %vm10924_vm2, %v14448_v39  ;;  %v6266_v38 = vpop.f32.mrb[238].mxu0 }
 0x63e   :  { %v10229_v3 = vpop.f32.mrb[239].mxu0  ;;  %v6882_v38 = vpack.c.bf16 %v7510_v51, %v7509_v17  ;;  %v7515_v17 = vld [vmem:[#allocation4 + $0x1f8] sm:$0xff] }
 0x63f   :  { %v6760_v19 = vpop.f32.mrb[240].mxu1 }
 0x640   :  { %v10404_v43 = vpop.f32.mrb[241].mxu1  ;;  %10515 = vmatmul.mubr.msk.bf16.gmra.mrb[88].mxu0 %vm119_vm3, %v6881_v4  ;;  %v7512_v4 = vld [vmem:[#allocation4 + $0x1e0] sm:$0xff] }
 0x641   :  { %v6762_v40 = vpop.f32.mrb[242].mxu1  ;;  %10518 = vmatprep.mubr.msk.bf16.mxu0 %vm10924_vm2, %v14448_v39 }
 0x642   :  { %v10405_v2 = vpop.f32.mrb[243].mxu1  ;;  %v7568_v40 = vpack.c.bf16 %v7513_v9, %v7512_v4 }
 0x643   :  { %v6270_v55 = vpop.f32.mrb[240].mxu0 }
 0x644   :  { %10691 = vmatmul.mubr.msk.bf16.gmra.mrb[92].mxu1 %vm119_vm3, %v7567_v10  ;;  %v10232_v23 = vpop.f32.mrb[241].mxu0 }
 0x645   :  { %10694 = vmatprep.mubr.msk.bf16.mxu1 %vm10924_vm2, %v14448_v39  ;;  %v6272_v20 = vpop.f32.mrb[242].mxu0 }
 0x646   :  { %v10233_v27 = vpop.f32.mrb[243].mxu0  ;;  %v6883_v20 = vpack.c.bf16 %v7512_v4, %v7511_v13  ;;  %v7517_v13 = vld [vmem:[#allocation4 + $0x208] sm:$0xff] }
 0x647   :  { %v6766_v28 = vpop.f32.mrb[244].mxu1 }
 0x648   :  { %v10408_v19 = vpop.f32.mrb[245].mxu1  ;;  %10519 = vmatmul.mubr.msk.bf16.gmra.mrb[92].mxu0 %vm119_vm3, %v6882_v38  ;;  %v7514_v38 = vld [vmem:[#allocation4 + $0x1f0] sm:$0xff] }
 0x649   :  { %v6768_v3 = vpop.f32.mrb[246].mxu1  ;;  %10522 = vmatprep.mubr.msk.bf16.mxu0 %vm10924_vm2, %v14448_v39 }
 0x64a   :  { %v10409_v43 = vpop.f32.mrb[247].mxu1  ;;  %v7569_v3 = vpack.c.bf16 %v7515_v17, %v7514_v38 }
 0x64b   :  { %v6276_v2 = vpop.f32.mrb[244].mxu0 }
 0x64c   :  { %10695 = vmatmul.mubr.msk.bf16.gmra.mrb[96].mxu1 %vm119_vm3, %v7568_v40  ;;  %v10236_v10 = vpop.f32.mrb[245].mxu0 }
 0x64d   :  { %10698 = vmatprep.mubr.msk.bf16.mxu1 %vm10924_vm2, %v14448_v39  ;;  %v6278_v55 = vpop.f32.mrb[246].mxu0 }
 0x64e   :  { %v10237_v51 = vpop.f32.mrb[247].mxu0  ;;  %v6884_v55 = vpack.c.bf16 %v7514_v38, %v7513_v9  ;;  %v13917_v9 = vld [vmem:[%s14439_s6] ss:$0 sm:$0xff] }
 0x64f   :  { %v6772_v23 = vpop.f32.mrb[248].mxu1 }
 0x650   :  { %v10412_v28 = vpop.f32.mrb[249].mxu1  ;;  %10523 = vmatmul.mubr.msk.bf16.gmra.mrb[96].mxu0 %vm119_vm3, %v6883_v20  ;;  %v7516_v20 = vld [vmem:[#allocation4 + $0x200] sm:$0xff] }
 0x651   :  { %v6774_v27 = vpop.f32.mrb[250].mxu1  ;;  %10526 = vmatprep.mubr.msk.bf16.mxu0 %vm10924_vm2, %v14448_v39 }
 0x652   :  { %v10413_v19 = vpop.f32.mrb[251].mxu1  ;;  %v7570_v27 = vpack.c.bf16 %v7517_v13, %v7516_v20 }
 0x653   :  { %v6282_v43 = vpop.f32.mrb[248].mxu0 }
 0x654   :  { %10699 = vmatmul.mubr.msk.bf16.gmra.mrb[100].mxu1 %vm119_vm3, %v7569_v3  ;;  %v10240_v40 = vpop.f32.mrb[249].mxu0 }
 0x655   :  { %10702 = vmatprep.mubr.msk.bf16.mxu1 %vm10924_vm2, %v14448_v39  ;;  %v6284_v2 = vpop.f32.mrb[250].mxu0 }
 0x656   :  { %v10241_v4 = vpop.f32.mrb[251].mxu0  ;;  %v13919_v2 = vld [vmem:[#allocation4 + $0x218] sm:$0xff] }
 0x657   :  { %v7774_v10 = vpop.f32.mrb[252].mxu1  ;;  %v7571_v8 = vpack.c.bf16 %v13919_v2, %v7518_v22 }
 0x658   :  { %v10596_v23 = vpop.f32.mrb[253].mxu1  ;;  %10527 = vmatmul.mubr.msk.bf16.gmra.mrb[100].mxu0 %vm119_vm3, %v6884_v55 }
 0x659   :  { %v7777_v51 = vpop.f32.mrb[254].mxu1  ;;  %10530 = vmatprep.mubr.msk.bf16.mxu0 %vm10924_vm2, %v14448_v39 }
 0x65a   :  { %v10597_v28 = vpop.f32.mrb[255].mxu1 }
 0x65b   :  { %v7089_v19 = vpop.f32.mrb[252].mxu0  ;;  %v6885_v28 = vpack.c.bf16 %v7516_v20, %v7515_v17 }
 0x65c   :  { %10703 = vmatmul.mubr.msk.bf16.gmra.mrb[104].mxu1 %vm119_vm3, %v7570_v27  ;;  %v7398_v3 = vadd.f32 %v7089_v19, %v13537_v34  ;;  %v10424_v43 = vpop.f32.mrb[253].mxu0 }
 0x65d   :  { %10706 = vmatprep.mubr.msk.bf16.mxu1 %vm10924_vm2, %v14448_v39  ;;  %v7092_v38 = vpop.f32.mrb[254].mxu0 }
 0x65e   :  { %v8083_v4 = vadd.f32 %v7774_v10, %v7398_v3  ;;  %v7399_v55 = vadd.f32 %v7092_v38, %v13539_v41  ;;  %v10425_v23 = vpop.f32.mrb[255].mxu0  ;;  %v13932_v38 = vld [vmem:[#allocation4 + $0x228] sm:$0xff] }
 0x65f   :  { %v7782_v40 = vpop.f32.mrb[0].mxu1 }
 0x660   :  { %v10600_v27 = vpop.f32.mrb[1].mxu1  ;;  %v8154_v34 = vadd.f32 %v13917_v9, %v8083_v4  ;;  %v8084_v19 = vadd.f32 %v7777_v51, %v7399_v55  ;;  %10531 = vmatmul.mubr.msk.bf16.gmra.mrb[104].mxu0 %vm119_vm3, %v6885_v28  ;;  %v6886_v28 = vpack.c.bf16 %v7518_v22, %v7517_v13 }
 0x661   :  { %v7785_v63 = vpop.f32.mrb[2].mxu1  ;;  %10534 = vmatprep.mubr.msk.bf16.mxu0 %vm10924_vm2, %v14448_v39 }
 0x662   :  { %v10601_v43 = vpop.f32.mrb[3].mxu1  ;;  %10789 = vtanh.f32 %v8154_v34  ;;  %v8155_v10 = vadd.f32 %v13917_v9, %v8084_v19 }
 0x663   :  { %v7097_v41 = vpop.f32.mrb[0].mxu0 }
 0x664   :  { %10707 = vmatmul.mubr.msk.bf16.gmra.mrb[108].mxu1 %vm119_vm3, %v7571_v8  ;;  %10791 = vtanh.f32 %v8155_v10  ;;  %v7400_v17 = vadd.f32 %v7097_v41, %v13547_v18  ;;  %v10428_v51 = vpop.f32.mrb[1].mxu0  ;;  %v7520_v8 = vld [vmem:[#allocation4 + $0x220] sm:$0xff] }
 0x665   :  { %10710 = vmatprep.mubr.msk.bf16.mxu1 %vm10924_vm2, %v14448_v39  ;;  %v7100_v20 = vpop.f32.mrb[2].mxu0  ;;  %v7572_v18 = vpack.c.bf16 %v13932_v38, %v7520_v8  ;;  %v7522_v51 = vld [vmem:[#allocation4 + $0x230] sm:$0xff] }
 0x666   :  { %v8085_v4 = vadd.f32 %v7782_v40, %v7400_v17  ;;  %v7401_v55 = vadd.f32 %v7100_v20, %v13549_v24  ;;  %v10429_v23 = vpop.f32.mrb[3].mxu0  ;;  %v13949_v20 = vld [vmem:[#allocation4 + $0x238] sm:$0xff] }
 0x667   :  { %v7790_v3 = vpop.f32.mrb[4].mxu1 }
 0x668   :  { %v10604_v27 = vpop.f32.mrb[5].mxu1  ;;  %v8156_v19 = vadd.f32 %v13917_v9, %v8085_v4  ;;  %v8086_v43 = vadd.f32 %v7785_v63, %v7401_v55  ;;  %10535 = vmatmul.mubr.msk.bf16.gmra.mrb[108].mxu0 %vm119_vm3, %v6886_v28 }
 0x669   :  { %v7793_v34 = vpop.f32.mrb[6].mxu1  ;;  %10538 = vmatprep.mubr.msk.bf16.mxu0 %vm10924_vm2, %v14448_v39  ;;  %v6887_v27 = vpack.c.bf16 %v7520_v8, %v13919_v2  ;;  %v7524_v8 = vld [vmem:[#allocation4 + $0x240] sm:$0xff] }
 0x66a   :  { %v10605_v10 = vpop.f32.mrb[7].mxu1  ;;  %10793 = vtanh.f32 %v8156_v19  ;;  %v8157_v24 = vadd.f32 %v13917_v9, %v8086_v43 }
 0x66b   :  { %v7105_v22 = vpop.f32.mrb[4].mxu0 }
 0x66c   :  { %10711 = vmatmul.mubr.msk.bf16.gmra.mrb[112].mxu1 %vm119_vm3, %v7572_v18  ;;  %v10790_v13 = vpop.eup %10789  ;;  %10795 = vtanh.f32 %v8157_v24  ;;  %v7402_v63 = vadd.f32 %v7105_v22, %v13557_v60  ;;  %v10432_v40 = vpop.f32.mrb[5].mxu0  ;;  %v13966_v24 = vld [vmem:[#allocation4 + $0x248] sm:$0xff] }
 0x66d   :  { %10714 = vmatprep.mubr.msk.bf16.mxu1 %vm10924_vm2, %v14448_v39  ;;  %8283 = vst.msk [vmem:[%s14440_s7] sm:$0xff] %vm8282_vm4, %v10790_v13  ;;  %v7108_v41 = vpop.f32.mrb[6].mxu0 }
 0x66e   :  { %v10792_v4 = vpop.eup %10791  ;;  %v8087_v55 = vadd.f32 %v7790_v3, %v7402_v63  ;;  %v7403_v23 = vadd.f32 %v7108_v41, %v13559_v29  ;;  %v10433_v28 = vpop.f32.mrb[7].mxu0  ;;  %v7573_v3 = vpack.c.bf16 %v13949_v20, %v7522_v51 }
 0x66f   :  { %v7798_v17 = vpop.f32.mrb[8].mxu1  ;;  %8284 = vst.msk [vmem:[%s14440_s7 + $0x8] sm:$0xff] %vm8282_vm4, %v10792_v4  ;;  %v6888_v28 = vpack.c.bf16 %v7522_v51, %v13932_v38  ;;  %v7526_v51 = vld [vmem:[#allocation4 + $0x250] sm:$0xff] }
 0x670   :  { %v10608_v19 = vpop.f32.mrb[9].mxu1  ;;  %v8158_v43 = vadd.f32 %v13917_v9, %v8087_v55  ;;  %v8088_v10 = vadd.f32 %v7793_v34, %v7403_v23  ;;  %10539 = vmatmul.mubr.msk.bf16.gmra.mrb[112].mxu0 %vm119_vm3, %v6887_v27 }
 0x671   :  { %v7801_v60 = vpop.f32.mrb[10].mxu1  ;;  %10542 = vmatprep.mubr.msk.bf16.mxu0 %vm10924_vm2, %v14448_v39  ;;  %v7574_v19 = vpack.c.bf16 %v13966_v24, %v7524_v8 }
 0x672   :  { %v10609_v18 = vpop.f32.mrb[11].mxu1  ;;  %10797 = vtanh.f32 %v8158_v43  ;;  %v8159_v29 = vadd.f32 %v13917_v9, %v8088_v10 }
 0x673   :  { %v7113_v2 = vpop.f32.mrb[8].mxu0  ;;  %v13988_v18 = vld [vmem:[#allocation4 + $0x258] sm:$0xff] }
 0x674   :  { %10715 = vmatmul.mubr.msk.bf16.gmra.mrb[116].mxu1 %vm119_vm3, %v7573_v3  ;;  %v10794_v34 = vpop.eup %10793  ;;  %10799 = vtanh.f32 %v8159_v29  ;;  %v7404_v22 = vadd.f32 %v7113_v2, %v13567_v7  ;;  %v10436_v13 = vpop.f32.mrb[9].mxu0  ;;  %v6889_v29 = vpack.c.bf16 %v7524_v8, %v13949_v20 }
 0x675   :  { %10718 = vmatprep.mubr.msk.bf16.mxu1 %vm10924_vm2, %v14448_v39  ;;  %8285 = vst.msk [vmem:[%s14440_s7 + $0x10] sm:$0xff] %vm8282_vm4, %v10794_v34  ;;  %v7116_v63 = vpop.f32.mrb[10].mxu0 }
 0x676   :  { %v10796_v41 = vpop.eup %10795  ;;  %v8089_v4 = vadd.f32 %v7798_v17, %v7404_v22  ;;  %v7405_v55 = vadd.f32 %v7116_v63, %v13569_v31  ;;  %v10437_v23 = vpop.f32.mrb[11].mxu0 }
 0x677   :  { %v7806_v40 = vpop.f32.mrb[12].mxu1  ;;  %8286 = vst.msk [vmem:[%s14440_s7 + $0x18] sm:$0xff] %vm8282_vm4, %v10796_v41  ;;  %v7575_v41 = vpack.c.bf16 %v13988_v18, %v7526_v51  ;;  %v7528_v23 = vld [vmem:[#allocation4 + $0x260] sm:$0xff] }
 0x678   :  { %v10612_v27 = vpop.f32.mrb[13].mxu1  ;;  %v8160_v43 = vadd.f32 %v13917_v9, %v8089_v4  ;;  %v8090_v10 = vadd.f32 %v7801_v60, %v7405_v55  ;;  %10543 = vmatmul.mubr.msk.bf16.gmra.mrb[116].mxu0 %vm119_vm3, %v6888_v28  ;;  %v14008_v28 = vld [vmem:[#allocation4 + $0x268] sm:$0xff] }
 0x679   :  { %v7808_v7 = vpop.f32.mrb[14].mxu1  ;;  %10546 = vmatprep.mubr.msk.bf16.mxu0 %vm10924_vm2, %v14448_v39 }
 0x67a   :  { %v10613_v17 = vpop.f32.mrb[15].mxu1  ;;  %10801 = vtanh.f32 %v8160_v43  ;;  %v8161_v31 = vadd.f32 %v13917_v9, %v8090_v10  ;;  %v6890_v43 = vpack.c.bf16 %v7526_v51, %v13966_v24 }
 0x67b   :  { %v7121_v38 = vpop.f32.mrb[12].mxu0 }
 0x67c   :  { %10719 = vmatmul.mubr.msk.bf16.gmra.mrb[120].mxu1 %vm119_vm3, %v7574_v19  ;;  %v10798_v3 = vpop.eup %10797  ;;  %10803 = vtanh.f32 %v8161_v31  ;;  %v10440_v60 = vpop.f32.mrb[13].mxu0 }
 0x67d   :  { %10722 = vmatprep.mubr.msk.bf16.mxu1 %vm10924_vm2, %v14448_v39  ;;  %8287 = vst.msk [vmem:[%s14440_s7 + $0x20] sm:$0xff] %vm8282_vm4, %v10798_v3  ;;  %v7123_v2 = vpop.f32.mrb[14].mxu0 }
 0x67e   :  { %v10800_v22 = vpop.eup %10799  ;;  %v7406_v13 = vadd.f32 %v7123_v2, %v13577_v45  ;;  %v10441_v63 = vpop.f32.mrb[15].mxu0  ;;  %v7576_v2 = vpack.c.bf16 %v14008_v28, %v7528_v23 }
 0x67f   :  { %v7813_v34 = vpop.f32.mrb[16].mxu1  ;;  %8288 = vst.msk [vmem:[%s14440_s7 + $0x28] sm:$0xff] %vm8282_vm4, %v10800_v22  ;;  %v14030_v63 = vld [vmem:[#allocation4 + $0x278] sm:$0xff] }
 0x680   :  { %v10616_v40 = vpop.f32.mrb[17].mxu1  ;;  %v8091_v8 = vadd.f32 %v7808_v7, %v7406_v13  ;;  %10547 = vmatmul.mubr.msk.bf16.gmra.mrb[120].mxu0 %vm119_vm3, %v6889_v29  ;;  %v7530_v13 = vld [vmem:[#allocation4 + $0x270] sm:$0xff] }
 0x681   :  { %v7816_v20 = vpop.f32.mrb[18].mxu1  ;;  %10550 = vmatprep.mubr.msk.bf16.mxu0 %vm10924_vm2, %v14448_v39 }
 0x682   :  { %v10617_v4 = vpop.f32.mrb[19].mxu1  ;;  %v8162_v55 = vadd.f32 %v13917_v9, %v8091_v8 }
 0x683   :  { %v7128_v45 = vpop.f32.mrb[16].mxu0 }
 0x684   :  { %10723 = vmatmul.mubr.msk.bf16.gmra.mrb[124].mxu1 %vm119_vm3, %v7575_v41  ;;  %v10802_v27 = vpop.eup %10801  ;;  %10805 = vtanh.f32 %v8162_v55  ;;  %v7407_v19 = vadd.f32 %v7128_v45, %v13585_v57  ;;  %v10444_v7 = vpop.f32.mrb[17].mxu0 }
 0x685   :  { %10726 = vmatprep.mubr.msk.bf16.mxu1 %vm10924_vm2, %v14448_v39  ;;  %8289 = vst.msk [vmem:[%s14440_s7 + $0x30] sm:$0xff] %vm8282_vm4, %v10802_v27  ;;  %v7131_v10 = vpop.f32.mrb[18].mxu0 }
 0x686   :  { %v10804_v31 = vpop.eup %10803  ;;  %v8092_v38 = vadd.f32 %v7813_v34, %v7407_v19  ;;  %v7408_v3 = vadd.f32 %v7131_v10, %v13587_v61  ;;  %v10445_v60 = vpop.f32.mrb[19].mxu0 }
 0x687   :  { %v7821_v17 = vpop.f32.mrb[20].mxu1  ;;  %8290 = vst.msk [vmem:[%s14440_s7 + $0x38] sm:$0xff] %vm8282_vm4, %v10804_v31 }
 0x688   :  { %v10620_v29 = vpop.f32.mrb[21].mxu1  ;;  %v8163_v24 = vadd.f32 %v13917_v9, %v8092_v38  ;;  %v8093_v51 = vadd.f32 %v7816_v20, %v7408_v3  ;;  %10551 = vmatmul.mubr.msk.bf16.gmra.mrb[124].mxu0 %vm119_vm3, %v6890_v43  ;;  %v6891_v20 = vpack.c.bf16 %v7528_v23, %v13988_v18  ;;  %v7577_v43 = vpack.c.bf16 %v14030_v63, %v7530_v13  ;;  %v14048_v38 = vld [vmem:[#allocation4 + $0x288] sm:$0xff] }
 0x689   :  { %v7824_v57 = vpop.f32.mrb[22].mxu1  ;;  %10554 = vmatprep.mubr.msk.bf16.mxu0 %vm10924_vm2, %v14448_v39 }
 0x68a   :  { %v10621_v22 = vpop.f32.mrb[23].mxu1  ;;  %10807 = vtanh.f32 %v8163_v24  ;;  %v8164_v61 = vadd.f32 %v13917_v9, %v8093_v51 }
 0x68b   :  { %v7136_v34 = vpop.f32.mrb[20].mxu0 }
 0x68c   :  { %10727 = vmatmul.mubr.msk.bf16.gmra.mrb[128].mxu1 %vm119_vm3, %v7576_v2  ;;  %10809 = vtanh.f32 %v8164_v61  ;;  %v7409_v40 = vadd.f32 %v7136_v34, %v13595_v49  ;;  %v10448_v41 = vpop.f32.mrb[21].mxu0  ;;  %v6892_v2 = vpack.c.bf16 %v7530_v13, %v14008_v28 }
 0x68d   :  { %10730 = vmatprep.mubr.msk.bf16.mxu1 %vm10924_vm2, %v14448_v39  ;;  %v7139_v8 = vpop.f32.mrb[22].mxu0 }
 0x68e   :  { %v10806_v55 = vpop.eup %10805  ;;  %v8094_v45 = vadd.f32 %v7821_v17, %v7409_v40  ;;  %v7410_v27 = vadd.f32 %v7139_v8, %v13597_v11  ;;  %v10449_v19 = vpop.f32.mrb[23].mxu0  ;;  %v7532_v17 = vld [vmem:[#allocation4 + $0x280] sm:$0xff] }
 0x68f   :  { %v7829_v4 = vpop.f32.mrb[24].mxu1  ;;  %8291 = vst.msk [vmem:[%s14440_s7 + $0x40] sm:$0xff] %vm8282_vm4, %v10806_v55  ;;  %v7578_v41 = vpack.c.bf16 %v14048_v38, %v7532_v17  ;;  %v14070_v55 = vld [vmem:[#allocation4 + $0x298] sm:$0xff] }
 0x690   :  { %v10624_v7 = vpop.f32.mrb[25].mxu1  ;;  %v8165_v49 = vadd.f32 %v13917_v9, %v8094_v45  ;;  %v8095_v31 = vadd.f32 %v7824_v57, %v7410_v27  ;;  %10555 = vmatmul.mubr.msk.bf16.gmra.mrb[128].mxu0 %vm119_vm3, %v6891_v20 }
 0x691   :  { %v7832_v10 = vpop.f32.mrb[26].mxu1  ;;  %10558 = vmatprep.mubr.msk.bf16.mxu0 %vm10924_vm2, %v14448_v39  ;;  %v6893_v7 = vpack.c.bf16 %v7532_v17, %v14030_v63 }
 0x692   :  { %v10625_v18 = vpop.f32.mrb[27].mxu1  ;;  %10811 = vtanh.f32 %v8165_v49  ;;  %v8166_v11 = vadd.f32 %v13917_v9, %v8095_v31 }
 0x693   :  { %v7144_v23 = vpop.f32.mrb[24].mxu0 }
 0x694   :  { %10731 = vmatmul.mubr.msk.bf16.gmra.mrb[132].mxu1 %vm119_vm3, %v7577_v43  ;;  %v10808_v3 = vpop.eup %10807  ;;  %10813 = vtanh.f32 %v8166_v11  ;;  %v7411_v60 = vadd.f32 %v7144_v23, %v13605_v50  ;;  %v10452_v29 = vpop.f32.mrb[25].mxu0 }
 0x695   :  { %10734 = vmatprep.mubr.msk.bf16.mxu1 %vm10924_vm2, %v14448_v39  ;;  %8292 = vst.msk [vmem:[%s14440_s7 + $0x48] sm:$0xff] %vm8282_vm4, %v10808_v3  ;;  %v7147_v57 = vpop.f32.mrb[26].mxu0  ;;  %v14090_v29 = vld [vmem:[#allocation4 + $0x2a8] sm:$0xff] }
 0x696   :  { %v10810_v51 = vpop.eup %10809  ;;  %v8096_v22 = vadd.f32 %v7829_v4, %v7411_v60  ;;  %v7412_v61 = vadd.f32 %v7147_v57, %v13607_v15  ;;  %v10453_v34 = vpop.f32.mrb[27].mxu0  ;;  %v7534_v4 = vld [vmem:[#allocation4 + $0x290] sm:$0xff]  ;;  %v7536_v60 = vld [vmem:[#allocation4 + $0x2a0] sm:$0xff] }
 0x697   :  { %v7837_v24 = vpop.f32.mrb[28].mxu1  ;;  %8293 = vst.msk [vmem:[%s14440_s7 + $0x50] sm:$0xff] %vm8282_vm4, %v10810_v51  ;;  %v7579_v23 = vpack.c.bf16 %v14070_v55, %v7534_v4  ;;  %v6894_v51 = vpack.c.bf16 %v7534_v4, %v14048_v38  ;;  %v7538_v4 = vld [vmem:[#allocation4 + $0x2b0] sm:$0xff] }
 0x698   :  { %v10628_v40 = vpop.f32.mrb[29].mxu1  ;;  %v8167_v28 = vadd.f32 %v13917_v9, %v8096_v22  ;;  %v8097_v13 = vadd.f32 %v7832_v10, %v7412_v61  ;;  %10559 = vmatmul.mubr.msk.bf16.gmra.mrb[132].mxu0 %vm119_vm3, %v6892_v2 }
 0x699   :  { %v7840_v50 = vpop.f32.mrb[30].mxu1  ;;  %10562 = vmatprep.mubr.msk.bf16.mxu0 %vm10924_vm2, %v14448_v39 }
 0x69a   :  { %v10629_v20 = vpop.f32.mrb[31].mxu1  ;;  %10815 = vtanh.f32 %v8167_v28  ;;  %v8168_v15 = vadd.f32 %v13917_v9, %v8097_v13  ;;  %v7580_v13 = vpack.c.bf16 %v14090_v29, %v7536_v60 }
 0x69b   :  { %v7152_v8 = vpop.f32.mrb[28].mxu0 }
 0x69c   :  { %10735 = vmatmul.mubr.msk.bf16.gmra.mrb[136].mxu1 %vm119_vm3, %v7578_v41  ;;  %v10812_v45 = vpop.eup %10811  ;;  %10817 = vtanh.f32 %v8168_v15  ;;  %v7413_v27 = vadd.f32 %v7152_v8, %v13615_v32  ;;  %v10456_v19 = vpop.f32.mrb[29].mxu0 }
 0x69d   :  { %10738 = vmatprep.mubr.msk.bf16.mxu1 %vm10924_vm2, %v14448_v39  ;;  %8294 = vst.msk [vmem:[%s14440_s7 + $0x58] sm:$0xff] %vm8282_vm4, %v10812_v45  ;;  %v7155_v43 = vpop.f32.mrb[30].mxu0  ;;  %v14112_v45 = vld [vmem:[#allocation4 + $0x2b8] sm:$0xff] }
 0x69e   :  { %v10814_v49 = vpop.eup %10813  ;;  %v8098_v31 = vadd.f32 %v7837_v24, %v7413_v27  ;;  %v10457_v18 = vpop.f32.mrb[31].mxu0  ;;  %v6895_v43 = vpack.c.bf16 %v7536_v60, %v14070_v55  ;;  %v7540_v60 = vld [vmem:[#allocation4 + $0x2c0] sm:$0xff] }
 0x69f   :  { %v7844_v10 = vpop.f32.mrb[32].mxu1  ;;  %8295 = vst.msk [vmem:[%s14440_s7 + $0x60] sm:$0xff] %vm8282_vm4, %v10814_v49 }
 0x6a0   :  { %v10632_v11 = vpop.f32.mrb[33].mxu1  ;;  %v8169_v63 = vadd.f32 %v13917_v9, %v8098_v31  ;;  %10563 = vmatmul.mubr.msk.bf16.gmra.mrb[136].mxu0 %vm119_vm3, %v6893_v7 }
 0x6a1   :  { %v7847_v32 = vpop.f32.mrb[34].mxu1  ;;  %10566 = vmatprep.mubr.msk.bf16.mxu0 %vm10924_vm2, %v14448_v39 }
 0x6a2   :  { %v10633_v17 = vpop.f32.mrb[35].mxu1  ;;  %10819 = vtanh.f32 %v8169_v63 }
 0x6a3   :  { %v7159_v3 = vpop.f32.mrb[32].mxu0 }
 0x6a4   :  { %10739 = vmatmul.mubr.msk.bf16.gmra.mrb[140].mxu1 %vm119_vm3, %v7579_v23  ;;  %v10816_v2 = vpop.eup %10815  ;;  %v7414_v57 = vadd.f32 %v7159_v3, %v13623_v59  ;;  %v10460_v24 = vpop.f32.mrb[33].mxu0 }
 0x6a5   :  { %10742 = vmatprep.mubr.msk.bf16.mxu1 %vm10924_vm2, %v14448_v39  ;;  %8296 = vst.msk [vmem:[%s14440_s7 + $0x68] sm:$0xff] %vm8282_vm4, %v10816_v2  ;;  %v7162_v22 = vpop.f32.mrb[34].mxu0  ;;  %v14130_v2 = vld [vmem:[#allocation4 + $0x2c8] sm:$0xff] }
 0x6a6   :  { %v10818_v34 = vpop.eup %10817  ;;  %v8099_v40 = vadd.f32 %v7844_v10, %v7414_v57  ;;  %v7415_v41 = vadd.f32 %v7162_v22, %v13625_v46  ;;  %v10461_v50 = vpop.f32.mrb[35].mxu0  ;;  %v6896_v22 = vpack.c.bf16 %v7538_v4, %v14090_v29 }
 0x6a7   :  { %v7852_v61 = vpop.f32.mrb[36].mxu1  ;;  %8297 = vst.msk [vmem:[%s14440_s7 + $0x70] sm:$0xff] %vm8282_vm4, %v10818_v34 }
 0x6a8   :  { %v10636_v28 = vpop.f32.mrb[37].mxu1  ;;  %v8170_v38 = vadd.f32 %v13917_v9, %v8099_v40  ;;  %v8100_v20 = vadd.f32 %v7847_v32, %v7415_v41  ;;  %10567 = vmatmul.mubr.msk.bf16.gmra.mrb[140].mxu0 %vm119_vm3, %v6894_v51  ;;  %v7581_v32 = vpack.c.bf16 %v14112_v45, %v7538_v4 }
 0x6a9   :  { %v7855_v59 = vpop.f32.mrb[38].mxu1  ;;  %10570 = vmatprep.mubr.msk.bf16.mxu0 %vm10924_vm2, %v14448_v39 }
 0x6aa   :  { %v10637_v15 = vpop.f32.mrb[39].mxu1  ;;  %10821 = vtanh.f32 %v8170_v38  ;;  %v8171_v46 = vadd.f32 %v13917_v9, %v8100_v20 }
 0x6ab   :  { %v7167_v8 = vpop.f32.mrb[36].mxu0 }
 0x6ac   :  { %10743 = vmatmul.mubr.msk.bf16.gmra.mrb[144].mxu1 %vm119_vm3, %v7580_v13  ;;  %v10820_v27 = vpop.eup %10819  ;;  %10823 = vtanh.f32 %v8171_v46  ;;  %v7416_v19 = vadd.f32 %v7167_v8, %v13633_v25  ;;  %v10464_v7 = vpop.f32.mrb[37].mxu0  ;;  %v7542_v46 = vld [vmem:[#allocation4 + $0x2d0] sm:$0xff] }
 0x6ad   :  { %10746 = vmatprep.mubr.msk.bf16.mxu1 %vm10924_vm2, %v14448_v39  ;;  %8298 = vst.msk [vmem:[%s14440_s7 + $0x78] sm:$0xff] %vm8282_vm4, %v10820_v27  ;;  %v7170_v10 = vpop.f32.mrb[38].mxu0 }
 0x6ae   :  { %v8101_v31 = vadd.f32 %v7852_v61, %v7416_v19  ;;  %v7417_v18 = vadd.f32 %v7170_v10, %v13635_v33  ;;  %v10465_v11 = vpop.f32.mrb[39].mxu0  ;;  %v6897_v19 = vpack.c.bf16 %v7540_v60, %v14112_v45 }
 0x6af   :  { %v7860_v49 = vpop.f32.mrb[40].mxu1 }
 0x6b0   :  { %v10640_v23 = vpop.f32.mrb[41].mxu1  ;;  %v8172_v25 = vadd.f32 %v13917_v9, %v8101_v31  ;;  %v8102_v17 = vadd.f32 %v7855_v59, %v7417_v18  ;;  %10571 = vmatmul.mubr.msk.bf16.gmra.mrb[144].mxu0 %vm119_vm3, %v6895_v43  ;;  %v7582_v59 = vpack.c.bf16 %v14130_v2, %v7540_v60 }
 0x6b1   :  { %v7863_v63 = vpop.f32.mrb[42].mxu1  ;;  %10574 = vmatprep.mubr.msk.bf16.mxu0 %vm10924_vm2, %v14448_v39  ;;  %v7583_v23 = vpack.c.bf16 %v7542_v46, %v7542_v46 }
 0x6b2   :  { %v10641_v55 = vpop.f32.mrb[43].mxu1  ;;  %10825 = vtanh.f32 %v8172_v25  ;;  %v8173_v3 = vadd.f32 %v13917_v9, %v8102_v17 }
 0x6b3   :  { %v7175_v33 = vpop.f32.mrb[40].mxu0 }
 0x6b4   :  { %10747 = vmatmul.mubr.msk.bf16.gmra.mrb[148].mxu1 %vm119_vm3, %v7581_v32  ;;  %v10822_v57 = vpop.eup %10821  ;;  %10827 = vtanh.f32 %v8173_v3  ;;  %v7418_v24 = vadd.f32 %v7175_v33, %v13643_v56  ;;  %v10468_v51 = vpop.f32.mrb[41].mxu0  ;;  %v6898_v3 = vpack.c.bf16 %v14130_v2, %v14130_v2 }
 0x6b5   :  { %10750 = vmatprep.mubr.msk.bf16.mxu1 %vm10924_vm2, %v14448_v39  ;;  %8299 = vst.msk [vmem:[%s14440_s7 + $0x80] sm:$0xff] %vm8282_vm4, %v10822_v57  ;;  %v7178_v61 = vpop.f32.mrb[42].mxu0 }
 0x6b6   :  { %v10824_v40 = vpop.eup %10823  ;;  %v8103_v41 = vadd.f32 %v7860_v49, %v7418_v24  ;;  %v7419_v50 = vadd.f32 %v7178_v61, %v13645_v35  ;;  %v10469_v28 = vpop.f32.mrb[43].mxu0 }
 0x6b7   :  { %v7868_v34 = vpop.f32.mrb[44].mxu1  ;;  %8300 = vst.msk [vmem:[%s14440_s7 + $0x88] sm:$0xff] %vm8282_vm4, %v10824_v40 }
 0x6b8   :  { %v10644_v13 = vpop.f32.mrb[45].mxu1  ;;  %v8174_v29 = vadd.f32 %v13917_v9, %v8103_v41  ;;  %v8104_v38 = vadd.f32 %v7863_v63, %v7419_v50  ;;  %10575 = vmatmul.mubr.msk.bf16.gmra.mrb[148].mxu0 %vm119_vm3, %v6896_v22 }
 0x6b9   :  { %v7871_v56 = vpop.f32.mrb[46].mxu1  ;;  %10578 = vmatprep.mubr.msk.bf16.mxu0 %vm10924_vm2, %v14448_v39 }
 0x6ba   :  { %v10645_v20 = vpop.f32.mrb[47].mxu1  ;;  %10829 = vtanh.f32 %v8174_v29  ;;  %v8175_v35 = vadd.f32 %v13917_v9, %v8104_v38 }
 0x6bb   :  { %v7183_v15 = vpop.f32.mrb[44].mxu0 }
 0x6bc   :  { %10751 = vmatmul.mubr.msk.bf16.gmra.mrb[152].mxu1 %vm119_vm3, %v7582_v59  ;;  %v10826_v8 = vpop.eup %10825  ;;  %10831 = vtanh.f32 %v8175_v35  ;;  %v7420_v4 = vadd.f32 %v7183_v15, %v13653_v12  ;;  %v10472_v27 = vpop.f32.mrb[45].mxu0 }
 0x6bd   :  { %10754 = vmatprep.mubr.msk.bf16.mxu1 %vm10924_vm2, %v14448_v39  ;;  %8301 = vst.msk [vmem:[%s14440_s7 + $0x90] sm:$0xff] %vm8282_vm4, %v10826_v8  ;;  %v7186_v7 = vpop.f32.mrb[46].mxu0 }
 0x6be   :  { %v10828_v10 = vpop.eup %10827  ;;  %v8105_v49 = vadd.f32 %v7868_v34, %v7420_v4  ;;  %v7421_v31 = vadd.f32 %v7186_v7, %v13655_v5  ;;  %v10473_v18 = vpop.f32.mrb[47].mxu0 }
 0x6bf   :  { %v7876_v43 = vpop.f32.mrb[48].mxu1  ;;  %8302 = vst.msk [vmem:[%s14440_s7 + $0x98] sm:$0xff] %vm8282_vm4, %v10828_v10 }
 0x6c0   :  { %v10648_v11 = vpop.f32.mrb[49].mxu1  ;;  %v8176_v45 = vadd.f32 %v13917_v9, %v8105_v49  ;;  %v8106_v32 = vadd.f32 %v7871_v56, %v7421_v31  ;;  %10579 = vmatmul.mubr.msk.bf16.gmra.mrb[152].mxu0 %vm119_vm3, %v6897_v19 }
 0x6c1   :  { %v7878_v12 = vpop.f32.mrb[50].mxu1  ;;  %10582 = vmatprep.mubr.msk.bf16.mxu0 %vm10924_vm2, %v14448_v39 }
 0x6c2   :  { %v10649_v63 = vpop.f32.mrb[51].mxu1  ;;  %10833 = vtanh.f32 %v8176_v45  ;;  %v8177_v5 = vadd.f32 %v13917_v9, %v8106_v32 }
 0x6c3   :  { %v7191_v25 = vpop.f32.mrb[48].mxu0 }
 0x6c4   :  { %10755 = vmatmul.mubr.msk.bf16.gmra.mrb[156].mxu1 %vm119_vm3, %v7583_v23  ;;  %v10830_v17 = vpop.eup %10829  ;;  %10835 = vtanh.f32 %v8177_v5  ;;  %v10476_v55 = vpop.f32.mrb[49].mxu0 }
 0x6c5   :  { %8303 = vst.msk [vmem:[%s14440_s7 + $0xa0] sm:$0xff] %vm8282_vm4, %v10830_v17  ;;  %v7193_v33 = vpop.f32.mrb[50].mxu0 }
 0x6c6   :  { %v10832_v39 = vpop.eup %10831  ;;  %v7422_v57 = vadd.f32 %v7193_v33, %v13663_v26  ;;  %v10477_v24 = vpop.f32.mrb[51].mxu0 }
 0x6c7   :  { %v7883_v60 = vpop.f32.mrb[52].mxu1  ;;  %8304 = vst.msk [vmem:[%s14440_s7 + $0xa8] sm:$0xff] %vm8282_vm4, %v10832_v39 }
 0x6c8   :  { %v10652_v51 = vpop.f32.mrb[53].mxu1  ;;  %v8107_v61 = vadd.f32 %v7878_v12, %v7422_v57  ;;  %10583 = vmatmul.mubr.msk.bf16.gmra.mrb[156].mxu0 %vm119_vm3, %v6898_v3 }
 0x6c9   :  { %v7886_v22 = vpop.f32.mrb[54].mxu1 }
 0x6ca   :  { %v10653_v2 = vpop.f32.mrb[55].mxu1  ;;  %v8178_v34 = vadd.f32 %v13917_v9, %v8107_v61 }
 0x6cb   :  { %v7198_v40 = vpop.f32.mrb[52].mxu0 }
 0x6cc   :  { %v10834_v41 = vpop.eup %10833  ;;  %10837 = vtanh.f32 %v8178_v34  ;;  %v7423_v50 = vadd.f32 %v7198_v40, %v13672_v58  ;;  %v10480_v26 = vpop.f32.mrb[53].mxu0 }
 0x6cd   :  { %8305 = vst.msk [vmem:[%s14440_s7 + $0xb0] sm:$0xff] %vm8282_vm4, %v10834_v41  ;;  %v7201_v28 = vpop.f32.mrb[54].mxu0 }
 0x6ce   :  { %v10836_v59 = vpop.eup %10835  ;;  %v8108_v56 = vadd.f32 %v7883_v60, %v7423_v50  ;;  %v7424_v29 = vadd.f32 %v7201_v28, %v13674_v53  ;;  %v10481_v38 = vpop.f32.mrb[55].mxu0 }
 0x6cf   :  { %v7891_v13 = vpop.f32.mrb[56].mxu1  ;;  %8306 = vst.msk [vmem:[%s14440_s7 + $0xb8] sm:$0xff] %vm8282_vm4, %v10836_v59 }
 0x6d0   :  { %v10656_v20 = vpop.f32.mrb[57].mxu1  ;;  %v8179_v35 = vadd.f32 %v13917_v9, %v8108_v56  ;;  %v8109_v15 = vadd.f32 %v7886_v22, %v7424_v29 }
 0x6d1   :  { %v7894_v58 = vpop.f32.mrb[58].mxu1 }
 0x6d2   :  { %v10657_v46 = vpop.f32.mrb[59].mxu1  ;;  %10839 = vtanh.f32 %v8179_v35  ;;  %v8180_v8 = vadd.f32 %v13917_v9, %v8109_v15 }
 0x6d3   :  { %v7206_v4 = vpop.f32.mrb[56].mxu0 }
 0x6d4   :  { %10841 = vtanh.f32 %v8180_v8  ;;  %v7425_v27 = vadd.f32 %v7206_v4, %v13683_v62  ;;  %v10484_v53 = vpop.f32.mrb[57].mxu0 }
 0x6d5   :  { %v7209_v19 = vpop.f32.mrb[58].mxu0 }
 0x6d6   :  { %v10838_v43 = vpop.eup %10837  ;;  %v8110_v10 = vadd.f32 %v7891_v13, %v7425_v27  ;;  %v7426_v49 = vadd.f32 %v7209_v19, %v13685_v30  ;;  %v10485_v31 = vpop.f32.mrb[59].mxu0 }
 0x6d7   :  { %v7899_v7 = vpop.f32.mrb[60].mxu1  ;;  %8307 = vst.msk [vmem:[%s14440_s7 + $0xc0] sm:$0xff] %vm8282_vm4, %v10838_v43 }
 0x6d8   :  { %v10660_v18 = vpop.f32.mrb[61].mxu1  ;;  %v8181_v23 = vadd.f32 %v13917_v9, %v8110_v10  ;;  %v8111_v12 = vadd.f32 %v7894_v58, %v7426_v49 }
 0x6d9   :  { %v7902_v11 = vpop.f32.mrb[62].mxu1 }
 0x6da   :  { %v10661_v45 = vpop.f32.mrb[63].mxu1  ;;  %10843 = vtanh.f32 %v8181_v23  ;;  %v8182_v62 = vadd.f32 %v13917_v9, %v8111_v12 }
 0x6db   :  { %v7214_v32 = vpop.f32.mrb[60].mxu0 }
 0x6dc   :  { %v10840_v63 = vpop.eup %10839  ;;  %10845 = vtanh.f32 %v8182_v62  ;;  %v7427_v30 = vadd.f32 %v7214_v32, %v13693_v37  ;;  %v10488_v5 = vpop.f32.mrb[61].mxu0 }
 0x6dd   :  { %8308 = vst.msk [vmem:[%s14440_s7 + $0xc8] sm:$0xff] %vm8282_vm4, %v10840_v63  ;;  %v7217_v25 = vpop.f32.mrb[62].mxu0 }
 0x6de   :  { %v10842_v55 = vpop.eup %10841  ;;  %v8112_v3 = vadd.f32 %v7899_v7, %v7427_v30  ;;  %v7428_v33 = vadd.f32 %v7217_v25, %v13695_v1  ;;  %v10489_v60 = vpop.f32.mrb[63].mxu0 }
 0x6df   :  { %v7907_v17 = vpop.f32.mrb[64].mxu1  ;;  %8309 = vst.msk [vmem:[%s14440_s7 + $0xd0] sm:$0xff] %vm8282_vm4, %v10842_v55 }
 0x6e0   :  { %v10664_v39 = vpop.f32.mrb[65].mxu1  ;;  %v8183_v57 = vadd.f32 %v13917_v9, %v8112_v3  ;;  %v8113_v24 = vadd.f32 %v7902_v11, %v7428_v33 }
 0x6e1   :  { %v7910_v37 = vpop.f32.mrb[66].mxu1 }
 0x6e2   :  { %v10665_v51 = vpop.f32.mrb[67].mxu1  ;;  %10847 = vtanh.f32 %v8183_v57  ;;  %v8184_v22 = vadd.f32 %v13917_v9, %v8113_v24 }
 0x6e3   :  { %v7222_v61 = vpop.f32.mrb[64].mxu0 }
 0x6e4   :  { %v10844_v2 = vpop.eup %10843  ;;  %10849 = vtanh.f32 %v8184_v22  ;;  %v7429_v1 = vadd.f32 %v7222_v61, %v13703_v0  ;;  %v10492_v34 = vpop.f32.mrb[65].mxu0 }
 0x6e5   :  { %8310 = vst.msk [vmem:[%s14440_s7 + $0xd8] sm:$0xff] %vm8282_vm4, %v10844_v2  ;;  %v7225_v40 = vpop.f32.mrb[66].mxu0 }
 0x6e6   :  { %v10846_v50 = vpop.eup %10845  ;;  %v8114_v26 = vadd.f32 %v7907_v17, %v7429_v1  ;;  %v10493_v28 = vpop.f32.mrb[67].mxu0 }
 0x6e7   :  { %v7914_v41 = vpop.f32.mrb[68].mxu1  ;;  %8311 = vst.msk [vmem:[%s14440_s7 + $0xe0] sm:$0xff] %vm8282_vm4, %v10846_v50 }
 0x6e8   :  { %v10668_v13 = vpop.f32.mrb[69].mxu1  ;;  %v8185_v0 = vadd.f32 %v13917_v9, %v8114_v26 }
 0x6e9   :  { %v7917_v59 = vpop.f32.mrb[70].mxu1 }
 0x6ea   :  { %v10669_v56 = vpop.f32.mrb[71].mxu1  ;;  %10851 = vtanh.f32 %v8185_v0 }
 0x6eb   :  { %v7229_v29 = vpop.f32.mrb[68].mxu0 }
 0x6ec   :  { %v10848_v38 = vpop.eup %10847  ;;  %v7430_v20 = vadd.f32 %v7229_v29, %v13711_v21  ;;  %v10496_v58 = vpop.f32.mrb[69].mxu0 }
 0x6ed   :  { %8312 = vst.msk [vmem:[%s14440_s7 + $0xe8] sm:$0xff] %vm8282_vm4, %v10848_v38  ;;  %v7232_v35 = vpop.f32.mrb[70].mxu0 }
 0x6ee   :  { %v10850_v46 = vpop.eup %10849  ;;  %v8115_v8 = vadd.f32 %v7914_v41, %v7430_v20  ;;  %v7431_v4 = vadd.f32 %v7232_v35, %v13713_v36  ;;  %v10497_v27 = vpop.f32.mrb[71].mxu0 }
 0x6ef   :  { %v7922_v15 = vpop.f32.mrb[72].mxu1  ;;  %8313 = vst.msk [vmem:[%s14440_s7 + $0xf0] sm:$0xff] %vm8282_vm4, %v10850_v46 }
 0x6f0   :  { %v10672_v53 = vpop.f32.mrb[73].mxu1  ;;  %v8186_v19 = vadd.f32 %v13917_v9, %v8115_v8  ;;  %v8116_v7 = vadd.f32 %v7917_v59, %v7431_v4 }
 0x6f1   :  { %v7925_v21 = vpop.f32.mrb[74].mxu1 }
 0x6f2   :  { %v10673_v43 = vpop.f32.mrb[75].mxu1  ;;  %10853 = vtanh.f32 %v8186_v19  ;;  %v8187_v10 = vadd.f32 %v13917_v9, %v8116_v7 }
 0x6f3   :  { %v7237_v49 = vpop.f32.mrb[72].mxu0  ;;  %v14280_v43 = vld [vmem:[%s14439_s6] ss:$0 sm:$0xff] }
 0x6f4   :  { %v10852_v31 = vpop.eup %10851  ;;  %10855 = vtanh.f32 %v8187_v10  ;;  %v7432_v36 = vadd.f32 %v7237_v49, %v13721_v16  ;;  %v10500_v18 = vpop.f32.mrb[73].mxu0 }
 0x6f5   :  { %8314 = vst.msk [vmem:[%s14440_s7 + $0xf8] sm:$0xff] %vm8282_vm4, %v10852_v31  ;;  %v7240_v11 = vpop.f32.mrb[74].mxu0 }
 0x6f6   :  { %v8117_v12 = vadd.f32 %v7922_v15, %v7432_v36  ;;  %v7433_v45 = vadd.f32 %v7240_v11, %v13723_v48  ;;  %v10501_v62 = vpop.f32.mrb[75].mxu0 }
 0x6f7   :  { %v7930_v23 = vpop.f32.mrb[76].mxu1 }
 0x6f8   :  { %v10676_v32 = vpop.f32.mrb[77].mxu1  ;;  %v8188_v30 = vadd.f32 %v13917_v9, %v8117_v12  ;;  %v8118_v5 = vadd.f32 %v7925_v21, %v7433_v45 }
 0x6f9   :  { %v7933_v63 = vpop.f32.mrb[78].mxu1 }
 0x6fa   :  { %v10677_v25 = vpop.f32.mrb[79].mxu1  ;;  %10857 = vtanh.f32 %v8188_v30  ;;  %v8189_v16 = vadd.f32 %v13917_v9, %v8118_v5 }
 0x6fb   :  { %v7245_v17 = vpop.f32.mrb[76].mxu0 }
 0x6fc   :  { %v10854_v55 = vpop.eup %10853  ;;  %10859 = vtanh.f32 %v8189_v16  ;;  %v7434_v3 = vadd.f32 %v7245_v17, %v13731_v47  ;;  %v10504_v33 = vpop.f32.mrb[77].mxu0  ;;  %v14509_v17 = vld [vmem:[#allocation5_spill] sm:$0xff] }
 0x6fd   :  { %8315 = vst.msk [vmem:[%s14440_s7 + $0x100] sm:$0xff] %vm8282_vm4, %v10854_v55  ;;  %v7248_v48 = vpop.f32.mrb[78].mxu0 }
 0x6fe   :  { %v10856_v39 = vpop.eup %10855  ;;  %v8119_v37 = vadd.f32 %v7930_v23, %v7434_v3  ;;  %v7435_v57 = vadd.f32 %v7248_v48, %v13733_v6  ;;  %v10505_v24 = vpop.f32.mrb[79].mxu0 }
 0x6ff   :  { %v7938_v60 = vpop.f32.mrb[80].mxu1  ;;  %8316 = vst.msk [vmem:[%s14440_s7 + $0x108] sm:$0xff] %vm8282_vm4, %v10856_v39  ;;  %v14510_v39 = vld [vmem:[#allocation6_spill] sm:$0xff] }
 0x700   :  { %v10680_v51 = vpop.f32.mrb[81].mxu1  ;;  %v8190_v22 = vadd.f32 %v13917_v9, %v8119_v37  ;;  %v8120_v61 = vadd.f32 %v7933_v63, %v7435_v57 }
 0x701   :  { %v7941_v47 = vpop.f32.mrb[82].mxu1 }
 0x702   :  { %v10681_v2 = vpop.f32.mrb[83].mxu1  ;;  %10861 = vtanh.f32 %v8190_v22  ;;  %v8191_v1 = vadd.f32 %v13917_v9, %v8120_v61 }
 0x703   :  { %v7253_v34 = vpop.f32.mrb[80].mxu0 }
 0x704   :  { %v10858_v40 = vpop.eup %10857  ;;  %10863 = vtanh.f32 %v8191_v1  ;;  %v7436_v6 = vadd.f32 %v7253_v34, %v13741_v14  ;;  %v10508_v41 = vpop.f32.mrb[81].mxu0 }
 0x705   :  { %8317 = vst.msk [vmem:[%s14440_s7 + $0x110] sm:$0xff] %vm8282_vm4, %v10858_v40  ;;  %v7256_v50 = vpop.f32.mrb[82].mxu0  ;;  %v14511_v40 = vld [vmem:[#allocation7_spill] sm:$0xff] }
 0x706   :  { %v10860_v28 = vpop.eup %10859  ;;  %v8121_v13 = vadd.f32 %v7938_v60, %v7436_v6  ;;  %v7437_v59 = vadd.f32 %v7256_v50, %v13743_v52  ;;  %v10509_v0 = vpop.f32.mrb[83].mxu0 }
 0x707   :  { %v7946_v26 = vpop.f32.mrb[84].mxu1  ;;  %8318 = vst.msk [vmem:[%s14440_s7 + $0x118] sm:$0xff] %vm8282_vm4, %v10860_v28 }
 0x708   :  { %v10684_v56 = vpop.f32.mrb[85].mxu1  ;;  %v8192_v29 = vadd.f32 %v13917_v9, %v8121_v13  ;;  %v8122_v38 = vadd.f32 %v7941_v47, %v7437_v59  ;;  %v14512_v59 = vld [vmem:[#allocation8_spill] sm:$0xff] }
 0x709   :  { %v7948_v14 = vpop.f32.mrb[86].mxu1 }
 0x70a   :  { %v10685_v20 = vpop.f32.mrb[87].mxu1  ;;  %10865 = vtanh.f32 %v8192_v29  ;;  %v8193_v58 = vadd.f32 %v13917_v9, %v8122_v38 }
 0x70b   :  { %v7261_v35 = vpop.f32.mrb[84].mxu0 }
 0x70c   :  { %v10862_v15 = vpop.eup %10861  ;;  %10867 = vtanh.f32 %v8193_v58  ;;  %v10512_v46 = vpop.f32.mrb[85].mxu0 }
 0x70d   :  { %8319 = vst.msk [vmem:[%s14440_s7 + $0x120] sm:$0xff] %vm8282_vm4, %v10862_v15  ;;  %v7263_v52 = vpop.f32.mrb[86].mxu0 }
 0x70e   :  { %v10864_v4 = vpop.eup %10863  ;;  %v7438_v27 = vadd.f32 %v7263_v52, %v13751_v42  ;;  %v10513_v53 = vpop.f32.mrb[87].mxu0  ;;  %v14513_v52 = vld [vmem:[#allocation9_spill] sm:$0xff] }
 0x70f   :  { %v7953_v8 = vpop.f32.mrb[88].mxu1  ;;  %8320 = vst.msk [vmem:[%s14440_s7 + $0x128] sm:$0xff] %vm8282_vm4, %v10864_v4 }
 0x710   :  { %v10688_v21 = vpop.f32.mrb[89].mxu1  ;;  %v8123_v19 = vadd.f32 %v7948_v14, %v7438_v27 }
 0x711   :  { %v7956_v9 = vpop.f32.mrb[90].mxu1 }
 0x712   :  { %v10689_v7 = vpop.f32.mrb[91].mxu1  ;;  %v8194_v10 = vadd.f32 %v14280_v43, %v8123_v19 }
 0x713   :  { %v7268_v49 = vpop.f32.mrb[88].mxu0 }
 0x714   :  { %v10866_v31 = vpop.eup %10865  ;;  %10869 = vtanh.f32 %v8194_v10  ;;  %v7439_v42 = vadd.f32 %v7268_v49, %v13759_v54  ;;  %v10516_v36 = vpop.f32.mrb[89].mxu0 }
 0x715   :  { %8321 = vst.msk [vmem:[%s14440_s7 + $0x130] sm:$0xff] %vm8282_vm4, %v10866_v31  ;;  %v7271_v18 = vpop.f32.mrb[90].mxu0 }
 0x716   :  { %v10868_v23 = vpop.eup %10867  ;;  %v8124_v12 = vadd.f32 %v7953_v8, %v7439_v42  ;;  %v7440_v45 = vadd.f32 %v7271_v18, %v13761_v44  ;;  %v10517_v62 = vpop.f32.mrb[91].mxu0  ;;  %v14514_v18 = vld [vmem:[#allocation10_spill] sm:$0xff] }
 0x717   :  { %v7961_v11 = vpop.f32.mrb[92].mxu1  ;;  %8322 = vst.msk [vmem:[%s14440_s7 + $0x138] sm:$0xff] %vm8282_vm4, %v10868_v23 }
 0x718   :  { %v10692_v32 = vpop.f32.mrb[93].mxu1  ;;  %v8195_v63 = vadd.f32 %v14280_v43, %v8124_v12  ;;  %v8125_v30 = vadd.f32 %v7956_v9, %v7440_v45 }
 0x719   :  { %v7964_v54 = vpop.f32.mrb[94].mxu1 }
 0x71a   :  { %v10693_v5 = vpop.f32.mrb[95].mxu1  ;;  %10871 = vtanh.f32 %v8195_v63  ;;  %v8196_v25 = vadd.f32 %v14280_v43, %v8125_v30 }
 0x71b   :  { %v7276_v16 = vpop.f32.mrb[92].mxu0 }
 0x71c   :  { %10873 = vtanh.f32 %v8196_v25  ;;  %v7441_v55 = vadd.f32 %v7276_v16, %v14509_v17  ;;  %v10520_v44 = vpop.f32.mrb[93].mxu0 }
 0x71d   :  { %v7279_v3 = vpop.f32.mrb[94].mxu0 }
 0x71e   :  { %v10870_v48 = vpop.eup %10869  ;;  %v8126_v60 = vadd.f32 %v7961_v11, %v7441_v55  ;;  %v7442_v37 = vadd.f32 %v7279_v3, %v14510_v39  ;;  %v10521_v57 = vpop.f32.mrb[95].mxu0 }
 0x71f   :  { %v7969_v33 = vpop.f32.mrb[96].mxu1  ;;  %8323 = vst.msk [vmem:[%s14440_s7 + $0x140] sm:$0xff] %vm8282_vm4, %v10870_v48  ;;  %v14516_v48 = vld [vmem:[#allocation12_spill] sm:$0xff] }
 0x720   :  { %v10696_v24 = vpop.f32.mrb[97].mxu1  ;;  %v8197_v47 = vadd.f32 %v14280_v43, %v8126_v60  ;;  %v8127_v22 = vadd.f32 %v7964_v54, %v7442_v37  ;;  %v14515_v54 = vld [vmem:[#allocation11_spill] sm:$0xff] }
 0x721   :  { %v7972_v51 = vpop.f32.mrb[98].mxu1 }
 0x722   :  { %v10697_v61 = vpop.f32.mrb[99].mxu1  ;;  %10875 = vtanh.f32 %v8197_v47  ;;  %v8198_v2 = vadd.f32 %v14280_v43, %v8127_v22 }
 0x723   :  { %v7284_v1 = vpop.f32.mrb[96].mxu0 }
 0x724   :  { %v10872_v34 = vpop.eup %10871  ;;  %10877 = vtanh.f32 %v8198_v2  ;;  %v7443_v6 = vadd.f32 %v7284_v1, %v14511_v40  ;;  %v10524_v41 = vpop.f32.mrb[97].mxu0 }
 0x725   :  { %8324 = vst.msk [vmem:[%s14440_s7 + $0x148] sm:$0xff] %vm8282_vm4, %v10872_v34  ;;  %v7287_v50 = vpop.f32.mrb[98].mxu0 }
 0x726   :  { %v10874_v28 = vpop.eup %10873  ;;  %v8128_v13 = vadd.f32 %v7969_v33, %v7443_v6  ;;  %v7444_v0 = vadd.f32 %v7287_v50, %v14512_v59  ;;  %v10525_v56 = vpop.f32.mrb[99].mxu0 }
 0x727   :  { %v7977_v26 = vpop.f32.mrb[100].mxu1  ;;  %8325 = vst.msk [vmem:[%s14440_s7 + $0x150] sm:$0xff] %vm8282_vm4, %v10874_v28 }
 0x728   :  { %v10700_v14 = vpop.f32.mrb[101].mxu1  ;;  %v8199_v38 = vadd.f32 %v14280_v43, %v8128_v13  ;;  %v8129_v20 = vadd.f32 %v7972_v51, %v7444_v0  ;;  %v14517_v51 = vld [vmem:[#allocation13_spill] sm:$0xff] }
 0x729   :  { %v7980_v29 = vpop.f32.mrb[102].mxu1 }
 0x72a   :  { %v10701_v58 = vpop.f32.mrb[103].mxu1  ;;  %10879 = vtanh.f32 %v8199_v38  ;;  %v8200_v35 = vadd.f32 %v14280_v43, %v8129_v20  ;;  %v14519_v29 = vld [vmem:[#allocation15_spill] sm:$0xff] }
 0x72b   :  { %v7292_v15 = vpop.f32.mrb[100].mxu0 }
 0x72c   :  { %v10876_v46 = vpop.eup %10875  ;;  %10881 = vtanh.f32 %v8200_v35  ;;  %v7445_v8 = vadd.f32 %v7292_v15, %v14513_v52  ;;  %v10528_v4 = vpop.f32.mrb[101].mxu0 }
 0x72d   :  { %8326 = vst.msk [vmem:[%s14440_s7 + $0x158] sm:$0xff] %vm8282_vm4, %v10876_v46  ;;  %v7295_v27 = vpop.f32.mrb[102].mxu0 }
 0x72e   :  { %v10878_v21 = vpop.eup %10877  ;;  %v8130_v9 = vadd.f32 %v7977_v26, %v7445_v8  ;;  %v10529_v19 = vpop.f32.mrb[103].mxu0  ;;  %v14518_v26 = vld [vmem:[#allocation14_spill] sm:$0xff] }
 0x72f   :  { %v7984_v53 = vpop.f32.mrb[104].mxu1  ;;  %8327 = vst.msk [vmem:[%s14440_s7 + $0x160] sm:$0xff] %vm8282_vm4, %v10878_v21 }
 0x730   :  { %v10704_v7 = vpop.f32.mrb[105].mxu1  ;;  %v8201_v49 = vadd.f32 %v14280_v43, %v8130_v9 }
 0x731   :  { %v7987_v10 = vpop.f32.mrb[106].mxu1 }
 0x732   :  { %v10705_v31 = vpop.f32.mrb[107].mxu1  ;;  %10883 = vtanh.f32 %v8201_v49 }
 0x733   :  { %v7299_v42 = vpop.f32.mrb[104].mxu0  ;;  %v14521_v31 = vld [vmem:[#allocation17_spill] sm:$0xff] }
 0x734   :  { %v10880_v36 = vpop.eup %10879  ;;  %v7446_v11 = vadd.f32 %v7299_v42, %v14514_v18  ;;  %v10532_v23 = vpop.f32.mrb[105].mxu0 }
 0x735   :  { %8328 = vst.msk [vmem:[%s14440_s7 + $0x168] sm:$0xff] %vm8282_vm4, %v10880_v36  ;;  %v7302_v12 = vpop.f32.mrb[106].mxu0 }
 0x736   :  { %v10882_v62 = vpop.eup %10881  ;;  %v8131_v32 = vadd.f32 %v7984_v53, %v7446_v11  ;;  %v7447_v63 = vadd.f32 %v7302_v12, %v14515_v54  ;;  %v10533_v30 = vpop.f32.mrb[107].mxu0  ;;  %v14520_v53 = vld [vmem:[#allocation16_spill] sm:$0xff] }
 0x737   :  { %v7992_v45 = vpop.f32.mrb[108].mxu1  ;;  %8329 = vst.msk [vmem:[%s14440_s7 + $0x170] sm:$0xff] %vm8282_vm4, %v10882_v62 }
 0x738   :  { %v10708_v5 = vpop.f32.mrb[109].mxu1  ;;  %v8202_v16 = vadd.f32 %v14280_v43, %v8131_v32  ;;  %v8132_v17 = vadd.f32 %v7987_v10, %v7447_v63 }
 0x739   :  { %v7995_v25 = vpop.f32.mrb[110].mxu1 }
 0x73a   :  { %v10709_v55 = vpop.f32.mrb[111].mxu1  ;;  %10885 = vtanh.f32 %v8202_v16  ;;  %v8203_v44 = vadd.f32 %v14280_v43, %v8132_v17  ;;  %v14522_v16 = vld [vmem:[#allocation18_spill] sm:$0xff] }
 0x73b   :  { %v7307_v3 = vpop.f32.mrb[108].mxu0 }
 0x73c   :  { %v10884_v33 = vpop.eup %10883  ;;  %10887 = vtanh.f32 %v8203_v44  ;;  %v7448_v60 = vadd.f32 %v7307_v3, %v14516_v48  ;;  %v10536_v39 = vpop.f32.mrb[109].mxu0 }
 0x73d   :  { %8330 = vst.msk [vmem:[%s14440_s7 + $0x178] sm:$0xff] %vm8282_vm4, %v10884_v33  ;;  %v7310_v37 = vpop.f32.mrb[110].mxu0 }
 0x73e   :  { %v8133_v24 = vadd.f32 %v7992_v45, %v7448_v60  ;;  %v7449_v47 = vadd.f32 %v7310_v37, %v14517_v51  ;;  %v10537_v22 = vpop.f32.mrb[111].mxu0 }
 0x73f   :  { %v8000_v57 = vpop.f32.mrb[112].mxu1 }
 0x740   :  { %v10712_v61 = vpop.f32.mrb[113].mxu1  ;;  %v8204_v1 = vadd.f32 %v14280_v43, %v8133_v24  ;;  %v8134_v34 = vadd.f32 %v7995_v25, %v7449_v47 }
 0x741   :  { %v8003_v2 = vpop.f32.mrb[114].mxu1 }
 0x742   :  { %v10713_v40 = vpop.f32.mrb[115].mxu1  ;;  %10889 = vtanh.f32 %v8204_v1  ;;  %v8205_v6 = vadd.f32 %v14280_v43, %v8134_v34  ;;  %v14524_v1 = vld [vmem:[#allocation20_spill] sm:$0xff] }
 0x743   :  { %v7315_v41 = vpop.f32.mrb[112].mxu0 }
 0x744   :  { %v10886_v50 = vpop.eup %10885  ;;  %10891 = vtanh.f32 %v8205_v6  ;;  %v7450_v28 = vadd.f32 %v7315_v41, %v14518_v26  ;;  %v10540_v13 = vpop.f32.mrb[113].mxu0 }
 0x745   :  { %8331 = vst.msk [vmem:[%s14440_s7 + $0x180] sm:$0xff] %vm8282_vm4, %v10886_v50  ;;  %v7318_v59 = vpop.f32.mrb[114].mxu0 }
 0x746   :  { %v10888_v56 = vpop.eup %10887  ;;  %v8135_v14 = vadd.f32 %v8000_v57, %v7450_v28  ;;  %v7451_v38 = vadd.f32 %v7318_v59, %v14519_v29  ;;  %v10541_v20 = vpop.f32.mrb[115].mxu0  ;;  %v14523_v57 = vld [vmem:[#allocation19_spill] sm:$0xff] }
 0x747   :  { %v8008_v0 = vpop.f32.mrb[116].mxu1  ;;  %8332 = vst.msk [vmem:[%s14440_s7 + $0x188] sm:$0xff] %vm8282_vm4, %v10888_v56 }
 0x748   :  { %v10716_v58 = vpop.f32.mrb[117].mxu1  ;;  %v8206_v15 = vadd.f32 %v14280_v43, %v8135_v14  ;;  %v8136_v46 = vadd.f32 %v8003_v2, %v7451_v38 }
 0x749   :  { %v8011_v35 = vpop.f32.mrb[118].mxu1 }
 0x74a   :  { %v10717_v52 = vpop.f32.mrb[119].mxu1  ;;  %10893 = vtanh.f32 %v8206_v15  ;;  %v8207_v8 = vadd.f32 %v14280_v43, %v8136_v46 }
 0x74b   :  { %v7323_v4 = vpop.f32.mrb[116].mxu0 }
 0x74c   :  { %v10890_v27 = vpop.eup %10889  ;;  %10895 = vtanh.f32 %v8207_v8  ;;  %v7452_v21 = vadd.f32 %v7323_v4, %v14520_v53  ;;  %v10544_v9 = vpop.f32.mrb[117].mxu0 }
 0x74d   :  { %8333 = vst.msk [vmem:[%s14440_s7 + $0x190] sm:$0xff] %vm8282_vm4, %v10890_v27  ;;  %v7326_v19 = vpop.f32.mrb[118].mxu0 }
 0x74e   :  { %v10892_v10 = vpop.eup %10891  ;;  %v8137_v49 = vadd.f32 %v8008_v0, %v7452_v21  ;;  %v7453_v42 = vadd.f32 %v7326_v19, %v14521_v31  ;;  %v10545_v36 = vpop.f32.mrb[119].mxu0  ;;  %v14525_v0 = vld [vmem:[#allocation21_spill] sm:$0xff] }
 0x74f   :  { %v8016_v7 = vpop.f32.mrb[120].mxu1  ;;  %8334 = vst.msk [vmem:[%s14440_s7 + $0x198] sm:$0xff] %vm8282_vm4, %v10892_v10 }
 0x750   :  { %v10720_v18 = vpop.f32.mrb[121].mxu1  ;;  %v8208_v23 = vadd.f32 %v14280_v43, %v8137_v49  ;;  %v8138_v12 = vadd.f32 %v8011_v35, %v7453_v42  ;;  %v14526_v35 = vld [vmem:[#allocation22_spill] sm:$0xff]  ;;  %v14527_v7 = vld [vmem:[#allocation23_spill] sm:$0xff] }
 0x751   :  { %v8018_v11 = vpop.f32.mrb[122].mxu1 }
 0x752   :  { %v10721_v45 = vpop.f32.mrb[123].mxu1  ;;  %10897 = vtanh.f32 %v8208_v23  ;;  %v8209_v62 = vadd.f32 %v14280_v43, %v8138_v12 }
 0x753   :  { %v7331_v32 = vpop.f32.mrb[120].mxu0 }
 0x754   :  { %v10894_v54 = vpop.eup %10893  ;;  %10899 = vtanh.f32 %v8209_v62  ;;  %v10548_v63 = vpop.f32.mrb[121].mxu0 }
 0x755   :  { %8335 = vst.msk [vmem:[%s14440_s7 + $0x1a0] sm:$0xff] %vm8282_vm4, %v10894_v54  ;;  %v7333_v30 = vpop.f32.mrb[122].mxu0 }
 0x756   :  { %v10896_v25 = vpop.eup %10895  ;;  %v7454_v17 = vadd.f32 %v7333_v30, %v14522_v16  ;;  %v10549_v55 = vpop.f32.mrb[123].mxu0  ;;  %v14529_v16 = vld [vmem:[#allocation25_spill] sm:$0xff] }
 0x757   :  { %v8023_v5 = vpop.f32.mrb[124].mxu1  ;;  %8336 = vst.msk [vmem:[%s14440_s7 + $0x1a8] sm:$0xff] %vm8282_vm4, %v10896_v25 }
 0x758   :  { %v10724_v44 = vpop.f32.mrb[125].mxu1  ;;  %v8139_v33 = vadd.f32 %v8018_v11, %v7454_v17  ;;  %v14528_v11 = vld [vmem:[#allocation24_spill] sm:$0xff] }
 0x759   :  { %v8026_v3 = vpop.f32.mrb[126].mxu1 }
 0x75a   :  { %v10725_v48 = vpop.f32.mrb[127].mxu1  ;;  %v8210_v60 = vadd.f32 %v14280_v43, %v8139_v33 }
 0x75b   :  { %v7338_v39 = vpop.f32.mrb[124].mxu0 }
 0x75c   :  { %v10898_v37 = vpop.eup %10897  ;;  %10901 = vtanh.f32 %v8210_v60  ;;  %v7455_v24 = vadd.f32 %v7338_v39, %v14523_v57  ;;  %v10552_v51 = vpop.f32.mrb[125].mxu0 }
 0x75d   :  { %8337 = vst.msk [vmem:[%s14440_s7 + $0x1b0] sm:$0xff] %vm8282_vm4, %v10898_v37  ;;  %v7341_v47 = vpop.f32.mrb[126].mxu0 }
 0x75e   :  { %v10900_v61 = vpop.eup %10899  ;;  %v8140_v2 = vadd.f32 %v8023_v5, %v7455_v24  ;;  %v7456_v34 = vadd.f32 %v7341_v47, %v14524_v1  ;;  %v10553_v40 = vpop.f32.mrb[127].mxu0 }
 0x75f   :  { %v8031_v22 = vpop.f32.mrb[128].mxu1  ;;  %8338 = vst.msk [vmem:[%s14440_s7 + $0x1b8] sm:$0xff] %vm8282_vm4, %v10900_v61 }
 0x760   :  { %v10728_v6 = vpop.f32.mrb[129].mxu1  ;;  %v8211_v50 = vadd.f32 %v14280_v43, %v8140_v2  ;;  %v8141_v26 = vadd.f32 %v8026_v3, %v7456_v34 }
 0x761   :  { %v8034_v41 = vpop.f32.mrb[130].mxu1 }
 0x762   :  { %v10729_v28 = vpop.f32.mrb[131].mxu1  ;;  %10903 = vtanh.f32 %v8211_v50  ;;  %v8212_v13 = vadd.f32 %v14280_v43, %v8141_v26 }
 0x763   :  { %v7346_v59 = vpop.f32.mrb[128].mxu0 }
 0x764   :  { %10905 = vtanh.f32 %v8212_v13  ;;  %v7457_v56 = vadd.f32 %v7346_v59, %v14525_v0  ;;  %v10556_v14 = vpop.f32.mrb[129].mxu0 }
 0x765   :  { %v7349_v29 = vpop.f32.mrb[130].mxu0 }
 0x766   :  { %v10902_v20 = vpop.eup %10901  ;;  %v8142_v58 = vadd.f32 %v8031_v22, %v7457_v56  ;;  %v7458_v15 = vadd.f32 %v7349_v29, %v14526_v35  ;;  %v10557_v46 = vpop.f32.mrb[131].mxu0 }
 0x767   :  { %v8039_v38 = vpop.f32.mrb[132].mxu1  ;;  %8339 = vst.msk [vmem:[%s14440_s7 + $0x1c0] sm:$0xff] %vm8282_vm4, %v10902_v20 }
 0x768   :  { %v10732_v52 = vpop.f32.mrb[133].mxu1  ;;  %v8213_v4 = vadd.f32 %v14280_v43, %v8142_v58  ;;  %v8143_v27 = vadd.f32 %v8034_v41, %v7458_v15 }
 0x769   :  { %v8042_v8 = vpop.f32.mrb[134].mxu1 }
 0x76a   :  { %v10733_v53 = vpop.f32.mrb[135].mxu1  ;;  %10907 = vtanh.f32 %v8213_v4  ;;  %v8214_v21 = vadd.f32 %v14280_v43, %v8143_v27 }
 0x76b   :  { %v7354_v9 = vpop.f32.mrb[132].mxu0 }
 0x76c   :  { %v10904_v19 = vpop.eup %10903  ;;  %10909 = vtanh.f32 %v8214_v21  ;;  %v7459_v10 = vadd.f32 %v7354_v9, %v14527_v7  ;;  %v10560_v49 = vpop.f32.mrb[133].mxu0 }
 0x76d   :  { %8340 = vst.msk [vmem:[%s14440_s7 + $0x1c8] sm:$0xff] %vm8282_vm4, %v10904_v19  ;;  %v7357_v31 = vpop.f32.mrb[134].mxu0 }
 0x76e   :  { %v10906_v36 = vpop.eup %10905  ;;  %v8144_v18 = vadd.f32 %v8039_v38, %v7459_v10  ;;  %v7460_v23 = vadd.f32 %v7357_v31, %v14528_v11  ;;  %v10561_v12 = vpop.f32.mrb[135].mxu0 }
 0x76f   :  { %v8047_v42 = vpop.f32.mrb[136].mxu1  ;;  %8341 = vst.msk [vmem:[%s14440_s7 + $0x1d0] sm:$0xff] %vm8282_vm4, %v10906_v36 }
 0x770   :  { %v10736_v45 = vpop.f32.mrb[137].mxu1  ;;  %v8215_v32 = vadd.f32 %v14280_v43, %v8144_v18  ;;  %v8145_v54 = vadd.f32 %v8042_v8, %v7460_v23 }
 0x771   :  { %v8050_v62 = vpop.f32.mrb[138].mxu1 }
 0x772   :  { %v10737_v63 = vpop.f32.mrb[139].mxu1  ;;  %10911 = vtanh.f32 %v8215_v32  ;;  %v8216_v30 = vadd.f32 %v14280_v43, %v8145_v54 }
 0x773   :  { %v7362_v5 = vpop.f32.mrb[136].mxu0 }
 0x774   :  { %v10908_v25 = vpop.eup %10907  ;;  %10913 = vtanh.f32 %v8216_v30  ;;  %v7461_v17 = vadd.f32 %v7362_v5, %v14529_v16  ;;  %v10564_v55 = vpop.f32.mrb[137].mxu0 }
 0x775   :  { %8342 = vst.msk [vmem:[%s14440_s7 + $0x1d8] sm:$0xff] %vm8282_vm4, %v10908_v25  ;;  %v7365_v44 = vpop.f32.mrb[138].mxu0 }
 0x776   :  { %v10910_v33 = vpop.eup %10909  ;;  %v8146_v48 = vadd.f32 %v8047_v42, %v7461_v17  ;;  %v10565_v60 = vpop.f32.mrb[139].mxu0 }
 0x777   :  { %v8054_v3 = vpop.f32.mrb[140].mxu1  ;;  %8343 = vst.msk [vmem:[%s14440_s7 + $0x1e0] sm:$0xff] %vm8282_vm4, %v10910_v33 }
 0x778   :  { %v10740_v39 = vpop.f32.mrb[141].mxu1  ;;  %v8217_v57 = vadd.f32 %v14280_v43, %v8146_v48 }
 0x779   :  { %v8056_v37 = vpop.f32.mrb[142].mxu1 }
 0x77a   :  { %v10741_v24 = vpop.f32.mrb[143].mxu1  ;;  %10915 = vtanh.f32 %v8217_v57 }
 0x77b   :  { %v7369_v51 = vpop.f32.mrb[140].mxu0 }
 0x77c   :  { %v10912_v47 = vpop.eup %10911  ;;  %v10568_v22 = vpop.f32.mrb[141].mxu0 }
 0x77d   :  { %8344 = vst.msk [vmem:[%s14440_s7 + $0x1e8] sm:$0xff] %vm8282_vm4, %v10912_v47  ;;  %v7371_v61 = vpop.f32.mrb[142].mxu0 }
 0x77e   :  { %v10914_v1 = vpop.eup %10913  ;;  %v10569_v34 = vpop.f32.mrb[143].mxu0 }
 0x77f   :  { %v8060_v2 = vpop.f32.mrb[144].mxu1  ;;  %8345 = vst.msk [vmem:[%s14440_s7 + $0x1f0] sm:$0xff] %vm8282_vm4, %v10914_v1 }
 0x780   :  { %v10744_v40 = vpop.f32.mrb[145].mxu1 }
 0x781   :  { %v8062_v43 = vpop.f32.mrb[146].mxu1 }
 0x782   :  { %v10745_v6 = vpop.f32.mrb[147].mxu1 }
 0x783   :  { %v7375_v41 = vpop.f32.mrb[144].mxu0 }
 0x784   :  { %v10916_v50 = vpop.eup %10915  ;;  %v10572_v26 = vpop.f32.mrb[145].mxu0 }
 0x785   :  { %8346 = vst.msk [vmem:[%s14440_s7 + $0x1f8] sm:$0xff] %vm8282_vm4, %v10916_v50  ;;  %v7377_v28 = vpop.f32.mrb[146].mxu0 }
 0x786   :  { %v10573_v59 = vpop.f32.mrb[147].mxu0 }
 0x787   :  { %v8066_v13 = vpop.f32.mrb[148].mxu1 }
 0x788   :  { %v10748_v0 = vpop.f32.mrb[149].mxu1 }
 0x789   :  { %v8068_v56 = vpop.f32.mrb[150].mxu1 }
 0x78a   :  { %v10749_v14 = vpop.f32.mrb[151].mxu1 }
 0x78b   :  { %v7381_v29 = vpop.f32.mrb[148].mxu0 }
 0x78c   :  { %v10576_v38 = vpop.f32.mrb[149].mxu0 }
 0x78d   :  { %v7383_v20 = vpop.f32.mrb[150].mxu0 }
 0x78e   :  { %v10577_v35 = vpop.f32.mrb[151].mxu0 }
 0x78f   :  { %v8072_v58 = vpop.f32.mrb[152].mxu1 }
 0x790   :  { %v10752_v15 = vpop.f32.mrb[153].mxu1 }
 0x791   :  { %v8074_v46 = vpop.f32.mrb[154].mxu1 }
 0x792   :  { %v10753_v52 = vpop.f32.mrb[155].mxu1 }
 0x793   :  { %v7387_v8 = vpop.f32.mrb[152].mxu0 }
 0x794   :  { %v10580_v4 = vpop.f32.mrb[153].mxu0 }
 0x795   :  { %v7389_v27 = vpop.f32.mrb[154].mxu0 }
 0x796   :  { %v10581_v21 = vpop.f32.mrb[155].mxu0 }
 0x797   :  { %v8078_v53 = vpop.f32.mrb[156].mxu1 }
 0x798   :  { %v10756_v9 = vpop.f32.mrb[157].mxu1 }
 0x799   :  { %v8080_v19 = vpop.f32.mrb[158].mxu1 }
 0x79a   :  { %v10757_v7 = vpop.f32.mrb[159].mxu1 }
 0x79b   :  { %v7393_v10 = vpop.f32.mrb[156].mxu0 }
 0x79c   :  { %v10584_v49 = vpop.f32.mrb[157].mxu0 }
 0x79d   :  { %v7395_v31 = vpop.f32.mrb[158].mxu0 }
 0x79e   :  { %v10585_v42 = vpop.f32.mrb[159].mxu0 }

</bundles_post_ra>
